<compile_context>
chip_gen: v7x
topology: tpu7x:2x2x1
jax: 0.10.0
libtpu: 0.0.40
codegen_flags: <defaults>
</compile_context>

<pallas_src>
import functools

import jax
import jax.numpy as jnp
from jax.experimental import pallas as pl
from jax.experimental.pallas import tpu as pltpu

ACT_DTYPE = jnp.bfloat16
_VMEM_LIMIT = 32 * 1024 * 1024   # <= physical VMEM on every generation (v5e..v7x)


# --------------------------------------------------------------------------
# Pallas kernel: fused (im2col + matmul + folded-BN affine [+ ReLU]) conv step.
# One grid step produces the (Cout, R) output plane of one (n, out_depth) pair.
# --------------------------------------------------------------------------
def _fused_conv_kernel(*refs, n_src, taps, R, relu):
    x_refs = refs[:n_src]          # each (Cin, LW)   bf16, one per (source, d-tap)
    w_ref = refs[n_src]            # (T, Cout, Cin)   bf16, BN scale pre-folded
    b_ref = refs[n_src + 1]        # (Cout, 1)        f32, folded BN bias
    o_ref = refs[-1]               # (Cout, R)        bf16

    acc = None
    for t, (src, off) in enumerate(taps):          # statically unrolled tap loop
        v = x_refs[src][:, off:off + R]            # (Cin, R) shifted window
        part = jnp.dot(w_ref[t], v, preferred_element_type=jnp.float32)
        acc = part if acc is None else acc + part
    acc = acc + b_ref[...]
    if relu:
        acc = jnp.maximum(acc, 0.0)
    o_ref[...] = acc.astype(o_ref.dtype)


def _fused_conv(sources, ref_plan, taps, w_packed, bias, Do, d_stride, R, relu):
    """Run the fused conv kernel.

    sources:  list of (N, Dsrc, Cin, LW) bf16 arrays (shared N / Cin / LW).
    ref_plan: per kernel input ref, (source_index, depth_offset).
    taps:     per weight row t, (ref_index, flattened_column_offset).
    Returns (N, Do, Cout, R) bf16.
    """
    N, _, Cin, LW = sources[0].shape
    for s in sources:
        assert s.shape[0] == N and s.shape[2] == Cin and s.shape[3] == LW
    T, Cout, _ = w_packed.shape

    in_specs, operands = [], []
    for (s_idx, koff) in ref_plan:
        in_specs.append(
            pl.BlockSpec((None, None, Cin, LW),
                         lambda n, d, _k=koff: (n, d * d_stride + _k, 0, 0)))
        operands.append(sources[s_idx])
    in_specs.append(pl.BlockSpec((T, Cout, Cin), lambda n, d: (0, 0, 0)))
    in_specs.append(pl.BlockSpec((Cout, 1), lambda n, d: (0, 0)))
    operands.extend([w_packed, bias])

    kernel = functools.partial(_fused_conv_kernel, n_src=len(ref_plan),
                               taps=tuple(taps), R=R, relu=relu)
    return pl.pallas_call(
        kernel,
        out_shape=jax.ShapeDtypeStruct((N, Do, Cout, R), ACT_DTYPE),
        grid=(N, Do),
        in_specs=in_specs,
        out_specs=pl.BlockSpec((None, None, Cout, R), lambda n, d: (n, d, 0, 0)),
        compiler_params=pltpu.CompilerParams(
            dimension_semantics=("parallel", "parallel"),
            vmem_limit_bytes=_VMEM_LIMIT),
    )(*operands)


def _unflatten_cols(out, Ho, Wo, row_w):
    """(N, Do, Cout, R) with R=(Ho-1)*row_w+Wo  ->  (N, Do, Cout, Ho, Wo)."""
    N, Do, Cout, R = out.shape
    out = jnp.pad(out, ((0, 0), (0, 0), (0, 0), (0, Ho * row_w - R)))
    return out.reshape(N, Do, Cout, Ho, row_w)[..., :Wo]


# --------------------------------------------------------------------------
# Conv3d(3x3x3, pad=1) + folded BatchNorm (+ReLU).   x: (N, D, Cin, H, W) bf16.
# --------------------------------------------------------------------------
def conv3d_bn(x, w, scale, bias, stride, relu):
    N, D, Cin, H, W = x.shape
    Cout = w.shape[0]
    Do = (D - 1) // stride + 1
    Ho = (H - 1) // stride + 1
    Wo = (W - 1) // stride + 1

    xp = jnp.pad(x, ((0, 0), (1, 1), (0, 0), (1, 1), (1, 1)))
    w_fold = (w * scale[:, None, None, None, None]).astype(ACT_DTYPE)   # fold BN scale
    w_packed = jnp.transpose(w_fold, (2, 3, 4, 0, 1)).reshape(27, Cout, Cin)
    b2 = bias.reshape(Cout, 1).astype(jnp.float32)

    if stride == 1:
        Hp, Wp = H + 2, W + 2
        sources = [xp.reshape(N, D + 2, Cin, Hp * Wp)]
        ref_plan = [(0, kd) for kd in range(3)]
        row_w = Wp
        taps = [(kd, kh * Wp + kw)
                for kd in range(3) for kh in range(3) for kw in range(3)]
    else:
        # stride 2: even/odd parity split of H/W so every tap is a unit-stride
        # lane-offset slice of a parity slab.
        Hp, Wp = H + 2, W + 2
        pad_h, pad_w = Hp % 2, Wp % 2
        if pad_h or pad_w:
            xp = jnp.pad(xp, ((0, 0), (0, 0), (0, 0), (0, pad_h), (0, pad_w)))
        Hs, Ws = (Hp + pad_h) // 2, (Wp + pad_w) // 2
        sources, ref_plan, ref_index = [], [], {}
        for ph in range(2):
            for pw in range(2):
                sub = xp[:, :, :, ph::2, pw::2]
                sources.append(sub.reshape(N, D + 2, Cin, Hs * Ws))
                for kd in range(3):
                    ref_index[(ph, pw, kd)] = len(ref_plan)
                    ref_plan.append((len(sources) - 1, kd))
        row_w = Ws
        taps = [(ref_index[(kh % 2, kw % 2, kd)], (kh // 2) * Ws + (kw // 2))
                for kd in range(3) for kh in range(3) for kw in range(3)]

    R = (Ho - 1) * row_w + Wo
    out = _fused_conv(sources, ref_plan, taps, w_packed, b2, Do,
                      d_stride=stride, R=R, relu=relu)
    return _unflatten_cols(out, Ho, Wo, row_w)


# --------------------------------------------------------------------------
# ConvTranspose3d(k=3, stride=2, pad=1, output_padding=1) + folded BatchNorm,
# via polyphase decomposition (8 parity sub-convs, no zero-upsampling).
# x: (N, D, Cin, H, W) bf16;  wt: (Cin, Cout, 3, 3, 3) f32 (PyTorch layout).
# --------------------------------------------------------------------------
def deconv3d_bn(x, wt, scale, bias):
    N, D, Cin, H, W = x.shape
    Cout = wt.shape[1]
    w_fold = (wt * scale[None, :, None, None, None]).astype(ACT_DTYPE)
    b2 = bias.reshape(Cout, 1).astype(jnp.float32)

    subs = []
    for pd in range(2):
        wi_d = (1,) if pd == 0 else (2, 0)        # weight tap indices per parity
        for ph in range(2):
            wi_h = (1,) if ph == 0 else (2, 0)
            for pw in range(2):
                wi_w = (1,) if pw == 0 else (2, 0)
                xp = jnp.pad(x, ((0, 0), (0, pd), (0, 0), (0, ph), (0, pw)))
                Dp, Hp, Wp = D + pd, H + ph, W + pw
                src = xp.reshape(N, Dp, Cin, Hp * Wp)
                ref_plan = [(0, td) for td in range(len(wi_d))]
                taps, w_rows = [], []
                for td in range(len(wi_d)):
                    for th in range(len(wi_h)):
                        for tw in range(len(wi_w)):
                            taps.append((td, th * Wp + tw))
                            w_rows.append(jnp.transpose(
                                w_fold[:, :, wi_d[td], wi_h[th], wi_w[tw]]))
                w_packed = jnp.stack(w_rows, axis=0)          # (T, Cout, Cin)
                R = (H - 1) * Wp + W
                o = _fused_conv([src], ref_plan, taps, w_packed, b2, D,
                                d_stride=1, R=R, relu=False)
                subs.append(_unflatten_cols(o, H, W, Wp))     # (N, D, Cout, H, W)

    # interleave: out[n, 2i+pd, c, 2j+ph, 2k+pw] = sub[pd, ph, pw][n, i, c, j, k]
    arr = jnp.stack(subs, axis=0).reshape(2, 2, 2, N, D, Cout, H, W)
    arr = jnp.transpose(arr, (3, 4, 0, 5, 6, 1, 7, 2))
    return arr.reshape(N, 2 * D, Cout, 2 * H, 2 * W)


# --------------------------------------------------------------------------
# hourglass module: params + forward (interface uses PyTorch NCDHW, float32)
# --------------------------------------------------------------------------
def init_hourglass_params(key, inplanes):
    c = inplanes
    keys = jax.random.split(key, 12)
    eps = 1e-5

    def bn(k, n):
        k1, k2, k3, k4 = jax.random.split(k, 4)
        gamma = jax.random.uniform(k1, (n,), jnp.float32, 0.5, 1.5)
        beta = jax.random.normal(k2, (n,), jnp.float32) * 0.1
        mean = jax.random.normal(k3, (n,), jnp.float32) * 0.1
        var = jax.random.uniform(k4, (n,), jnp.float32, 0.5, 1.5)
        scale = gamma / jnp.sqrt(var + eps)
        return scale, beta - mean * scale

    def cw(k, cout, cin):   # Conv3d weight (Cout, Cin, 3, 3, 3)
        return jax.random.normal(k, (cout, cin, 3, 3, 3), jnp.float32) * 0.05

    def dw(k, cin, cout):   # ConvTranspose3d weight (Cin, Cout, 3, 3, 3)
        return jax.random.normal(k, (cin, cout, 3, 3, 3), jnp.float32) * 0.05

    return {
        "w1": cw(keys[0], 2 * c, c),      "bn1": bn(keys[1], 2 * c),
        "w2": cw(keys[2], 2 * c, 2 * c),  "bn2": bn(keys[3], 2 * c),
        "w3": cw(keys[4], 2 * c, 2 * c),  "bn3": bn(keys[5], 2 * c),
        "w4": cw(keys[6], 2 * c, 2 * c),  "bn4": bn(keys[7], 2 * c),
        "w5": dw(keys[8], 2 * c, 2 * c),  "bn5": bn(keys[9], 2 * c),
        "w6": dw(keys[10], 2 * c, c),     "bn6": bn(keys[11], c),
    }


def hourglass_forward(x, params, presqu=None, postsqu=None):
    """x / presqu / postsqu and all outputs use PyTorch NCDHW layout (float32)."""
    def to_int(t):   # NCDHW f32 -> internal (N, D, C, H, W) bf16
        return jnp.transpose(t, (0, 2, 1, 3, 4)).astype(ACT_DTYPE)

    def to_ext(t):   # internal -> NCDHW f32
        return jnp.transpose(t, (0, 2, 1, 3, 4)).astype(jnp.float32)

    p = params
    xi = to_int(x)
    out = conv3d_bn(xi, p["w1"], *p["bn1"], stride=2, relu=True)
    pre = conv3d_bn(out, p["w2"], *p["bn2"], stride=1, relu=(postsqu is None))
    if postsqu is not None:
        pre = jnp.maximum(pre + to_int(postsqu), 0.0)
    out = conv3d_bn(pre, p["w3"], *p["bn3"], stride=2, relu=True)
    out = conv3d_bn(out, p["w4"], *p["bn4"], stride=1, relu=True)
    res5 = to_int(presqu) if presqu is not None else pre
    post = jnp.maximum(deconv3d_bn(out, p["w5"], *p["bn5"]) + res5, 0.0)
    out = deconv3d_bn(post, p["w6"], *p["bn6"])
    return to_ext(out), to_ext(pre), to_ext(post)


if __name__ == "__main__":
    key = jax.random.PRNGKey(0)
    kx, kp = jax.random.split(key)

    # small shapes: batch=2, inplanes=4, D=8 (disparity), H=W=16   (PyTorch NCDHW)
    N, C, D, H, W = 2, 4, 8, 16, 16
    x = jax.random.normal(kx, (N, C, D, H, W), jnp.float32)
    params = init_hourglass_params(kp, C)

    fwd_first = jax.jit(lambda xx, pp: hourglass_forward(xx, pp, None, None))
    fwd_skip = jax.jit(lambda xx, pp, pr, po: hourglass_forward(xx, pp, pr, po))

    # first hourglass call in PSMNet: presqu=None, postsqu=None
    out1, pre1, post1 = fwd_first(x, params)
    # second-style call exercising the residual paths: (x, pre1, post1)
    out2, pre2, post2 = fwd_skip(x, params, pre1, post1)
    jax.block_until_ready((out1, pre1, post1, out2, pre2, post2))

    assert out1.shape == (N, C, D, H, W)
    assert pre1.shape == (N, 2 * C, D // 2, H // 2, W // 2)
    assert post1.shape == pre1.shape
    assert out2.shape == out1.shape

    print("KERNEL_OK")
</pallas_src>

<mosaic_0001>
module attributes {stable_mosaic.version = 11 : i64} {
  func.func @_fused_conv_kernel(%arg0: i32, %arg1: i32, %arg2: memref<1x1x4x81xbf16, #tpu.memory_space<vmem>>, %arg3: memref<1x1x4x81xbf16, #tpu.memory_space<vmem>>, %arg4: memref<1x1x4x81xbf16, #tpu.memory_space<vmem>>, %arg5: memref<1x1x4x81xbf16, #tpu.memory_space<vmem>>, %arg6: memref<1x1x4x81xbf16, #tpu.memory_space<vmem>>, %arg7: memref<1x1x4x81xbf16, #tpu.memory_space<vmem>>, %arg8: memref<1x1x4x81xbf16, #tpu.memory_space<vmem>>, %arg9: memref<1x1x4x81xbf16, #tpu.memory_space<vmem>>, %arg10: memref<1x1x4x81xbf16, #tpu.memory_space<vmem>>, %arg11: memref<1x1x4x81xbf16, #tpu.memory_space<vmem>>, %arg12: memref<1x1x4x81xbf16, #tpu.memory_space<vmem>>, %arg13: memref<1x1x4x81xbf16, #tpu.memory_space<vmem>>, %arg14: memref<27x8x4xbf16, #tpu.memory_space<vmem>>, %arg15: memref<8x1xf32, #tpu.memory_space<vmem>>, %arg16: memref<1x1x8x71xbf16, #tpu.memory_space<vmem>>) attributes {dimension_semantics = [#tpu.dimension_semantics<parallel>, #tpu.dimension_semantics<parallel>], iteration_bounds = array<i64: 2, 4>, scalar_prefetch = 0 : i64, scratch_operands = 0 : i64, tpu.core_type = #tpu.core_type<tc>, window_params = [{transform_indices = @transform_0, window_bounds = array<i64: 1, 1, 4, 81>}, {transform_indices = @transform_1, window_bounds = array<i64: 1, 1, 4, 81>}, {transform_indices = @transform_2, window_bounds = array<i64: 1, 1, 4, 81>}, {transform_indices = @transform_3, window_bounds = array<i64: 1, 1, 4, 81>}, {transform_indices = @transform_4, window_bounds = array<i64: 1, 1, 4, 81>}, {transform_indices = @transform_5, window_bounds = array<i64: 1, 1, 4, 81>}, {transform_indices = @transform_6, window_bounds = array<i64: 1, 1, 4, 81>}, {transform_indices = @transform_7, window_bounds = array<i64: 1, 1, 4, 81>}, {transform_indices = @transform_8, window_bounds = array<i64: 1, 1, 4, 81>}, {transform_indices = @transform_9, window_bounds = array<i64: 1, 1, 4, 81>}, {transform_indices = @transform_10, window_bounds = array<i64: 1, 1, 4, 81>}, {transform_indices = @transform_11, window_bounds = array<i64: 1, 1, 4, 81>}, {pipeline_mode = #tpu.pipeline_mode<synchronous>, transform_indices = @transform_12, window_bounds = array<i64: 27, 8, 4>}, {pipeline_mode = #tpu.pipeline_mode<synchronous>, transform_indices = @transform_13, window_bounds = array<i64: 8, 1>}, {transform_indices = @transform_14, window_bounds = array<i64: 1, 1, 8, 71>}]} {
    %c0 = arith.constant 0 : index
    %c0_0 = arith.constant 0 : index
    %c0_1 = arith.constant 0 : index
    %c0_2 = arith.constant 0 : index
    %0 = vector.load %arg2[%c0, %c0_0, %c0_1, %c0_2] : memref<1x1x4x81xbf16, #tpu.memory_space<vmem>>, vector<1x1x4x71xbf16>
    %1 = vector.shape_cast %0 : vector<1x1x4x71xbf16> to vector<4x71xbf16>
    %c0_3 = arith.constant 0 : index
    %c0_4 = arith.constant 0 : index
    %c0_5 = arith.constant 0 : index
    %2 = vector.load %arg14[%c0_3, %c0_4, %c0_5] : memref<27x8x4xbf16, #tpu.memory_space<vmem>>, vector<1x8x4xbf16>
    %3 = vector.shape_cast %2 : vector<1x8x4xbf16> to vector<8x4xbf16>
    %cst = arith.constant dense<0.000000e+00> : vector<8x71xf32>
    %4 = tpu.matmul %3, %1, %cst {dimension_numbers = #tpu.dot_dimension_numbers<[1], [0], [0], [1], [0, 0, 1, 1], [], []>} : vector<8x4xbf16>, vector<4x71xbf16>, vector<8x71xf32> -> vector<8x71xf32>
    %c0_6 = arith.constant 0 : index
    %c0_7 = arith.constant 0 : index
    %c0_8 = arith.constant 0 : index
    %c0_9 = arith.constant 0 : index
    %5 = vector.load %arg5[%c0_6, %c0_7, %c0_8, %c0_9] : memref<1x1x4x81xbf16, #tpu.memory_space<vmem>>, vector<1x1x4x71xbf16>
    %6 = vector.shape_cast %5 : vector<1x1x4x71xbf16> to vector<4x71xbf16>
    %c1 = arith.constant 1 : index
    %c0_10 = arith.constant 0 : index
    %c0_11 = arith.constant 0 : index
    %7 = vector.load %arg14[%c1, %c0_10, %c0_11] : memref<27x8x4xbf16, #tpu.memory_space<vmem>>, vector<1x8x4xbf16>
    %8 = vector.shape_cast %7 : vector<1x8x4xbf16> to vector<8x4xbf16>
    %cst_12 = arith.constant dense<0.000000e+00> : vector<8x71xf32>
    %9 = tpu.matmul %8, %6, %cst_12 {dimension_numbers = #tpu.dot_dimension_numbers<[1], [0], [0], [1], [0, 0, 1, 1], [], []>} : vector<8x4xbf16>, vector<4x71xbf16>, vector<8x71xf32> -> vector<8x71xf32>
    %10 = arith.addf %4, %9 : vector<8x71xf32>
    %c0_13 = arith.constant 0 : index
    %c0_14 = arith.constant 0 : index
    %c0_15 = arith.constant 0 : index
    %c1_16 = arith.constant 1 : index
    %11 = vector.load %arg2[%c0_13, %c0_14, %c0_15, %c1_16] : memref<1x1x4x81xbf16, #tpu.memory_space<vmem>>, vector<1x1x4x71xbf16>
    %12 = vector.shape_cast %11 : vector<1x1x4x71xbf16> to vector<4x71xbf16>
    %c2 = arith.constant 2 : index
    %c0_17 = arith.constant 0 : index
    %c0_18 = arith.constant 0 : index
    %13 = vector.load %arg14[%c2, %c0_17, %c0_18] : memref<27x8x4xbf16, #tpu.memory_space<vmem>>, vector<1x8x4xbf16>
    %14 = vector.shape_cast %13 : vector<1x8x4xbf16> to vector<8x4xbf16>
    %cst_19 = arith.constant dense<0.000000e+00> : vector<8x71xf32>
    %15 = tpu.matmul %14, %12, %cst_19 {dimension_numbers = #tpu.dot_dimension_numbers<[1], [0], [0], [1], [0, 0, 1, 1], [], []>} : vector<8x4xbf16>, vector<4x71xbf16>, vector<8x71xf32> -> vector<8x71xf32>
    %16 = arith.addf %10, %15 : vector<8x71xf32>
    %c0_20 = arith.constant 0 : index
    %c0_21 = arith.constant 0 : index
    %c0_22 = arith.constant 0 : index
    %c0_23 = arith.constant 0 : index
    %17 = vector.load %arg8[%c0_20, %c0_21, %c0_22, %c0_23] : memref<1x1x4x81xbf16, #tpu.memory_space<vmem>>, vector<1x1x4x71xbf16>
    %18 = vector.shape_cast %17 : vector<1x1x4x71xbf16> to vector<4x71xbf16>
    %c3 = arith.constant 3 : index
    %c0_24 = arith.constant 0 : index
    %c0_25 = arith.constant 0 : index
    %19 = vector.load %arg14[%c3, %c0_24, %c0_25] : memref<27x8x4xbf16, #tpu.memory_space<vmem>>, vector<1x8x4xbf16>
    %20 = vector.shape_cast %19 : vector<1x8x4xbf16> to vector<8x4xbf16>
    %cst_26 = arith.constant dense<0.000000e+00> : vector<8x71xf32>
    %21 = tpu.matmul %20, %18, %cst_26 {dimension_numbers = #tpu.dot_dimension_numbers<[1], [0], [0], [1], [0, 0, 1, 1], [], []>} : vector<8x4xbf16>, vector<4x71xbf16>, vector<8x71xf32> -> vector<8x71xf32>
    %22 = arith.addf %16, %21 : vector<8x71xf32>
    %c0_27 = arith.constant 0 : index
    %c0_28 = arith.constant 0 : index
    %c0_29 = arith.constant 0 : index
    %c0_30 = arith.constant 0 : index
    %23 = vector.load %arg11[%c0_27, %c0_28, %c0_29, %c0_30] : memref<1x1x4x81xbf16, #tpu.memory_space<vmem>>, vector<1x1x4x71xbf16>
    %24 = vector.shape_cast %23 : vector<1x1x4x71xbf16> to vector<4x71xbf16>
    %c4 = arith.constant 4 : index
    %c0_31 = arith.constant 0 : index
    %c0_32 = arith.constant 0 : index
    %25 = vector.load %arg14[%c4, %c0_31, %c0_32] : memref<27x8x4xbf16, #tpu.memory_space<vmem>>, vector<1x8x4xbf16>
    %26 = vector.shape_cast %25 : vector<1x8x4xbf16> to vector<8x4xbf16>
    %cst_33 = arith.constant dense<0.000000e+00> : vector<8x71xf32>
    %27 = tpu.matmul %26, %24, %cst_33 {dimension_numbers = #tpu.dot_dimension_numbers<[1], [0], [0], [1], [0, 0, 1, 1], [], []>} : vector<8x4xbf16>, vector<4x71xbf16>, vector<8x71xf32> -> vector<8x71xf32>
    %28 = arith.addf %22, %27 : vector<8x71xf32>
    %c0_34 = arith.constant 0 : index
    %c0_35 = arith.constant 0 : index
    %c0_36 = arith.constant 0 : index
    %c1_37 = arith.constant 1 : index
    %29 = vector.load %arg8[%c0_34, %c0_35, %c0_36, %c1_37] : memref<1x1x4x81xbf16, #tpu.memory_space<vmem>>, vector<1x1x4x71xbf16>
    %30 = vector.shape_cast %29 : vector<1x1x4x71xbf16> to vector<4x71xbf16>
    %c5 = arith.constant 5 : index
    %c0_38 = arith.constant 0 : index
    %c0_39 = arith.constant 0 : index
    %31 = vector.load %arg14[%c5, %c0_38, %c0_39] : memref<27x8x4xbf16, #tpu.memory_space<vmem>>, vector<1x8x4xbf16>
    %32 = vector.shape_cast %31 : vector<1x8x4xbf16> to vector<8x4xbf16>
    %cst_40 = arith.constant dense<0.000000e+00> : vector<8x71xf32>
    %33 = tpu.matmul %32, %30, %cst_40 {dimension_numbers = #tpu.dot_dimension_numbers<[1], [0], [0], [1], [0, 0, 1, 1], [], []>} : vector<8x4xbf16>, vector<4x71xbf16>, vector<8x71xf32> -> vector<8x71xf32>
    %34 = arith.addf %28, %33 : vector<8x71xf32>
    %c0_41 = arith.constant 0 : index
    %c0_42 = arith.constant 0 : index
    %c0_43 = arith.constant 0 : index
    %c9 = arith.constant 9 : index
    %35 = vector.load %arg2[%c0_41, %c0_42, %c0_43, %c9] : memref<1x1x4x81xbf16, #tpu.memory_space<vmem>>, vector<1x1x4x71xbf16>
    %36 = vector.shape_cast %35 : vector<1x1x4x71xbf16> to vector<4x71xbf16>
    %c6 = arith.constant 6 : index
    %c0_44 = arith.constant 0 : index
    %c0_45 = arith.constant 0 : index
    %37 = vector.load %arg14[%c6, %c0_44, %c0_45] : memref<27x8x4xbf16, #tpu.memory_space<vmem>>, vector<1x8x4xbf16>
    %38 = vector.shape_cast %37 : vector<1x8x4xbf16> to vector<8x4xbf16>
    %cst_46 = arith.constant dense<0.000000e+00> : vector<8x71xf32>
    %39 = tpu.matmul %38, %36, %cst_46 {dimension_numbers = #tpu.dot_dimension_numbers<[1], [0], [0], [1], [0, 0, 1, 1], [], []>} : vector<8x4xbf16>, vector<4x71xbf16>, vector<8x71xf32> -> vector<8x71xf32>
    %40 = arith.addf %34, %39 : vector<8x71xf32>
    %c0_47 = arith.constant 0 : index
    %c0_48 = arith.constant 0 : index
    %c0_49 = arith.constant 0 : index
    %c9_50 = arith.constant 9 : index
    %41 = vector.load %arg5[%c0_47, %c0_48, %c0_49, %c9_50] : memref<1x1x4x81xbf16, #tpu.memory_space<vmem>>, vector<1x1x4x71xbf16>
    %42 = vector.shape_cast %41 : vector<1x1x4x71xbf16> to vector<4x71xbf16>
    %c7 = arith.constant 7 : index
    %c0_51 = arith.constant 0 : index
    %c0_52 = arith.constant 0 : index
    %43 = vector.load %arg14[%c7, %c0_51, %c0_52] : memref<27x8x4xbf16, #tpu.memory_space<vmem>>, vector<1x8x4xbf16>
    %44 = vector.shape_cast %43 : vector<1x8x4xbf16> to vector<8x4xbf16>
    %cst_53 = arith.constant dense<0.000000e+00> : vector<8x71xf32>
    %45 = tpu.matmul %44, %42, %cst_53 {dimension_numbers = #tpu.dot_dimension_numbers<[1], [0], [0], [1], [0, 0, 1, 1], [], []>} : vector<8x4xbf16>, vector<4x71xbf16>, vector<8x71xf32> -> vector<8x71xf32>
    %46 = arith.addf %40, %45 : vector<8x71xf32>
    %c0_54 = arith.constant 0 : index
    %c0_55 = arith.constant 0 : index
    %c0_56 = arith.constant 0 : index
    %c10 = arith.constant 10 : index
    %47 = vector.load %arg2[%c0_54, %c0_55, %c0_56, %c10] : memref<1x1x4x81xbf16, #tpu.memory_space<vmem>>, vector<1x1x4x71xbf16>
    %48 = vector.shape_cast %47 : vector<1x1x4x71xbf16> to vector<4x71xbf16>
    %c8 = arith.constant 8 : index
    %c0_57 = arith.constant 0 : index
    %c0_58 = arith.constant 0 : index
    %49 = vector.load %arg14[%c8, %c0_57, %c0_58] : memref<27x8x4xbf16, #tpu.memory_space<vmem>>, vector<1x8x4xbf16>
    %50 = vector.shape_cast %49 : vector<1x8x4xbf16> to vector<8x4xbf16>
    %cst_59 = arith.constant dense<0.000000e+00> : vector<8x71xf32>
    %51 = tpu.matmul %50, %48, %cst_59 {dimension_numbers = #tpu.dot_dimension_numbers<[1], [0], [0], [1], [0, 0, 1, 1], [], []>} : vector<8x4xbf16>, vector<4x71xbf16>, vector<8x71xf32> -> vector<8x71xf32>
    %52 = arith.addf %46, %51 : vector<8x71xf32>
    %c0_60 = arith.constant 0 : index
    %c0_61 = arith.constant 0 : index
    %c0_62 = arith.constant 0 : index
    %c0_63 = arith.constant 0 : index
    %53 = vector.load %arg3[%c0_60, %c0_61, %c0_62, %c0_63] : memref<1x1x4x81xbf16, #tpu.memory_space<vmem>>, vector<1x1x4x71xbf16>
    %54 = vector.shape_cast %53 : vector<1x1x4x71xbf16> to vector<4x71xbf16>
    %c9_64 = arith.constant 9 : index
    %c0_65 = arith.constant 0 : index
    %c0_66 = arith.constant 0 : index
    %55 = vector.load %arg14[%c9_64, %c0_65, %c0_66] : memref<27x8x4xbf16, #tpu.memory_space<vmem>>, vector<1x8x4xbf16>
    %56 = vector.shape_cast %55 : vector<1x8x4xbf16> to vector<8x4xbf16>
    %cst_67 = arith.constant dense<0.000000e+00> : vector<8x71xf32>
    %57 = tpu.matmul %56, %54, %cst_67 {dimension_numbers = #tpu.dot_dimension_numbers<[1], [0], [0], [1], [0, 0, 1, 1], [], []>} : vector<8x4xbf16>, vector<4x71xbf16>, vector<8x71xf32> -> vector<8x71xf32>
    %58 = arith.addf %52, %57 : vector<8x71xf32>
    %c0_68 = arith.constant 0 : index
    %c0_69 = arith.constant 0 : index
    %c0_70 = arith.constant 0 : index
    %c0_71 = arith.constant 0 : index
    %59 = vector.load %arg6[%c0_68, %c0_69, %c0_70, %c0_71] : memref<1x1x4x81xbf16, #tpu.memory_space<vmem>>, vector<1x1x4x71xbf16>
    %60 = vector.shape_cast %59 : vector<1x1x4x71xbf16> to vector<4x71xbf16>
    %c10_72 = arith.constant 10 : index
    %c0_73 = arith.constant 0 : index
    %c0_74 = arith.constant 0 : index
    %61 = vector.load %arg14[%c10_72, %c0_73, %c0_74] : memref<27x8x4xbf16, #tpu.memory_space<vmem>>, vector<1x8x4xbf16>
    %62 = vector.shape_cast %61 : vector<1x8x4xbf16> to vector<8x4xbf16>
    %cst_75 = arith.constant dense<0.000000e+00> : vector<8x71xf32>
    %63 = tpu.matmul %62, %60, %cst_75 {dimension_numbers = #tpu.dot_dimension_numbers<[1], [0], [0], [1], [0, 0, 1, 1], [], []>} : vector<8x4xbf16>, vector<4x71xbf16>, vector<8x71xf32> -> vector<8x71xf32>
    %64 = arith.addf %58, %63 : vector<8x71xf32>
    %c0_76 = arith.constant 0 : index
    %c0_77 = arith.constant 0 : index
    %c0_78 = arith.constant 0 : index
    %c1_79 = arith.constant 1 : index
    %65 = vector.load %arg3[%c0_76, %c0_77, %c0_78, %c1_79] : memref<1x1x4x81xbf16, #tpu.memory_space<vmem>>, vector<1x1x4x71xbf16>
    %66 = vector.shape_cast %65 : vector<1x1x4x71xbf16> to vector<4x71xbf16>
    %c11 = arith.constant 11 : index
    %c0_80 = arith.constant 0 : index
    %c0_81 = arith.constant 0 : index
    %67 = vector.load %arg14[%c11, %c0_80, %c0_81] : memref<27x8x4xbf16, #tpu.memory_space<vmem>>, vector<1x8x4xbf16>
    %68 = vector.shape_cast %67 : vector<1x8x4xbf16> to vector<8x4xbf16>
    %cst_82 = arith.constant dense<0.000000e+00> : vector<8x71xf32>
    %69 = tpu.matmul %68, %66, %cst_82 {dimension_numbers = #tpu.dot_dimension_numbers<[1], [0], [0], [1], [0, 0, 1, 1], [], []>} : vector<8x4xbf16>, vector<4x71xbf16>, vector<8x71xf32> -> vector<8x71xf32>
    %70 = arith.addf %64, %69 : vector<8x71xf32>
    %c0_83 = arith.constant 0 : index
    %c0_84 = arith.constant 0 : index
    %c0_85 = arith.constant 0 : index
    %c0_86 = arith.constant 0 : index
    %71 = vector.load %arg9[%c0_83, %c0_84, %c0_85, %c0_86] : memref<1x1x4x81xbf16, #tpu.memory_space<vmem>>, vector<1x1x4x71xbf16>
    %72 = vector.shape_cast %71 : vector<1x1x4x71xbf16> to vector<4x71xbf16>
    %c12 = arith.constant 12 : index
    %c0_87 = arith.constant 0 : index
    %c0_88 = arith.constant 0 : index
    %73 = vector.load %arg14[%c12, %c0_87, %c0_88] : memref<27x8x4xbf16, #tpu.memory_space<vmem>>, vector<1x8x4xbf16>
    %74 = vector.shape_cast %73 : vector<1x8x4xbf16> to vector<8x4xbf16>
    %cst_89 = arith.constant dense<0.000000e+00> : vector<8x71xf32>
    %75 = tpu.matmul %74, %72, %cst_89 {dimension_numbers = #tpu.dot_dimension_numbers<[1], [0], [0], [1], [0, 0, 1, 1], [], []>} : vector<8x4xbf16>, vector<4x71xbf16>, vector<8x71xf32> -> vector<8x71xf32>
    %76 = arith.addf %70, %75 : vector<8x71xf32>
    %c0_90 = arith.constant 0 : index
    %c0_91 = arith.constant 0 : index
    %c0_92 = arith.constant 0 : index
    %c0_93 = arith.constant 0 : index
    %77 = vector.load %arg12[%c0_90, %c0_91, %c0_92, %c0_93] : memref<1x1x4x81xbf16, #tpu.memory_space<vmem>>, vector<1x1x4x71xbf16>
    %78 = vector.shape_cast %77 : vector<1x1x4x71xbf16> to vector<4x71xbf16>
    %c13 = arith.constant 13 : index
    %c0_94 = arith.constant 0 : index
    %c0_95 = arith.constant 0 : index
    %79 = vector.load %arg14[%c13, %c0_94, %c0_95] : memref<27x8x4xbf16, #tpu.memory_space<vmem>>, vector<1x8x4xbf16>
    %80 = vector.shape_cast %79 : vector<1x8x4xbf16> to vector<8x4xbf16>
    %cst_96 = arith.constant dense<0.000000e+00> : vector<8x71xf32>
    %81 = tpu.matmul %80, %78, %cst_96 {dimension_numbers = #tpu.dot_dimension_numbers<[1], [0], [0], [1], [0, 0, 1, 1], [], []>} : vector<8x4xbf16>, vector<4x71xbf16>, vector<8x71xf32> -> vector<8x71xf32>
    %82 = arith.addf %76, %81 : vector<8x71xf32>
    %c0_97 = arith.constant 0 : index
    %c0_98 = arith.constant 0 : index
    %c0_99 = arith.constant 0 : index
    %c1_100 = arith.constant 1 : index
    %83 = vector.load %arg9[%c0_97, %c0_98, %c0_99, %c1_100] : memref<1x1x4x81xbf16, #tpu.memory_space<vmem>>, vector<1x1x4x71xbf16>
    %84 = vector.shape_cast %83 : vector<1x1x4x71xbf16> to vector<4x71xbf16>
    %c14 = arith.constant 14 : index
    %c0_101 = arith.constant 0 : index
    %c0_102 = arith.constant 0 : index
    %85 = vector.load %arg14[%c14, %c0_101, %c0_102] : memref<27x8x4xbf16, #tpu.memory_space<vmem>>, vector<1x8x4xbf16>
    %86 = vector.shape_cast %85 : vector<1x8x4xbf16> to vector<8x4xbf16>
    %cst_103 = arith.constant dense<0.000000e+00> : vector<8x71xf32>
    %87 = tpu.matmul %86, %84, %cst_103 {dimension_numbers = #tpu.dot_dimension_numbers<[1], [0], [0], [1], [0, 0, 1, 1], [], []>} : vector<8x4xbf16>, vector<4x71xbf16>, vector<8x71xf32> -> vector<8x71xf32>
    %88 = arith.addf %82, %87 : vector<8x71xf32>
    %c0_104 = arith.constant 0 : index
    %c0_105 = arith.constant 0 : index
    %c0_106 = arith.constant 0 : index
    %c9_107 = arith.constant 9 : index
    %89 = vector.load %arg3[%c0_104, %c0_105, %c0_106, %c9_107] : memref<1x1x4x81xbf16, #tpu.memory_space<vmem>>, vector<1x1x4x71xbf16>
    %90 = vector.shape_cast %89 : vector<1x1x4x71xbf16> to vector<4x71xbf16>
    %c15 = arith.constant 15 : index
    %c0_108 = arith.constant 0 : index
    %c0_109 = arith.constant 0 : index
    %91 = vector.load %arg14[%c15, %c0_108, %c0_109] : memref<27x8x4xbf16, #tpu.memory_space<vmem>>, vector<1x8x4xbf16>
    %92 = vector.shape_cast %91 : vector<1x8x4xbf16> to vector<8x4xbf16>
    %cst_110 = arith.constant dense<0.000000e+00> : vector<8x71xf32>
    %93 = tpu.matmul %92, %90, %cst_110 {dimension_numbers = #tpu.dot_dimension_numbers<[1], [0], [0], [1], [0, 0, 1, 1], [], []>} : vector<8x4xbf16>, vector<4x71xbf16>, vector<8x71xf32> -> vector<8x71xf32>
    %94 = arith.addf %88, %93 : vector<8x71xf32>
    %c0_111 = arith.constant 0 : index
    %c0_112 = arith.constant 0 : index
    %c0_113 = arith.constant 0 : index
    %c9_114 = arith.constant 9 : index
    %95 = vector.load %arg6[%c0_111, %c0_112, %c0_113, %c9_114] : memref<1x1x4x81xbf16, #tpu.memory_space<vmem>>, vector<1x1x4x71xbf16>
    %96 = vector.shape_cast %95 : vector<1x1x4x71xbf16> to vector<4x71xbf16>
    %c16 = arith.constant 16 : index
    %c0_115 = arith.constant 0 : index
    %c0_116 = arith.constant 0 : index
    %97 = vector.load %arg14[%c16, %c0_115, %c0_116] : memref<27x8x4xbf16, #tpu.memory_space<vmem>>, vector<1x8x4xbf16>
    %98 = vector.shape_cast %97 : vector<1x8x4xbf16> to vector<8x4xbf16>
    %cst_117 = arith.constant dense<0.000000e+00> : vector<8x71xf32>
    %99 = tpu.matmul %98, %96, %cst_117 {dimension_numbers = #tpu.dot_dimension_numbers<[1], [0], [0], [1], [0, 0, 1, 1], [], []>} : vector<8x4xbf16>, vector<4x71xbf16>, vector<8x71xf32> -> vector<8x71xf32>
    %100 = arith.addf %94, %99 : vector<8x71xf32>
    %c0_118 = arith.constant 0 : index
    %c0_119 = arith.constant 0 : index
    %c0_120 = arith.constant 0 : index
    %c10_121 = arith.constant 10 : index
    %101 = vector.load %arg3[%c0_118, %c0_119, %c0_120, %c10_121] : memref<1x1x4x81xbf16, #tpu.memory_space<vmem>>, vector<1x1x4x71xbf16>
    %102 = vector.shape_cast %101 : vector<1x1x4x71xbf16> to vector<4x71xbf16>
    %c17 = arith.constant 17 : index
    %c0_122 = arith.constant 0 : index
    %c0_123 = arith.constant 0 : index
    %103 = vector.load %arg14[%c17, %c0_122, %c0_123] : memref<27x8x4xbf16, #tpu.memory_space<vmem>>, vector<1x8x4xbf16>
    %104 = vector.shape_cast %103 : vector<1x8x4xbf16> to vector<8x4xbf16>
    %cst_124 = arith.constant dense<0.000000e+00> : vector<8x71xf32>
    %105 = tpu.matmul %104, %102, %cst_124 {dimension_numbers = #tpu.dot_dimension_numbers<[1], [0], [0], [1], [0, 0, 1, 1], [], []>} : vector<8x4xbf16>, vector<4x71xbf16>, vector<8x71xf32> -> vector<8x71xf32>
    %106 = arith.addf %100, %105 : vector<8x71xf32>
    %c0_125 = arith.constant 0 : index
    %c0_126 = arith.constant 0 : index
    %c0_127 = arith.constant 0 : index
    %c0_128 = arith.constant 0 : index
    %107 = vector.load %arg4[%c0_125, %c0_126, %c0_127, %c0_128] : memref<1x1x4x81xbf16, #tpu.memory_space<vmem>>, vector<1x1x4x71xbf16>
    %108 = vector.shape_cast %107 : vector<1x1x4x71xbf16> to vector<4x71xbf16>
    %c18 = arith.constant 18 : index
    %c0_129 = arith.constant 0 : index
    %c0_130 = arith.constant 0 : index
    %109 = vector.load %arg14[%c18, %c0_129, %c0_130] : memref<27x8x4xbf16, #tpu.memory_space<vmem>>, vector<1x8x4xbf16>
    %110 = vector.shape_cast %109 : vector<1x8x4xbf16> to vector<8x4xbf16>
    %cst_131 = arith.constant dense<0.000000e+00> : vector<8x71xf32>
    %111 = tpu.matmul %110, %108, %cst_131 {dimension_numbers = #tpu.dot_dimension_numbers<[1], [0], [0], [1], [0, 0, 1, 1], [], []>} : vector<8x4xbf16>, vector<4x71xbf16>, vector<8x71xf32> -> vector<8x71xf32>
    %112 = arith.addf %106, %111 : vector<8x71xf32>
    %c0_132 = arith.constant 0 : index
    %c0_133 = arith.constant 0 : index
    %c0_134 = arith.constant 0 : index
    %c0_135 = arith.constant 0 : index
    %113 = vector.load %arg7[%c0_132, %c0_133, %c0_134, %c0_135] : memref<1x1x4x81xbf16, #tpu.memory_space<vmem>>, vector<1x1x4x71xbf16>
    %114 = vector.shape_cast %113 : vector<1x1x4x71xbf16> to vector<4x71xbf16>
    %c19 = arith.constant 19 : index
    %c0_136 = arith.constant 0 : index
    %c0_137 = arith.constant 0 : index
    %115 = vector.load %arg14[%c19, %c0_136, %c0_137] : memref<27x8x4xbf16, #tpu.memory_space<vmem>>, vector<1x8x4xbf16>
    %116 = vector.shape_cast %115 : vector<1x8x4xbf16> to vector<8x4xbf16>
    %cst_138 = arith.constant dense<0.000000e+00> : vector<8x71xf32>
    %117 = tpu.matmul %116, %114, %cst_138 {dimension_numbers = #tpu.dot_dimension_numbers<[1], [0], [0], [1], [0, 0, 1, 1], [], []>} : vector<8x4xbf16>, vector<4x71xbf16>, vector<8x71xf32> -> vector<8x71xf32>
    %118 = arith.addf %112, %117 : vector<8x71xf32>
    %c0_139 = arith.constant 0 : index
    %c0_140 = arith.constant 0 : index
    %c0_141 = arith.constant 0 : index
    %c1_142 = arith.constant 1 : index
    %119 = vector.load %arg4[%c0_139, %c0_140, %c0_141, %c1_142] : memref<1x1x4x81xbf16, #tpu.memory_space<vmem>>, vector<1x1x4x71xbf16>
    %120 = vector.shape_cast %119 : vector<1x1x4x71xbf16> to vector<4x71xbf16>
    %c20 = arith.constant 20 : index
    %c0_143 = arith.constant 0 : index
    %c0_144 = arith.constant 0 : index
    %121 = vector.load %arg14[%c20, %c0_143, %c0_144] : memref<27x8x4xbf16, #tpu.memory_space<vmem>>, vector<1x8x4xbf16>
    %122 = vector.shape_cast %121 : vector<1x8x4xbf16> to vector<8x4xbf16>
    %cst_145 = arith.constant dense<0.000000e+00> : vector<8x71xf32>
    %123 = tpu.matmul %122, %120, %cst_145 {dimension_numbers = #tpu.dot_dimension_numbers<[1], [0], [0], [1], [0, 0, 1, 1], [], []>} : vector<8x4xbf16>, vector<4x71xbf16>, vector<8x71xf32> -> vector<8x71xf32>
    %124 = arith.addf %118, %123 : vector<8x71xf32>
    %c0_146 = arith.constant 0 : index
    %c0_147 = arith.constant 0 : index
    %c0_148 = arith.constant 0 : index
    %c0_149 = arith.constant 0 : index
    %125 = vector.load %arg10[%c0_146, %c0_147, %c0_148, %c0_149] : memref<1x1x4x81xbf16, #tpu.memory_space<vmem>>, vector<1x1x4x71xbf16>
    %126 = vector.shape_cast %125 : vector<1x1x4x71xbf16> to vector<4x71xbf16>
    %c21 = arith.constant 21 : index
    %c0_150 = arith.constant 0 : index
    %c0_151 = arith.constant 0 : index
    %127 = vector.load %arg14[%c21, %c0_150, %c0_151] : memref<27x8x4xbf16, #tpu.memory_space<vmem>>, vector<1x8x4xbf16>
    %128 = vector.shape_cast %127 : vector<1x8x4xbf16> to vector<8x4xbf16>
    %cst_152 = arith.constant dense<0.000000e+00> : vector<8x71xf32>
    %129 = tpu.matmul %128, %126, %cst_152 {dimension_numbers = #tpu.dot_dimension_numbers<[1], [0], [0], [1], [0, 0, 1, 1], [], []>} : vector<8x4xbf16>, vector<4x71xbf16>, vector<8x71xf32> -> vector<8x71xf32>
    %130 = arith.addf %124, %129 : vector<8x71xf32>
    %c0_153 = arith.constant 0 : index
    %c0_154 = arith.constant 0 : index
    %c0_155 = arith.constant 0 : index
    %c0_156 = arith.constant 0 : index
    %131 = vector.load %arg13[%c0_153, %c0_154, %c0_155, %c0_156] : memref<1x1x4x81xbf16, #tpu.memory_space<vmem>>, vector<1x1x4x71xbf16>
    %132 = vector.shape_cast %131 : vector<1x1x4x71xbf16> to vector<4x71xbf16>
    %c22 = arith.constant 22 : index
    %c0_157 = arith.constant 0 : index
    %c0_158 = arith.constant 0 : index
    %133 = vector.load %arg14[%c22, %c0_157, %c0_158] : memref<27x8x4xbf16, #tpu.memory_space<vmem>>, vector<1x8x4xbf16>
    %134 = vector.shape_cast %133 : vector<1x8x4xbf16> to vector<8x4xbf16>
    %cst_159 = arith.constant dense<0.000000e+00> : vector<8x71xf32>
    %135 = tpu.matmul %134, %132, %cst_159 {dimension_numbers = #tpu.dot_dimension_numbers<[1], [0], [0], [1], [0, 0, 1, 1], [], []>} : vector<8x4xbf16>, vector<4x71xbf16>, vector<8x71xf32> -> vector<8x71xf32>
    %136 = arith.addf %130, %135 : vector<8x71xf32>
    %c0_160 = arith.constant 0 : index
    %c0_161 = arith.constant 0 : index
    %c0_162 = arith.constant 0 : index
    %c1_163 = arith.constant 1 : index
    %137 = vector.load %arg10[%c0_160, %c0_161, %c0_162, %c1_163] : memref<1x1x4x81xbf16, #tpu.memory_space<vmem>>, vector<1x1x4x71xbf16>
    %138 = vector.shape_cast %137 : vector<1x1x4x71xbf16> to vector<4x71xbf16>
    %c23 = arith.constant 23 : index
    %c0_164 = arith.constant 0 : index
    %c0_165 = arith.constant 0 : index
    %139 = vector.load %arg14[%c23, %c0_164, %c0_165] : memref<27x8x4xbf16, #tpu.memory_space<vmem>>, vector<1x8x4xbf16>
    %140 = vector.shape_cast %139 : vector<1x8x4xbf16> to vector<8x4xbf16>
    %cst_166 = arith.constant dense<0.000000e+00> : vector<8x71xf32>
    %141 = tpu.matmul %140, %138, %cst_166 {dimension_numbers = #tpu.dot_dimension_numbers<[1], [0], [0], [1], [0, 0, 1, 1], [], []>} : vector<8x4xbf16>, vector<4x71xbf16>, vector<8x71xf32> -> vector<8x71xf32>
    %142 = arith.addf %136, %141 : vector<8x71xf32>
    %c0_167 = arith.constant 0 : index
    %c0_168 = arith.constant 0 : index
    %c0_169 = arith.constant 0 : index
    %c9_170 = arith.constant 9 : index
    %143 = vector.load %arg4[%c0_167, %c0_168, %c0_169, %c9_170] : memref<1x1x4x81xbf16, #tpu.memory_space<vmem>>, vector<1x1x4x71xbf16>
    %144 = vector.shape_cast %143 : vector<1x1x4x71xbf16> to vector<4x71xbf16>
    %c24 = arith.constant 24 : index
    %c0_171 = arith.constant 0 : index
    %c0_172 = arith.constant 0 : index
    %145 = vector.load %arg14[%c24, %c0_171, %c0_172] : memref<27x8x4xbf16, #tpu.memory_space<vmem>>, vector<1x8x4xbf16>
    %146 = vector.shape_cast %145 : vector<1x8x4xbf16> to vector<8x4xbf16>
    %cst_173 = arith.constant dense<0.000000e+00> : vector<8x71xf32>
    %147 = tpu.matmul %146, %144, %cst_173 {dimension_numbers = #tpu.dot_dimension_numbers<[1], [0], [0], [1], [0, 0, 1, 1], [], []>} : vector<8x4xbf16>, vector<4x71xbf16>, vector<8x71xf32> -> vector<8x71xf32>
    %148 = arith.addf %142, %147 : vector<8x71xf32>
    %c0_174 = arith.constant 0 : index
    %c0_175 = arith.constant 0 : index
    %c0_176 = arith.constant 0 : index
    %c9_177 = arith.constant 9 : index
    %149 = vector.load %arg7[%c0_174, %c0_175, %c0_176, %c9_177] : memref<1x1x4x81xbf16, #tpu.memory_space<vmem>>, vector<1x1x4x71xbf16>
    %150 = vector.shape_cast %149 : vector<1x1x4x71xbf16> to vector<4x71xbf16>
    %c25 = arith.constant 25 : index
    %c0_178 = arith.constant 0 : index
    %c0_179 = arith.constant 0 : index
    %151 = vector.load %arg14[%c25, %c0_178, %c0_179] : memref<27x8x4xbf16, #tpu.memory_space<vmem>>, vector<1x8x4xbf16>
    %152 = vector.shape_cast %151 : vector<1x8x4xbf16> to vector<8x4xbf16>
    %cst_180 = arith.constant dense<0.000000e+00> : vector<8x71xf32>
    %153 = tpu.matmul %152, %150, %cst_180 {dimension_numbers = #tpu.dot_dimension_numbers<[1], [0], [0], [1], [0, 0, 1, 1], [], []>} : vector<8x4xbf16>, vector<4x71xbf16>, vector<8x71xf32> -> vector<8x71xf32>
    %154 = arith.addf %148, %153 : vector<8x71xf32>
    %c0_181 = arith.constant 0 : index
    %c0_182 = arith.constant 0 : index
    %c0_183 = arith.constant 0 : index
    %c10_184 = arith.constant 10 : index
    %155 = vector.load %arg4[%c0_181, %c0_182, %c0_183, %c10_184] : memref<1x1x4x81xbf16, #tpu.memory_space<vmem>>, vector<1x1x4x71xbf16>
    %156 = vector.shape_cast %155 : vector<1x1x4x71xbf16> to vector<4x71xbf16>
    %c26 = arith.constant 26 : index
    %c0_185 = arith.constant 0 : index
    %c0_186 = arith.constant 0 : index
    %157 = vector.load %arg14[%c26, %c0_185, %c0_186] : memref<27x8x4xbf16, #tpu.memory_space<vmem>>, vector<1x8x4xbf16>
    %158 = vector.shape_cast %157 : vector<1x8x4xbf16> to vector<8x4xbf16>
    %cst_187 = arith.constant dense<0.000000e+00> : vector<8x71xf32>
    %159 = tpu.matmul %158, %156, %cst_187 {dimension_numbers = #tpu.dot_dimension_numbers<[1], [0], [0], [1], [0, 0, 1, 1], [], []>} : vector<8x4xbf16>, vector<4x71xbf16>, vector<8x71xf32> -> vector<8x71xf32>
    %160 = arith.addf %154, %159 : vector<8x71xf32>
    %c0_188 = arith.constant 0 : index
    %c0_189 = arith.constant 0 : index
    %161 = vector.load %arg15[%c0_188, %c0_189] : memref<8x1xf32, #tpu.memory_space<vmem>>, vector<8x1xf32>
    %162 = vector.broadcast %161 : vector<8x1xf32> to vector<8x71xf32>
    %163 = arith.addf %160, %162 : vector<8x71xf32>
    %cst_190 = arith.constant 0.000000e+00 : f32
    %164 = vector.broadcast %cst_190 : f32 to vector<8x71xf32>
    %165 = arith.maximumf %163, %164 : vector<8x71xf32>
    %166 = arith.truncf %165 : vector<8x71xf32> to vector<8x71xbf16>
    %c0_191 = arith.constant 0 : index
    %c0_192 = arith.constant 0 : index
    %c0_193 = arith.constant 0 : index
    %c0_194 = arith.constant 0 : index
    %167 = vector.load %arg16[%c0_191, %c0_192, %c0_193, %c0_194] : memref<1x1x8x71xbf16, #tpu.memory_space<vmem>>, vector<1x1x8x71xbf16>
    %168 = vector.shape_cast %167 : vector<1x1x8x71xbf16> to vector<8x71xbf16>
    %169 = vector.shape_cast %166 : vector<8x71xbf16> to vector<1x1x8x71xbf16>
    tpu.vector_store %arg16[%c0_191, %c0_192, %c0_193, %c0_194], %169 {strides = array<i32>} : memref<1x1x8x71xbf16, #tpu.memory_space<vmem>>, vector<1x1x8x71xbf16>,
    return
  }
  func.func @transform_0(%arg0: i32, %arg1: i32) -> (i32, i32, i32, i32) {
    %c2_i32 = arith.constant 2 : i32
    %0 = arith.muli %arg1, %c2_i32 : i32
    %c0_i32 = arith.constant 0 : i32
    %1 = arith.addi %0, %c0_i32 : i32
    %c0_i32_0 = arith.constant 0 : i32
    %c0_i32_1 = arith.constant 0 : i32
    %c0_i32_2 = arith.constant 0 : i32
    return %arg0, %1, %c0_i32_0, %c0_i32_1 : i32, i32, i32, i32
  }
  func.func @transform_1(%arg0: i32, %arg1: i32) -> (i32, i32, i32, i32) {
    %c2_i32 = arith.constant 2 : i32
    %0 = arith.muli %arg1, %c2_i32 : i32
    %c1_i32 = arith.constant 1 : i32
    %1 = arith.addi %0, %c1_i32 : i32
    %c0_i32 = arith.constant 0 : i32
    %c0_i32_0 = arith.constant 0 : i32
    %c0_i32_1 = arith.constant 0 : i32
    return %arg0, %1, %c0_i32, %c0_i32_0 : i32, i32, i32, i32
  }
  func.func @transform_2(%arg0: i32, %arg1: i32) -> (i32, i32, i32, i32) {
    %c2_i32 = arith.constant 2 : i32
    %0 = arith.muli %arg1, %c2_i32 : i32
    %c2_i32_0 = arith.constant 2 : i32
    %1 = arith.addi %0, %c2_i32_0 : i32
    %c0_i32 = arith.constant 0 : i32
    %c0_i32_1 = arith.constant 0 : i32
    %c0_i32_2 = arith.constant 0 : i32
    return %arg0, %1, %c0_i32, %c0_i32_1 : i32, i32, i32, i32
  }
  func.func @transform_3(%arg0: i32, %arg1: i32) -> (i32, i32, i32, i32) {
    %c2_i32 = arith.constant 2 : i32
    %0 = arith.muli %arg1, %c2_i32 : i32
    %c0_i32 = arith.constant 0 : i32
    %1 = arith.addi %0, %c0_i32 : i32
    %c0_i32_0 = arith.constant 0 : i32
    %c0_i32_1 = arith.constant 0 : i32
    %c0_i32_2 = arith.constant 0 : i32
    return %arg0, %1, %c0_i32_0, %c0_i32_1 : i32, i32, i32, i32
  }
  func.func @transform_4(%arg0: i32, %arg1: i32) -> (i32, i32, i32, i32) {
    %c2_i32 = arith.constant 2 : i32
    %0 = arith.muli %arg1, %c2_i32 : i32
    %c1_i32 = arith.constant 1 : i32
    %1 = arith.addi %0, %c1_i32 : i32
    %c0_i32 = arith.constant 0 : i32
    %c0_i32_0 = arith.constant 0 : i32
    %c0_i32_1 = arith.constant 0 : i32
    return %arg0, %1, %c0_i32, %c0_i32_0 : i32, i32, i32, i32
  }
  func.func @transform_5(%arg0: i32, %arg1: i32) -> (i32, i32, i32, i32) {
    %c2_i32 = arith.constant 2 : i32
    %0 = arith.muli %arg1, %c2_i32 : i32
    %c2_i32_0 = arith.constant 2 : i32
    %1 = arith.addi %0, %c2_i32_0 : i32
    %c0_i32 = arith.constant 0 : i32
    %c0_i32_1 = arith.constant 0 : i32
    %c0_i32_2 = arith.constant 0 : i32
    return %arg0, %1, %c0_i32, %c0_i32_1 : i32, i32, i32, i32
  }
  func.func @transform_6(%arg0: i32, %arg1: i32) -> (i32, i32, i32, i32) {
    %c2_i32 = arith.constant 2 : i32
    %0 = arith.muli %arg1, %c2_i32 : i32
    %c0_i32 = arith.constant 0 : i32
    %1 = arith.addi %0, %c0_i32 : i32
    %c0_i32_0 = arith.constant 0 : i32
    %c0_i32_1 = arith.constant 0 : i32
    %c0_i32_2 = arith.constant 0 : i32
    return %arg0, %1, %c0_i32_0, %c0_i32_1 : i32, i32, i32, i32
  }
  func.func @transform_7(%arg0: i32, %arg1: i32) -> (i32, i32, i32, i32) {
    %c2_i32 = arith.constant 2 : i32
    %0 = arith.muli %arg1, %c2_i32 : i32
    %c1_i32 = arith.constant 1 : i32
    %1 = arith.addi %0, %c1_i32 : i32
    %c0_i32 = arith.constant 0 : i32
    %c0_i32_0 = arith.constant 0 : i32
    %c0_i32_1 = arith.constant 0 : i32
    return %arg0, %1, %c0_i32, %c0_i32_0 : i32, i32, i32, i32
  }
  func.func @transform_8(%arg0: i32, %arg1: i32) -> (i32, i32, i32, i32) {
    %c2_i32 = arith.constant 2 : i32
    %0 = arith.muli %arg1, %c2_i32 : i32
    %c2_i32_0 = arith.constant 2 : i32
    %1 = arith.addi %0, %c2_i32_0 : i32
    %c0_i32 = arith.constant 0 : i32
    %c0_i32_1 = arith.constant 0 : i32
    %c0_i32_2 = arith.constant 0 : i32
    return %arg0, %1, %c0_i32, %c0_i32_1 : i32, i32, i32, i32
  }
  func.func @transform_9(%arg0: i32, %arg1: i32) -> (i32, i32, i32, i32) {
    %c2_i32 = arith.constant 2 : i32
    %0 = arith.muli %arg1, %c2_i32 : i32
    %c0_i32 = arith.constant 0 : i32
    %1 = arith.addi %0, %c0_i32 : i32
    %c0_i32_0 = arith.constant 0 : i32
    %c0_i32_1 = arith.constant 0 : i32
    %c0_i32_2 = arith.constant 0 : i32
    return %arg0, %1, %c0_i32_0, %c0_i32_1 : i32, i32, i32, i32
  }
  func.func @transform_10(%arg0: i32, %arg1: i32) -> (i32, i32, i32, i32) {
    %c2_i32 = arith.constant 2 : i32
    %0 = arith.muli %arg1, %c2_i32 : i32
    %c1_i32 = arith.constant 1 : i32
    %1 = arith.addi %0, %c1_i32 : i32
    %c0_i32 = arith.constant 0 : i32
    %c0_i32_0 = arith.constant 0 : i32
    %c0_i32_1 = arith.constant 0 : i32
    return %arg0, %1, %c0_i32, %c0_i32_0 : i32, i32, i32, i32
  }
  func.func @transform_11(%arg0: i32, %arg1: i32) -> (i32, i32, i32, i32) {
    %c2_i32 = arith.constant 2 : i32
    %0 = arith.muli %arg1, %c2_i32 : i32
    %c2_i32_0 = arith.constant 2 : i32
    %1 = arith.addi %0, %c2_i32_0 : i32
    %c0_i32 = arith.constant 0 : i32
    %c0_i32_1 = arith.constant 0 : i32
    %c0_i32_2 = arith.constant 0 : i32
    return %arg0, %1, %c0_i32, %c0_i32_1 : i32, i32, i32, i32
  }
  func.func @transform_12(%arg0: i32, %arg1: i32) -> (i32, i32, i32) {
    %c0_i32 = arith.constant 0 : i32
    %c0_i32_0 = arith.constant 0 : i32
    %c0_i32_1 = arith.constant 0 : i32
    %c0_i32_2 = arith.constant 0 : i32
    return %c0_i32, %c0_i32_0, %c0_i32_1 : i32, i32, i32
  }
  func.func @transform_13(%arg0: i32, %arg1: i32) -> (i32, i32) {
    %c0_i32 = arith.constant 0 : i32
    %c0_i32_0 = arith.constant 0 : i32
    %c0_i32_1 = arith.constant 0 : i32
    return %c0_i32, %c0_i32_0 : i32, i32
  }
  func.func @transform_14(%arg0: i32, %arg1: i32) -> (i32, i32, i32, i32) {
    %c0_i32 = arith.constant 0 : i32
    %c0_i32_0 = arith.constant 0 : i32
    %c0_i32_1 = arith.constant 0 : i32
    return %arg0, %arg1, %c0_i32, %c0_i32_0 : i32, i32, i32, i32
  }
}

module attributes {stable_mosaic.version = 11 : i64} {
  func.func @_fused_conv_kernel(%arg0: i32, %arg1: i32, %arg2: memref<1x1x8x100xbf16, #tpu.memory_space<vmem>>, %arg3: memref<1x1x8x100xbf16, #tpu.memory_space<vmem>>, %arg4: memref<1x1x8x100xbf16, #tpu.memory_space<vmem>>, %arg5: memref<27x8x8xbf16, #tpu.memory_space<vmem>>, %arg6: memref<8x1xf32, #tpu.memory_space<vmem>>, %arg7: memref<1x1x8x78xbf16, #tpu.memory_space<vmem>>) attributes {dimension_semantics = [#tpu.dimension_semantics<parallel>, #tpu.dimension_semantics<parallel>], iteration_bounds = array<i64: 2, 4>, scalar_prefetch = 0 : i64, scratch_operands = 0 : i64, tpu.core_type = #tpu.core_type<tc>, window_params = [{transform_indices = @transform_0, window_bounds = array<i64: 1, 1, 8, 100>}, {transform_indices = @transform_1, window_bounds = array<i64: 1, 1, 8, 100>}, {transform_indices = @transform_2, window_bounds = array<i64: 1, 1, 8, 100>}, {pipeline_mode = #tpu.pipeline_mode<synchronous>, transform_indices = @transform_3, window_bounds = array<i64: 27, 8, 8>}, {pipeline_mode = #tpu.pipeline_mode<synchronous>, transform_indices = @transform_4, window_bounds = array<i64: 8, 1>}, {transform_indices = @transform_5, window_bounds = array<i64: 1, 1, 8, 78>}]} {
    %c0 = arith.constant 0 : index
    %c0_0 = arith.constant 0 : index
    %c0_1 = arith.constant 0 : index
    %c0_2 = arith.constant 0 : index
    %0 = vector.load %arg2[%c0, %c0_0, %c0_1, %c0_2] : memref<1x1x8x100xbf16, #tpu.memory_space<vmem>>, vector<1x1x8x78xbf16>
    %1 = vector.shape_cast %0 : vector<1x1x8x78xbf16> to vector<8x78xbf16>
    %c0_3 = arith.constant 0 : index
    %c0_4 = arith.constant 0 : index
    %c0_5 = arith.constant 0 : index
    %2 = vector.load %arg5[%c0_3, %c0_4, %c0_5] : memref<27x8x8xbf16, #tpu.memory_space<vmem>>, vector<1x8x8xbf16>
    %3 = vector.shape_cast %2 : vector<1x8x8xbf16> to vector<8x8xbf16>
    %cst = arith.constant dense<0.000000e+00> : vector<8x78xf32>
    %4 = tpu.matmul %3, %1, %cst {dimension_numbers = #tpu.dot_dimension_numbers<[1], [0], [0], [1], [0, 0, 1, 1], [], []>} : vector<8x8xbf16>, vector<8x78xbf16>, vector<8x78xf32> -> vector<8x78xf32>
    %c0_6 = arith.constant 0 : index
    %c0_7 = arith.constant 0 : index
    %c0_8 = arith.constant 0 : index
    %c1 = arith.constant 1 : index
    %5 = vector.load %arg2[%c0_6, %c0_7, %c0_8, %c1] : memref<1x1x8x100xbf16, #tpu.memory_space<vmem>>, vector<1x1x8x78xbf16>
    %6 = vector.shape_cast %5 : vector<1x1x8x78xbf16> to vector<8x78xbf16>
    %c1_9 = arith.constant 1 : index
    %c0_10 = arith.constant 0 : index
    %c0_11 = arith.constant 0 : index
    %7 = vector.load %arg5[%c1_9, %c0_10, %c0_11] : memref<27x8x8xbf16, #tpu.memory_space<vmem>>, vector<1x8x8xbf16>
    %8 = vector.shape_cast %7 : vector<1x8x8xbf16> to vector<8x8xbf16>
    %cst_12 = arith.constant dense<0.000000e+00> : vector<8x78xf32>
    %9 = tpu.matmul %8, %6, %cst_12 {dimension_numbers = #tpu.dot_dimension_numbers<[1], [0], [0], [1], [0, 0, 1, 1], [], []>} : vector<8x8xbf16>, vector<8x78xbf16>, vector<8x78xf32> -> vector<8x78xf32>
    %10 = arith.addf %4, %9 : vector<8x78xf32>
    %c0_13 = arith.constant 0 : index
    %c0_14 = arith.constant 0 : index
    %c0_15 = arith.constant 0 : index
    %c2 = arith.constant 2 : index
    %11 = vector.load %arg2[%c0_13, %c0_14, %c0_15, %c2] : memref<1x1x8x100xbf16, #tpu.memory_space<vmem>>, vector<1x1x8x78xbf16>
    %12 = vector.shape_cast %11 : vector<1x1x8x78xbf16> to vector<8x78xbf16>
    %c2_16 = arith.constant 2 : index
    %c0_17 = arith.constant 0 : index
    %c0_18 = arith.constant 0 : index
    %13 = vector.load %arg5[%c2_16, %c0_17, %c0_18] : memref<27x8x8xbf16, #tpu.memory_space<vmem>>, vector<1x8x8xbf16>
    %14 = vector.shape_cast %13 : vector<1x8x8xbf16> to vector<8x8xbf16>
    %cst_19 = arith.constant dense<0.000000e+00> : vector<8x78xf32>
    %15 = tpu.matmul %14, %12, %cst_19 {dimension_numbers = #tpu.dot_dimension_numbers<[1], [0], [0], [1], [0, 0, 1, 1], [], []>} : vector<8x8xbf16>, vector<8x78xbf16>, vector<8x78xf32> -> vector<8x78xf32>
    %16 = arith.addf %10, %15 : vector<8x78xf32>
    %c0_20 = arith.constant 0 : index
    %c0_21 = arith.constant 0 : index
    %c0_22 = arith.constant 0 : index
    %c10 = arith.constant 10 : index
    %17 = vector.load %arg2[%c0_20, %c0_21, %c0_22, %c10] : memref<1x1x8x100xbf16, #tpu.memory_space<vmem>>, vector<1x1x8x78xbf16>
    %18 = vector.shape_cast %17 : vector<1x1x8x78xbf16> to vector<8x78xbf16>
    %c3 = arith.constant 3 : index
    %c0_23 = arith.constant 0 : index
    %c0_24 = arith.constant 0 : index
    %19 = vector.load %arg5[%c3, %c0_23, %c0_24] : memref<27x8x8xbf16, #tpu.memory_space<vmem>>, vector<1x8x8xbf16>
    %20 = vector.shape_cast %19 : vector<1x8x8xbf16> to vector<8x8xbf16>
    %cst_25 = arith.constant dense<0.000000e+00> : vector<8x78xf32>
    %21 = tpu.matmul %20, %18, %cst_25 {dimension_numbers = #tpu.dot_dimension_numbers<[1], [0], [0], [1], [0, 0, 1, 1], [], []>} : vector<8x8xbf16>, vector<8x78xbf16>, vector<8x78xf32> -> vector<8x78xf32>
    %22 = arith.addf %16, %21 : vector<8x78xf32>
    %c0_26 = arith.constant 0 : index
    %c0_27 = arith.constant 0 : index
    %c0_28 = arith.constant 0 : index
    %c11 = arith.constant 11 : index
    %23 = vector.load %arg2[%c0_26, %c0_27, %c0_28, %c11] : memref<1x1x8x100xbf16, #tpu.memory_space<vmem>>, vector<1x1x8x78xbf16>
    %24 = vector.shape_cast %23 : vector<1x1x8x78xbf16> to vector<8x78xbf16>
    %c4 = arith.constant 4 : index
    %c0_29 = arith.constant 0 : index
    %c0_30 = arith.constant 0 : index
    %25 = vector.load %arg5[%c4, %c0_29, %c0_30] : memref<27x8x8xbf16, #tpu.memory_space<vmem>>, vector<1x8x8xbf16>
    %26 = vector.shape_cast %25 : vector<1x8x8xbf16> to vector<8x8xbf16>
    %cst_31 = arith.constant dense<0.000000e+00> : vector<8x78xf32>
    %27 = tpu.matmul %26, %24, %cst_31 {dimension_numbers = #tpu.dot_dimension_numbers<[1], [0], [0], [1], [0, 0, 1, 1], [], []>} : vector<8x8xbf16>, vector<8x78xbf16>, vector<8x78xf32> -> vector<8x78xf32>
    %28 = arith.addf %22, %27 : vector<8x78xf32>
    %c0_32 = arith.constant 0 : index
    %c0_33 = arith.constant 0 : index
    %c0_34 = arith.constant 0 : index
    %c12 = arith.constant 12 : index
    %29 = vector.load %arg2[%c0_32, %c0_33, %c0_34, %c12] : memref<1x1x8x100xbf16, #tpu.memory_space<vmem>>, vector<1x1x8x78xbf16>
    %30 = vector.shape_cast %29 : vector<1x1x8x78xbf16> to vector<8x78xbf16>
    %c5 = arith.constant 5 : index
    %c0_35 = arith.constant 0 : index
    %c0_36 = arith.constant 0 : index
    %31 = vector.load %arg5[%c5, %c0_35, %c0_36] : memref<27x8x8xbf16, #tpu.memory_space<vmem>>, vector<1x8x8xbf16>
    %32 = vector.shape_cast %31 : vector<1x8x8xbf16> to vector<8x8xbf16>
    %cst_37 = arith.constant dense<0.000000e+00> : vector<8x78xf32>
    %33 = tpu.matmul %32, %30, %cst_37 {dimension_numbers = #tpu.dot_dimension_numbers<[1], [0], [0], [1], [0, 0, 1, 1], [], []>} : vector<8x8xbf16>, vector<8x78xbf16>, vector<8x78xf32> -> vector<8x78xf32>
    %34 = arith.addf %28, %33 : vector<8x78xf32>
    %c0_38 = arith.constant 0 : index
    %c0_39 = arith.constant 0 : index
    %c0_40 = arith.constant 0 : index
    %c20 = arith.constant 20 : index
    %35 = vector.load %arg2[%c0_38, %c0_39, %c0_40, %c20] : memref<1x1x8x100xbf16, #tpu.memory_space<vmem>>, vector<1x1x8x78xbf16>
    %36 = vector.shape_cast %35 : vector<1x1x8x78xbf16> to vector<8x78xbf16>
    %c6 = arith.constant 6 : index
    %c0_41 = arith.constant 0 : index
    %c0_42 = arith.constant 0 : index
    %37 = vector.load %arg5[%c6, %c0_41, %c0_42] : memref<27x8x8xbf16, #tpu.memory_space<vmem>>, vector<1x8x8xbf16>
    %38 = vector.shape_cast %37 : vector<1x8x8xbf16> to vector<8x8xbf16>
    %cst_43 = arith.constant dense<0.000000e+00> : vector<8x78xf32>
    %39 = tpu.matmul %38, %36, %cst_43 {dimension_numbers = #tpu.dot_dimension_numbers<[1], [0], [0], [1], [0, 0, 1, 1], [], []>} : vector<8x8xbf16>, vector<8x78xbf16>, vector<8x78xf32> -> vector<8x78xf32>
    %40 = arith.addf %34, %39 : vector<8x78xf32>
    %c0_44 = arith.constant 0 : index
    %c0_45 = arith.constant 0 : index
    %c0_46 = arith.constant 0 : index
    %c21 = arith.constant 21 : index
    %41 = vector.load %arg2[%c0_44, %c0_45, %c0_46, %c21] : memref<1x1x8x100xbf16, #tpu.memory_space<vmem>>, vector<1x1x8x78xbf16>
    %42 = vector.shape_cast %41 : vector<1x1x8x78xbf16> to vector<8x78xbf16>
    %c7 = arith.constant 7 : index
    %c0_47 = arith.constant 0 : index
    %c0_48 = arith.constant 0 : index
    %43 = vector.load %arg5[%c7, %c0_47, %c0_48] : memref<27x8x8xbf16, #tpu.memory_space<vmem>>, vector<1x8x8xbf16>
    %44 = vector.shape_cast %43 : vector<1x8x8xbf16> to vector<8x8xbf16>
    %cst_49 = arith.constant dense<0.000000e+00> : vector<8x78xf32>
    %45 = tpu.matmul %44, %42, %cst_49 {dimension_numbers = #tpu.dot_dimension_numbers<[1], [0], [0], [1], [0, 0, 1, 1], [], []>} : vector<8x8xbf16>, vector<8x78xbf16>, vector<8x78xf32> -> vector<8x78xf32>
    %46 = arith.addf %40, %45 : vector<8x78xf32>
    %c0_50 = arith.constant 0 : index
    %c0_51 = arith.constant 0 : index
    %c0_52 = arith.constant 0 : index
    %c22 = arith.constant 22 : index
    %47 = vector.load %arg2[%c0_50, %c0_51, %c0_52, %c22] : memref<1x1x8x100xbf16, #tpu.memory_space<vmem>>, vector<1x1x8x78xbf16>
    %48 = vector.shape_cast %47 : vector<1x1x8x78xbf16> to vector<8x78xbf16>
    %c8 = arith.constant 8 : index
    %c0_53 = arith.constant 0 : index
    %c0_54 = arith.constant 0 : index
    %49 = vector.load %arg5[%c8, %c0_53, %c0_54] : memref<27x8x8xbf16, #tpu.memory_space<vmem>>, vector<1x8x8xbf16>
    %50 = vector.shape_cast %49 : vector<1x8x8xbf16> to vector<8x8xbf16>
    %cst_55 = arith.constant dense<0.000000e+00> : vector<8x78xf32>
    %51 = tpu.matmul %50, %48, %cst_55 {dimension_numbers = #tpu.dot_dimension_numbers<[1], [0], [0], [1], [0, 0, 1, 1], [], []>} : vector<8x8xbf16>, vector<8x78xbf16>, vector<8x78xf32> -> vector<8x78xf32>
    %52 = arith.addf %46, %51 : vector<8x78xf32>
    %c0_56 = arith.constant 0 : index
    %c0_57 = arith.constant 0 : index
    %c0_58 = arith.constant 0 : index
    %c0_59 = arith.constant 0 : index
    %53 = vector.load %arg3[%c0_56, %c0_57, %c0_58, %c0_59] : memref<1x1x8x100xbf16, #tpu.memory_space<vmem>>, vector<1x1x8x78xbf16>
    %54 = vector.shape_cast %53 : vector<1x1x8x78xbf16> to vector<8x78xbf16>
    %c9 = arith.constant 9 : index
    %c0_60 = arith.constant 0 : index
    %c0_61 = arith.constant 0 : index
    %55 = vector.load %arg5[%c9, %c0_60, %c0_61] : memref<27x8x8xbf16, #tpu.memory_space<vmem>>, vector<1x8x8xbf16>
    %56 = vector.shape_cast %55 : vector<1x8x8xbf16> to vector<8x8xbf16>
    %cst_62 = arith.constant dense<0.000000e+00> : vector<8x78xf32>
    %57 = tpu.matmul %56, %54, %cst_62 {dimension_numbers = #tpu.dot_dimension_numbers<[1], [0], [0], [1], [0, 0, 1, 1], [], []>} : vector<8x8xbf16>, vector<8x78xbf16>, vector<8x78xf32> -> vector<8x78xf32>
    %58 = arith.addf %52, %57 : vector<8x78xf32>
    %c0_63 = arith.constant 0 : index
    %c0_64 = arith.constant 0 : index
    %c0_65 = arith.constant 0 : index
    %c1_66 = arith.constant 1 : index
    %59 = vector.load %arg3[%c0_63, %c0_64, %c0_65, %c1_66] : memref<1x1x8x100xbf16, #tpu.memory_space<vmem>>, vector<1x1x8x78xbf16>
    %60 = vector.shape_cast %59 : vector<1x1x8x78xbf16> to vector<8x78xbf16>
    %c10_67 = arith.constant 10 : index
    %c0_68 = arith.constant 0 : index
    %c0_69 = arith.constant 0 : index
    %61 = vector.load %arg5[%c10_67, %c0_68, %c0_69] : memref<27x8x8xbf16, #tpu.memory_space<vmem>>, vector<1x8x8xbf16>
    %62 = vector.shape_cast %61 : vector<1x8x8xbf16> to vector<8x8xbf16>
    %cst_70 = arith.constant dense<0.000000e+00> : vector<8x78xf32>
    %63 = tpu.matmul %62, %60, %cst_70 {dimension_numbers = #tpu.dot_dimension_numbers<[1], [0], [0], [1], [0, 0, 1, 1], [], []>} : vector<8x8xbf16>, vector<8x78xbf16>, vector<8x78xf32> -> vector<8x78xf32>
    %64 = arith.addf %58, %63 : vector<8x78xf32>
    %c0_71 = arith.constant 0 : index
    %c0_72 = arith.constant 0 : index
    %c0_73 = arith.constant 0 : index
    %c2_74 = arith.constant 2 : index
    %65 = vector.load %arg3[%c0_71, %c0_72, %c0_73, %c2_74] : memref<1x1x8x100xbf16, #tpu.memory_space<vmem>>, vector<1x1x8x78xbf16>
    %66 = vector.shape_cast %65 : vector<1x1x8x78xbf16> to vector<8x78xbf16>
    %c11_75 = arith.constant 11 : index
    %c0_76 = arith.constant 0 : index
    %c0_77 = arith.constant 0 : index
    %67 = vector.load %arg5[%c11_75, %c0_76, %c0_77] : memref<27x8x8xbf16, #tpu.memory_space<vmem>>, vector<1x8x8xbf16>
    %68 = vector.shape_cast %67 : vector<1x8x8xbf16> to vector<8x8xbf16>
    %cst_78 = arith.constant dense<0.000000e+00> : vector<8x78xf32>
    %69 = tpu.matmul %68, %66, %cst_78 {dimension_numbers = #tpu.dot_dimension_numbers<[1], [0], [0], [1], [0, 0, 1, 1], [], []>} : vector<8x8xbf16>, vector<8x78xbf16>, vector<8x78xf32> -> vector<8x78xf32>
    %70 = arith.addf %64, %69 : vector<8x78xf32>
    %c0_79 = arith.constant 0 : index
    %c0_80 = arith.constant 0 : index
    %c0_81 = arith.constant 0 : index
    %c10_82 = arith.constant 10 : index
    %71 = vector.load %arg3[%c0_79, %c0_80, %c0_81, %c10_82] : memref<1x1x8x100xbf16, #tpu.memory_space<vmem>>, vector<1x1x8x78xbf16>
    %72 = vector.shape_cast %71 : vector<1x1x8x78xbf16> to vector<8x78xbf16>
    %c12_83 = arith.constant 12 : index
    %c0_84 = arith.constant 0 : index
    %c0_85 = arith.constant 0 : index
    %73 = vector.load %arg5[%c12_83, %c0_84, %c0_85] : memref<27x8x8xbf16, #tpu.memory_space<vmem>>, vector<1x8x8xbf16>
    %74 = vector.shape_cast %73 : vector<1x8x8xbf16> to vector<8x8xbf16>
    %cst_86 = arith.constant dense<0.000000e+00> : vector<8x78xf32>
    %75 = tpu.matmul %74, %72, %cst_86 {dimension_numbers = #tpu.dot_dimension_numbers<[1], [0], [0], [1], [0, 0, 1, 1], [], []>} : vector<8x8xbf16>, vector<8x78xbf16>, vector<8x78xf32> -> vector<8x78xf32>
    %76 = arith.addf %70, %75 : vector<8x78xf32>
    %c0_87 = arith.constant 0 : index
    %c0_88 = arith.constant 0 : index
    %c0_89 = arith.constant 0 : index
    %c11_90 = arith.constant 11 : index
    %77 = vector.load %arg3[%c0_87, %c0_88, %c0_89, %c11_90] : memref<1x1x8x100xbf16, #tpu.memory_space<vmem>>, vector<1x1x8x78xbf16>
    %78 = vector.shape_cast %77 : vector<1x1x8x78xbf16> to vector<8x78xbf16>
    %c13 = arith.constant 13 : index
    %c0_91 = arith.constant 0 : index
    %c0_92 = arith.constant 0 : index
    %79 = vector.load %arg5[%c13, %c0_91, %c0_92] : memref<27x8x8xbf16, #tpu.memory_space<vmem>>, vector<1x8x8xbf16>
    %80 = vector.shape_cast %79 : vector<1x8x8xbf16> to vector<8x8xbf16>
    %cst_93 = arith.constant dense<0.000000e+00> : vector<8x78xf32>
    %81 = tpu.matmul %80, %78, %cst_93 {dimension_numbers = #tpu.dot_dimension_numbers<[1], [0], [0], [1], [0, 0, 1, 1], [], []>} : vector<8x8xbf16>, vector<8x78xbf16>, vector<8x78xf32> -> vector<8x78xf32>
    %82 = arith.addf %76, %81 : vector<8x78xf32>
    %c0_94 = arith.constant 0 : index
    %c0_95 = arith.constant 0 : index
    %c0_96 = arith.constant 0 : index
    %c12_97 = arith.constant 12 : index
    %83 = vector.load %arg3[%c0_94, %c0_95, %c0_96, %c12_97] : memref<1x1x8x100xbf16, #tpu.memory_space<vmem>>, vector<1x1x8x78xbf16>
    %84 = vector.shape_cast %83 : vector<1x1x8x78xbf16> to vector<8x78xbf16>
    %c14 = arith.constant 14 : index
    %c0_98 = arith.constant 0 : index
    %c0_99 = arith.constant 0 : index
    %85 = vector.load %arg5[%c14, %c0_98, %c0_99] : memref<27x8x8xbf16, #tpu.memory_space<vmem>>, vector<1x8x8xbf16>
    %86 = vector.shape_cast %85 : vector<1x8x8xbf16> to vector<8x8xbf16>
    %cst_100 = arith.constant dense<0.000000e+00> : vector<8x78xf32>
    %87 = tpu.matmul %86, %84, %cst_100 {dimension_numbers = #tpu.dot_dimension_numbers<[1], [0], [0], [1], [0, 0, 1, 1], [], []>} : vector<8x8xbf16>, vector<8x78xbf16>, vector<8x78xf32> -> vector<8x78xf32>
    %88 = arith.addf %82, %87 : vector<8x78xf32>
    %c0_101 = arith.constant 0 : index
    %c0_102 = arith.constant 0 : index
    %c0_103 = arith.constant 0 : index
    %c20_104 = arith.constant 20 : index
    %89 = vector.load %arg3[%c0_101, %c0_102, %c0_103, %c20_104] : memref<1x1x8x100xbf16, #tpu.memory_space<vmem>>, vector<1x1x8x78xbf16>
    %90 = vector.shape_cast %89 : vector<1x1x8x78xbf16> to vector<8x78xbf16>
    %c15 = arith.constant 15 : index
    %c0_105 = arith.constant 0 : index
    %c0_106 = arith.constant 0 : index
    %91 = vector.load %arg5[%c15, %c0_105, %c0_106] : memref<27x8x8xbf16, #tpu.memory_space<vmem>>, vector<1x8x8xbf16>
    %92 = vector.shape_cast %91 : vector<1x8x8xbf16> to vector<8x8xbf16>
    %cst_107 = arith.constant dense<0.000000e+00> : vector<8x78xf32>
    %93 = tpu.matmul %92, %90, %cst_107 {dimension_numbers = #tpu.dot_dimension_numbers<[1], [0], [0], [1], [0, 0, 1, 1], [], []>} : vector<8x8xbf16>, vector<8x78xbf16>, vector<8x78xf32> -> vector<8x78xf32>
    %94 = arith.addf %88, %93 : vector<8x78xf32>
    %c0_108 = arith.constant 0 : index
    %c0_109 = arith.constant 0 : index
    %c0_110 = arith.constant 0 : index
    %c21_111 = arith.constant 21 : index
    %95 = vector.load %arg3[%c0_108, %c0_109, %c0_110, %c21_111] : memref<1x1x8x100xbf16, #tpu.memory_space<vmem>>, vector<1x1x8x78xbf16>
    %96 = vector.shape_cast %95 : vector<1x1x8x78xbf16> to vector<8x78xbf16>
    %c16 = arith.constant 16 : index
    %c0_112 = arith.constant 0 : index
    %c0_113 = arith.constant 0 : index
    %97 = vector.load %arg5[%c16, %c0_112, %c0_113] : memref<27x8x8xbf16, #tpu.memory_space<vmem>>, vector<1x8x8xbf16>
    %98 = vector.shape_cast %97 : vector<1x8x8xbf16> to vector<8x8xbf16>
    %cst_114 = arith.constant dense<0.000000e+00> : vector<8x78xf32>
    %99 = tpu.matmul %98, %96, %cst_114 {dimension_numbers = #tpu.dot_dimension_numbers<[1], [0], [0], [1], [0, 0, 1, 1], [], []>} : vector<8x8xbf16>, vector<8x78xbf16>, vector<8x78xf32> -> vector<8x78xf32>
    %100 = arith.addf %94, %99 : vector<8x78xf32>
    %c0_115 = arith.constant 0 : index
    %c0_116 = arith.constant 0 : index
    %c0_117 = arith.constant 0 : index
    %c22_118 = arith.constant 22 : index
    %101 = vector.load %arg3[%c0_115, %c0_116, %c0_117, %c22_118] : memref<1x1x8x100xbf16, #tpu.memory_space<vmem>>, vector<1x1x8x78xbf16>
    %102 = vector.shape_cast %101 : vector<1x1x8x78xbf16> to vector<8x78xbf16>
    %c17 = arith.constant 17 : index
    %c0_119 = arith.constant 0 : index
    %c0_120 = arith.constant 0 : index
    %103 = vector.load %arg5[%c17, %c0_119, %c0_120] : memref<27x8x8xbf16, #tpu.memory_space<vmem>>, vector<1x8x8xbf16>
    %104 = vector.shape_cast %103 : vector<1x8x8xbf16> to vector<8x8xbf16>
    %cst_121 = arith.constant dense<0.000000e+00> : vector<8x78xf32>
    %105 = tpu.matmul %104, %102, %cst_121 {dimension_numbers = #tpu.dot_dimension_numbers<[1], [0], [0], [1], [0, 0, 1, 1], [], []>} : vector<8x8xbf16>, vector<8x78xbf16>, vector<8x78xf32> -> vector<8x78xf32>
    %106 = arith.addf %100, %105 : vector<8x78xf32>
    %c0_122 = arith.constant 0 : index
    %c0_123 = arith.constant 0 : index
    %c0_124 = arith.constant 0 : index
    %c0_125 = arith.constant 0 : index
    %107 = vector.load %arg4[%c0_122, %c0_123, %c0_124, %c0_125] : memref<1x1x8x100xbf16, #tpu.memory_space<vmem>>, vector<1x1x8x78xbf16>
    %108 = vector.shape_cast %107 : vector<1x1x8x78xbf16> to vector<8x78xbf16>
    %c18 = arith.constant 18 : index
    %c0_126 = arith.constant 0 : index
    %c0_127 = arith.constant 0 : index
    %109 = vector.load %arg5[%c18, %c0_126, %c0_127] : memref<27x8x8xbf16, #tpu.memory_space<vmem>>, vector<1x8x8xbf16>
    %110 = vector.shape_cast %109 : vector<1x8x8xbf16> to vector<8x8xbf16>
    %cst_128 = arith.constant dense<0.000000e+00> : vector<8x78xf32>
    %111 = tpu.matmul %110, %108, %cst_128 {dimension_numbers = #tpu.dot_dimension_numbers<[1], [0], [0], [1], [0, 0, 1, 1], [], []>} : vector<8x8xbf16>, vector<8x78xbf16>, vector<8x78xf32> -> vector<8x78xf32>
    %112 = arith.addf %106, %111 : vector<8x78xf32>
    %c0_129 = arith.constant 0 : index
    %c0_130 = arith.constant 0 : index
    %c0_131 = arith.constant 0 : index
    %c1_132 = arith.constant 1 : index
    %113 = vector.load %arg4[%c0_129, %c0_130, %c0_131, %c1_132] : memref<1x1x8x100xbf16, #tpu.memory_space<vmem>>, vector<1x1x8x78xbf16>
    %114 = vector.shape_cast %113 : vector<1x1x8x78xbf16> to vector<8x78xbf16>
    %c19 = arith.constant 19 : index
    %c0_133 = arith.constant 0 : index
    %c0_134 = arith.constant 0 : index
    %115 = vector.load %arg5[%c19, %c0_133, %c0_134] : memref<27x8x8xbf16, #tpu.memory_space<vmem>>, vector<1x8x8xbf16>
    %116 = vector.shape_cast %115 : vector<1x8x8xbf16> to vector<8x8xbf16>
    %cst_135 = arith.constant dense<0.000000e+00> : vector<8x78xf32>
    %117 = tpu.matmul %116, %114, %cst_135 {dimension_numbers = #tpu.dot_dimension_numbers<[1], [0], [0], [1], [0, 0, 1, 1], [], []>} : vector<8x8xbf16>, vector<8x78xbf16>, vector<8x78xf32> -> vector<8x78xf32>
    %118 = arith.addf %112, %117 : vector<8x78xf32>
    %c0_136 = arith.constant 0 : index
    %c0_137 = arith.constant 0 : index
    %c0_138 = arith.constant 0 : index
    %c2_139 = arith.constant 2 : index
    %119 = vector.load %arg4[%c0_136, %c0_137, %c0_138, %c2_139] : memref<1x1x8x100xbf16, #tpu.memory_space<vmem>>, vector<1x1x8x78xbf16>
    %120 = vector.shape_cast %119 : vector<1x1x8x78xbf16> to vector<8x78xbf16>
    %c20_140 = arith.constant 20 : index
    %c0_141 = arith.constant 0 : index
    %c0_142 = arith.constant 0 : index
    %121 = vector.load %arg5[%c20_140, %c0_141, %c0_142] : memref<27x8x8xbf16, #tpu.memory_space<vmem>>, vector<1x8x8xbf16>
    %122 = vector.shape_cast %121 : vector<1x8x8xbf16> to vector<8x8xbf16>
    %cst_143 = arith.constant dense<0.000000e+00> : vector<8x78xf32>
    %123 = tpu.matmul %122, %120, %cst_143 {dimension_numbers = #tpu.dot_dimension_numbers<[1], [0], [0], [1], [0, 0, 1, 1], [], []>} : vector<8x8xbf16>, vector<8x78xbf16>, vector<8x78xf32> -> vector<8x78xf32>
    %124 = arith.addf %118, %123 : vector<8x78xf32>
    %c0_144 = arith.constant 0 : index
    %c0_145 = arith.constant 0 : index
    %c0_146 = arith.constant 0 : index
    %c10_147 = arith.constant 10 : index
    %125 = vector.load %arg4[%c0_144, %c0_145, %c0_146, %c10_147] : memref<1x1x8x100xbf16, #tpu.memory_space<vmem>>, vector<1x1x8x78xbf16>
    %126 = vector.shape_cast %125 : vector<1x1x8x78xbf16> to vector<8x78xbf16>
    %c21_148 = arith.constant 21 : index
    %c0_149 = arith.constant 0 : index
    %c0_150 = arith.constant 0 : index
    %127 = vector.load %arg5[%c21_148, %c0_149, %c0_150] : memref<27x8x8xbf16, #tpu.memory_space<vmem>>, vector<1x8x8xbf16>
    %128 = vector.shape_cast %127 : vector<1x8x8xbf16> to vector<8x8xbf16>
    %cst_151 = arith.constant dense<0.000000e+00> : vector<8x78xf32>
    %129 = tpu.matmul %128, %126, %cst_151 {dimension_numbers = #tpu.dot_dimension_numbers<[1], [0], [0], [1], [0, 0, 1, 1], [], []>} : vector<8x8xbf16>, vector<8x78xbf16>, vector<8x78xf32> -> vector<8x78xf32>
    %130 = arith.addf %124, %129 : vector<8x78xf32>
    %c0_152 = arith.constant 0 : index
    %c0_153 = arith.constant 0 : index
    %c0_154 = arith.constant 0 : index
    %c11_155 = arith.constant 11 : index
    %131 = vector.load %arg4[%c0_152, %c0_153, %c0_154, %c11_155] : memref<1x1x8x100xbf16, #tpu.memory_space<vmem>>, vector<1x1x8x78xbf16>
    %132 = vector.shape_cast %131 : vector<1x1x8x78xbf16> to vector<8x78xbf16>
    %c22_156 = arith.constant 22 : index
    %c0_157 = arith.constant 0 : index
    %c0_158 = arith.constant 0 : index
    %133 = vector.load %arg5[%c22_156, %c0_157, %c0_158] : memref<27x8x8xbf16, #tpu.memory_space<vmem>>, vector<1x8x8xbf16>
    %134 = vector.shape_cast %133 : vector<1x8x8xbf16> to vector<8x8xbf16>
    %cst_159 = arith.constant dense<0.000000e+00> : vector<8x78xf32>
    %135 = tpu.matmul %134, %132, %cst_159 {dimension_numbers = #tpu.dot_dimension_numbers<[1], [0], [0], [1], [0, 0, 1, 1], [], []>} : vector<8x8xbf16>, vector<8x78xbf16>, vector<8x78xf32> -> vector<8x78xf32>
    %136 = arith.addf %130, %135 : vector<8x78xf32>
    %c0_160 = arith.constant 0 : index
    %c0_161 = arith.constant 0 : index
    %c0_162 = arith.constant 0 : index
    %c12_163 = arith.constant 12 : index
    %137 = vector.load %arg4[%c0_160, %c0_161, %c0_162, %c12_163] : memref<1x1x8x100xbf16, #tpu.memory_space<vmem>>, vector<1x1x8x78xbf16>
    %138 = vector.shape_cast %137 : vector<1x1x8x78xbf16> to vector<8x78xbf16>
    %c23 = arith.constant 23 : index
    %c0_164 = arith.constant 0 : index
    %c0_165 = arith.constant 0 : index
    %139 = vector.load %arg5[%c23, %c0_164, %c0_165] : memref<27x8x8xbf16, #tpu.memory_space<vmem>>, vector<1x8x8xbf16>
    %140 = vector.shape_cast %139 : vector<1x8x8xbf16> to vector<8x8xbf16>
    %cst_166 = arith.constant dense<0.000000e+00> : vector<8x78xf32>
    %141 = tpu.matmul %140, %138, %cst_166 {dimension_numbers = #tpu.dot_dimension_numbers<[1], [0], [0], [1], [0, 0, 1, 1], [], []>} : vector<8x8xbf16>, vector<8x78xbf16>, vector<8x78xf32> -> vector<8x78xf32>
    %142 = arith.addf %136, %141 : vector<8x78xf32>
    %c0_167 = arith.constant 0 : index
    %c0_168 = arith.constant 0 : index
    %c0_169 = arith.constant 0 : index
    %c20_170 = arith.constant 20 : index
    %143 = vector.load %arg4[%c0_167, %c0_168, %c0_169, %c20_170] : memref<1x1x8x100xbf16, #tpu.memory_space<vmem>>, vector<1x1x8x78xbf16>
    %144 = vector.shape_cast %143 : vector<1x1x8x78xbf16> to vector<8x78xbf16>
    %c24 = arith.constant 24 : index
    %c0_171 = arith.constant 0 : index
    %c0_172 = arith.constant 0 : index
    %145 = vector.load %arg5[%c24, %c0_171, %c0_172] : memref<27x8x8xbf16, #tpu.memory_space<vmem>>, vector<1x8x8xbf16>
    %146 = vector.shape_cast %145 : vector<1x8x8xbf16> to vector<8x8xbf16>
    %cst_173 = arith.constant dense<0.000000e+00> : vector<8x78xf32>
    %147 = tpu.matmul %146, %144, %cst_173 {dimension_numbers = #tpu.dot_dimension_numbers<[1], [0], [0], [1], [0, 0, 1, 1], [], []>} : vector<8x8xbf16>, vector<8x78xbf16>, vector<8x78xf32> -> vector<8x78xf32>
    %148 = arith.addf %142, %147 : vector<8x78xf32>
    %c0_174 = arith.constant 0 : index
    %c0_175 = arith.constant 0 : index
    %c0_176 = arith.constant 0 : index
    %c21_177 = arith.constant 21 : index
    %149 = vector.load %arg4[%c0_174, %c0_175, %c0_176, %c21_177] : memref<1x1x8x100xbf16, #tpu.memory_space<vmem>>, vector<1x1x8x78xbf16>
    %150 = vector.shape_cast %149 : vector<1x1x8x78xbf16> to vector<8x78xbf16>
    %c25 = arith.constant 25 : index
    %c0_178 = arith.constant 0 : index
    %c0_179 = arith.constant 0 : index
    %151 = vector.load %arg5[%c25, %c0_178, %c0_179] : memref<27x8x8xbf16, #tpu.memory_space<vmem>>, vector<1x8x8xbf16>
    %152 = vector.shape_cast %151 : vector<1x8x8xbf16> to vector<8x8xbf16>
    %cst_180 = arith.constant dense<0.000000e+00> : vector<8x78xf32>
    %153 = tpu.matmul %152, %150, %cst_180 {dimension_numbers = #tpu.dot_dimension_numbers<[1], [0], [0], [1], [0, 0, 1, 1], [], []>} : vector<8x8xbf16>, vector<8x78xbf16>, vector<8x78xf32> -> vector<8x78xf32>
    %154 = arith.addf %148, %153 : vector<8x78xf32>
    %c0_181 = arith.constant 0 : index
    %c0_182 = arith.constant 0 : index
    %c0_183 = arith.constant 0 : index
    %c22_184 = arith.constant 22 : index
    %155 = vector.load %arg4[%c0_181, %c0_182, %c0_183, %c22_184] : memref<1x1x8x100xbf16, #tpu.memory_space<vmem>>, vector<1x1x8x78xbf16>
    %156 = vector.shape_cast %155 : vector<1x1x8x78xbf16> to vector<8x78xbf16>
    %c26 = arith.constant 26 : index
    %c0_185 = arith.constant 0 : index
    %c0_186 = arith.constant 0 : index
    %157 = vector.load %arg5[%c26, %c0_185, %c0_186] : memref<27x8x8xbf16, #tpu.memory_space<vmem>>, vector<1x8x8xbf16>
    %158 = vector.shape_cast %157 : vector<1x8x8xbf16> to vector<8x8xbf16>
    %cst_187 = arith.constant dense<0.000000e+00> : vector<8x78xf32>
    %159 = tpu.matmul %158, %156, %cst_187 {dimension_numbers = #tpu.dot_dimension_numbers<[1], [0], [0], [1], [0, 0, 1, 1], [], []>} : vector<8x8xbf16>, vector<8x78xbf16>, vector<8x78xf32> -> vector<8x78xf32>
    %160 = arith.addf %154, %159 : vector<8x78xf32>
    %c0_188 = arith.constant 0 : index
    %c0_189 = arith.constant 0 : index
    %161 = vector.load %arg6[%c0_188, %c0_189] : memref<8x1xf32, #tpu.memory_space<vmem>>, vector<8x1xf32>
    %162 = vector.broadcast %161 : vector<8x1xf32> to vector<8x78xf32>
    %163 = arith.addf %160, %162 : vector<8x78xf32>
    %cst_190 = arith.constant 0.000000e+00 : f32
    %164 = vector.broadcast %cst_190 : f32 to vector<8x78xf32>
    %165 = arith.maximumf %163, %164 : vector<8x78xf32>
    %166 = arith.truncf %165 : vector<8x78xf32> to vector<8x78xbf16>
    %c0_191 = arith.constant 0 : index
    %c0_192 = arith.constant 0 : index
    %c0_193 = arith.constant 0 : index
    %c0_194 = arith.constant 0 : index
    %167 = vector.load %arg7[%c0_191, %c0_192, %c0_193, %c0_194] : memref<1x1x8x78xbf16, #tpu.memory_space<vmem>>, vector<1x1x8x78xbf16>
    %168 = vector.shape_cast %167 : vector<1x1x8x78xbf16> to vector<8x78xbf16>
    %169 = vector.shape_cast %166 : vector<8x78xbf16> to vector<1x1x8x78xbf16>
    tpu.vector_store %arg7[%c0_191, %c0_192, %c0_193, %c0_194], %169 {strides = array<i32>} : memref<1x1x8x78xbf16, #tpu.memory_space<vmem>>, vector<1x1x8x78xbf16>,
    return
  }
  func.func @transform_0(%arg0: i32, %arg1: i32) -> (i32, i32, i32, i32) {
    %c1_i32 = arith.constant 1 : i32
    %0 = arith.muli %arg1, %c1_i32 : i32
    %c0_i32 = arith.constant 0 : i32
    %1 = arith.addi %0, %c0_i32 : i32
    %c0_i32_0 = arith.constant 0 : i32
    %c0_i32_1 = arith.constant 0 : i32
    %c0_i32_2 = arith.constant 0 : i32
    return %arg0, %1, %c0_i32_0, %c0_i32_1 : i32, i32, i32, i32
  }
  func.func @transform_1(%arg0: i32, %arg1: i32) -> (i32, i32, i32, i32) {
    %c1_i32 = arith.constant 1 : i32
    %0 = arith.muli %arg1, %c1_i32 : i32
    %c1_i32_0 = arith.constant 1 : i32
    %1 = arith.addi %0, %c1_i32_0 : i32
    %c0_i32 = arith.constant 0 : i32
    %c0_i32_1 = arith.constant 0 : i32
    %c0_i32_2 = arith.constant 0 : i32
    return %arg0, %1, %c0_i32, %c0_i32_1 : i32, i32, i32, i32
  }
  func.func @transform_2(%arg0: i32, %arg1: i32) -> (i32, i32, i32, i32) {
    %c1_i32 = arith.constant 1 : i32
    %0 = arith.muli %arg1, %c1_i32 : i32
    %c2_i32 = arith.constant 2 : i32
    %1 = arith.addi %0, %c2_i32 : i32
    %c0_i32 = arith.constant 0 : i32
    %c0_i32_0 = arith.constant 0 : i32
    %c0_i32_1 = arith.constant 0 : i32
    return %arg0, %1, %c0_i32, %c0_i32_0 : i32, i32, i32, i32
  }
  func.func @transform_3(%arg0: i32, %arg1: i32) -> (i32, i32, i32) {
    %c0_i32 = arith.constant 0 : i32
    %c0_i32_0 = arith.constant 0 : i32
    %c0_i32_1 = arith.constant 0 : i32
    %c0_i32_2 = arith.constant 0 : i32
    return %c0_i32, %c0_i32_0, %c0_i32_1 : i32, i32, i32
  }
  func.func @transform_4(%arg0: i32, %arg1: i32) -> (i32, i32) {
    %c0_i32 = arith.constant 0 : i32
    %c0_i32_0 = arith.constant 0 : i32
    %c0_i32_1 = arith.constant 0 : i32
    return %c0_i32, %c0_i32_0 : i32, i32
  }
  func.func @transform_5(%arg0: i32, %arg1: i32) -> (i32, i32, i32, i32) {
    %c0_i32 = arith.constant 0 : i32
    %c0_i32_0 = arith.constant 0 : i32
    %c0_i32_1 = arith.constant 0 : i32
    return %arg0, %arg1, %c0_i32, %c0_i32_0 : i32, i32, i32, i32
  }
}

module attributes {stable_mosaic.version = 11 : i64} {
  func.func @_fused_conv_kernel(%arg0: i32, %arg1: i32, %arg2: memref<1x1x8x25xbf16, #tpu.memory_space<vmem>>, %arg3: memref<1x1x8x25xbf16, #tpu.memory_space<vmem>>, %arg4: memref<1x1x8x25xbf16, #tpu.memory_space<vmem>>, %arg5: memref<1x1x8x25xbf16, #tpu.memory_space<vmem>>, %arg6: memref<1x1x8x25xbf16, #tpu.memory_space<vmem>>, %arg7: memref<1x1x8x25xbf16, #tpu.memory_space<vmem>>, %arg8: memref<1x1x8x25xbf16, #tpu.memory_space<vmem>>, %arg9: memref<1x1x8x25xbf16, #tpu.memory_space<vmem>>, %arg10: memref<1x1x8x25xbf16, #tpu.memory_space<vmem>>, %arg11: memref<1x1x8x25xbf16, #tpu.memory_space<vmem>>, %arg12: memref<1x1x8x25xbf16, #tpu.memory_space<vmem>>, %arg13: memref<1x1x8x25xbf16, #tpu.memory_space<vmem>>, %arg14: memref<27x8x8xbf16, #tpu.memory_space<vmem>>, %arg15: memref<8x1xf32, #tpu.memory_space<vmem>>, %arg16: memref<1x1x8x19xbf16, #tpu.memory_space<vmem>>) attributes {dimension_semantics = [#tpu.dimension_semantics<parallel>, #tpu.dimension_semantics<parallel>], iteration_bounds = array<i64: 2, 2>, scalar_prefetch = 0 : i64, scratch_operands = 0 : i64, tpu.core_type = #tpu.core_type<tc>, window_params = [{transform_indices = @transform_0, window_bounds = array<i64: 1, 1, 8, 25>}, {transform_indices = @transform_1, window_bounds = array<i64: 1, 1, 8, 25>}, {transform_indices = @transform_2, window_bounds = array<i64: 1, 1, 8, 25>}, {transform_indices = @transform_3, window_bounds = array<i64: 1, 1, 8, 25>}, {transform_indices = @transform_4, window_bounds = array<i64: 1, 1, 8, 25>}, {transform_indices = @transform_5, window_bounds = array<i64: 1, 1, 8, 25>}, {transform_indices = @transform_6, window_bounds = array<i64: 1, 1, 8, 25>}, {transform_indices = @transform_7, window_bounds = array<i64: 1, 1, 8, 25>}, {transform_indices = @transform_8, window_bounds = array<i64: 1, 1, 8, 25>}, {transform_indices = @transform_9, window_bounds = array<i64: 1, 1, 8, 25>}, {transform_indices = @transform_10, window_bounds = array<i64: 1, 1, 8, 25>}, {transform_indices = @transform_11, window_bounds = array<i64: 1, 1, 8, 25>}, {pipeline_mode = #tpu.pipeline_mode<synchronous>, transform_indices = @transform_12, window_bounds = array<i64: 27, 8, 8>}, {pipeline_mode = #tpu.pipeline_mode<synchronous>, transform_indices = @transform_13, window_bounds = array<i64: 8, 1>}, {transform_indices = @transform_14, window_bounds = array<i64: 1, 1, 8, 19>}]} {
    %c0 = arith.constant 0 : index
    %c0_0 = arith.constant 0 : index
    %c0_1 = arith.constant 0 : index
    %c0_2 = arith.constant 0 : index
    %0 = vector.load %arg2[%c0, %c0_0, %c0_1, %c0_2] : memref<1x1x8x25xbf16, #tpu.memory_space<vmem>>, vector<1x1x8x19xbf16>
    %1 = vector.shape_cast %0 : vector<1x1x8x19xbf16> to vector<8x19xbf16>
    %c0_3 = arith.constant 0 : index
    %c0_4 = arith.constant 0 : index
    %c0_5 = arith.constant 0 : index
    %2 = vector.load %arg14[%c0_3, %c0_4, %c0_5] : memref<27x8x8xbf16, #tpu.memory_space<vmem>>, vector<1x8x8xbf16>
    %3 = vector.shape_cast %2 : vector<1x8x8xbf16> to vector<8x8xbf16>
    %cst = arith.constant dense<0.000000e+00> : vector<8x19xf32>
    %4 = tpu.matmul %3, %1, %cst {dimension_numbers = #tpu.dot_dimension_numbers<[1], [0], [0], [1], [0, 0, 1, 1], [], []>} : vector<8x8xbf16>, vector<8x19xbf16>, vector<8x19xf32> -> vector<8x19xf32>
    %c0_6 = arith.constant 0 : index
    %c0_7 = arith.constant 0 : index
    %c0_8 = arith.constant 0 : index
    %c0_9 = arith.constant 0 : index
    %5 = vector.load %arg5[%c0_6, %c0_7, %c0_8, %c0_9] : memref<1x1x8x25xbf16, #tpu.memory_space<vmem>>, vector<1x1x8x19xbf16>
    %6 = vector.shape_cast %5 : vector<1x1x8x19xbf16> to vector<8x19xbf16>
    %c1 = arith.constant 1 : index
    %c0_10 = arith.constant 0 : index
    %c0_11 = arith.constant 0 : index
    %7 = vector.load %arg14[%c1, %c0_10, %c0_11] : memref<27x8x8xbf16, #tpu.memory_space<vmem>>, vector<1x8x8xbf16>
    %8 = vector.shape_cast %7 : vector<1x8x8xbf16> to vector<8x8xbf16>
    %cst_12 = arith.constant dense<0.000000e+00> : vector<8x19xf32>
    %9 = tpu.matmul %8, %6, %cst_12 {dimension_numbers = #tpu.dot_dimension_numbers<[1], [0], [0], [1], [0, 0, 1, 1], [], []>} : vector<8x8xbf16>, vector<8x19xbf16>, vector<8x19xf32> -> vector<8x19xf32>
    %10 = arith.addf %4, %9 : vector<8x19xf32>
    %c0_13 = arith.constant 0 : index
    %c0_14 = arith.constant 0 : index
    %c0_15 = arith.constant 0 : index
    %c1_16 = arith.constant 1 : index
    %11 = vector.load %arg2[%c0_13, %c0_14, %c0_15, %c1_16] : memref<1x1x8x25xbf16, #tpu.memory_space<vmem>>, vector<1x1x8x19xbf16>
    %12 = vector.shape_cast %11 : vector<1x1x8x19xbf16> to vector<8x19xbf16>
    %c2 = arith.constant 2 : index
    %c0_17 = arith.constant 0 : index
    %c0_18 = arith.constant 0 : index
    %13 = vector.load %arg14[%c2, %c0_17, %c0_18] : memref<27x8x8xbf16, #tpu.memory_space<vmem>>, vector<1x8x8xbf16>
    %14 = vector.shape_cast %13 : vector<1x8x8xbf16> to vector<8x8xbf16>
    %cst_19 = arith.constant dense<0.000000e+00> : vector<8x19xf32>
    %15 = tpu.matmul %14, %12, %cst_19 {dimension_numbers = #tpu.dot_dimension_numbers<[1], [0], [0], [1], [0, 0, 1, 1], [], []>} : vector<8x8xbf16>, vector<8x19xbf16>, vector<8x19xf32> -> vector<8x19xf32>
    %16 = arith.addf %10, %15 : vector<8x19xf32>
    %c0_20 = arith.constant 0 : index
    %c0_21 = arith.constant 0 : index
    %c0_22 = arith.constant 0 : index
    %c0_23 = arith.constant 0 : index
    %17 = vector.load %arg8[%c0_20, %c0_21, %c0_22, %c0_23] : memref<1x1x8x25xbf16, #tpu.memory_space<vmem>>, vector<1x1x8x19xbf16>
    %18 = vector.shape_cast %17 : vector<1x1x8x19xbf16> to vector<8x19xbf16>
    %c3 = arith.constant 3 : index
    %c0_24 = arith.constant 0 : index
    %c0_25 = arith.constant 0 : index
    %19 = vector.load %arg14[%c3, %c0_24, %c0_25] : memref<27x8x8xbf16, #tpu.memory_space<vmem>>, vector<1x8x8xbf16>
    %20 = vector.shape_cast %19 : vector<1x8x8xbf16> to vector<8x8xbf16>
    %cst_26 = arith.constant dense<0.000000e+00> : vector<8x19xf32>
    %21 = tpu.matmul %20, %18, %cst_26 {dimension_numbers = #tpu.dot_dimension_numbers<[1], [0], [0], [1], [0, 0, 1, 1], [], []>} : vector<8x8xbf16>, vector<8x19xbf16>, vector<8x19xf32> -> vector<8x19xf32>
    %22 = arith.addf %16, %21 : vector<8x19xf32>
    %c0_27 = arith.constant 0 : index
    %c0_28 = arith.constant 0 : index
    %c0_29 = arith.constant 0 : index
    %c0_30 = arith.constant 0 : index
    %23 = vector.load %arg11[%c0_27, %c0_28, %c0_29, %c0_30] : memref<1x1x8x25xbf16, #tpu.memory_space<vmem>>, vector<1x1x8x19xbf16>
    %24 = vector.shape_cast %23 : vector<1x1x8x19xbf16> to vector<8x19xbf16>
    %c4 = arith.constant 4 : index
    %c0_31 = arith.constant 0 : index
    %c0_32 = arith.constant 0 : index
    %25 = vector.load %arg14[%c4, %c0_31, %c0_32] : memref<27x8x8xbf16, #tpu.memory_space<vmem>>, vector<1x8x8xbf16>
    %26 = vector.shape_cast %25 : vector<1x8x8xbf16> to vector<8x8xbf16>
    %cst_33 = arith.constant dense<0.000000e+00> : vector<8x19xf32>
    %27 = tpu.matmul %26, %24, %cst_33 {dimension_numbers = #tpu.dot_dimension_numbers<[1], [0], [0], [1], [0, 0, 1, 1], [], []>} : vector<8x8xbf16>, vector<8x19xbf16>, vector<8x19xf32> -> vector<8x19xf32>
    %28 = arith.addf %22, %27 : vector<8x19xf32>
    %c0_34 = arith.constant 0 : index
    %c0_35 = arith.constant 0 : index
    %c0_36 = arith.constant 0 : index
    %c1_37 = arith.constant 1 : index
    %29 = vector.load %arg8[%c0_34, %c0_35, %c0_36, %c1_37] : memref<1x1x8x25xbf16, #tpu.memory_space<vmem>>, vector<1x1x8x19xbf16>
    %30 = vector.shape_cast %29 : vector<1x1x8x19xbf16> to vector<8x19xbf16>
    %c5 = arith.constant 5 : index
    %c0_38 = arith.constant 0 : index
    %c0_39 = arith.constant 0 : index
    %31 = vector.load %arg14[%c5, %c0_38, %c0_39] : memref<27x8x8xbf16, #tpu.memory_space<vmem>>, vector<1x8x8xbf16>
    %32 = vector.shape_cast %31 : vector<1x8x8xbf16> to vector<8x8xbf16>
    %cst_40 = arith.constant dense<0.000000e+00> : vector<8x19xf32>
    %33 = tpu.matmul %32, %30, %cst_40 {dimension_numbers = #tpu.dot_dimension_numbers<[1], [0], [0], [1], [0, 0, 1, 1], [], []>} : vector<8x8xbf16>, vector<8x19xbf16>, vector<8x19xf32> -> vector<8x19xf32>
    %34 = arith.addf %28, %33 : vector<8x19xf32>
    %c0_41 = arith.constant 0 : index
    %c0_42 = arith.constant 0 : index
    %c0_43 = arith.constant 0 : index
    %c5_44 = arith.constant 5 : index
    %35 = vector.load %arg2[%c0_41, %c0_42, %c0_43, %c5_44] : memref<1x1x8x25xbf16, #tpu.memory_space<vmem>>, vector<1x1x8x19xbf16>
    %36 = vector.shape_cast %35 : vector<1x1x8x19xbf16> to vector<8x19xbf16>
    %c6 = arith.constant 6 : index
    %c0_45 = arith.constant 0 : index
    %c0_46 = arith.constant 0 : index
    %37 = vector.load %arg14[%c6, %c0_45, %c0_46] : memref<27x8x8xbf16, #tpu.memory_space<vmem>>, vector<1x8x8xbf16>
    %38 = vector.shape_cast %37 : vector<1x8x8xbf16> to vector<8x8xbf16>
    %cst_47 = arith.constant dense<0.000000e+00> : vector<8x19xf32>
    %39 = tpu.matmul %38, %36, %cst_47 {dimension_numbers = #tpu.dot_dimension_numbers<[1], [0], [0], [1], [0, 0, 1, 1], [], []>} : vector<8x8xbf16>, vector<8x19xbf16>, vector<8x19xf32> -> vector<8x19xf32>
    %40 = arith.addf %34, %39 : vector<8x19xf32>
    %c0_48 = arith.constant 0 : index
    %c0_49 = arith.constant 0 : index
    %c0_50 = arith.constant 0 : index
    %c5_51 = arith.constant 5 : index
    %41 = vector.load %arg5[%c0_48, %c0_49, %c0_50, %c5_51] : memref<1x1x8x25xbf16, #tpu.memory_space<vmem>>, vector<1x1x8x19xbf16>
    %42 = vector.shape_cast %41 : vector<1x1x8x19xbf16> to vector<8x19xbf16>
    %c7 = arith.constant 7 : index
    %c0_52 = arith.constant 0 : index
    %c0_53 = arith.constant 0 : index
    %43 = vector.load %arg14[%c7, %c0_52, %c0_53] : memref<27x8x8xbf16, #tpu.memory_space<vmem>>, vector<1x8x8xbf16>
    %44 = vector.shape_cast %43 : vector<1x8x8xbf16> to vector<8x8xbf16>
    %cst_54 = arith.constant dense<0.000000e+00> : vector<8x19xf32>
    %45 = tpu.matmul %44, %42, %cst_54 {dimension_numbers = #tpu.dot_dimension_numbers<[1], [0], [0], [1], [0, 0, 1, 1], [], []>} : vector<8x8xbf16>, vector<8x19xbf16>, vector<8x19xf32> -> vector<8x19xf32>
    %46 = arith.addf %40, %45 : vector<8x19xf32>
    %c0_55 = arith.constant 0 : index
    %c0_56 = arith.constant 0 : index
    %c0_57 = arith.constant 0 : index
    %c6_58 = arith.constant 6 : index
    %47 = vector.load %arg2[%c0_55, %c0_56, %c0_57, %c6_58] : memref<1x1x8x25xbf16, #tpu.memory_space<vmem>>, vector<1x1x8x19xbf16>
    %48 = vector.shape_cast %47 : vector<1x1x8x19xbf16> to vector<8x19xbf16>
    %c8 = arith.constant 8 : index
    %c0_59 = arith.constant 0 : index
    %c0_60 = arith.constant 0 : index
    %49 = vector.load %arg14[%c8, %c0_59, %c0_60] : memref<27x8x8xbf16, #tpu.memory_space<vmem>>, vector<1x8x8xbf16>
    %50 = vector.shape_cast %49 : vector<1x8x8xbf16> to vector<8x8xbf16>
    %cst_61 = arith.constant dense<0.000000e+00> : vector<8x19xf32>
    %51 = tpu.matmul %50, %48, %cst_61 {dimension_numbers = #tpu.dot_dimension_numbers<[1], [0], [0], [1], [0, 0, 1, 1], [], []>} : vector<8x8xbf16>, vector<8x19xbf16>, vector<8x19xf32> -> vector<8x19xf32>
    %52 = arith.addf %46, %51 : vector<8x19xf32>
    %c0_62 = arith.constant 0 : index
    %c0_63 = arith.constant 0 : index
    %c0_64 = arith.constant 0 : index
    %c0_65 = arith.constant 0 : index
    %53 = vector.load %arg3[%c0_62, %c0_63, %c0_64, %c0_65] : memref<1x1x8x25xbf16, #tpu.memory_space<vmem>>, vector<1x1x8x19xbf16>
    %54 = vector.shape_cast %53 : vector<1x1x8x19xbf16> to vector<8x19xbf16>
    %c9 = arith.constant 9 : index
    %c0_66 = arith.constant 0 : index
    %c0_67 = arith.constant 0 : index
    %55 = vector.load %arg14[%c9, %c0_66, %c0_67] : memref<27x8x8xbf16, #tpu.memory_space<vmem>>, vector<1x8x8xbf16>
    %56 = vector.shape_cast %55 : vector<1x8x8xbf16> to vector<8x8xbf16>
    %cst_68 = arith.constant dense<0.000000e+00> : vector<8x19xf32>
    %57 = tpu.matmul %56, %54, %cst_68 {dimension_numbers = #tpu.dot_dimension_numbers<[1], [0], [0], [1], [0, 0, 1, 1], [], []>} : vector<8x8xbf16>, vector<8x19xbf16>, vector<8x19xf32> -> vector<8x19xf32>
    %58 = arith.addf %52, %57 : vector<8x19xf32>
    %c0_69 = arith.constant 0 : index
    %c0_70 = arith.constant 0 : index
    %c0_71 = arith.constant 0 : index
    %c0_72 = arith.constant 0 : index
    %59 = vector.load %arg6[%c0_69, %c0_70, %c0_71, %c0_72] : memref<1x1x8x25xbf16, #tpu.memory_space<vmem>>, vector<1x1x8x19xbf16>
    %60 = vector.shape_cast %59 : vector<1x1x8x19xbf16> to vector<8x19xbf16>
    %c10 = arith.constant 10 : index
    %c0_73 = arith.constant 0 : index
    %c0_74 = arith.constant 0 : index
    %61 = vector.load %arg14[%c10, %c0_73, %c0_74] : memref<27x8x8xbf16, #tpu.memory_space<vmem>>, vector<1x8x8xbf16>
    %62 = vector.shape_cast %61 : vector<1x8x8xbf16> to vector<8x8xbf16>
    %cst_75 = arith.constant dense<0.000000e+00> : vector<8x19xf32>
    %63 = tpu.matmul %62, %60, %cst_75 {dimension_numbers = #tpu.dot_dimension_numbers<[1], [0], [0], [1], [0, 0, 1, 1], [], []>} : vector<8x8xbf16>, vector<8x19xbf16>, vector<8x19xf32> -> vector<8x19xf32>
    %64 = arith.addf %58, %63 : vector<8x19xf32>
    %c0_76 = arith.constant 0 : index
    %c0_77 = arith.constant 0 : index
    %c0_78 = arith.constant 0 : index
    %c1_79 = arith.constant 1 : index
    %65 = vector.load %arg3[%c0_76, %c0_77, %c0_78, %c1_79] : memref<1x1x8x25xbf16, #tpu.memory_space<vmem>>, vector<1x1x8x19xbf16>
    %66 = vector.shape_cast %65 : vector<1x1x8x19xbf16> to vector<8x19xbf16>
    %c11 = arith.constant 11 : index
    %c0_80 = arith.constant 0 : index
    %c0_81 = arith.constant 0 : index
    %67 = vector.load %arg14[%c11, %c0_80, %c0_81] : memref<27x8x8xbf16, #tpu.memory_space<vmem>>, vector<1x8x8xbf16>
    %68 = vector.shape_cast %67 : vector<1x8x8xbf16> to vector<8x8xbf16>
    %cst_82 = arith.constant dense<0.000000e+00> : vector<8x19xf32>
    %69 = tpu.matmul %68, %66, %cst_82 {dimension_numbers = #tpu.dot_dimension_numbers<[1], [0], [0], [1], [0, 0, 1, 1], [], []>} : vector<8x8xbf16>, vector<8x19xbf16>, vector<8x19xf32> -> vector<8x19xf32>
    %70 = arith.addf %64, %69 : vector<8x19xf32>
    %c0_83 = arith.constant 0 : index
    %c0_84 = arith.constant 0 : index
    %c0_85 = arith.constant 0 : index
    %c0_86 = arith.constant 0 : index
    %71 = vector.load %arg9[%c0_83, %c0_84, %c0_85, %c0_86] : memref<1x1x8x25xbf16, #tpu.memory_space<vmem>>, vector<1x1x8x19xbf16>
    %72 = vector.shape_cast %71 : vector<1x1x8x19xbf16> to vector<8x19xbf16>
    %c12 = arith.constant 12 : index
    %c0_87 = arith.constant 0 : index
    %c0_88 = arith.constant 0 : index
    %73 = vector.load %arg14[%c12, %c0_87, %c0_88] : memref<27x8x8xbf16, #tpu.memory_space<vmem>>, vector<1x8x8xbf16>
    %74 = vector.shape_cast %73 : vector<1x8x8xbf16> to vector<8x8xbf16>
    %cst_89 = arith.constant dense<0.000000e+00> : vector<8x19xf32>
    %75 = tpu.matmul %74, %72, %cst_89 {dimension_numbers = #tpu.dot_dimension_numbers<[1], [0], [0], [1], [0, 0, 1, 1], [], []>} : vector<8x8xbf16>, vector<8x19xbf16>, vector<8x19xf32> -> vector<8x19xf32>
    %76 = arith.addf %70, %75 : vector<8x19xf32>
    %c0_90 = arith.constant 0 : index
    %c0_91 = arith.constant 0 : index
    %c0_92 = arith.constant 0 : index
    %c0_93 = arith.constant 0 : index
    %77 = vector.load %arg12[%c0_90, %c0_91, %c0_92, %c0_93] : memref<1x1x8x25xbf16, #tpu.memory_space<vmem>>, vector<1x1x8x19xbf16>
    %78 = vector.shape_cast %77 : vector<1x1x8x19xbf16> to vector<8x19xbf16>
    %c13 = arith.constant 13 : index
    %c0_94 = arith.constant 0 : index
    %c0_95 = arith.constant 0 : index
    %79 = vector.load %arg14[%c13, %c0_94, %c0_95] : memref<27x8x8xbf16, #tpu.memory_space<vmem>>, vector<1x8x8xbf16>
    %80 = vector.shape_cast %79 : vector<1x8x8xbf16> to vector<8x8xbf16>
    %cst_96 = arith.constant dense<0.000000e+00> : vector<8x19xf32>
    %81 = tpu.matmul %80, %78, %cst_96 {dimension_numbers = #tpu.dot_dimension_numbers<[1], [0], [0], [1], [0, 0, 1, 1], [], []>} : vector<8x8xbf16>, vector<8x19xbf16>, vector<8x19xf32> -> vector<8x19xf32>
    %82 = arith.addf %76, %81 : vector<8x19xf32>
    %c0_97 = arith.constant 0 : index
    %c0_98 = arith.constant 0 : index
    %c0_99 = arith.constant 0 : index
    %c1_100 = arith.constant 1 : index
    %83 = vector.load %arg9[%c0_97, %c0_98, %c0_99, %c1_100] : memref<1x1x8x25xbf16, #tpu.memory_space<vmem>>, vector<1x1x8x19xbf16>
    %84 = vector.shape_cast %83 : vector<1x1x8x19xbf16> to vector<8x19xbf16>
    %c14 = arith.constant 14 : index
    %c0_101 = arith.constant 0 : index
    %c0_102 = arith.constant 0 : index
    %85 = vector.load %arg14[%c14, %c0_101, %c0_102] : memref<27x8x8xbf16, #tpu.memory_space<vmem>>, vector<1x8x8xbf16>
    %86 = vector.shape_cast %85 : vector<1x8x8xbf16> to vector<8x8xbf16>
    %cst_103 = arith.constant dense<0.000000e+00> : vector<8x19xf32>
    %87 = tpu.matmul %86, %84, %cst_103 {dimension_numbers = #tpu.dot_dimension_numbers<[1], [0], [0], [1], [0, 0, 1, 1], [], []>} : vector<8x8xbf16>, vector<8x19xbf16>, vector<8x19xf32> -> vector<8x19xf32>
    %88 = arith.addf %82, %87 : vector<8x19xf32>
    %c0_104 = arith.constant 0 : index
    %c0_105 = arith.constant 0 : index
    %c0_106 = arith.constant 0 : index
    %c5_107 = arith.constant 5 : index
    %89 = vector.load %arg3[%c0_104, %c0_105, %c0_106, %c5_107] : memref<1x1x8x25xbf16, #tpu.memory_space<vmem>>, vector<1x1x8x19xbf16>
    %90 = vector.shape_cast %89 : vector<1x1x8x19xbf16> to vector<8x19xbf16>
    %c15 = arith.constant 15 : index
    %c0_108 = arith.constant 0 : index
    %c0_109 = arith.constant 0 : index
    %91 = vector.load %arg14[%c15, %c0_108, %c0_109] : memref<27x8x8xbf16, #tpu.memory_space<vmem>>, vector<1x8x8xbf16>
    %92 = vector.shape_cast %91 : vector<1x8x8xbf16> to vector<8x8xbf16>
    %cst_110 = arith.constant dense<0.000000e+00> : vector<8x19xf32>
    %93 = tpu.matmul %92, %90, %cst_110 {dimension_numbers = #tpu.dot_dimension_numbers<[1], [0], [0], [1], [0, 0, 1, 1], [], []>} : vector<8x8xbf16>, vector<8x19xbf16>, vector<8x19xf32> -> vector<8x19xf32>
    %94 = arith.addf %88, %93 : vector<8x19xf32>
    %c0_111 = arith.constant 0 : index
    %c0_112 = arith.constant 0 : index
    %c0_113 = arith.constant 0 : index
    %c5_114 = arith.constant 5 : index
    %95 = vector.load %arg6[%c0_111, %c0_112, %c0_113, %c5_114] : memref<1x1x8x25xbf16, #tpu.memory_space<vmem>>, vector<1x1x8x19xbf16>
    %96 = vector.shape_cast %95 : vector<1x1x8x19xbf16> to vector<8x19xbf16>
    %c16 = arith.constant 16 : index
    %c0_115 = arith.constant 0 : index
    %c0_116 = arith.constant 0 : index
    %97 = vector.load %arg14[%c16, %c0_115, %c0_116] : memref<27x8x8xbf16, #tpu.memory_space<vmem>>, vector<1x8x8xbf16>
    %98 = vector.shape_cast %97 : vector<1x8x8xbf16> to vector<8x8xbf16>
    %cst_117 = arith.constant dense<0.000000e+00> : vector<8x19xf32>
    %99 = tpu.matmul %98, %96, %cst_117 {dimension_numbers = #tpu.dot_dimension_numbers<[1], [0], [0], [1], [0, 0, 1, 1], [], []>} : vector<8x8xbf16>, vector<8x19xbf16>, vector<8x19xf32> -> vector<8x19xf32>
    %100 = arith.addf %94, %99 : vector<8x19xf32>
    %c0_118 = arith.constant 0 : index
    %c0_119 = arith.constant 0 : index
    %c0_120 = arith.constant 0 : index
    %c6_121 = arith.constant 6 : index
    %101 = vector.load %arg3[%c0_118, %c0_119, %c0_120, %c6_121] : memref<1x1x8x25xbf16, #tpu.memory_space<vmem>>, vector<1x1x8x19xbf16>
    %102 = vector.shape_cast %101 : vector<1x1x8x19xbf16> to vector<8x19xbf16>
    %c17 = arith.constant 17 : index
    %c0_122 = arith.constant 0 : index
    %c0_123 = arith.constant 0 : index
    %103 = vector.load %arg14[%c17, %c0_122, %c0_123] : memref<27x8x8xbf16, #tpu.memory_space<vmem>>, vector<1x8x8xbf16>
    %104 = vector.shape_cast %103 : vector<1x8x8xbf16> to vector<8x8xbf16>
    %cst_124 = arith.constant dense<0.000000e+00> : vector<8x19xf32>
    %105 = tpu.matmul %104, %102, %cst_124 {dimension_numbers = #tpu.dot_dimension_numbers<[1], [0], [0], [1], [0, 0, 1, 1], [], []>} : vector<8x8xbf16>, vector<8x19xbf16>, vector<8x19xf32> -> vector<8x19xf32>
    %106 = arith.addf %100, %105 : vector<8x19xf32>
    %c0_125 = arith.constant 0 : index
    %c0_126 = arith.constant 0 : index
    %c0_127 = arith.constant 0 : index
    %c0_128 = arith.constant 0 : index
    %107 = vector.load %arg4[%c0_125, %c0_126, %c0_127, %c0_128] : memref<1x1x8x25xbf16, #tpu.memory_space<vmem>>, vector<1x1x8x19xbf16>
    %108 = vector.shape_cast %107 : vector<1x1x8x19xbf16> to vector<8x19xbf16>
    %c18 = arith.constant 18 : index
    %c0_129 = arith.constant 0 : index
    %c0_130 = arith.constant 0 : index
    %109 = vector.load %arg14[%c18, %c0_129, %c0_130] : memref<27x8x8xbf16, #tpu.memory_space<vmem>>, vector<1x8x8xbf16>
    %110 = vector.shape_cast %109 : vector<1x8x8xbf16> to vector<8x8xbf16>
    %cst_131 = arith.constant dense<0.000000e+00> : vector<8x19xf32>
    %111 = tpu.matmul %110, %108, %cst_131 {dimension_numbers = #tpu.dot_dimension_numbers<[1], [0], [0], [1], [0, 0, 1, 1], [], []>} : vector<8x8xbf16>, vector<8x19xbf16>, vector<8x19xf32> -> vector<8x19xf32>
    %112 = arith.addf %106, %111 : vector<8x19xf32>
    %c0_132 = arith.constant 0 : index
    %c0_133 = arith.constant 0 : index
    %c0_134 = arith.constant 0 : index
    %c0_135 = arith.constant 0 : index
    %113 = vector.load %arg7[%c0_132, %c0_133, %c0_134, %c0_135] : memref<1x1x8x25xbf16, #tpu.memory_space<vmem>>, vector<1x1x8x19xbf16>
    %114 = vector.shape_cast %113 : vector<1x1x8x19xbf16> to vector<8x19xbf16>
    %c19 = arith.constant 19 : index
    %c0_136 = arith.constant 0 : index
    %c0_137 = arith.constant 0 : index
    %115 = vector.load %arg14[%c19, %c0_136, %c0_137] : memref<27x8x8xbf16, #tpu.memory_space<vmem>>, vector<1x8x8xbf16>
    %116 = vector.shape_cast %115 : vector<1x8x8xbf16> to vector<8x8xbf16>
    %cst_138 = arith.constant dense<0.000000e+00> : vector<8x19xf32>
    %117 = tpu.matmul %116, %114, %cst_138 {dimension_numbers = #tpu.dot_dimension_numbers<[1], [0], [0], [1], [0, 0, 1, 1], [], []>} : vector<8x8xbf16>, vector<8x19xbf16>, vector<8x19xf32> -> vector<8x19xf32>
    %118 = arith.addf %112, %117 : vector<8x19xf32>
    %c0_139 = arith.constant 0 : index
    %c0_140 = arith.constant 0 : index
    %c0_141 = arith.constant 0 : index
    %c1_142 = arith.constant 1 : index
    %119 = vector.load %arg4[%c0_139, %c0_140, %c0_141, %c1_142] : memref<1x1x8x25xbf16, #tpu.memory_space<vmem>>, vector<1x1x8x19xbf16>
    %120 = vector.shape_cast %119 : vector<1x1x8x19xbf16> to vector<8x19xbf16>
    %c20 = arith.constant 20 : index
    %c0_143 = arith.constant 0 : index
    %c0_144 = arith.constant 0 : index
    %121 = vector.load %arg14[%c20, %c0_143, %c0_144] : memref<27x8x8xbf16, #tpu.memory_space<vmem>>, vector<1x8x8xbf16>
    %122 = vector.shape_cast %121 : vector<1x8x8xbf16> to vector<8x8xbf16>
    %cst_145 = arith.constant dense<0.000000e+00> : vector<8x19xf32>
    %123 = tpu.matmul %122, %120, %cst_145 {dimension_numbers = #tpu.dot_dimension_numbers<[1], [0], [0], [1], [0, 0, 1, 1], [], []>} : vector<8x8xbf16>, vector<8x19xbf16>, vector<8x19xf32> -> vector<8x19xf32>
    %124 = arith.addf %118, %123 : vector<8x19xf32>
    %c0_146 = arith.constant 0 : index
    %c0_147 = arith.constant 0 : index
    %c0_148 = arith.constant 0 : index
    %c0_149 = arith.constant 0 : index
    %125 = vector.load %arg10[%c0_146, %c0_147, %c0_148, %c0_149] : memref<1x1x8x25xbf16, #tpu.memory_space<vmem>>, vector<1x1x8x19xbf16>
    %126 = vector.shape_cast %125 : vector<1x1x8x19xbf16> to vector<8x19xbf16>
    %c21 = arith.constant 21 : index
    %c0_150 = arith.constant 0 : index
    %c0_151 = arith.constant 0 : index
    %127 = vector.load %arg14[%c21, %c0_150, %c0_151] : memref<27x8x8xbf16, #tpu.memory_space<vmem>>, vector<1x8x8xbf16>
    %128 = vector.shape_cast %127 : vector<1x8x8xbf16> to vector<8x8xbf16>
    %cst_152 = arith.constant dense<0.000000e+00> : vector<8x19xf32>
    %129 = tpu.matmul %128, %126, %cst_152 {dimension_numbers = #tpu.dot_dimension_numbers<[1], [0], [0], [1], [0, 0, 1, 1], [], []>} : vector<8x8xbf16>, vector<8x19xbf16>, vector<8x19xf32> -> vector<8x19xf32>
    %130 = arith.addf %124, %129 : vector<8x19xf32>
    %c0_153 = arith.constant 0 : index
    %c0_154 = arith.constant 0 : index
    %c0_155 = arith.constant 0 : index
    %c0_156 = arith.constant 0 : index
    %131 = vector.load %arg13[%c0_153, %c0_154, %c0_155, %c0_156] : memref<1x1x8x25xbf16, #tpu.memory_space<vmem>>, vector<1x1x8x19xbf16>
    %132 = vector.shape_cast %131 : vector<1x1x8x19xbf16> to vector<8x19xbf16>
    %c22 = arith.constant 22 : index
    %c0_157 = arith.constant 0 : index
    %c0_158 = arith.constant 0 : index
    %133 = vector.load %arg14[%c22, %c0_157, %c0_158] : memref<27x8x8xbf16, #tpu.memory_space<vmem>>, vector<1x8x8xbf16>
    %134 = vector.shape_cast %133 : vector<1x8x8xbf16> to vector<8x8xbf16>
    %cst_159 = arith.constant dense<0.000000e+00> : vector<8x19xf32>
    %135 = tpu.matmul %134, %132, %cst_159 {dimension_numbers = #tpu.dot_dimension_numbers<[1], [0], [0], [1], [0, 0, 1, 1], [], []>} : vector<8x8xbf16>, vector<8x19xbf16>, vector<8x19xf32> -> vector<8x19xf32>
    %136 = arith.addf %130, %135 : vector<8x19xf32>
    %c0_160 = arith.constant 0 : index
    %c0_161 = arith.constant 0 : index
    %c0_162 = arith.constant 0 : index
    %c1_163 = arith.constant 1 : index
    %137 = vector.load %arg10[%c0_160, %c0_161, %c0_162, %c1_163] : memref<1x1x8x25xbf16, #tpu.memory_space<vmem>>, vector<1x1x8x19xbf16>
    %138 = vector.shape_cast %137 : vector<1x1x8x19xbf16> to vector<8x19xbf16>
    %c23 = arith.constant 23 : index
    %c0_164 = arith.constant 0 : index
    %c0_165 = arith.constant 0 : index
    %139 = vector.load %arg14[%c23, %c0_164, %c0_165] : memref<27x8x8xbf16, #tpu.memory_space<vmem>>, vector<1x8x8xbf16>
    %140 = vector.shape_cast %139 : vector<1x8x8xbf16> to vector<8x8xbf16>
    %cst_166 = arith.constant dense<0.000000e+00> : vector<8x19xf32>
    %141 = tpu.matmul %140, %138, %cst_166 {dimension_numbers = #tpu.dot_dimension_numbers<[1], [0], [0], [1], [0, 0, 1, 1], [], []>} : vector<8x8xbf16>, vector<8x19xbf16>, vector<8x19xf32> -> vector<8x19xf32>
    %142 = arith.addf %136, %141 : vector<8x19xf32>
    %c0_167 = arith.constant 0 : index
    %c0_168 = arith.constant 0 : index
    %c0_169 = arith.constant 0 : index
    %c5_170 = arith.constant 5 : index
    %143 = vector.load %arg4[%c0_167, %c0_168, %c0_169, %c5_170] : memref<1x1x8x25xbf16, #tpu.memory_space<vmem>>, vector<1x1x8x19xbf16>
    %144 = vector.shape_cast %143 : vector<1x1x8x19xbf16> to vector<8x19xbf16>
    %c24 = arith.constant 24 : index
    %c0_171 = arith.constant 0 : index
    %c0_172 = arith.constant 0 : index
    %145 = vector.load %arg14[%c24, %c0_171, %c0_172] : memref<27x8x8xbf16, #tpu.memory_space<vmem>>, vector<1x8x8xbf16>
    %146 = vector.shape_cast %145 : vector<1x8x8xbf16> to vector<8x8xbf16>
    %cst_173 = arith.constant dense<0.000000e+00> : vector<8x19xf32>
    %147 = tpu.matmul %146, %144, %cst_173 {dimension_numbers = #tpu.dot_dimension_numbers<[1], [0], [0], [1], [0, 0, 1, 1], [], []>} : vector<8x8xbf16>, vector<8x19xbf16>, vector<8x19xf32> -> vector<8x19xf32>
    %148 = arith.addf %142, %147 : vector<8x19xf32>
    %c0_174 = arith.constant 0 : index
    %c0_175 = arith.constant 0 : index
    %c0_176 = arith.constant 0 : index
    %c5_177 = arith.constant 5 : index
    %149 = vector.load %arg7[%c0_174, %c0_175, %c0_176, %c5_177] : memref<1x1x8x25xbf16, #tpu.memory_space<vmem>>, vector<1x1x8x19xbf16>
    %150 = vector.shape_cast %149 : vector<1x1x8x19xbf16> to vector<8x19xbf16>
    %c25 = arith.constant 25 : index
    %c0_178 = arith.constant 0 : index
    %c0_179 = arith.constant 0 : index
    %151 = vector.load %arg14[%c25, %c0_178, %c0_179] : memref<27x8x8xbf16, #tpu.memory_space<vmem>>, vector<1x8x8xbf16>
    %152 = vector.shape_cast %151 : vector<1x8x8xbf16> to vector<8x8xbf16>
    %cst_180 = arith.constant dense<0.000000e+00> : vector<8x19xf32>
    %153 = tpu.matmul %152, %150, %cst_180 {dimension_numbers = #tpu.dot_dimension_numbers<[1], [0], [0], [1], [0, 0, 1, 1], [], []>} : vector<8x8xbf16>, vector<8x19xbf16>, vector<8x19xf32> -> vector<8x19xf32>
    %154 = arith.addf %148, %153 : vector<8x19xf32>
    %c0_181 = arith.constant 0 : index
    %c0_182 = arith.constant 0 : index
    %c0_183 = arith.constant 0 : index
    %c6_184 = arith.constant 6 : index
    %155 = vector.load %arg4[%c0_181, %c0_182, %c0_183, %c6_184] : memref<1x1x8x25xbf16, #tpu.memory_space<vmem>>, vector<1x1x8x19xbf16>
    %156 = vector.shape_cast %155 : vector<1x1x8x19xbf16> to vector<8x19xbf16>
    %c26 = arith.constant 26 : index
    %c0_185 = arith.constant 0 : index
    %c0_186 = arith.constant 0 : index
    %157 = vector.load %arg14[%c26, %c0_185, %c0_186] : memref<27x8x8xbf16, #tpu.memory_space<vmem>>, vector<1x8x8xbf16>
    %158 = vector.shape_cast %157 : vector<1x8x8xbf16> to vector<8x8xbf16>
    %cst_187 = arith.constant dense<0.000000e+00> : vector<8x19xf32>
    %159 = tpu.matmul %158, %156, %cst_187 {dimension_numbers = #tpu.dot_dimension_numbers<[1], [0], [0], [1], [0, 0, 1, 1], [], []>} : vector<8x8xbf16>, vector<8x19xbf16>, vector<8x19xf32> -> vector<8x19xf32>
    %160 = arith.addf %154, %159 : vector<8x19xf32>
    %c0_188 = arith.constant 0 : index
    %c0_189 = arith.constant 0 : index
    %161 = vector.load %arg15[%c0_188, %c0_189] : memref<8x1xf32, #tpu.memory_space<vmem>>, vector<8x1xf32>
    %162 = vector.broadcast %161 : vector<8x1xf32> to vector<8x19xf32>
    %163 = arith.addf %160, %162 : vector<8x19xf32>
    %cst_190 = arith.constant 0.000000e+00 : f32
    %164 = vector.broadcast %cst_190 : f32 to vector<8x19xf32>
    %165 = arith.maximumf %163, %164 : vector<8x19xf32>
    %166 = arith.truncf %165 : vector<8x19xf32> to vector<8x19xbf16>
    %c0_191 = arith.constant 0 : index
    %c0_192 = arith.constant 0 : index
    %c0_193 = arith.constant 0 : index
    %c0_194 = arith.constant 0 : index
    %167 = vector.load %arg16[%c0_191, %c0_192, %c0_193, %c0_194] : memref<1x1x8x19xbf16, #tpu.memory_space<vmem>>, vector<1x1x8x19xbf16>
    %168 = vector.shape_cast %167 : vector<1x1x8x19xbf16> to vector<8x19xbf16>
    %169 = vector.shape_cast %166 : vector<8x19xbf16> to vector<1x1x8x19xbf16>
    tpu.vector_store %arg16[%c0_191, %c0_192, %c0_193, %c0_194], %169 {strides = array<i32>} : memref<1x1x8x19xbf16, #tpu.memory_space<vmem>>, vector<1x1x8x19xbf16>,
    return
  }
  func.func @transform_0(%arg0: i32, %arg1: i32) -> (i32, i32, i32, i32) {
    %c2_i32 = arith.constant 2 : i32
    %0 = arith.muli %arg1, %c2_i32 : i32
    %c0_i32 = arith.constant 0 : i32
    %1 = arith.addi %0, %c0_i32 : i32
    %c0_i32_0 = arith.constant 0 : i32
    %c0_i32_1 = arith.constant 0 : i32
    %c0_i32_2 = arith.constant 0 : i32
    return %arg0, %1, %c0_i32_0, %c0_i32_1 : i32, i32, i32, i32
  }
  func.func @transform_1(%arg0: i32, %arg1: i32) -> (i32, i32, i32, i32) {
    %c2_i32 = arith.constant 2 : i32
    %0 = arith.muli %arg1, %c2_i32 : i32
    %c1_i32 = arith.constant 1 : i32
    %1 = arith.addi %0, %c1_i32 : i32
    %c0_i32 = arith.constant 0 : i32
    %c0_i32_0 = arith.constant 0 : i32
    %c0_i32_1 = arith.constant 0 : i32
    return %arg0, %1, %c0_i32, %c0_i32_0 : i32, i32, i32, i32
  }
  func.func @transform_2(%arg0: i32, %arg1: i32) -> (i32, i32, i32, i32) {
    %c2_i32 = arith.constant 2 : i32
    %0 = arith.muli %arg1, %c2_i32 : i32
    %c2_i32_0 = arith.constant 2 : i32
    %1 = arith.addi %0, %c2_i32_0 : i32
    %c0_i32 = arith.constant 0 : i32
    %c0_i32_1 = arith.constant 0 : i32
    %c0_i32_2 = arith.constant 0 : i32
    return %arg0, %1, %c0_i32, %c0_i32_1 : i32, i32, i32, i32
  }
  func.func @transform_3(%arg0: i32, %arg1: i32) -> (i32, i32, i32, i32) {
    %c2_i32 = arith.constant 2 : i32
    %0 = arith.muli %arg1, %c2_i32 : i32
    %c0_i32 = arith.constant 0 : i32
    %1 = arith.addi %0, %c0_i32 : i32
    %c0_i32_0 = arith.constant 0 : i32
    %c0_i32_1 = arith.constant 0 : i32
    %c0_i32_2 = arith.constant 0 : i32
    return %arg0, %1, %c0_i32_0, %c0_i32_1 : i32, i32, i32, i32
  }
  func.func @transform_4(%arg0: i32, %arg1: i32) -> (i32, i32, i32, i32) {
    %c2_i32 = arith.constant 2 : i32
    %0 = arith.muli %arg1, %c2_i32 : i32
    %c1_i32 = arith.constant 1 : i32
    %1 = arith.addi %0, %c1_i32 : i32
    %c0_i32 = arith.constant 0 : i32
    %c0_i32_0 = arith.constant 0 : i32
    %c0_i32_1 = arith.constant 0 : i32
    return %arg0, %1, %c0_i32, %c0_i32_0 : i32, i32, i32, i32
  }
  func.func @transform_5(%arg0: i32, %arg1: i32) -> (i32, i32, i32, i32) {
    %c2_i32 = arith.constant 2 : i32
    %0 = arith.muli %arg1, %c2_i32 : i32
    %c2_i32_0 = arith.constant 2 : i32
    %1 = arith.addi %0, %c2_i32_0 : i32
    %c0_i32 = arith.constant 0 : i32
    %c0_i32_1 = arith.constant 0 : i32
    %c0_i32_2 = arith.constant 0 : i32
    return %arg0, %1, %c0_i32, %c0_i32_1 : i32, i32, i32, i32
  }
  func.func @transform_6(%arg0: i32, %arg1: i32) -> (i32, i32, i32, i32) {
    %c2_i32 = arith.constant 2 : i32
    %0 = arith.muli %arg1, %c2_i32 : i32
    %c0_i32 = arith.constant 0 : i32
    %1 = arith.addi %0, %c0_i32 : i32
    %c0_i32_0 = arith.constant 0 : i32
    %c0_i32_1 = arith.constant 0 : i32
    %c0_i32_2 = arith.constant 0 : i32
    return %arg0, %1, %c0_i32_0, %c0_i32_1 : i32, i32, i32, i32
  }
  func.func @transform_7(%arg0: i32, %arg1: i32) -> (i32, i32, i32, i32) {
    %c2_i32 = arith.constant 2 : i32
    %0 = arith.muli %arg1, %c2_i32 : i32
    %c1_i32 = arith.constant 1 : i32
    %1 = arith.addi %0, %c1_i32 : i32
    %c0_i32 = arith.constant 0 : i32
    %c0_i32_0 = arith.constant 0 : i32
    %c0_i32_1 = arith.constant 0 : i32
    return %arg0, %1, %c0_i32, %c0_i32_0 : i32, i32, i32, i32
  }
  func.func @transform_8(%arg0: i32, %arg1: i32) -> (i32, i32, i32, i32) {
    %c2_i32 = arith.constant 2 : i32
    %0 = arith.muli %arg1, %c2_i32 : i32
    %c2_i32_0 = arith.constant 2 : i32
    %1 = arith.addi %0, %c2_i32_0 : i32
    %c0_i32 = arith.constant 0 : i32
    %c0_i32_1 = arith.constant 0 : i32
    %c0_i32_2 = arith.constant 0 : i32
    return %arg0, %1, %c0_i32, %c0_i32_1 : i32, i32, i32, i32
  }
  func.func @transform_9(%arg0: i32, %arg1: i32) -> (i32, i32, i32, i32) {
    %c2_i32 = arith.constant 2 : i32
    %0 = arith.muli %arg1, %c2_i32 : i32
    %c0_i32 = arith.constant 0 : i32
    %1 = arith.addi %0, %c0_i32 : i32
    %c0_i32_0 = arith.constant 0 : i32
    %c0_i32_1 = arith.constant 0 : i32
    %c0_i32_2 = arith.constant 0 : i32
    return %arg0, %1, %c0_i32_0, %c0_i32_1 : i32, i32, i32, i32
  }
  func.func @transform_10(%arg0: i32, %arg1: i32) -> (i32, i32, i32, i32) {
    %c2_i32 = arith.constant 2 : i32
    %0 = arith.muli %arg1, %c2_i32 : i32
    %c1_i32 = arith.constant 1 : i32
    %1 = arith.addi %0, %c1_i32 : i32
    %c0_i32 = arith.constant 0 : i32
    %c0_i32_0 = arith.constant 0 : i32
    %c0_i32_1 = arith.constant 0 : i32
    return %arg0, %1, %c0_i32, %c0_i32_0 : i32, i32, i32, i32
  }
  func.func @transform_11(%arg0: i32, %arg1: i32) -> (i32, i32, i32, i32) {
    %c2_i32 = arith.constant 2 : i32
    %0 = arith.muli %arg1, %c2_i32 : i32
    %c2_i32_0 = arith.constant 2 : i32
    %1 = arith.addi %0, %c2_i32_0 : i32
    %c0_i32 = arith.constant 0 : i32
    %c0_i32_1 = arith.constant 0 : i32
    %c0_i32_2 = arith.constant 0 : i32
    return %arg0, %1, %c0_i32, %c0_i32_1 : i32, i32, i32, i32
  }
  func.func @transform_12(%arg0: i32, %arg1: i32) -> (i32, i32, i32) {
    %c0_i32 = arith.constant 0 : i32
    %c0_i32_0 = arith.constant 0 : i32
    %c0_i32_1 = arith.constant 0 : i32
    %c0_i32_2 = arith.constant 0 : i32
    return %c0_i32, %c0_i32_0, %c0_i32_1 : i32, i32, i32
  }
  func.func @transform_13(%arg0: i32, %arg1: i32) -> (i32, i32) {
    %c0_i32 = arith.constant 0 : i32
    %c0_i32_0 = arith.constant 0 : i32
    %c0_i32_1 = arith.constant 0 : i32
    return %c0_i32, %c0_i32_0 : i32, i32
  }
  func.func @transform_14(%arg0: i32, %arg1: i32) -> (i32, i32, i32, i32) {
    %c0_i32 = arith.constant 0 : i32
    %c0_i32_0 = arith.constant 0 : i32
    %c0_i32_1 = arith.constant 0 : i32
    return %arg0, %arg1, %c0_i32, %c0_i32_0 : i32, i32, i32, i32
  }
}

module attributes {stable_mosaic.version = 11 : i64} {
  func.func @_fused_conv_kernel(%arg0: i32, %arg1: i32, %arg2: memref<1x1x8x36xbf16, #tpu.memory_space<vmem>>, %arg3: memref<1x1x8x36xbf16, #tpu.memory_space<vmem>>, %arg4: memref<1x1x8x36xbf16, #tpu.memory_space<vmem>>, %arg5: memref<27x8x8xbf16, #tpu.memory_space<vmem>>, %arg6: memref<8x1xf32, #tpu.memory_space<vmem>>, %arg7: memref<1x1x8x22xbf16, #tpu.memory_space<vmem>>) attributes {dimension_semantics = [#tpu.dimension_semantics<parallel>, #tpu.dimension_semantics<parallel>], iteration_bounds = array<i64: 2, 2>, scalar_prefetch = 0 : i64, scratch_operands = 0 : i64, tpu.core_type = #tpu.core_type<tc>, window_params = [{transform_indices = @transform_0, window_bounds = array<i64: 1, 1, 8, 36>}, {transform_indices = @transform_1, window_bounds = array<i64: 1, 1, 8, 36>}, {transform_indices = @transform_2, window_bounds = array<i64: 1, 1, 8, 36>}, {pipeline_mode = #tpu.pipeline_mode<synchronous>, transform_indices = @transform_3, window_bounds = array<i64: 27, 8, 8>}, {pipeline_mode = #tpu.pipeline_mode<synchronous>, transform_indices = @transform_4, window_bounds = array<i64: 8, 1>}, {transform_indices = @transform_5, window_bounds = array<i64: 1, 1, 8, 22>}]} {
    %c0 = arith.constant 0 : index
    %c0_0 = arith.constant 0 : index
    %c0_1 = arith.constant 0 : index
    %c0_2 = arith.constant 0 : index
    %0 = vector.load %arg2[%c0, %c0_0, %c0_1, %c0_2] : memref<1x1x8x36xbf16, #tpu.memory_space<vmem>>, vector<1x1x8x22xbf16>
    %1 = vector.shape_cast %0 : vector<1x1x8x22xbf16> to vector<8x22xbf16>
    %c0_3 = arith.constant 0 : index
    %c0_4 = arith.constant 0 : index
    %c0_5 = arith.constant 0 : index
    %2 = vector.load %arg5[%c0_3, %c0_4, %c0_5] : memref<27x8x8xbf16, #tpu.memory_space<vmem>>, vector<1x8x8xbf16>
    %3 = vector.shape_cast %2 : vector<1x8x8xbf16> to vector<8x8xbf16>
    %cst = arith.constant dense<0.000000e+00> : vector<8x22xf32>
    %4 = tpu.matmul %3, %1, %cst {dimension_numbers = #tpu.dot_dimension_numbers<[1], [0], [0], [1], [0, 0, 1, 1], [], []>} : vector<8x8xbf16>, vector<8x22xbf16>, vector<8x22xf32> -> vector<8x22xf32>
    %c0_6 = arith.constant 0 : index
    %c0_7 = arith.constant 0 : index
    %c0_8 = arith.constant 0 : index
    %c1 = arith.constant 1 : index
    %5 = vector.load %arg2[%c0_6, %c0_7, %c0_8, %c1] : memref<1x1x8x36xbf16, #tpu.memory_space<vmem>>, vector<1x1x8x22xbf16>
    %6 = vector.shape_cast %5 : vector<1x1x8x22xbf16> to vector<8x22xbf16>
    %c1_9 = arith.constant 1 : index
    %c0_10 = arith.constant 0 : index
    %c0_11 = arith.constant 0 : index
    %7 = vector.load %arg5[%c1_9, %c0_10, %c0_11] : memref<27x8x8xbf16, #tpu.memory_space<vmem>>, vector<1x8x8xbf16>
    %8 = vector.shape_cast %7 : vector<1x8x8xbf16> to vector<8x8xbf16>
    %cst_12 = arith.constant dense<0.000000e+00> : vector<8x22xf32>
    %9 = tpu.matmul %8, %6, %cst_12 {dimension_numbers = #tpu.dot_dimension_numbers<[1], [0], [0], [1], [0, 0, 1, 1], [], []>} : vector<8x8xbf16>, vector<8x22xbf16>, vector<8x22xf32> -> vector<8x22xf32>
    %10 = arith.addf %4, %9 : vector<8x22xf32>
    %c0_13 = arith.constant 0 : index
    %c0_14 = arith.constant 0 : index
    %c0_15 = arith.constant 0 : index
    %c2 = arith.constant 2 : index
    %11 = vector.load %arg2[%c0_13, %c0_14, %c0_15, %c2] : memref<1x1x8x36xbf16, #tpu.memory_space<vmem>>, vector<1x1x8x22xbf16>
    %12 = vector.shape_cast %11 : vector<1x1x8x22xbf16> to vector<8x22xbf16>
    %c2_16 = arith.constant 2 : index
    %c0_17 = arith.constant 0 : index
    %c0_18 = arith.constant 0 : index
    %13 = vector.load %arg5[%c2_16, %c0_17, %c0_18] : memref<27x8x8xbf16, #tpu.memory_space<vmem>>, vector<1x8x8xbf16>
    %14 = vector.shape_cast %13 : vector<1x8x8xbf16> to vector<8x8xbf16>
    %cst_19 = arith.constant dense<0.000000e+00> : vector<8x22xf32>
    %15 = tpu.matmul %14, %12, %cst_19 {dimension_numbers = #tpu.dot_dimension_numbers<[1], [0], [0], [1], [0, 0, 1, 1], [], []>} : vector<8x8xbf16>, vector<8x22xbf16>, vector<8x22xf32> -> vector<8x22xf32>
    %16 = arith.addf %10, %15 : vector<8x22xf32>
    %c0_20 = arith.constant 0 : index
    %c0_21 = arith.constant 0 : index
    %c0_22 = arith.constant 0 : index
    %c6 = arith.constant 6 : index
    %17 = vector.load %arg2[%c0_20, %c0_21, %c0_22, %c6] : memref<1x1x8x36xbf16, #tpu.memory_space<vmem>>, vector<1x1x8x22xbf16>
    %18 = vector.shape_cast %17 : vector<1x1x8x22xbf16> to vector<8x22xbf16>
    %c3 = arith.constant 3 : index
    %c0_23 = arith.constant 0 : index
    %c0_24 = arith.constant 0 : index
    %19 = vector.load %arg5[%c3, %c0_23, %c0_24] : memref<27x8x8xbf16, #tpu.memory_space<vmem>>, vector<1x8x8xbf16>
    %20 = vector.shape_cast %19 : vector<1x8x8xbf16> to vector<8x8xbf16>
    %cst_25 = arith.constant dense<0.000000e+00> : vector<8x22xf32>
    %21 = tpu.matmul %20, %18, %cst_25 {dimension_numbers = #tpu.dot_dimension_numbers<[1], [0], [0], [1], [0, 0, 1, 1], [], []>} : vector<8x8xbf16>, vector<8x22xbf16>, vector<8x22xf32> -> vector<8x22xf32>
    %22 = arith.addf %16, %21 : vector<8x22xf32>
    %c0_26 = arith.constant 0 : index
    %c0_27 = arith.constant 0 : index
    %c0_28 = arith.constant 0 : index
    %c7 = arith.constant 7 : index
    %23 = vector.load %arg2[%c0_26, %c0_27, %c0_28, %c7] : memref<1x1x8x36xbf16, #tpu.memory_space<vmem>>, vector<1x1x8x22xbf16>
    %24 = vector.shape_cast %23 : vector<1x1x8x22xbf16> to vector<8x22xbf16>
    %c4 = arith.constant 4 : index
    %c0_29 = arith.constant 0 : index
    %c0_30 = arith.constant 0 : index
    %25 = vector.load %arg5[%c4, %c0_29, %c0_30] : memref<27x8x8xbf16, #tpu.memory_space<vmem>>, vector<1x8x8xbf16>
    %26 = vector.shape_cast %25 : vector<1x8x8xbf16> to vector<8x8xbf16>
    %cst_31 = arith.constant dense<0.000000e+00> : vector<8x22xf32>
    %27 = tpu.matmul %26, %24, %cst_31 {dimension_numbers = #tpu.dot_dimension_numbers<[1], [0], [0], [1], [0, 0, 1, 1], [], []>} : vector<8x8xbf16>, vector<8x22xbf16>, vector<8x22xf32> -> vector<8x22xf32>
    %28 = arith.addf %22, %27 : vector<8x22xf32>
    %c0_32 = arith.constant 0 : index
    %c0_33 = arith.constant 0 : index
    %c0_34 = arith.constant 0 : index
    %c8 = arith.constant 8 : index
    %29 = vector.load %arg2[%c0_32, %c0_33, %c0_34, %c8] : memref<1x1x8x36xbf16, #tpu.memory_space<vmem>>, vector<1x1x8x22xbf16>
    %30 = vector.shape_cast %29 : vector<1x1x8x22xbf16> to vector<8x22xbf16>
    %c5 = arith.constant 5 : index
    %c0_35 = arith.constant 0 : index
    %c0_36 = arith.constant 0 : index
    %31 = vector.load %arg5[%c5, %c0_35, %c0_36] : memref<27x8x8xbf16, #tpu.memory_space<vmem>>, vector<1x8x8xbf16>
    %32 = vector.shape_cast %31 : vector<1x8x8xbf16> to vector<8x8xbf16>
    %cst_37 = arith.constant dense<0.000000e+00> : vector<8x22xf32>
    %33 = tpu.matmul %32, %30, %cst_37 {dimension_numbers = #tpu.dot_dimension_numbers<[1], [0], [0], [1], [0, 0, 1, 1], [], []>} : vector<8x8xbf16>, vector<8x22xbf16>, vector<8x22xf32> -> vector<8x22xf32>
    %34 = arith.addf %28, %33 : vector<8x22xf32>
    %c0_38 = arith.constant 0 : index
    %c0_39 = arith.constant 0 : index
    %c0_40 = arith.constant 0 : index
    %c12 = arith.constant 12 : index
    %35 = vector.load %arg2[%c0_38, %c0_39, %c0_40, %c12] : memref<1x1x8x36xbf16, #tpu.memory_space<vmem>>, vector<1x1x8x22xbf16>
    %36 = vector.shape_cast %35 : vector<1x1x8x22xbf16> to vector<8x22xbf16>
    %c6_41 = arith.constant 6 : index
    %c0_42 = arith.constant 0 : index
    %c0_43 = arith.constant 0 : index
    %37 = vector.load %arg5[%c6_41, %c0_42, %c0_43] : memref<27x8x8xbf16, #tpu.memory_space<vmem>>, vector<1x8x8xbf16>
    %38 = vector.shape_cast %37 : vector<1x8x8xbf16> to vector<8x8xbf16>
    %cst_44 = arith.constant dense<0.000000e+00> : vector<8x22xf32>
    %39 = tpu.matmul %38, %36, %cst_44 {dimension_numbers = #tpu.dot_dimension_numbers<[1], [0], [0], [1], [0, 0, 1, 1], [], []>} : vector<8x8xbf16>, vector<8x22xbf16>, vector<8x22xf32> -> vector<8x22xf32>
    %40 = arith.addf %34, %39 : vector<8x22xf32>
    %c0_45 = arith.constant 0 : index
    %c0_46 = arith.constant 0 : index
    %c0_47 = arith.constant 0 : index
    %c13 = arith.constant 13 : index
    %41 = vector.load %arg2[%c0_45, %c0_46, %c0_47, %c13] : memref<1x1x8x36xbf16, #tpu.memory_space<vmem>>, vector<1x1x8x22xbf16>
    %42 = vector.shape_cast %41 : vector<1x1x8x22xbf16> to vector<8x22xbf16>
    %c7_48 = arith.constant 7 : index
    %c0_49 = arith.constant 0 : index
    %c0_50 = arith.constant 0 : index
    %43 = vector.load %arg5[%c7_48, %c0_49, %c0_50] : memref<27x8x8xbf16, #tpu.memory_space<vmem>>, vector<1x8x8xbf16>
    %44 = vector.shape_cast %43 : vector<1x8x8xbf16> to vector<8x8xbf16>
    %cst_51 = arith.constant dense<0.000000e+00> : vector<8x22xf32>
    %45 = tpu.matmul %44, %42, %cst_51 {dimension_numbers = #tpu.dot_dimension_numbers<[1], [0], [0], [1], [0, 0, 1, 1], [], []>} : vector<8x8xbf16>, vector<8x22xbf16>, vector<8x22xf32> -> vector<8x22xf32>
    %46 = arith.addf %40, %45 : vector<8x22xf32>
    %c0_52 = arith.constant 0 : index
    %c0_53 = arith.constant 0 : index
    %c0_54 = arith.constant 0 : index
    %c14 = arith.constant 14 : index
    %47 = vector.load %arg2[%c0_52, %c0_53, %c0_54, %c14] : memref<1x1x8x36xbf16, #tpu.memory_space<vmem>>, vector<1x1x8x22xbf16>
    %48 = vector.shape_cast %47 : vector<1x1x8x22xbf16> to vector<8x22xbf16>
    %c8_55 = arith.constant 8 : index
    %c0_56 = arith.constant 0 : index
    %c0_57 = arith.constant 0 : index
    %49 = vector.load %arg5[%c8_55, %c0_56, %c0_57] : memref<27x8x8xbf16, #tpu.memory_space<vmem>>, vector<1x8x8xbf16>
    %50 = vector.shape_cast %49 : vector<1x8x8xbf16> to vector<8x8xbf16>
    %cst_58 = arith.constant dense<0.000000e+00> : vector<8x22xf32>
    %51 = tpu.matmul %50, %48, %cst_58 {dimension_numbers = #tpu.dot_dimension_numbers<[1], [0], [0], [1], [0, 0, 1, 1], [], []>} : vector<8x8xbf16>, vector<8x22xbf16>, vector<8x22xf32> -> vector<8x22xf32>
    %52 = arith.addf %46, %51 : vector<8x22xf32>
    %c0_59 = arith.constant 0 : index
    %c0_60 = arith.constant 0 : index
    %c0_61 = arith.constant 0 : index
    %c0_62 = arith.constant 0 : index
    %53 = vector.load %arg3[%c0_59, %c0_60, %c0_61, %c0_62] : memref<1x1x8x36xbf16, #tpu.memory_space<vmem>>, vector<1x1x8x22xbf16>
    %54 = vector.shape_cast %53 : vector<1x1x8x22xbf16> to vector<8x22xbf16>
    %c9 = arith.constant 9 : index
    %c0_63 = arith.constant 0 : index
    %c0_64 = arith.constant 0 : index
    %55 = vector.load %arg5[%c9, %c0_63, %c0_64] : memref<27x8x8xbf16, #tpu.memory_space<vmem>>, vector<1x8x8xbf16>
    %56 = vector.shape_cast %55 : vector<1x8x8xbf16> to vector<8x8xbf16>
    %cst_65 = arith.constant dense<0.000000e+00> : vector<8x22xf32>
    %57 = tpu.matmul %56, %54, %cst_65 {dimension_numbers = #tpu.dot_dimension_numbers<[1], [0], [0], [1], [0, 0, 1, 1], [], []>} : vector<8x8xbf16>, vector<8x22xbf16>, vector<8x22xf32> -> vector<8x22xf32>
    %58 = arith.addf %52, %57 : vector<8x22xf32>
    %c0_66 = arith.constant 0 : index
    %c0_67 = arith.constant 0 : index
    %c0_68 = arith.constant 0 : index
    %c1_69 = arith.constant 1 : index
    %59 = vector.load %arg3[%c0_66, %c0_67, %c0_68, %c1_69] : memref<1x1x8x36xbf16, #tpu.memory_space<vmem>>, vector<1x1x8x22xbf16>
    %60 = vector.shape_cast %59 : vector<1x1x8x22xbf16> to vector<8x22xbf16>
    %c10 = arith.constant 10 : index
    %c0_70 = arith.constant 0 : index
    %c0_71 = arith.constant 0 : index
    %61 = vector.load %arg5[%c10, %c0_70, %c0_71] : memref<27x8x8xbf16, #tpu.memory_space<vmem>>, vector<1x8x8xbf16>
    %62 = vector.shape_cast %61 : vector<1x8x8xbf16> to vector<8x8xbf16>
    %cst_72 = arith.constant dense<0.000000e+00> : vector<8x22xf32>
    %63 = tpu.matmul %62, %60, %cst_72 {dimension_numbers = #tpu.dot_dimension_numbers<[1], [0], [0], [1], [0, 0, 1, 1], [], []>} : vector<8x8xbf16>, vector<8x22xbf16>, vector<8x22xf32> -> vector<8x22xf32>
    %64 = arith.addf %58, %63 : vector<8x22xf32>
    %c0_73 = arith.constant 0 : index
    %c0_74 = arith.constant 0 : index
    %c0_75 = arith.constant 0 : index
    %c2_76 = arith.constant 2 : index
    %65 = vector.load %arg3[%c0_73, %c0_74, %c0_75, %c2_76] : memref<1x1x8x36xbf16, #tpu.memory_space<vmem>>, vector<1x1x8x22xbf16>
    %66 = vector.shape_cast %65 : vector<1x1x8x22xbf16> to vector<8x22xbf16>
    %c11 = arith.constant 11 : index
    %c0_77 = arith.constant 0 : index
    %c0_78 = arith.constant 0 : index
    %67 = vector.load %arg5[%c11, %c0_77, %c0_78] : memref<27x8x8xbf16, #tpu.memory_space<vmem>>, vector<1x8x8xbf16>
    %68 = vector.shape_cast %67 : vector<1x8x8xbf16> to vector<8x8xbf16>
    %cst_79 = arith.constant dense<0.000000e+00> : vector<8x22xf32>
    %69 = tpu.matmul %68, %66, %cst_79 {dimension_numbers = #tpu.dot_dimension_numbers<[1], [0], [0], [1], [0, 0, 1, 1], [], []>} : vector<8x8xbf16>, vector<8x22xbf16>, vector<8x22xf32> -> vector<8x22xf32>
    %70 = arith.addf %64, %69 : vector<8x22xf32>
    %c0_80 = arith.constant 0 : index
    %c0_81 = arith.constant 0 : index
    %c0_82 = arith.constant 0 : index
    %c6_83 = arith.constant 6 : index
    %71 = vector.load %arg3[%c0_80, %c0_81, %c0_82, %c6_83] : memref<1x1x8x36xbf16, #tpu.memory_space<vmem>>, vector<1x1x8x22xbf16>
    %72 = vector.shape_cast %71 : vector<1x1x8x22xbf16> to vector<8x22xbf16>
    %c12_84 = arith.constant 12 : index
    %c0_85 = arith.constant 0 : index
    %c0_86 = arith.constant 0 : index
    %73 = vector.load %arg5[%c12_84, %c0_85, %c0_86] : memref<27x8x8xbf16, #tpu.memory_space<vmem>>, vector<1x8x8xbf16>
    %74 = vector.shape_cast %73 : vector<1x8x8xbf16> to vector<8x8xbf16>
    %cst_87 = arith.constant dense<0.000000e+00> : vector<8x22xf32>
    %75 = tpu.matmul %74, %72, %cst_87 {dimension_numbers = #tpu.dot_dimension_numbers<[1], [0], [0], [1], [0, 0, 1, 1], [], []>} : vector<8x8xbf16>, vector<8x22xbf16>, vector<8x22xf32> -> vector<8x22xf32>
    %76 = arith.addf %70, %75 : vector<8x22xf32>
    %c0_88 = arith.constant 0 : index
    %c0_89 = arith.constant 0 : index
    %c0_90 = arith.constant 0 : index
    %c7_91 = arith.constant 7 : index
    %77 = vector.load %arg3[%c0_88, %c0_89, %c0_90, %c7_91] : memref<1x1x8x36xbf16, #tpu.memory_space<vmem>>, vector<1x1x8x22xbf16>
    %78 = vector.shape_cast %77 : vector<1x1x8x22xbf16> to vector<8x22xbf16>
    %c13_92 = arith.constant 13 : index
    %c0_93 = arith.constant 0 : index
    %c0_94 = arith.constant 0 : index
    %79 = vector.load %arg5[%c13_92, %c0_93, %c0_94] : memref<27x8x8xbf16, #tpu.memory_space<vmem>>, vector<1x8x8xbf16>
    %80 = vector.shape_cast %79 : vector<1x8x8xbf16> to vector<8x8xbf16>
    %cst_95 = arith.constant dense<0.000000e+00> : vector<8x22xf32>
    %81 = tpu.matmul %80, %78, %cst_95 {dimension_numbers = #tpu.dot_dimension_numbers<[1], [0], [0], [1], [0, 0, 1, 1], [], []>} : vector<8x8xbf16>, vector<8x22xbf16>, vector<8x22xf32> -> vector<8x22xf32>
    %82 = arith.addf %76, %81 : vector<8x22xf32>
    %c0_96 = arith.constant 0 : index
    %c0_97 = arith.constant 0 : index
    %c0_98 = arith.constant 0 : index
    %c8_99 = arith.constant 8 : index
    %83 = vector.load %arg3[%c0_96, %c0_97, %c0_98, %c8_99] : memref<1x1x8x36xbf16, #tpu.memory_space<vmem>>, vector<1x1x8x22xbf16>
    %84 = vector.shape_cast %83 : vector<1x1x8x22xbf16> to vector<8x22xbf16>
    %c14_100 = arith.constant 14 : index
    %c0_101 = arith.constant 0 : index
    %c0_102 = arith.constant 0 : index
    %85 = vector.load %arg5[%c14_100, %c0_101, %c0_102] : memref<27x8x8xbf16, #tpu.memory_space<vmem>>, vector<1x8x8xbf16>
    %86 = vector.shape_cast %85 : vector<1x8x8xbf16> to vector<8x8xbf16>
    %cst_103 = arith.constant dense<0.000000e+00> : vector<8x22xf32>
    %87 = tpu.matmul %86, %84, %cst_103 {dimension_numbers = #tpu.dot_dimension_numbers<[1], [0], [0], [1], [0, 0, 1, 1], [], []>} : vector<8x8xbf16>, vector<8x22xbf16>, vector<8x22xf32> -> vector<8x22xf32>
    %88 = arith.addf %82, %87 : vector<8x22xf32>
    %c0_104 = arith.constant 0 : index
    %c0_105 = arith.constant 0 : index
    %c0_106 = arith.constant 0 : index
    %c12_107 = arith.constant 12 : index
    %89 = vector.load %arg3[%c0_104, %c0_105, %c0_106, %c12_107] : memref<1x1x8x36xbf16, #tpu.memory_space<vmem>>, vector<1x1x8x22xbf16>
    %90 = vector.shape_cast %89 : vector<1x1x8x22xbf16> to vector<8x22xbf16>
    %c15 = arith.constant 15 : index
    %c0_108 = arith.constant 0 : index
    %c0_109 = arith.constant 0 : index
    %91 = vector.load %arg5[%c15, %c0_108, %c0_109] : memref<27x8x8xbf16, #tpu.memory_space<vmem>>, vector<1x8x8xbf16>
    %92 = vector.shape_cast %91 : vector<1x8x8xbf16> to vector<8x8xbf16>
    %cst_110 = arith.constant dense<0.000000e+00> : vector<8x22xf32>
    %93 = tpu.matmul %92, %90, %cst_110 {dimension_numbers = #tpu.dot_dimension_numbers<[1], [0], [0], [1], [0, 0, 1, 1], [], []>} : vector<8x8xbf16>, vector<8x22xbf16>, vector<8x22xf32> -> vector<8x22xf32>
    %94 = arith.addf %88, %93 : vector<8x22xf32>
    %c0_111 = arith.constant 0 : index
    %c0_112 = arith.constant 0 : index
    %c0_113 = arith.constant 0 : index
    %c13_114 = arith.constant 13 : index
    %95 = vector.load %arg3[%c0_111, %c0_112, %c0_113, %c13_114] : memref<1x1x8x36xbf16, #tpu.memory_space<vmem>>, vector<1x1x8x22xbf16>
    %96 = vector.shape_cast %95 : vector<1x1x8x22xbf16> to vector<8x22xbf16>
    %c16 = arith.constant 16 : index
    %c0_115 = arith.constant 0 : index
    %c0_116 = arith.constant 0 : index
    %97 = vector.load %arg5[%c16, %c0_115, %c0_116] : memref<27x8x8xbf16, #tpu.memory_space<vmem>>, vector<1x8x8xbf16>
    %98 = vector.shape_cast %97 : vector<1x8x8xbf16> to vector<8x8xbf16>
    %cst_117 = arith.constant dense<0.000000e+00> : vector<8x22xf32>
    %99 = tpu.matmul %98, %96, %cst_117 {dimension_numbers = #tpu.dot_dimension_numbers<[1], [0], [0], [1], [0, 0, 1, 1], [], []>} : vector<8x8xbf16>, vector<8x22xbf16>, vector<8x22xf32> -> vector<8x22xf32>
    %100 = arith.addf %94, %99 : vector<8x22xf32>
    %c0_118 = arith.constant 0 : index
    %c0_119 = arith.constant 0 : index
    %c0_120 = arith.constant 0 : index
    %c14_121 = arith.constant 14 : index
    %101 = vector.load %arg3[%c0_118, %c0_119, %c0_120, %c14_121] : memref<1x1x8x36xbf16, #tpu.memory_space<vmem>>, vector<1x1x8x22xbf16>
    %102 = vector.shape_cast %101 : vector<1x1x8x22xbf16> to vector<8x22xbf16>
    %c17 = arith.constant 17 : index
    %c0_122 = arith.constant 0 : index
    %c0_123 = arith.constant 0 : index
    %103 = vector.load %arg5[%c17, %c0_122, %c0_123] : memref<27x8x8xbf16, #tpu.memory_space<vmem>>, vector<1x8x8xbf16>
    %104 = vector.shape_cast %103 : vector<1x8x8xbf16> to vector<8x8xbf16>
    %cst_124 = arith.constant dense<0.000000e+00> : vector<8x22xf32>
    %105 = tpu.matmul %104, %102, %cst_124 {dimension_numbers = #tpu.dot_dimension_numbers<[1], [0], [0], [1], [0, 0, 1, 1], [], []>} : vector<8x8xbf16>, vector<8x22xbf16>, vector<8x22xf32> -> vector<8x22xf32>
    %106 = arith.addf %100, %105 : vector<8x22xf32>
    %c0_125 = arith.constant 0 : index
    %c0_126 = arith.constant 0 : index
    %c0_127 = arith.constant 0 : index
    %c0_128 = arith.constant 0 : index
    %107 = vector.load %arg4[%c0_125, %c0_126, %c0_127, %c0_128] : memref<1x1x8x36xbf16, #tpu.memory_space<vmem>>, vector<1x1x8x22xbf16>
    %108 = vector.shape_cast %107 : vector<1x1x8x22xbf16> to vector<8x22xbf16>
    %c18 = arith.constant 18 : index
    %c0_129 = arith.constant 0 : index
    %c0_130 = arith.constant 0 : index
    %109 = vector.load %arg5[%c18, %c0_129, %c0_130] : memref<27x8x8xbf16, #tpu.memory_space<vmem>>, vector<1x8x8xbf16>
    %110 = vector.shape_cast %109 : vector<1x8x8xbf16> to vector<8x8xbf16>
    %cst_131 = arith.constant dense<0.000000e+00> : vector<8x22xf32>
    %111 = tpu.matmul %110, %108, %cst_131 {dimension_numbers = #tpu.dot_dimension_numbers<[1], [0], [0], [1], [0, 0, 1, 1], [], []>} : vector<8x8xbf16>, vector<8x22xbf16>, vector<8x22xf32> -> vector<8x22xf32>
    %112 = arith.addf %106, %111 : vector<8x22xf32>
    %c0_132 = arith.constant 0 : index
    %c0_133 = arith.constant 0 : index
    %c0_134 = arith.constant 0 : index
    %c1_135 = arith.constant 1 : index
    %113 = vector.load %arg4[%c0_132, %c0_133, %c0_134, %c1_135] : memref<1x1x8x36xbf16, #tpu.memory_space<vmem>>, vector<1x1x8x22xbf16>
    %114 = vector.shape_cast %113 : vector<1x1x8x22xbf16> to vector<8x22xbf16>
    %c19 = arith.constant 19 : index
    %c0_136 = arith.constant 0 : index
    %c0_137 = arith.constant 0 : index
    %115 = vector.load %arg5[%c19, %c0_136, %c0_137] : memref<27x8x8xbf16, #tpu.memory_space<vmem>>, vector<1x8x8xbf16>
    %116 = vector.shape_cast %115 : vector<1x8x8xbf16> to vector<8x8xbf16>
    %cst_138 = arith.constant dense<0.000000e+00> : vector<8x22xf32>
    %117 = tpu.matmul %116, %114, %cst_138 {dimension_numbers = #tpu.dot_dimension_numbers<[1], [0], [0], [1], [0, 0, 1, 1], [], []>} : vector<8x8xbf16>, vector<8x22xbf16>, vector<8x22xf32> -> vector<8x22xf32>
    %118 = arith.addf %112, %117 : vector<8x22xf32>
    %c0_139 = arith.constant 0 : index
    %c0_140 = arith.constant 0 : index
    %c0_141 = arith.constant 0 : index
    %c2_142 = arith.constant 2 : index
    %119 = vector.load %arg4[%c0_139, %c0_140, %c0_141, %c2_142] : memref<1x1x8x36xbf16, #tpu.memory_space<vmem>>, vector<1x1x8x22xbf16>
    %120 = vector.shape_cast %119 : vector<1x1x8x22xbf16> to vector<8x22xbf16>
    %c20 = arith.constant 20 : index
    %c0_143 = arith.constant 0 : index
    %c0_144 = arith.constant 0 : index
    %121 = vector.load %arg5[%c20, %c0_143, %c0_144] : memref<27x8x8xbf16, #tpu.memory_space<vmem>>, vector<1x8x8xbf16>
    %122 = vector.shape_cast %121 : vector<1x8x8xbf16> to vector<8x8xbf16>
    %cst_145 = arith.constant dense<0.000000e+00> : vector<8x22xf32>
    %123 = tpu.matmul %122, %120, %cst_145 {dimension_numbers = #tpu.dot_dimension_numbers<[1], [0], [0], [1], [0, 0, 1, 1], [], []>} : vector<8x8xbf16>, vector<8x22xbf16>, vector<8x22xf32> -> vector<8x22xf32>
    %124 = arith.addf %118, %123 : vector<8x22xf32>
    %c0_146 = arith.constant 0 : index
    %c0_147 = arith.constant 0 : index
    %c0_148 = arith.constant 0 : index
    %c6_149 = arith.constant 6 : index
    %125 = vector.load %arg4[%c0_146, %c0_147, %c0_148, %c6_149] : memref<1x1x8x36xbf16, #tpu.memory_space<vmem>>, vector<1x1x8x22xbf16>
    %126 = vector.shape_cast %125 : vector<1x1x8x22xbf16> to vector<8x22xbf16>
    %c21 = arith.constant 21 : index
    %c0_150 = arith.constant 0 : index
    %c0_151 = arith.constant 0 : index
    %127 = vector.load %arg5[%c21, %c0_150, %c0_151] : memref<27x8x8xbf16, #tpu.memory_space<vmem>>, vector<1x8x8xbf16>
    %128 = vector.shape_cast %127 : vector<1x8x8xbf16> to vector<8x8xbf16>
    %cst_152 = arith.constant dense<0.000000e+00> : vector<8x22xf32>
    %129 = tpu.matmul %128, %126, %cst_152 {dimension_numbers = #tpu.dot_dimension_numbers<[1], [0], [0], [1], [0, 0, 1, 1], [], []>} : vector<8x8xbf16>, vector<8x22xbf16>, vector<8x22xf32> -> vector<8x22xf32>
    %130 = arith.addf %124, %129 : vector<8x22xf32>
    %c0_153 = arith.constant 0 : index
    %c0_154 = arith.constant 0 : index
    %c0_155 = arith.constant 0 : index
    %c7_156 = arith.constant 7 : index
    %131 = vector.load %arg4[%c0_153, %c0_154, %c0_155, %c7_156] : memref<1x1x8x36xbf16, #tpu.memory_space<vmem>>, vector<1x1x8x22xbf16>
    %132 = vector.shape_cast %131 : vector<1x1x8x22xbf16> to vector<8x22xbf16>
    %c22 = arith.constant 22 : index
    %c0_157 = arith.constant 0 : index
    %c0_158 = arith.constant 0 : index
    %133 = vector.load %arg5[%c22, %c0_157, %c0_158] : memref<27x8x8xbf16, #tpu.memory_space<vmem>>, vector<1x8x8xbf16>
    %134 = vector.shape_cast %133 : vector<1x8x8xbf16> to vector<8x8xbf16>
    %cst_159 = arith.constant dense<0.000000e+00> : vector<8x22xf32>
    %135 = tpu.matmul %134, %132, %cst_159 {dimension_numbers = #tpu.dot_dimension_numbers<[1], [0], [0], [1], [0, 0, 1, 1], [], []>} : vector<8x8xbf16>, vector<8x22xbf16>, vector<8x22xf32> -> vector<8x22xf32>
    %136 = arith.addf %130, %135 : vector<8x22xf32>
    %c0_160 = arith.constant 0 : index
    %c0_161 = arith.constant 0 : index
    %c0_162 = arith.constant 0 : index
    %c8_163 = arith.constant 8 : index
    %137 = vector.load %arg4[%c0_160, %c0_161, %c0_162, %c8_163] : memref<1x1x8x36xbf16, #tpu.memory_space<vmem>>, vector<1x1x8x22xbf16>
    %138 = vector.shape_cast %137 : vector<1x1x8x22xbf16> to vector<8x22xbf16>
    %c23 = arith.constant 23 : index
    %c0_164 = arith.constant 0 : index
    %c0_165 = arith.constant 0 : index
    %139 = vector.load %arg5[%c23, %c0_164, %c0_165] : memref<27x8x8xbf16, #tpu.memory_space<vmem>>, vector<1x8x8xbf16>
    %140 = vector.shape_cast %139 : vector<1x8x8xbf16> to vector<8x8xbf16>
    %cst_166 = arith.constant dense<0.000000e+00> : vector<8x22xf32>
    %141 = tpu.matmul %140, %138, %cst_166 {dimension_numbers = #tpu.dot_dimension_numbers<[1], [0], [0], [1], [0, 0, 1, 1], [], []>} : vector<8x8xbf16>, vector<8x22xbf16>, vector<8x22xf32> -> vector<8x22xf32>
    %142 = arith.addf %136, %141 : vector<8x22xf32>
    %c0_167 = arith.constant 0 : index
    %c0_168 = arith.constant 0 : index
    %c0_169 = arith.constant 0 : index
    %c12_170 = arith.constant 12 : index
    %143 = vector.load %arg4[%c0_167, %c0_168, %c0_169, %c12_170] : memref<1x1x8x36xbf16, #tpu.memory_space<vmem>>, vector<1x1x8x22xbf16>
    %144 = vector.shape_cast %143 : vector<1x1x8x22xbf16> to vector<8x22xbf16>
    %c24 = arith.constant 24 : index
    %c0_171 = arith.constant 0 : index
    %c0_172 = arith.constant 0 : index
    %145 = vector.load %arg5[%c24, %c0_171, %c0_172] : memref<27x8x8xbf16, #tpu.memory_space<vmem>>, vector<1x8x8xbf16>
    %146 = vector.shape_cast %145 : vector<1x8x8xbf16> to vector<8x8xbf16>
    %cst_173 = arith.constant dense<0.000000e+00> : vector<8x22xf32>
    %147 = tpu.matmul %146, %144, %cst_173 {dimension_numbers = #tpu.dot_dimension_numbers<[1], [0], [0], [1], [0, 0, 1, 1], [], []>} : vector<8x8xbf16>, vector<8x22xbf16>, vector<8x22xf32> -> vector<8x22xf32>
    %148 = arith.addf %142, %147 : vector<8x22xf32>
    %c0_174 = arith.constant 0 : index
    %c0_175 = arith.constant 0 : index
    %c0_176 = arith.constant 0 : index
    %c13_177 = arith.constant 13 : index
    %149 = vector.load %arg4[%c0_174, %c0_175, %c0_176, %c13_177] : memref<1x1x8x36xbf16, #tpu.memory_space<vmem>>, vector<1x1x8x22xbf16>
    %150 = vector.shape_cast %149 : vector<1x1x8x22xbf16> to vector<8x22xbf16>
    %c25 = arith.constant 25 : index
    %c0_178 = arith.constant 0 : index
    %c0_179 = arith.constant 0 : index
    %151 = vector.load %arg5[%c25, %c0_178, %c0_179] : memref<27x8x8xbf16, #tpu.memory_space<vmem>>, vector<1x8x8xbf16>
    %152 = vector.shape_cast %151 : vector<1x8x8xbf16> to vector<8x8xbf16>
    %cst_180 = arith.constant dense<0.000000e+00> : vector<8x22xf32>
    %153 = tpu.matmul %152, %150, %cst_180 {dimension_numbers = #tpu.dot_dimension_numbers<[1], [0], [0], [1], [0, 0, 1, 1], [], []>} : vector<8x8xbf16>, vector<8x22xbf16>, vector<8x22xf32> -> vector<8x22xf32>
    %154 = arith.addf %148, %153 : vector<8x22xf32>
    %c0_181 = arith.constant 0 : index
    %c0_182 = arith.constant 0 : index
    %c0_183 = arith.constant 0 : index
    %c14_184 = arith.constant 14 : index
    %155 = vector.load %arg4[%c0_181, %c0_182, %c0_183, %c14_184] : memref<1x1x8x36xbf16, #tpu.memory_space<vmem>>, vector<1x1x8x22xbf16>
    %156 = vector.shape_cast %155 : vector<1x1x8x22xbf16> to vector<8x22xbf16>
    %c26 = arith.constant 26 : index
    %c0_185 = arith.constant 0 : index
    %c0_186 = arith.constant 0 : index
    %157 = vector.load %arg5[%c26, %c0_185, %c0_186] : memref<27x8x8xbf16, #tpu.memory_space<vmem>>, vector<1x8x8xbf16>
    %158 = vector.shape_cast %157 : vector<1x8x8xbf16> to vector<8x8xbf16>
    %cst_187 = arith.constant dense<0.000000e+00> : vector<8x22xf32>
    %159 = tpu.matmul %158, %156, %cst_187 {dimension_numbers = #tpu.dot_dimension_numbers<[1], [0], [0], [1], [0, 0, 1, 1], [], []>} : vector<8x8xbf16>, vector<8x22xbf16>, vector<8x22xf32> -> vector<8x22xf32>
    %160 = arith.addf %154, %159 : vector<8x22xf32>
    %c0_188 = arith.constant 0 : index
    %c0_189 = arith.constant 0 : index
    %161 = vector.load %arg6[%c0_188, %c0_189] : memref<8x1xf32, #tpu.memory_space<vmem>>, vector<8x1xf32>
    %162 = vector.broadcast %161 : vector<8x1xf32> to vector<8x22xf32>
    %163 = arith.addf %160, %162 : vector<8x22xf32>
    %cst_190 = arith.constant 0.000000e+00 : f32
    %164 = vector.broadcast %cst_190 : f32 to vector<8x22xf32>
    %165 = arith.maximumf %163, %164 : vector<8x22xf32>
    %166 = arith.truncf %165 : vector<8x22xf32> to vector<8x22xbf16>
    %c0_191 = arith.constant 0 : index
    %c0_192 = arith.constant 0 : index
    %c0_193 = arith.constant 0 : index
    %c0_194 = arith.constant 0 : index
    %167 = vector.load %arg7[%c0_191, %c0_192, %c0_193, %c0_194] : memref<1x1x8x22xbf16, #tpu.memory_space<vmem>>, vector<1x1x8x22xbf16>
    %168 = vector.shape_cast %167 : vector<1x1x8x22xbf16> to vector<8x22xbf16>
    %169 = vector.shape_cast %166 : vector<8x22xbf16> to vector<1x1x8x22xbf16>
    tpu.vector_store %arg7[%c0_191, %c0_192, %c0_193, %c0_194], %169 {strides = array<i32>} : memref<1x1x8x22xbf16, #tpu.memory_space<vmem>>, vector<1x1x8x22xbf16>,
    return
  }
  func.func @transform_0(%arg0: i32, %arg1: i32) -> (i32, i32, i32, i32) {
    %c1_i32 = arith.constant 1 : i32
    %0 = arith.muli %arg1, %c1_i32 : i32
    %c0_i32 = arith.constant 0 : i32
    %1 = arith.addi %0, %c0_i32 : i32
    %c0_i32_0 = arith.constant 0 : i32
    %c0_i32_1 = arith.constant 0 : i32
    %c0_i32_2 = arith.constant 0 : i32
    return %arg0, %1, %c0_i32_0, %c0_i32_1 : i32, i32, i32, i32
  }
  func.func @transform_1(%arg0: i32, %arg1: i32) -> (i32, i32, i32, i32) {
    %c1_i32 = arith.constant 1 : i32
    %0 = arith.muli %arg1, %c1_i32 : i32
    %c1_i32_0 = arith.constant 1 : i32
    %1 = arith.addi %0, %c1_i32_0 : i32
    %c0_i32 = arith.constant 0 : i32
    %c0_i32_1 = arith.constant 0 : i32
    %c0_i32_2 = arith.constant 0 : i32
    return %arg0, %1, %c0_i32, %c0_i32_1 : i32, i32, i32, i32
  }
  func.func @transform_2(%arg0: i32, %arg1: i32) -> (i32, i32, i32, i32) {
    %c1_i32 = arith.constant 1 : i32
    %0 = arith.muli %arg1, %c1_i32 : i32
    %c2_i32 = arith.constant 2 : i32
    %1 = arith.addi %0, %c2_i32 : i32
    %c0_i32 = arith.constant 0 : i32
    %c0_i32_0 = arith.constant 0 : i32
    %c0_i32_1 = arith.constant 0 : i32
    return %arg0, %1, %c0_i32, %c0_i32_0 : i32, i32, i32, i32
  }
  func.func @transform_3(%arg0: i32, %arg1: i32) -> (i32, i32, i32) {
    %c0_i32 = arith.constant 0 : i32
    %c0_i32_0 = arith.constant 0 : i32
    %c0_i32_1 = arith.constant 0 : i32
    %c0_i32_2 = arith.constant 0 : i32
    return %c0_i32, %c0_i32_0, %c0_i32_1 : i32, i32, i32
  }
  func.func @transform_4(%arg0: i32, %arg1: i32) -> (i32, i32) {
    %c0_i32 = arith.constant 0 : i32
    %c0_i32_0 = arith.constant 0 : i32
    %c0_i32_1 = arith.constant 0 : i32
    return %c0_i32, %c0_i32_0 : i32, i32
  }
  func.func @transform_5(%arg0: i32, %arg1: i32) -> (i32, i32, i32, i32) {
    %c0_i32 = arith.constant 0 : i32
    %c0_i32_0 = arith.constant 0 : i32
    %c0_i32_1 = arith.constant 0 : i32
    return %arg0, %arg1, %c0_i32, %c0_i32_0 : i32, i32, i32, i32
  }
}

module attributes {stable_mosaic.version = 11 : i64} {
  func.func @_fused_conv_kernel(%arg0: i32, %arg1: i32, %arg2: memref<1x1x8x16xbf16, #tpu.memory_space<vmem>>, %arg3: memref<1x8x8xbf16, #tpu.memory_space<vmem>>, %arg4: memref<8x1xf32, #tpu.memory_space<vmem>>, %arg5: memref<1x1x8x16xbf16, #tpu.memory_space<vmem>>) attributes {dimension_semantics = [#tpu.dimension_semantics<parallel>, #tpu.dimension_semantics<parallel>], iteration_bounds = array<i64: 2, 2>, scalar_prefetch = 0 : i64, scratch_operands = 0 : i64, tpu.core_type = #tpu.core_type<tc>, window_params = [{transform_indices = @transform_0, window_bounds = array<i64: 1, 1, 8, 16>}, {pipeline_mode = #tpu.pipeline_mode<synchronous>, transform_indices = @transform_1, window_bounds = array<i64: 1, 8, 8>}, {pipeline_mode = #tpu.pipeline_mode<synchronous>, transform_indices = @transform_2, window_bounds = array<i64: 8, 1>}, {transform_indices = @transform_3, window_bounds = array<i64: 1, 1, 8, 16>}]} {
    %c0 = arith.constant 0 : index
    %c0_0 = arith.constant 0 : index
    %c0_1 = arith.constant 0 : index
    %c0_2 = arith.constant 0 : index
    %0 = vector.load %arg2[%c0, %c0_0, %c0_1, %c0_2] : memref<1x1x8x16xbf16, #tpu.memory_space<vmem>>, vector<1x1x8x16xbf16>
    %1 = vector.shape_cast %0 : vector<1x1x8x16xbf16> to vector<8x16xbf16>
    %c0_3 = arith.constant 0 : index
    %c0_4 = arith.constant 0 : index
    %c0_5 = arith.constant 0 : index
    %2 = vector.load %arg3[%c0_3, %c0_4, %c0_5] : memref<1x8x8xbf16, #tpu.memory_space<vmem>>, vector<1x8x8xbf16>
    %3 = vector.shape_cast %2 : vector<1x8x8xbf16> to vector<8x8xbf16>
    %cst = arith.constant dense<0.000000e+00> : vector<8x16xf32>
    %4 = tpu.matmul %3, %1, %cst {dimension_numbers = #tpu.dot_dimension_numbers<[1], [0], [0], [1], [0, 0, 1, 1], [], []>} : vector<8x8xbf16>, vector<8x16xbf16>, vector<8x16xf32> -> vector<8x16xf32>
    %c0_6 = arith.constant 0 : index
    %c0_7 = arith.constant 0 : index
    %5 = vector.load %arg4[%c0_6, %c0_7] : memref<8x1xf32, #tpu.memory_space<vmem>>, vector<8x1xf32>
    %6 = vector.broadcast %5 : vector<8x1xf32> to vector<8x16xf32>
    %7 = arith.addf %4, %6 : vector<8x16xf32>
    %8 = arith.truncf %7 : vector<8x16xf32> to vector<8x16xbf16>
    %c0_8 = arith.constant 0 : index
    %c0_9 = arith.constant 0 : index
    %c0_10 = arith.constant 0 : index
    %c0_11 = arith.constant 0 : index
    %9 = vector.load %arg5[%c0_8, %c0_9, %c0_10, %c0_11] : memref<1x1x8x16xbf16, #tpu.memory_space<vmem>>, vector<1x1x8x16xbf16>
    %10 = vector.shape_cast %9 : vector<1x1x8x16xbf16> to vector<8x16xbf16>
    %11 = vector.shape_cast %8 : vector<8x16xbf16> to vector<1x1x8x16xbf16>
    tpu.vector_store %arg5[%c0_8, %c0_9, %c0_10, %c0_11], %11 {strides = array<i32>} : memref<1x1x8x16xbf16, #tpu.memory_space<vmem>>, vector<1x1x8x16xbf16>,
    return
  }
  func.func @transform_0(%arg0: i32, %arg1: i32) -> (i32, i32, i32, i32) {
    %c1_i32 = arith.constant 1 : i32
    %0 = arith.muli %arg1, %c1_i32 : i32
    %c0_i32 = arith.constant 0 : i32
    %1 = arith.addi %0, %c0_i32 : i32
    %c0_i32_0 = arith.constant 0 : i32
    %c0_i32_1 = arith.constant 0 : i32
    %c0_i32_2 = arith.constant 0 : i32
    return %arg0, %1, %c0_i32_0, %c0_i32_1 : i32, i32, i32, i32
  }
  func.func @transform_1(%arg0: i32, %arg1: i32) -> (i32, i32, i32) {
    %c0_i32 = arith.constant 0 : i32
    %c0_i32_0 = arith.constant 0 : i32
    %c0_i32_1 = arith.constant 0 : i32
    %c0_i32_2 = arith.constant 0 : i32
    return %c0_i32, %c0_i32_0, %c0_i32_1 : i32, i32, i32
  }
  func.func @transform_2(%arg0: i32, %arg1: i32) -> (i32, i32) {
    %c0_i32 = arith.constant 0 : i32
    %c0_i32_0 = arith.constant 0 : i32
    %c0_i32_1 = arith.constant 0 : i32
    return %c0_i32, %c0_i32_0 : i32, i32
  }
  func.func @transform_3(%arg0: i32, %arg1: i32) -> (i32, i32, i32, i32) {
    %c0_i32 = arith.constant 0 : i32
    %c0_i32_0 = arith.constant 0 : i32
    %c0_i32_1 = arith.constant 0 : i32
    return %arg0, %arg1, %c0_i32, %c0_i32_0 : i32, i32, i32, i32
  }
}

module attributes {stable_mosaic.version = 11 : i64} {
  func.func @_fused_conv_kernel(%arg0: i32, %arg1: i32, %arg2: memref<1x1x8x20xbf16, #tpu.memory_space<vmem>>, %arg3: memref<2x8x8xbf16, #tpu.memory_space<vmem>>, %arg4: memref<8x1xf32, #tpu.memory_space<vmem>>, %arg5: memref<1x1x8x16xbf16, #tpu.memory_space<vmem>>) attributes {dimension_semantics = [#tpu.dimension_semantics<parallel>, #tpu.dimension_semantics<parallel>], iteration_bounds = array<i64: 2, 2>, scalar_prefetch = 0 : i64, scratch_operands = 0 : i64, tpu.core_type = #tpu.core_type<tc>, window_params = [{transform_indices = @transform_0, window_bounds = array<i64: 1, 1, 8, 20>}, {pipeline_mode = #tpu.pipeline_mode<synchronous>, transform_indices = @transform_1, window_bounds = array<i64: 2, 8, 8>}, {pipeline_mode = #tpu.pipeline_mode<synchronous>, transform_indices = @transform_2, window_bounds = array<i64: 8, 1>}, {transform_indices = @transform_3, window_bounds = array<i64: 1, 1, 8, 16>}]} {
    %c0 = arith.constant 0 : index
    %c0_0 = arith.constant 0 : index
    %c0_1 = arith.constant 0 : index
    %c0_2 = arith.constant 0 : index
    %0 = vector.load %arg2[%c0, %c0_0, %c0_1, %c0_2] : memref<1x1x8x20xbf16, #tpu.memory_space<vmem>>, vector<1x1x8x16xbf16>
    %1 = vector.shape_cast %0 : vector<1x1x8x16xbf16> to vector<8x16xbf16>
    %c0_3 = arith.constant 0 : index
    %c0_4 = arith.constant 0 : index
    %c0_5 = arith.constant 0 : index
    %2 = vector.load %arg3[%c0_3, %c0_4, %c0_5] : memref<2x8x8xbf16, #tpu.memory_space<vmem>>, vector<1x8x8xbf16>
    %3 = vector.shape_cast %2 : vector<1x8x8xbf16> to vector<8x8xbf16>
    %cst = arith.constant dense<0.000000e+00> : vector<8x16xf32>
    %4 = tpu.matmul %3, %1, %cst {dimension_numbers = #tpu.dot_dimension_numbers<[1], [0], [0], [1], [0, 0, 1, 1], [], []>} : vector<8x8xbf16>, vector<8x16xbf16>, vector<8x16xf32> -> vector<8x16xf32>
    %c0_6 = arith.constant 0 : index
    %c0_7 = arith.constant 0 : index
    %c0_8 = arith.constant 0 : index
    %c4 = arith.constant 4 : index
    %5 = vector.load %arg2[%c0_6, %c0_7, %c0_8, %c4] : memref<1x1x8x20xbf16, #tpu.memory_space<vmem>>, vector<1x1x8x16xbf16>
    %6 = vector.shape_cast %5 : vector<1x1x8x16xbf16> to vector<8x16xbf16>
    %c1 = arith.constant 1 : index
    %c0_9 = arith.constant 0 : index
    %c0_10 = arith.constant 0 : index
    %7 = vector.load %arg3[%c1, %c0_9, %c0_10] : memref<2x8x8xbf16, #tpu.memory_space<vmem>>, vector<1x8x8xbf16>
    %8 = vector.shape_cast %7 : vector<1x8x8xbf16> to vector<8x8xbf16>
    %cst_11 = arith.constant dense<0.000000e+00> : vector<8x16xf32>
    %9 = tpu.matmul %8, %6, %cst_11 {dimension_numbers = #tpu.dot_dimension_numbers<[1], [0], [0], [1], [0, 0, 1, 1], [], []>} : vector<8x8xbf16>, vector<8x16xbf16>, vector<8x16xf32> -> vector<8x16xf32>
    %10 = arith.addf %4, %9 : vector<8x16xf32>
    %c0_12 = arith.constant 0 : index
    %c0_13 = arith.constant 0 : index
    %11 = vector.load %arg4[%c0_12, %c0_13] : memref<8x1xf32, #tpu.memory_space<vmem>>, vector<8x1xf32>
    %12 = vector.broadcast %11 : vector<8x1xf32> to vector<8x16xf32>
    %13 = arith.addf %10, %12 : vector<8x16xf32>
    %14 = arith.truncf %13 : vector<8x16xf32> to vector<8x16xbf16>
    %c0_14 = arith.constant 0 : index
    %c0_15 = arith.constant 0 : index
    %c0_16 = arith.constant 0 : index
    %c0_17 = arith.constant 0 : index
    %15 = vector.load %arg5[%c0_14, %c0_15, %c0_16, %c0_17] : memref<1x1x8x16xbf16, #tpu.memory_space<vmem>>, vector<1x1x8x16xbf16>
    %16 = vector.shape_cast %15 : vector<1x1x8x16xbf16> to vector<8x16xbf16>
    %17 = vector.shape_cast %14 : vector<8x16xbf16> to vector<1x1x8x16xbf16>
    tpu.vector_store %arg5[%c0_14, %c0_15, %c0_16, %c0_17], %17 {strides = array<i32>} : memref<1x1x8x16xbf16, #tpu.memory_space<vmem>>, vector<1x1x8x16xbf16>,
    return
  }
  func.func @transform_0(%arg0: i32, %arg1: i32) -> (i32, i32, i32, i32) {
    %c1_i32 = arith.constant 1 : i32
    %0 = arith.muli %arg1, %c1_i32 : i32
    %c0_i32 = arith.constant 0 : i32
    %1 = arith.addi %0, %c0_i32 : i32
    %c0_i32_0 = arith.constant 0 : i32
    %c0_i32_1 = arith.constant 0 : i32
    %c0_i32_2 = arith.constant 0 : i32
    return %arg0, %1, %c0_i32_0, %c0_i32_1 : i32, i32, i32, i32
  }
  func.func @transform_1(%arg0: i32, %arg1: i32) -> (i32, i32, i32) {
    %c0_i32 = arith.constant 0 : i32
    %c0_i32_0 = arith.constant 0 : i32
    %c0_i32_1 = arith.constant 0 : i32
    %c0_i32_2 = arith.constant 0 : i32
    return %c0_i32, %c0_i32_0, %c0_i32_1 : i32, i32, i32
  }
  func.func @transform_2(%arg0: i32, %arg1: i32) -> (i32, i32) {
    %c0_i32 = arith.constant 0 : i32
    %c0_i32_0 = arith.constant 0 : i32
    %c0_i32_1 = arith.constant 0 : i32
    return %c0_i32, %c0_i32_0 : i32, i32
  }
  func.func @transform_3(%arg0: i32, %arg1: i32) -> (i32, i32, i32, i32) {
    %c0_i32 = arith.constant 0 : i32
    %c0_i32_0 = arith.constant 0 : i32
    %c0_i32_1 = arith.constant 0 : i32
    return %arg0, %arg1, %c0_i32, %c0_i32_0 : i32, i32, i32, i32
  }
}

module attributes {stable_mosaic.version = 11 : i64} {
  func.func @_fused_conv_kernel(%arg0: i32, %arg1: i32, %arg2: memref<1x1x8x16xbf16, #tpu.memory_space<vmem>>, %arg3: memref<1x1x8x16xbf16, #tpu.memory_space<vmem>>, %arg4: memref<2x8x8xbf16, #tpu.memory_space<vmem>>, %arg5: memref<8x1xf32, #tpu.memory_space<vmem>>, %arg6: memref<1x1x8x16xbf16, #tpu.memory_space<vmem>>) attributes {dimension_semantics = [#tpu.dimension_semantics<parallel>, #tpu.dimension_semantics<parallel>], iteration_bounds = array<i64: 2, 2>, scalar_prefetch = 0 : i64, scratch_operands = 0 : i64, tpu.core_type = #tpu.core_type<tc>, window_params = [{transform_indices = @transform_0, window_bounds = array<i64: 1, 1, 8, 16>}, {transform_indices = @transform_1, window_bounds = array<i64: 1, 1, 8, 16>}, {pipeline_mode = #tpu.pipeline_mode<synchronous>, transform_indices = @transform_2, window_bounds = array<i64: 2, 8, 8>}, {pipeline_mode = #tpu.pipeline_mode<synchronous>, transform_indices = @transform_3, window_bounds = array<i64: 8, 1>}, {transform_indices = @transform_4, window_bounds = array<i64: 1, 1, 8, 16>}]} {
    %c0 = arith.constant 0 : index
    %c0_0 = arith.constant 0 : index
    %c0_1 = arith.constant 0 : index
    %c0_2 = arith.constant 0 : index
    %0 = vector.load %arg2[%c0, %c0_0, %c0_1, %c0_2] : memref<1x1x8x16xbf16, #tpu.memory_space<vmem>>, vector<1x1x8x16xbf16>
    %1 = vector.shape_cast %0 : vector<1x1x8x16xbf16> to vector<8x16xbf16>
    %c0_3 = arith.constant 0 : index
    %c0_4 = arith.constant 0 : index
    %c0_5 = arith.constant 0 : index
    %2 = vector.load %arg4[%c0_3, %c0_4, %c0_5] : memref<2x8x8xbf16, #tpu.memory_space<vmem>>, vector<1x8x8xbf16>
    %3 = vector.shape_cast %2 : vector<1x8x8xbf16> to vector<8x8xbf16>
    %cst = arith.constant dense<0.000000e+00> : vector<8x16xf32>
    %4 = tpu.matmul %3, %1, %cst {dimension_numbers = #tpu.dot_dimension_numbers<[1], [0], [0], [1], [0, 0, 1, 1], [], []>} : vector<8x8xbf16>, vector<8x16xbf16>, vector<8x16xf32> -> vector<8x16xf32>
    %c0_6 = arith.constant 0 : index
    %c0_7 = arith.constant 0 : index
    %c0_8 = arith.constant 0 : index
    %c0_9 = arith.constant 0 : index
    %5 = vector.load %arg3[%c0_6, %c0_7, %c0_8, %c0_9] : memref<1x1x8x16xbf16, #tpu.memory_space<vmem>>, vector<1x1x8x16xbf16>
    %6 = vector.shape_cast %5 : vector<1x1x8x16xbf16> to vector<8x16xbf16>
    %c1 = arith.constant 1 : index
    %c0_10 = arith.constant 0 : index
    %c0_11 = arith.constant 0 : index
    %7 = vector.load %arg4[%c1, %c0_10, %c0_11] : memref<2x8x8xbf16, #tpu.memory_space<vmem>>, vector<1x8x8xbf16>
    %8 = vector.shape_cast %7 : vector<1x8x8xbf16> to vector<8x8xbf16>
    %cst_12 = arith.constant dense<0.000000e+00> : vector<8x16xf32>
    %9 = tpu.matmul %8, %6, %cst_12 {dimension_numbers = #tpu.dot_dimension_numbers<[1], [0], [0], [1], [0, 0, 1, 1], [], []>} : vector<8x8xbf16>, vector<8x16xbf16>, vector<8x16xf32> -> vector<8x16xf32>
    %10 = arith.addf %4, %9 : vector<8x16xf32>
    %c0_13 = arith.constant 0 : index
    %c0_14 = arith.constant 0 : index
    %11 = vector.load %arg5[%c0_13, %c0_14] : memref<8x1xf32, #tpu.memory_space<vmem>>, vector<8x1xf32>
    %12 = vector.broadcast %11 : vector<8x1xf32> to vector<8x16xf32>
    %13 = arith.addf %10, %12 : vector<8x16xf32>
    %14 = arith.truncf %13 : vector<8x16xf32> to vector<8x16xbf16>
    %c0_15 = arith.constant 0 : index
    %c0_16 = arith.constant 0 : index
    %c0_17 = arith.constant 0 : index
    %c0_18 = arith.constant 0 : index
    %15 = vector.load %arg6[%c0_15, %c0_16, %c0_17, %c0_18] : memref<1x1x8x16xbf16, #tpu.memory_space<vmem>>, vector<1x1x8x16xbf16>
    %16 = vector.shape_cast %15 : vector<1x1x8x16xbf16> to vector<8x16xbf16>
    %17 = vector.shape_cast %14 : vector<8x16xbf16> to vector<1x1x8x16xbf16>
    tpu.vector_store %arg6[%c0_15, %c0_16, %c0_17, %c0_18], %17 {strides = array<i32>} : memref<1x1x8x16xbf16, #tpu.memory_space<vmem>>, vector<1x1x8x16xbf16>,
    return
  }
  func.func @transform_0(%arg0: i32, %arg1: i32) -> (i32, i32, i32, i32) {
    %c1_i32 = arith.constant 1 : i32
    %0 = arith.muli %arg1, %c1_i32 : i32
    %c0_i32 = arith.constant 0 : i32
    %1 = arith.addi %0, %c0_i32 : i32
    %c0_i32_0 = arith.constant 0 : i32
    %c0_i32_1 = arith.constant 0 : i32
    %c0_i32_2 = arith.constant 0 : i32
    return %arg0, %1, %c0_i32_0, %c0_i32_1 : i32, i32, i32, i32
  }
  func.func @transform_1(%arg0: i32, %arg1: i32) -> (i32, i32, i32, i32) {
    %c1_i32 = arith.constant 1 : i32
    %0 = arith.muli %arg1, %c1_i32 : i32
    %c1_i32_0 = arith.constant 1 : i32
    %1 = arith.addi %0, %c1_i32_0 : i32
    %c0_i32 = arith.constant 0 : i32
    %c0_i32_1 = arith.constant 0 : i32
    %c0_i32_2 = arith.constant 0 : i32
    return %arg0, %1, %c0_i32, %c0_i32_1 : i32, i32, i32, i32
  }
  func.func @transform_2(%arg0: i32, %arg1: i32) -> (i32, i32, i32) {
    %c0_i32 = arith.constant 0 : i32
    %c0_i32_0 = arith.constant 0 : i32
    %c0_i32_1 = arith.constant 0 : i32
    %c0_i32_2 = arith.constant 0 : i32
    return %c0_i32, %c0_i32_0, %c0_i32_1 : i32, i32, i32
  }
  func.func @transform_3(%arg0: i32, %arg1: i32) -> (i32, i32) {
    %c0_i32 = arith.constant 0 : i32
    %c0_i32_0 = arith.constant 0 : i32
    %c0_i32_1 = arith.constant 0 : i32
    return %c0_i32, %c0_i32_0 : i32, i32
  }
  func.func @transform_4(%arg0: i32, %arg1: i32) -> (i32, i32, i32, i32) {
    %c0_i32 = arith.constant 0 : i32
    %c0_i32_0 = arith.constant 0 : i32
    %c0_i32_1 = arith.constant 0 : i32
    return %arg0, %arg1, %c0_i32, %c0_i32_0 : i32, i32, i32, i32
  }
}

module attributes {stable_mosaic.version = 11 : i64} {
  func.func @_fused_conv_kernel(%arg0: i32, %arg1: i32, %arg2: memref<1x1x8x25xbf16, #tpu.memory_space<vmem>>, %arg3: memref<4x8x8xbf16, #tpu.memory_space<vmem>>, %arg4: memref<8x1xf32, #tpu.memory_space<vmem>>, %arg5: memref<1x1x8x19xbf16, #tpu.memory_space<vmem>>) attributes {dimension_semantics = [#tpu.dimension_semantics<parallel>, #tpu.dimension_semantics<parallel>], iteration_bounds = array<i64: 2, 2>, scalar_prefetch = 0 : i64, scratch_operands = 0 : i64, tpu.core_type = #tpu.core_type<tc>, window_params = [{transform_indices = @transform_0, window_bounds = array<i64: 1, 1, 8, 25>}, {pipeline_mode = #tpu.pipeline_mode<synchronous>, transform_indices = @transform_1, window_bounds = array<i64: 4, 8, 8>}, {pipeline_mode = #tpu.pipeline_mode<synchronous>, transform_indices = @transform_2, window_bounds = array<i64: 8, 1>}, {transform_indices = @transform_3, window_bounds = array<i64: 1, 1, 8, 19>}]} {
    %c0 = arith.constant 0 : index
    %c0_0 = arith.constant 0 : index
    %c0_1 = arith.constant 0 : index
    %c0_2 = arith.constant 0 : index
    %0 = vector.load %arg2[%c0, %c0_0, %c0_1, %c0_2] : memref<1x1x8x25xbf16, #tpu.memory_space<vmem>>, vector<1x1x8x19xbf16>
    %1 = vector.shape_cast %0 : vector<1x1x8x19xbf16> to vector<8x19xbf16>
    %c0_3 = arith.constant 0 : index
    %c0_4 = arith.constant 0 : index
    %c0_5 = arith.constant 0 : index
    %2 = vector.load %arg3[%c0_3, %c0_4, %c0_5] : memref<4x8x8xbf16, #tpu.memory_space<vmem>>, vector<1x8x8xbf16>
    %3 = vector.shape_cast %2 : vector<1x8x8xbf16> to vector<8x8xbf16>
    %cst = arith.constant dense<0.000000e+00> : vector<8x19xf32>
    %4 = tpu.matmul %3, %1, %cst {dimension_numbers = #tpu.dot_dimension_numbers<[1], [0], [0], [1], [0, 0, 1, 1], [], []>} : vector<8x8xbf16>, vector<8x19xbf16>, vector<8x19xf32> -> vector<8x19xf32>
    %c0_6 = arith.constant 0 : index
    %c0_7 = arith.constant 0 : index
    %c0_8 = arith.constant 0 : index
    %c1 = arith.constant 1 : index
    %5 = vector.load %arg2[%c0_6, %c0_7, %c0_8, %c1] : memref<1x1x8x25xbf16, #tpu.memory_space<vmem>>, vector<1x1x8x19xbf16>
    %6 = vector.shape_cast %5 : vector<1x1x8x19xbf16> to vector<8x19xbf16>
    %c1_9 = arith.constant 1 : index
    %c0_10 = arith.constant 0 : index
    %c0_11 = arith.constant 0 : index
    %7 = vector.load %arg3[%c1_9, %c0_10, %c0_11] : memref<4x8x8xbf16, #tpu.memory_space<vmem>>, vector<1x8x8xbf16>
    %8 = vector.shape_cast %7 : vector<1x8x8xbf16> to vector<8x8xbf16>
    %cst_12 = arith.constant dense<0.000000e+00> : vector<8x19xf32>
    %9 = tpu.matmul %8, %6, %cst_12 {dimension_numbers = #tpu.dot_dimension_numbers<[1], [0], [0], [1], [0, 0, 1, 1], [], []>} : vector<8x8xbf16>, vector<8x19xbf16>, vector<8x19xf32> -> vector<8x19xf32>
    %10 = arith.addf %4, %9 : vector<8x19xf32>
    %c0_13 = arith.constant 0 : index
    %c0_14 = arith.constant 0 : index
    %c0_15 = arith.constant 0 : index
    %c5 = arith.constant 5 : index
    %11 = vector.load %arg2[%c0_13, %c0_14, %c0_15, %c5] : memref<1x1x8x25xbf16, #tpu.memory_space<vmem>>, vector<1x1x8x19xbf16>
    %12 = vector.shape_cast %11 : vector<1x1x8x19xbf16> to vector<8x19xbf16>
    %c2 = arith.constant 2 : index
    %c0_16 = arith.constant 0 : index
    %c0_17 = arith.constant 0 : index
    %13 = vector.load %arg3[%c2, %c0_16, %c0_17] : memref<4x8x8xbf16, #tpu.memory_space<vmem>>, vector<1x8x8xbf16>
    %14 = vector.shape_cast %13 : vector<1x8x8xbf16> to vector<8x8xbf16>
    %cst_18 = arith.constant dense<0.000000e+00> : vector<8x19xf32>
    %15 = tpu.matmul %14, %12, %cst_18 {dimension_numbers = #tpu.dot_dimension_numbers<[1], [0], [0], [1], [0, 0, 1, 1], [], []>} : vector<8x8xbf16>, vector<8x19xbf16>, vector<8x19xf32> -> vector<8x19xf32>
    %16 = arith.addf %10, %15 : vector<8x19xf32>
    %c0_19 = arith.constant 0 : index
    %c0_20 = arith.constant 0 : index
    %c0_21 = arith.constant 0 : index
    %c6 = arith.constant 6 : index
    %17 = vector.load %arg2[%c0_19, %c0_20, %c0_21, %c6] : memref<1x1x8x25xbf16, #tpu.memory_space<vmem>>, vector<1x1x8x19xbf16>
    %18 = vector.shape_cast %17 : vector<1x1x8x19xbf16> to vector<8x19xbf16>
    %c3 = arith.constant 3 : index
    %c0_22 = arith.constant 0 : index
    %c0_23 = arith.constant 0 : index
    %19 = vector.load %arg3[%c3, %c0_22, %c0_23] : memref<4x8x8xbf16, #tpu.memory_space<vmem>>, vector<1x8x8xbf16>
    %20 = vector.shape_cast %19 : vector<1x8x8xbf16> to vector<8x8xbf16>
    %cst_24 = arith.constant dense<0.000000e+00> : vector<8x19xf32>
    %21 = tpu.matmul %20, %18, %cst_24 {dimension_numbers = #tpu.dot_dimension_numbers<[1], [0], [0], [1], [0, 0, 1, 1], [], []>} : vector<8x8xbf16>, vector<8x19xbf16>, vector<8x19xf32> -> vector<8x19xf32>
    %22 = arith.addf %16, %21 : vector<8x19xf32>
    %c0_25 = arith.constant 0 : index
    %c0_26 = arith.constant 0 : index
    %23 = vector.load %arg4[%c0_25, %c0_26] : memref<8x1xf32, #tpu.memory_space<vmem>>, vector<8x1xf32>
    %24 = vector.broadcast %23 : vector<8x1xf32> to vector<8x19xf32>
    %25 = arith.addf %22, %24 : vector<8x19xf32>
    %26 = arith.truncf %25 : vector<8x19xf32> to vector<8x19xbf16>
    %c0_27 = arith.constant 0 : index
    %c0_28 = arith.constant 0 : index
    %c0_29 = arith.constant 0 : index
    %c0_30 = arith.constant 0 : index
    %27 = vector.load %arg5[%c0_27, %c0_28, %c0_29, %c0_30] : memref<1x1x8x19xbf16, #tpu.memory_space<vmem>>, vector<1x1x8x19xbf16>
    %28 = vector.shape_cast %27 : vector<1x1x8x19xbf16> to vector<8x19xbf16>
    %29 = vector.shape_cast %26 : vector<8x19xbf16> to vector<1x1x8x19xbf16>
    tpu.vector_store %arg5[%c0_27, %c0_28, %c0_29, %c0_30], %29 {strides = array<i32>} : memref<1x1x8x19xbf16, #tpu.memory_space<vmem>>, vector<1x1x8x19xbf16>,
    return
  }
  func.func @transform_0(%arg0: i32, %arg1: i32) -> (i32, i32, i32, i32) {
    %c1_i32 = arith.constant 1 : i32
    %0 = arith.muli %arg1, %c1_i32 : i32
    %c0_i32 = arith.constant 0 : i32
    %1 = arith.addi %0, %c0_i32 : i32
    %c0_i32_0 = arith.constant 0 : i32
    %c0_i32_1 = arith.constant 0 : i32
    %c0_i32_2 = arith.constant 0 : i32
    return %arg0, %1, %c0_i32_0, %c0_i32_1 : i32, i32, i32, i32
  }
  func.func @transform_1(%arg0: i32, %arg1: i32) -> (i32, i32, i32) {
    %c0_i32 = arith.constant 0 : i32
    %c0_i32_0 = arith.constant 0 : i32
    %c0_i32_1 = arith.constant 0 : i32
    %c0_i32_2 = arith.constant 0 : i32
    return %c0_i32, %c0_i32_0, %c0_i32_1 : i32, i32, i32
  }
  func.func @transform_2(%arg0: i32, %arg1: i32) -> (i32, i32) {
    %c0_i32 = arith.constant 0 : i32
    %c0_i32_0 = arith.constant 0 : i32
    %c0_i32_1 = arith.constant 0 : i32
    return %c0_i32, %c0_i32_0 : i32, i32
  }
  func.func @transform_3(%arg0: i32, %arg1: i32) -> (i32, i32, i32, i32) {
    %c0_i32 = arith.constant 0 : i32
    %c0_i32_0 = arith.constant 0 : i32
    %c0_i32_1 = arith.constant 0 : i32
    return %arg0, %arg1, %c0_i32, %c0_i32_0 : i32, i32, i32, i32
  }
}

module attributes {stable_mosaic.version = 11 : i64} {
  func.func @_fused_conv_kernel(%arg0: i32, %arg1: i32, %arg2: memref<1x1x8x20xbf16, #tpu.memory_space<vmem>>, %arg3: memref<1x1x8x20xbf16, #tpu.memory_space<vmem>>, %arg4: memref<4x8x8xbf16, #tpu.memory_space<vmem>>, %arg5: memref<8x1xf32, #tpu.memory_space<vmem>>, %arg6: memref<1x1x8x16xbf16, #tpu.memory_space<vmem>>) attributes {dimension_semantics = [#tpu.dimension_semantics<parallel>, #tpu.dimension_semantics<parallel>], iteration_bounds = array<i64: 2, 2>, scalar_prefetch = 0 : i64, scratch_operands = 0 : i64, tpu.core_type = #tpu.core_type<tc>, window_params = [{transform_indices = @transform_0, window_bounds = array<i64: 1, 1, 8, 20>}, {transform_indices = @transform_1, window_bounds = array<i64: 1, 1, 8, 20>}, {pipeline_mode = #tpu.pipeline_mode<synchronous>, transform_indices = @transform_2, window_bounds = array<i64: 4, 8, 8>}, {pipeline_mode = #tpu.pipeline_mode<synchronous>, transform_indices = @transform_3, window_bounds = array<i64: 8, 1>}, {transform_indices = @transform_4, window_bounds = array<i64: 1, 1, 8, 16>}]} {
    %c0 = arith.constant 0 : index
    %c0_0 = arith.constant 0 : index
    %c0_1 = arith.constant 0 : index
    %c0_2 = arith.constant 0 : index
    %0 = vector.load %arg2[%c0, %c0_0, %c0_1, %c0_2] : memref<1x1x8x20xbf16, #tpu.memory_space<vmem>>, vector<1x1x8x16xbf16>
    %1 = vector.shape_cast %0 : vector<1x1x8x16xbf16> to vector<8x16xbf16>
    %c0_3 = arith.constant 0 : index
    %c0_4 = arith.constant 0 : index
    %c0_5 = arith.constant 0 : index
    %2 = vector.load %arg4[%c0_3, %c0_4, %c0_5] : memref<4x8x8xbf16, #tpu.memory_space<vmem>>, vector<1x8x8xbf16>
    %3 = vector.shape_cast %2 : vector<1x8x8xbf16> to vector<8x8xbf16>
    %cst = arith.constant dense<0.000000e+00> : vector<8x16xf32>
    %4 = tpu.matmul %3, %1, %cst {dimension_numbers = #tpu.dot_dimension_numbers<[1], [0], [0], [1], [0, 0, 1, 1], [], []>} : vector<8x8xbf16>, vector<8x16xbf16>, vector<8x16xf32> -> vector<8x16xf32>
    %c0_6 = arith.constant 0 : index
    %c0_7 = arith.constant 0 : index
    %c0_8 = arith.constant 0 : index
    %c4 = arith.constant 4 : index
    %5 = vector.load %arg2[%c0_6, %c0_7, %c0_8, %c4] : memref<1x1x8x20xbf16, #tpu.memory_space<vmem>>, vector<1x1x8x16xbf16>
    %6 = vector.shape_cast %5 : vector<1x1x8x16xbf16> to vector<8x16xbf16>
    %c1 = arith.constant 1 : index
    %c0_9 = arith.constant 0 : index
    %c0_10 = arith.constant 0 : index
    %7 = vector.load %arg4[%c1, %c0_9, %c0_10] : memref<4x8x8xbf16, #tpu.memory_space<vmem>>, vector<1x8x8xbf16>
    %8 = vector.shape_cast %7 : vector<1x8x8xbf16> to vector<8x8xbf16>
    %cst_11 = arith.constant dense<0.000000e+00> : vector<8x16xf32>
    %9 = tpu.matmul %8, %6, %cst_11 {dimension_numbers = #tpu.dot_dimension_numbers<[1], [0], [0], [1], [0, 0, 1, 1], [], []>} : vector<8x8xbf16>, vector<8x16xbf16>, vector<8x16xf32> -> vector<8x16xf32>
    %10 = arith.addf %4, %9 : vector<8x16xf32>
    %c0_12 = arith.constant 0 : index
    %c0_13 = arith.constant 0 : index
    %c0_14 = arith.constant 0 : index
    %c0_15 = arith.constant 0 : index
    %11 = vector.load %arg3[%c0_12, %c0_13, %c0_14, %c0_15] : memref<1x1x8x20xbf16, #tpu.memory_space<vmem>>, vector<1x1x8x16xbf16>
    %12 = vector.shape_cast %11 : vector<1x1x8x16xbf16> to vector<8x16xbf16>
    %c2 = arith.constant 2 : index
    %c0_16 = arith.constant 0 : index
    %c0_17 = arith.constant 0 : index
    %13 = vector.load %arg4[%c2, %c0_16, %c0_17] : memref<4x8x8xbf16, #tpu.memory_space<vmem>>, vector<1x8x8xbf16>
    %14 = vector.shape_cast %13 : vector<1x8x8xbf16> to vector<8x8xbf16>
    %cst_18 = arith.constant dense<0.000000e+00> : vector<8x16xf32>
    %15 = tpu.matmul %14, %12, %cst_18 {dimension_numbers = #tpu.dot_dimension_numbers<[1], [0], [0], [1], [0, 0, 1, 1], [], []>} : vector<8x8xbf16>, vector<8x16xbf16>, vector<8x16xf32> -> vector<8x16xf32>
    %16 = arith.addf %10, %15 : vector<8x16xf32>
    %c0_19 = arith.constant 0 : index
    %c0_20 = arith.constant 0 : index
    %c0_21 = arith.constant 0 : index
    %c4_22 = arith.constant 4 : index
    %17 = vector.load %arg3[%c0_19, %c0_20, %c0_21, %c4_22] : memref<1x1x8x20xbf16, #tpu.memory_space<vmem>>, vector<1x1x8x16xbf16>
    %18 = vector.shape_cast %17 : vector<1x1x8x16xbf16> to vector<8x16xbf16>
    %c3 = arith.constant 3 : index
    %c0_23 = arith.constant 0 : index
    %c0_24 = arith.constant 0 : index
    %19 = vector.load %arg4[%c3, %c0_23, %c0_24] : memref<4x8x8xbf16, #tpu.memory_space<vmem>>, vector<1x8x8xbf16>
    %20 = vector.shape_cast %19 : vector<1x8x8xbf16> to vector<8x8xbf16>
    %cst_25 = arith.constant dense<0.000000e+00> : vector<8x16xf32>
    %21 = tpu.matmul %20, %18, %cst_25 {dimension_numbers = #tpu.dot_dimension_numbers<[1], [0], [0], [1], [0, 0, 1, 1], [], []>} : vector<8x8xbf16>, vector<8x16xbf16>, vector<8x16xf32> -> vector<8x16xf32>
    %22 = arith.addf %16, %21 : vector<8x16xf32>
    %c0_26 = arith.constant 0 : index
    %c0_27 = arith.constant 0 : index
    %23 = vector.load %arg5[%c0_26, %c0_27] : memref<8x1xf32, #tpu.memory_space<vmem>>, vector<8x1xf32>
    %24 = vector.broadcast %23 : vector<8x1xf32> to vector<8x16xf32>
    %25 = arith.addf %22, %24 : vector<8x16xf32>
    %26 = arith.truncf %25 : vector<8x16xf32> to vector<8x16xbf16>
    %c0_28 = arith.constant 0 : index
    %c0_29 = arith.constant 0 : index
    %c0_30 = arith.constant 0 : index
    %c0_31 = arith.constant 0 : index
    %27 = vector.load %arg6[%c0_28, %c0_29, %c0_30, %c0_31] : memref<1x1x8x16xbf16, #tpu.memory_space<vmem>>, vector<1x1x8x16xbf16>
    %28 = vector.shape_cast %27 : vector<1x1x8x16xbf16> to vector<8x16xbf16>
    %29 = vector.shape_cast %26 : vector<8x16xbf16> to vector<1x1x8x16xbf16>
    tpu.vector_store %arg6[%c0_28, %c0_29, %c0_30, %c0_31], %29 {strides = array<i32>} : memref<1x1x8x16xbf16, #tpu.memory_space<vmem>>, vector<1x1x8x16xbf16>,
    return
  }
  func.func @transform_0(%arg0: i32, %arg1: i32) -> (i32, i32, i32, i32) {
    %c1_i32 = arith.constant 1 : i32
    %0 = arith.muli %arg1, %c1_i32 : i32
    %c0_i32 = arith.constant 0 : i32
    %1 = arith.addi %0, %c0_i32 : i32
    %c0_i32_0 = arith.constant 0 : i32
    %c0_i32_1 = arith.constant 0 : i32
    %c0_i32_2 = arith.constant 0 : i32
    return %arg0, %1, %c0_i32_0, %c0_i32_1 : i32, i32, i32, i32
  }
  func.func @transform_1(%arg0: i32, %arg1: i32) -> (i32, i32, i32, i32) {
    %c1_i32 = arith.constant 1 : i32
    %0 = arith.muli %arg1, %c1_i32 : i32
    %c1_i32_0 = arith.constant 1 : i32
    %1 = arith.addi %0, %c1_i32_0 : i32
    %c0_i32 = arith.constant 0 : i32
    %c0_i32_1 = arith.constant 0 : i32
    %c0_i32_2 = arith.constant 0 : i32
    return %arg0, %1, %c0_i32, %c0_i32_1 : i32, i32, i32, i32
  }
  func.func @transform_2(%arg0: i32, %arg1: i32) -> (i32, i32, i32) {
    %c0_i32 = arith.constant 0 : i32
    %c0_i32_0 = arith.constant 0 : i32
    %c0_i32_1 = arith.constant 0 : i32
    %c0_i32_2 = arith.constant 0 : i32
    return %c0_i32, %c0_i32_0, %c0_i32_1 : i32, i32, i32
  }
  func.func @transform_3(%arg0: i32, %arg1: i32) -> (i32, i32) {
    %c0_i32 = arith.constant 0 : i32
    %c0_i32_0 = arith.constant 0 : i32
    %c0_i32_1 = arith.constant 0 : i32
    return %c0_i32, %c0_i32_0 : i32, i32
  }
  func.func @transform_4(%arg0: i32, %arg1: i32) -> (i32, i32, i32, i32) {
    %c0_i32 = arith.constant 0 : i32
    %c0_i32_0 = arith.constant 0 : i32
    %c0_i32_1 = arith.constant 0 : i32
    return %arg0, %arg1, %c0_i32, %c0_i32_0 : i32, i32, i32, i32
  }
}

module attributes {stable_mosaic.version = 11 : i64} {
  func.func @_fused_conv_kernel(%arg0: i32, %arg1: i32, %arg2: memref<1x1x8x20xbf16, #tpu.memory_space<vmem>>, %arg3: memref<1x1x8x20xbf16, #tpu.memory_space<vmem>>, %arg4: memref<4x8x8xbf16, #tpu.memory_space<vmem>>, %arg5: memref<8x1xf32, #tpu.memory_space<vmem>>, %arg6: memref<1x1x8x19xbf16, #tpu.memory_space<vmem>>) attributes {dimension_semantics = [#tpu.dimension_semantics<parallel>, #tpu.dimension_semantics<parallel>], iteration_bounds = array<i64: 2, 2>, scalar_prefetch = 0 : i64, scratch_operands = 0 : i64, tpu.core_type = #tpu.core_type<tc>, window_params = [{transform_indices = @transform_0, window_bounds = array<i64: 1, 1, 8, 20>}, {transform_indices = @transform_1, window_bounds = array<i64: 1, 1, 8, 20>}, {pipeline_mode = #tpu.pipeline_mode<synchronous>, transform_indices = @transform_2, window_bounds = array<i64: 4, 8, 8>}, {pipeline_mode = #tpu.pipeline_mode<synchronous>, transform_indices = @transform_3, window_bounds = array<i64: 8, 1>}, {transform_indices = @transform_4, window_bounds = array<i64: 1, 1, 8, 19>}]} {
    %c0 = arith.constant 0 : index
    %c0_0 = arith.constant 0 : index
    %c0_1 = arith.constant 0 : index
    %c0_2 = arith.constant 0 : index
    %0 = vector.load %arg2[%c0, %c0_0, %c0_1, %c0_2] : memref<1x1x8x20xbf16, #tpu.memory_space<vmem>>, vector<1x1x8x19xbf16>
    %1 = vector.shape_cast %0 : vector<1x1x8x19xbf16> to vector<8x19xbf16>
    %c0_3 = arith.constant 0 : index
    %c0_4 = arith.constant 0 : index
    %c0_5 = arith.constant 0 : index
    %2 = vector.load %arg4[%c0_3, %c0_4, %c0_5] : memref<4x8x8xbf16, #tpu.memory_space<vmem>>, vector<1x8x8xbf16>
    %3 = vector.shape_cast %2 : vector<1x8x8xbf16> to vector<8x8xbf16>
    %cst = arith.constant dense<0.000000e+00> : vector<8x19xf32>
    %4 = tpu.matmul %3, %1, %cst {dimension_numbers = #tpu.dot_dimension_numbers<[1], [0], [0], [1], [0, 0, 1, 1], [], []>} : vector<8x8xbf16>, vector<8x19xbf16>, vector<8x19xf32> -> vector<8x19xf32>
    %c0_6 = arith.constant 0 : index
    %c0_7 = arith.constant 0 : index
    %c0_8 = arith.constant 0 : index
    %c1 = arith.constant 1 : index
    %5 = vector.load %arg2[%c0_6, %c0_7, %c0_8, %c1] : memref<1x1x8x20xbf16, #tpu.memory_space<vmem>>, vector<1x1x8x19xbf16>
    %6 = vector.shape_cast %5 : vector<1x1x8x19xbf16> to vector<8x19xbf16>
    %c1_9 = arith.constant 1 : index
    %c0_10 = arith.constant 0 : index
    %c0_11 = arith.constant 0 : index
    %7 = vector.load %arg4[%c1_9, %c0_10, %c0_11] : memref<4x8x8xbf16, #tpu.memory_space<vmem>>, vector<1x8x8xbf16>
    %8 = vector.shape_cast %7 : vector<1x8x8xbf16> to vector<8x8xbf16>
    %cst_12 = arith.constant dense<0.000000e+00> : vector<8x19xf32>
    %9 = tpu.matmul %8, %6, %cst_12 {dimension_numbers = #tpu.dot_dimension_numbers<[1], [0], [0], [1], [0, 0, 1, 1], [], []>} : vector<8x8xbf16>, vector<8x19xbf16>, vector<8x19xf32> -> vector<8x19xf32>
    %10 = arith.addf %4, %9 : vector<8x19xf32>
    %c0_13 = arith.constant 0 : index
    %c0_14 = arith.constant 0 : index
    %c0_15 = arith.constant 0 : index
    %c0_16 = arith.constant 0 : index
    %11 = vector.load %arg3[%c0_13, %c0_14, %c0_15, %c0_16] : memref<1x1x8x20xbf16, #tpu.memory_space<vmem>>, vector<1x1x8x19xbf16>
    %12 = vector.shape_cast %11 : vector<1x1x8x19xbf16> to vector<8x19xbf16>
    %c2 = arith.constant 2 : index
    %c0_17 = arith.constant 0 : index
    %c0_18 = arith.constant 0 : index
    %13 = vector.load %arg4[%c2, %c0_17, %c0_18] : memref<4x8x8xbf16, #tpu.memory_space<vmem>>, vector<1x8x8xbf16>
    %14 = vector.shape_cast %13 : vector<1x8x8xbf16> to vector<8x8xbf16>
    %cst_19 = arith.constant dense<0.000000e+00> : vector<8x19xf32>
    %15 = tpu.matmul %14, %12, %cst_19 {dimension_numbers = #tpu.dot_dimension_numbers<[1], [0], [0], [1], [0, 0, 1, 1], [], []>} : vector<8x8xbf16>, vector<8x19xbf16>, vector<8x19xf32> -> vector<8x19xf32>
    %16 = arith.addf %10, %15 : vector<8x19xf32>
    %c0_20 = arith.constant 0 : index
    %c0_21 = arith.constant 0 : index
    %c0_22 = arith.constant 0 : index
    %c1_23 = arith.constant 1 : index
    %17 = vector.load %arg3[%c0_20, %c0_21, %c0_22, %c1_23] : memref<1x1x8x20xbf16, #tpu.memory_space<vmem>>, vector<1x1x8x19xbf16>
    %18 = vector.shape_cast %17 : vector<1x1x8x19xbf16> to vector<8x19xbf16>
    %c3 = arith.constant 3 : index
    %c0_24 = arith.constant 0 : index
    %c0_25 = arith.constant 0 : index
    %19 = vector.load %arg4[%c3, %c0_24, %c0_25] : memref<4x8x8xbf16, #tpu.memory_space<vmem>>, vector<1x8x8xbf16>
    %20 = vector.shape_cast %19 : vector<1x8x8xbf16> to vector<8x8xbf16>
    %cst_26 = arith.constant dense<0.000000e+00> : vector<8x19xf32>
    %21 = tpu.matmul %20, %18, %cst_26 {dimension_numbers = #tpu.dot_dimension_numbers<[1], [0], [0], [1], [0, 0, 1, 1], [], []>} : vector<8x8xbf16>, vector<8x19xbf16>, vector<8x19xf32> -> vector<8x19xf32>
    %22 = arith.addf %16, %21 : vector<8x19xf32>
    %c0_27 = arith.constant 0 : index
    %c0_28 = arith.constant 0 : index
    %23 = vector.load %arg5[%c0_27, %c0_28] : memref<8x1xf32, #tpu.memory_space<vmem>>, vector<8x1xf32>
    %24 = vector.broadcast %23 : vector<8x1xf32> to vector<8x19xf32>
    %25 = arith.addf %22, %24 : vector<8x19xf32>
    %26 = arith.truncf %25 : vector<8x19xf32> to vector<8x19xbf16>
    %c0_29 = arith.constant 0 : index
    %c0_30 = arith.constant 0 : index
    %c0_31 = arith.constant 0 : index
    %c0_32 = arith.constant 0 : index
    %27 = vector.load %arg6[%c0_29, %c0_30, %c0_31, %c0_32] : memref<1x1x8x19xbf16, #tpu.memory_space<vmem>>, vector<1x1x8x19xbf16>
    %28 = vector.shape_cast %27 : vector<1x1x8x19xbf16> to vector<8x19xbf16>
    %29 = vector.shape_cast %26 : vector<8x19xbf16> to vector<1x1x8x19xbf16>
    tpu.vector_store %arg6[%c0_29, %c0_30, %c0_31, %c0_32], %29 {strides = array<i32>} : memref<1x1x8x19xbf16, #tpu.memory_space<vmem>>, vector<1x1x8x19xbf16>,
    return
  }
  func.func @transform_0(%arg0: i32, %arg1: i32) -> (i32, i32, i32, i32) {
    %c1_i32 = arith.constant 1 : i32
    %0 = arith.muli %arg1, %c1_i32 : i32
    %c0_i32 = arith.constant 0 : i32
    %1 = arith.addi %0, %c0_i32 : i32
    %c0_i32_0 = arith.constant 0 : i32
    %c0_i32_1 = arith.constant 0 : i32
    %c0_i32_2 = arith.constant 0 : i32
    return %arg0, %1, %c0_i32_0, %c0_i32_1 : i32, i32, i32, i32
  }
  func.func @transform_1(%arg0: i32, %arg1: i32) -> (i32, i32, i32, i32) {
    %c1_i32 = arith.constant 1 : i32
    %0 = arith.muli %arg1, %c1_i32 : i32
    %c1_i32_0 = arith.constant 1 : i32
    %1 = arith.addi %0, %c1_i32_0 : i32
    %c0_i32 = arith.constant 0 : i32
    %c0_i32_1 = arith.constant 0 : i32
    %c0_i32_2 = arith.constant 0 : i32
    return %arg0, %1, %c0_i32, %c0_i32_1 : i32, i32, i32, i32
  }
  func.func @transform_2(%arg0: i32, %arg1: i32) -> (i32, i32, i32) {
    %c0_i32 = arith.constant 0 : i32
    %c0_i32_0 = arith.constant 0 : i32
    %c0_i32_1 = arith.constant 0 : i32
    %c0_i32_2 = arith.constant 0 : i32
    return %c0_i32, %c0_i32_0, %c0_i32_1 : i32, i32, i32
  }
  func.func @transform_3(%arg0: i32, %arg1: i32) -> (i32, i32) {
    %c0_i32 = arith.constant 0 : i32
    %c0_i32_0 = arith.constant 0 : i32
    %c0_i32_1 = arith.constant 0 : i32
    return %c0_i32, %c0_i32_0 : i32, i32
  }
  func.func @transform_4(%arg0: i32, %arg1: i32) -> (i32, i32, i32, i32) {
    %c0_i32 = arith.constant 0 : i32
    %c0_i32_0 = arith.constant 0 : i32
    %c0_i32_1 = arith.constant 0 : i32
    return %arg0, %arg1, %c0_i32, %c0_i32_0 : i32, i32, i32, i32
  }
}

module attributes {stable_mosaic.version = 11 : i64} {
  func.func @_fused_conv_kernel(%arg0: i32, %arg1: i32, %arg2: memref<1x1x8x25xbf16, #tpu.memory_space<vmem>>, %arg3: memref<1x1x8x25xbf16, #tpu.memory_space<vmem>>, %arg4: memref<8x8x8xbf16, #tpu.memory_space<vmem>>, %arg5: memref<8x1xf32, #tpu.memory_space<vmem>>, %arg6: memref<1x1x8x19xbf16, #tpu.memory_space<vmem>>) attributes {dimension_semantics = [#tpu.dimension_semantics<parallel>, #tpu.dimension_semantics<parallel>], iteration_bounds = array<i64: 2, 2>, scalar_prefetch = 0 : i64, scratch_operands = 0 : i64, tpu.core_type = #tpu.core_type<tc>, window_params = [{transform_indices = @transform_0, window_bounds = array<i64: 1, 1, 8, 25>}, {transform_indices = @transform_1, window_bounds = array<i64: 1, 1, 8, 25>}, {pipeline_mode = #tpu.pipeline_mode<synchronous>, transform_indices = @transform_2, window_bounds = array<i64: 8, 8, 8>}, {pipeline_mode = #tpu.pipeline_mode<synchronous>, transform_indices = @transform_3, window_bounds = array<i64: 8, 1>}, {transform_indices = @transform_4, window_bounds = array<i64: 1, 1, 8, 19>}]} {
    %c0 = arith.constant 0 : index
    %c0_0 = arith.constant 0 : index
    %c0_1 = arith.constant 0 : index
    %c0_2 = arith.constant 0 : index
    %0 = vector.load %arg2[%c0, %c0_0, %c0_1, %c0_2] : memref<1x1x8x25xbf16, #tpu.memory_space<vmem>>, vector<1x1x8x19xbf16>
    %1 = vector.shape_cast %0 : vector<1x1x8x19xbf16> to vector<8x19xbf16>
    %c0_3 = arith.constant 0 : index
    %c0_4 = arith.constant 0 : index
    %c0_5 = arith.constant 0 : index
    %2 = vector.load %arg4[%c0_3, %c0_4, %c0_5] : memref<8x8x8xbf16, #tpu.memory_space<vmem>>, vector<1x8x8xbf16>
    %3 = vector.shape_cast %2 : vector<1x8x8xbf16> to vector<8x8xbf16>
    %cst = arith.constant dense<0.000000e+00> : vector<8x19xf32>
    %4 = tpu.matmul %3, %1, %cst {dimension_numbers = #tpu.dot_dimension_numbers<[1], [0], [0], [1], [0, 0, 1, 1], [], []>} : vector<8x8xbf16>, vector<8x19xbf16>, vector<8x19xf32> -> vector<8x19xf32>
    %c0_6 = arith.constant 0 : index
    %c0_7 = arith.constant 0 : index
    %c0_8 = arith.constant 0 : index
    %c1 = arith.constant 1 : index
    %5 = vector.load %arg2[%c0_6, %c0_7, %c0_8, %c1] : memref<1x1x8x25xbf16, #tpu.memory_space<vmem>>, vector<1x1x8x19xbf16>
    %6 = vector.shape_cast %5 : vector<1x1x8x19xbf16> to vector<8x19xbf16>
    %c1_9 = arith.constant 1 : index
    %c0_10 = arith.constant 0 : index
    %c0_11 = arith.constant 0 : index
    %7 = vector.load %arg4[%c1_9, %c0_10, %c0_11] : memref<8x8x8xbf16, #tpu.memory_space<vmem>>, vector<1x8x8xbf16>
    %8 = vector.shape_cast %7 : vector<1x8x8xbf16> to vector<8x8xbf16>
    %cst_12 = arith.constant dense<0.000000e+00> : vector<8x19xf32>
    %9 = tpu.matmul %8, %6, %cst_12 {dimension_numbers = #tpu.dot_dimension_numbers<[1], [0], [0], [1], [0, 0, 1, 1], [], []>} : vector<8x8xbf16>, vector<8x19xbf16>, vector<8x19xf32> -> vector<8x19xf32>
    %10 = arith.addf %4, %9 : vector<8x19xf32>
    %c0_13 = arith.constant 0 : index
    %c0_14 = arith.constant 0 : index
    %c0_15 = arith.constant 0 : index
    %c5 = arith.constant 5 : index
    %11 = vector.load %arg2[%c0_13, %c0_14, %c0_15, %c5] : memref<1x1x8x25xbf16, #tpu.memory_space<vmem>>, vector<1x1x8x19xbf16>
    %12 = vector.shape_cast %11 : vector<1x1x8x19xbf16> to vector<8x19xbf16>
    %c2 = arith.constant 2 : index
    %c0_16 = arith.constant 0 : index
    %c0_17 = arith.constant 0 : index
    %13 = vector.load %arg4[%c2, %c0_16, %c0_17] : memref<8x8x8xbf16, #tpu.memory_space<vmem>>, vector<1x8x8xbf16>
    %14 = vector.shape_cast %13 : vector<1x8x8xbf16> to vector<8x8xbf16>
    %cst_18 = arith.constant dense<0.000000e+00> : vector<8x19xf32>
    %15 = tpu.matmul %14, %12, %cst_18 {dimension_numbers = #tpu.dot_dimension_numbers<[1], [0], [0], [1], [0, 0, 1, 1], [], []>} : vector<8x8xbf16>, vector<8x19xbf16>, vector<8x19xf32> -> vector<8x19xf32>
    %16 = arith.addf %10, %15 : vector<8x19xf32>
    %c0_19 = arith.constant 0 : index
    %c0_20 = arith.constant 0 : index
    %c0_21 = arith.constant 0 : index
    %c6 = arith.constant 6 : index
    %17 = vector.load %arg2[%c0_19, %c0_20, %c0_21, %c6] : memref<1x1x8x25xbf16, #tpu.memory_space<vmem>>, vector<1x1x8x19xbf16>
    %18 = vector.shape_cast %17 : vector<1x1x8x19xbf16> to vector<8x19xbf16>
    %c3 = arith.constant 3 : index
    %c0_22 = arith.constant 0 : index
    %c0_23 = arith.constant 0 : index
    %19 = vector.load %arg4[%c3, %c0_22, %c0_23] : memref<8x8x8xbf16, #tpu.memory_space<vmem>>, vector<1x8x8xbf16>
    %20 = vector.shape_cast %19 : vector<1x8x8xbf16> to vector<8x8xbf16>
    %cst_24 = arith.constant dense<0.000000e+00> : vector<8x19xf32>
    %21 = tpu.matmul %20, %18, %cst_24 {dimension_numbers = #tpu.dot_dimension_numbers<[1], [0], [0], [1], [0, 0, 1, 1], [], []>} : vector<8x8xbf16>, vector<8x19xbf16>, vector<8x19xf32> -> vector<8x19xf32>
    %22 = arith.addf %16, %21 : vector<8x19xf32>
    %c0_25 = arith.constant 0 : index
    %c0_26 = arith.constant 0 : index
    %c0_27 = arith.constant 0 : index
    %c0_28 = arith.constant 0 : index
    %23 = vector.load %arg3[%c0_25, %c0_26, %c0_27, %c0_28] : memref<1x1x8x25xbf16, #tpu.memory_space<vmem>>, vector<1x1x8x19xbf16>
    %24 = vector.shape_cast %23 : vector<1x1x8x19xbf16> to vector<8x19xbf16>
    %c4 = arith.constant 4 : index
    %c0_29 = arith.constant 0 : index
    %c0_30 = arith.constant 0 : index
    %25 = vector.load %arg4[%c4, %c0_29, %c0_30] : memref<8x8x8xbf16, #tpu.memory_space<vmem>>, vector<1x8x8xbf16>
    %26 = vector.shape_cast %25 : vector<1x8x8xbf16> to vector<8x8xbf16>
    %cst_31 = arith.constant dense<0.000000e+00> : vector<8x19xf32>
    %27 = tpu.matmul %26, %24, %cst_31 {dimension_numbers = #tpu.dot_dimension_numbers<[1], [0], [0], [1], [0, 0, 1, 1], [], []>} : vector<8x8xbf16>, vector<8x19xbf16>, vector<8x19xf32> -> vector<8x19xf32>
    %28 = arith.addf %22, %27 : vector<8x19xf32>
    %c0_32 = arith.constant 0 : index
    %c0_33 = arith.constant 0 : index
    %c0_34 = arith.constant 0 : index
    %c1_35 = arith.constant 1 : index
    %29 = vector.load %arg3[%c0_32, %c0_33, %c0_34, %c1_35] : memref<1x1x8x25xbf16, #tpu.memory_space<vmem>>, vector<1x1x8x19xbf16>
    %30 = vector.shape_cast %29 : vector<1x1x8x19xbf16> to vector<8x19xbf16>
    %c5_36 = arith.constant 5 : index
    %c0_37 = arith.constant 0 : index
    %c0_38 = arith.constant 0 : index
    %31 = vector.load %arg4[%c5_36, %c0_37, %c0_38] : memref<8x8x8xbf16, #tpu.memory_space<vmem>>, vector<1x8x8xbf16>
    %32 = vector.shape_cast %31 : vector<1x8x8xbf16> to vector<8x8xbf16>
    %cst_39 = arith.constant dense<0.000000e+00> : vector<8x19xf32>
    %33 = tpu.matmul %32, %30, %cst_39 {dimension_numbers = #tpu.dot_dimension_numbers<[1], [0], [0], [1], [0, 0, 1, 1], [], []>} : vector<8x8xbf16>, vector<8x19xbf16>, vector<8x19xf32> -> vector<8x19xf32>
    %34 = arith.addf %28, %33 : vector<8x19xf32>
    %c0_40 = arith.constant 0 : index
    %c0_41 = arith.constant 0 : index
    %c0_42 = arith.constant 0 : index
    %c5_43 = arith.constant 5 : index
    %35 = vector.load %arg3[%c0_40, %c0_41, %c0_42, %c5_43] : memref<1x1x8x25xbf16, #tpu.memory_space<vmem>>, vector<1x1x8x19xbf16>
    %36 = vector.shape_cast %35 : vector<1x1x8x19xbf16> to vector<8x19xbf16>
    %c6_44 = arith.constant 6 : index
    %c0_45 = arith.constant 0 : index
    %c0_46 = arith.constant 0 : index
    %37 = vector.load %arg4[%c6_44, %c0_45, %c0_46] : memref<8x8x8xbf16, #tpu.memory_space<vmem>>, vector<1x8x8xbf16>
    %38 = vector.shape_cast %37 : vector<1x8x8xbf16> to vector<8x8xbf16>
    %cst_47 = arith.constant dense<0.000000e+00> : vector<8x19xf32>
    %39 = tpu.matmul %38, %36, %cst_47 {dimension_numbers = #tpu.dot_dimension_numbers<[1], [0], [0], [1], [0, 0, 1, 1], [], []>} : vector<8x8xbf16>, vector<8x19xbf16>, vector<8x19xf32> -> vector<8x19xf32>
    %40 = arith.addf %34, %39 : vector<8x19xf32>
    %c0_48 = arith.constant 0 : index
    %c0_49 = arith.constant 0 : index
    %c0_50 = arith.constant 0 : index
    %c6_51 = arith.constant 6 : index
    %41 = vector.load %arg3[%c0_48, %c0_49, %c0_50, %c6_51] : memref<1x1x8x25xbf16, #tpu.memory_space<vmem>>, vector<1x1x8x19xbf16>
    %42 = vector.shape_cast %41 : vector<1x1x8x19xbf16> to vector<8x19xbf16>
    %c7 = arith.constant 7 : index
    %c0_52 = arith.constant 0 : index
    %c0_53 = arith.constant 0 : index
    %43 = vector.load %arg4[%c7, %c0_52, %c0_53] : memref<8x8x8xbf16, #tpu.memory_space<vmem>>, vector<1x8x8xbf16>
    %44 = vector.shape_cast %43 : vector<1x8x8xbf16> to vector<8x8xbf16>
    %cst_54 = arith.constant dense<0.000000e+00> : vector<8x19xf32>
    %45 = tpu.matmul %44, %42, %cst_54 {dimension_numbers = #tpu.dot_dimension_numbers<[1], [0], [0], [1], [0, 0, 1, 1], [], []>} : vector<8x8xbf16>, vector<8x19xbf16>, vector<8x19xf32> -> vector<8x19xf32>
    %46 = arith.addf %40, %45 : vector<8x19xf32>
    %c0_55 = arith.constant 0 : index
    %c0_56 = arith.constant 0 : index
    %47 = vector.load %arg5[%c0_55, %c0_56] : memref<8x1xf32, #tpu.memory_space<vmem>>, vector<8x1xf32>
    %48 = vector.broadcast %47 : vector<8x1xf32> to vector<8x19xf32>
    %49 = arith.addf %46, %48 : vector<8x19xf32>
    %50 = arith.truncf %49 : vector<8x19xf32> to vector<8x19xbf16>
    %c0_57 = arith.constant 0 : index
    %c0_58 = arith.constant 0 : index
    %c0_59 = arith.constant 0 : index
    %c0_60 = arith.constant 0 : index
    %51 = vector.load %arg6[%c0_57, %c0_58, %c0_59, %c0_60] : memref<1x1x8x19xbf16, #tpu.memory_space<vmem>>, vector<1x1x8x19xbf16>
    %52 = vector.shape_cast %51 : vector<1x1x8x19xbf16> to vector<8x19xbf16>
    %53 = vector.shape_cast %50 : vector<8x19xbf16> to vector<1x1x8x19xbf16>
    tpu.vector_store %arg6[%c0_57, %c0_58, %c0_59, %c0_60], %53 {strides = array<i32>} : memref<1x1x8x19xbf16, #tpu.memory_space<vmem>>, vector<1x1x8x19xbf16>,
    return
  }
  func.func @transform_0(%arg0: i32, %arg1: i32) -> (i32, i32, i32, i32) {
    %c1_i32 = arith.constant 1 : i32
    %0 = arith.muli %arg1, %c1_i32 : i32
    %c0_i32 = arith.constant 0 : i32
    %1 = arith.addi %0, %c0_i32 : i32
    %c0_i32_0 = arith.constant 0 : i32
    %c0_i32_1 = arith.constant 0 : i32
    %c0_i32_2 = arith.constant 0 : i32
    return %arg0, %1, %c0_i32_0, %c0_i32_1 : i32, i32, i32, i32
  }
  func.func @transform_1(%arg0: i32, %arg1: i32) -> (i32, i32, i32, i32) {
    %c1_i32 = arith.constant 1 : i32
    %0 = arith.muli %arg1, %c1_i32 : i32
    %c1_i32_0 = arith.constant 1 : i32
    %1 = arith.addi %0, %c1_i32_0 : i32
    %c0_i32 = arith.constant 0 : i32
    %c0_i32_1 = arith.constant 0 : i32
    %c0_i32_2 = arith.constant 0 : i32
    return %arg0, %1, %c0_i32, %c0_i32_1 : i32, i32, i32, i32
  }
  func.func @transform_2(%arg0: i32, %arg1: i32) -> (i32, i32, i32) {
    %c0_i32 = arith.constant 0 : i32
    %c0_i32_0 = arith.constant 0 : i32
    %c0_i32_1 = arith.constant 0 : i32
    %c0_i32_2 = arith.constant 0 : i32
    return %c0_i32, %c0_i32_0, %c0_i32_1 : i32, i32, i32
  }
  func.func @transform_3(%arg0: i32, %arg1: i32) -> (i32, i32) {
    %c0_i32 = arith.constant 0 : i32
    %c0_i32_0 = arith.constant 0 : i32
    %c0_i32_1 = arith.constant 0 : i32
    return %c0_i32, %c0_i32_0 : i32, i32
  }
  func.func @transform_4(%arg0: i32, %arg1: i32) -> (i32, i32, i32, i32) {
    %c0_i32 = arith.constant 0 : i32
    %c0_i32_0 = arith.constant 0 : i32
    %c0_i32_1 = arith.constant 0 : i32
    return %arg0, %arg1, %c0_i32, %c0_i32_0 : i32, i32, i32, i32
  }
}

module attributes {stable_mosaic.version = 11 : i64} {
  func.func @_fused_conv_kernel(%arg0: i32, %arg1: i32, %arg2: memref<1x1x8x20xbf16, #tpu.memory_space<vmem>>, %arg3: memref<2x8x8xbf16, #tpu.memory_space<vmem>>, %arg4: memref<8x1xf32, #tpu.memory_space<vmem>>, %arg5: memref<1x1x8x19xbf16, #tpu.memory_space<vmem>>) attributes {dimension_semantics = [#tpu.dimension_semantics<parallel>, #tpu.dimension_semantics<parallel>], iteration_bounds = array<i64: 2, 2>, scalar_prefetch = 0 : i64, scratch_operands = 0 : i64, tpu.core_type = #tpu.core_type<tc>, window_params = [{transform_indices = @transform_0, window_bounds = array<i64: 1, 1, 8, 20>}, {pipeline_mode = #tpu.pipeline_mode<synchronous>, transform_indices = @transform_1, window_bounds = array<i64: 2, 8, 8>}, {pipeline_mode = #tpu.pipeline_mode<synchronous>, transform_indices = @transform_2, window_bounds = array<i64: 8, 1>}, {transform_indices = @transform_3, window_bounds = array<i64: 1, 1, 8, 19>}]} {
    %c0 = arith.constant 0 : index
    %c0_0 = arith.constant 0 : index
    %c0_1 = arith.constant 0 : index
    %c0_2 = arith.constant 0 : index
    %0 = vector.load %arg2[%c0, %c0_0, %c0_1, %c0_2] : memref<1x1x8x20xbf16, #tpu.memory_space<vmem>>, vector<1x1x8x19xbf16>
    %1 = vector.shape_cast %0 : vector<1x1x8x19xbf16> to vector<8x19xbf16>
    %c0_3 = arith.constant 0 : index
    %c0_4 = arith.constant 0 : index
    %c0_5 = arith.constant 0 : index
    %2 = vector.load %arg3[%c0_3, %c0_4, %c0_5] : memref<2x8x8xbf16, #tpu.memory_space<vmem>>, vector<1x8x8xbf16>
    %3 = vector.shape_cast %2 : vector<1x8x8xbf16> to vector<8x8xbf16>
    %cst = arith.constant dense<0.000000e+00> : vector<8x19xf32>
    %4 = tpu.matmul %3, %1, %cst {dimension_numbers = #tpu.dot_dimension_numbers<[1], [0], [0], [1], [0, 0, 1, 1], [], []>} : vector<8x8xbf16>, vector<8x19xbf16>, vector<8x19xf32> -> vector<8x19xf32>
    %c0_6 = arith.constant 0 : index
    %c0_7 = arith.constant 0 : index
    %c0_8 = arith.constant 0 : index
    %c1 = arith.constant 1 : index
    %5 = vector.load %arg2[%c0_6, %c0_7, %c0_8, %c1] : memref<1x1x8x20xbf16, #tpu.memory_space<vmem>>, vector<1x1x8x19xbf16>
    %6 = vector.shape_cast %5 : vector<1x1x8x19xbf16> to vector<8x19xbf16>
    %c1_9 = arith.constant 1 : index
    %c0_10 = arith.constant 0 : index
    %c0_11 = arith.constant 0 : index
    %7 = vector.load %arg3[%c1_9, %c0_10, %c0_11] : memref<2x8x8xbf16, #tpu.memory_space<vmem>>, vector<1x8x8xbf16>
    %8 = vector.shape_cast %7 : vector<1x8x8xbf16> to vector<8x8xbf16>
    %cst_12 = arith.constant dense<0.000000e+00> : vector<8x19xf32>
    %9 = tpu.matmul %8, %6, %cst_12 {dimension_numbers = #tpu.dot_dimension_numbers<[1], [0], [0], [1], [0, 0, 1, 1], [], []>} : vector<8x8xbf16>, vector<8x19xbf16>, vector<8x19xf32> -> vector<8x19xf32>
    %10 = arith.addf %4, %9 : vector<8x19xf32>
    %c0_13 = arith.constant 0 : index
    %c0_14 = arith.constant 0 : index
    %11 = vector.load %arg4[%c0_13, %c0_14] : memref<8x1xf32, #tpu.memory_space<vmem>>, vector<8x1xf32>
    %12 = vector.broadcast %11 : vector<8x1xf32> to vector<8x19xf32>
    %13 = arith.addf %10, %12 : vector<8x19xf32>
    %14 = arith.truncf %13 : vector<8x19xf32> to vector<8x19xbf16>
    %c0_15 = arith.constant 0 : index
    %c0_16 = arith.constant 0 : index
    %c0_17 = arith.constant 0 : index
    %c0_18 = arith.constant 0 : index
    %15 = vector.load %arg5[%c0_15, %c0_16, %c0_17, %c0_18] : memref<1x1x8x19xbf16, #tpu.memory_space<vmem>>, vector<1x1x8x19xbf16>
    %16 = vector.shape_cast %15 : vector<1x1x8x19xbf16> to vector<8x19xbf16>
    %17 = vector.shape_cast %14 : vector<8x19xbf16> to vector<1x1x8x19xbf16>
    tpu.vector_store %arg5[%c0_15, %c0_16, %c0_17, %c0_18], %17 {strides = array<i32>} : memref<1x1x8x19xbf16, #tpu.memory_space<vmem>>, vector<1x1x8x19xbf16>,
    return
  }
  func.func @transform_0(%arg0: i32, %arg1: i32) -> (i32, i32, i32, i32) {
    %c1_i32 = arith.constant 1 : i32
    %0 = arith.muli %arg1, %c1_i32 : i32
    %c0_i32 = arith.constant 0 : i32
    %1 = arith.addi %0, %c0_i32 : i32
    %c0_i32_0 = arith.constant 0 : i32
    %c0_i32_1 = arith.constant 0 : i32
    %c0_i32_2 = arith.constant 0 : i32
    return %arg0, %1, %c0_i32_0, %c0_i32_1 : i32, i32, i32, i32
  }
  func.func @transform_1(%arg0: i32, %arg1: i32) -> (i32, i32, i32) {
    %c0_i32 = arith.constant 0 : i32
    %c0_i32_0 = arith.constant 0 : i32
    %c0_i32_1 = arith.constant 0 : i32
    %c0_i32_2 = arith.constant 0 : i32
    return %c0_i32, %c0_i32_0, %c0_i32_1 : i32, i32, i32
  }
  func.func @transform_2(%arg0: i32, %arg1: i32) -> (i32, i32) {
    %c0_i32 = arith.constant 0 : i32
    %c0_i32_0 = arith.constant 0 : i32
    %c0_i32_1 = arith.constant 0 : i32
    return %c0_i32, %c0_i32_0 : i32, i32
  }
  func.func @transform_3(%arg0: i32, %arg1: i32) -> (i32, i32, i32, i32) {
    %c0_i32 = arith.constant 0 : i32
    %c0_i32_0 = arith.constant 0 : i32
    %c0_i32_1 = arith.constant 0 : i32
    return %arg0, %arg1, %c0_i32, %c0_i32_0 : i32, i32, i32, i32
  }
}

module attributes {stable_mosaic.version = 11 : i64} {
  func.func @_fused_conv_kernel(%arg0: i32, %arg1: i32, %arg2: memref<1x1x8x64xbf16, #tpu.memory_space<vmem>>, %arg3: memref<1x4x8xbf16, #tpu.memory_space<vmem>>, %arg4: memref<4x1xf32, #tpu.memory_space<vmem>>, %arg5: memref<1x1x4x64xbf16, #tpu.memory_space<vmem>>) attributes {dimension_semantics = [#tpu.dimension_semantics<parallel>, #tpu.dimension_semantics<parallel>], iteration_bounds = array<i64: 2, 4>, scalar_prefetch = 0 : i64, scratch_operands = 0 : i64, tpu.core_type = #tpu.core_type<tc>, window_params = [{transform_indices = @transform_0, window_bounds = array<i64: 1, 1, 8, 64>}, {pipeline_mode = #tpu.pipeline_mode<synchronous>, transform_indices = @transform_1, window_bounds = array<i64: 1, 4, 8>}, {pipeline_mode = #tpu.pipeline_mode<synchronous>, transform_indices = @transform_2, window_bounds = array<i64: 4, 1>}, {transform_indices = @transform_3, window_bounds = array<i64: 1, 1, 4, 64>}]} {
    %c0 = arith.constant 0 : index
    %c0_0 = arith.constant 0 : index
    %c0_1 = arith.constant 0 : index
    %c0_2 = arith.constant 0 : index
    %0 = vector.load %arg2[%c0, %c0_0, %c0_1, %c0_2] : memref<1x1x8x64xbf16, #tpu.memory_space<vmem>>, vector<1x1x8x64xbf16>
    %1 = vector.shape_cast %0 : vector<1x1x8x64xbf16> to vector<8x64xbf16>
    %c0_3 = arith.constant 0 : index
    %c0_4 = arith.constant 0 : index
    %c0_5 = arith.constant 0 : index
    %2 = vector.load %arg3[%c0_3, %c0_4, %c0_5] : memref<1x4x8xbf16, #tpu.memory_space<vmem>>, vector<1x4x8xbf16>
    %3 = vector.shape_cast %2 : vector<1x4x8xbf16> to vector<4x8xbf16>
    %cst = arith.constant dense<0.000000e+00> : vector<4x64xf32>
    %4 = tpu.matmul %3, %1, %cst {dimension_numbers = #tpu.dot_dimension_numbers<[1], [0], [0], [1], [0, 0, 1, 1], [], []>} : vector<4x8xbf16>, vector<8x64xbf16>, vector<4x64xf32> -> vector<4x64xf32>
    %c0_6 = arith.constant 0 : index
    %c0_7 = arith.constant 0 : index
    %5 = vector.load %arg4[%c0_6, %c0_7] : memref<4x1xf32, #tpu.memory_space<vmem>>, vector<4x1xf32>
    %6 = vector.broadcast %5 : vector<4x1xf32> to vector<4x64xf32>
    %7 = arith.addf %4, %6 : vector<4x64xf32>
    %8 = arith.truncf %7 : vector<4x64xf32> to vector<4x64xbf16>
    %c0_8 = arith.constant 0 : index
    %c0_9 = arith.constant 0 : index
    %c0_10 = arith.constant 0 : index
    %c0_11 = arith.constant 0 : index
    %9 = vector.load %arg5[%c0_8, %c0_9, %c0_10, %c0_11] : memref<1x1x4x64xbf16, #tpu.memory_space<vmem>>, vector<1x1x4x64xbf16>
    %10 = vector.shape_cast %9 : vector<1x1x4x64xbf16> to vector<4x64xbf16>
    %11 = vector.shape_cast %8 : vector<4x64xbf16> to vector<1x1x4x64xbf16>
    tpu.vector_store %arg5[%c0_8, %c0_9, %c0_10, %c0_11], %11 {strides = array<i32>} : memref<1x1x4x64xbf16, #tpu.memory_space<vmem>>, vector<1x1x4x64xbf16>,
    return
  }
  func.func @transform_0(%arg0: i32, %arg1: i32) -> (i32, i32, i32, i32) {
    %c1_i32 = arith.constant 1 : i32
    %0 = arith.muli %arg1, %c1_i32 : i32
    %c0_i32 = arith.constant 0 : i32
    %1 = arith.addi %0, %c0_i32 : i32
    %c0_i32_0 = arith.constant 0 : i32
    %c0_i32_1 = arith.constant 0 : i32
    %c0_i32_2 = arith.constant 0 : i32
    return %arg0, %1, %c0_i32_0, %c0_i32_1 : i32, i32, i32, i32
  }
  func.func @transform_1(%arg0: i32, %arg1: i32) -> (i32, i32, i32) {
    %c0_i32 = arith.constant 0 : i32
    %c0_i32_0 = arith.constant 0 : i32
    %c0_i32_1 = arith.constant 0 : i32
    %c0_i32_2 = arith.constant 0 : i32
    return %c0_i32, %c0_i32_0, %c0_i32_1 : i32, i32, i32
  }
  func.func @transform_2(%arg0: i32, %arg1: i32) -> (i32, i32) {
    %c0_i32 = arith.constant 0 : i32
    %c0_i32_0 = arith.constant 0 : i32
    %c0_i32_1 = arith.constant 0 : i32
    return %c0_i32, %c0_i32_0 : i32, i32
  }
  func.func @transform_3(%arg0: i32, %arg1: i32) -> (i32, i32, i32, i32) {
    %c0_i32 = arith.constant 0 : i32
    %c0_i32_0 = arith.constant 0 : i32
    %c0_i32_1 = arith.constant 0 : i32
    return %arg0, %arg1, %c0_i32, %c0_i32_0 : i32, i32, i32, i32
  }
}

module attributes {stable_mosaic.version = 11 : i64} {
  func.func @_fused_conv_kernel(%arg0: i32, %arg1: i32, %arg2: memref<1x1x8x72xbf16, #tpu.memory_space<vmem>>, %arg3: memref<2x4x8xbf16, #tpu.memory_space<vmem>>, %arg4: memref<4x1xf32, #tpu.memory_space<vmem>>, %arg5: memref<1x1x4x64xbf16, #tpu.memory_space<vmem>>) attributes {dimension_semantics = [#tpu.dimension_semantics<parallel>, #tpu.dimension_semantics<parallel>], iteration_bounds = array<i64: 2, 4>, scalar_prefetch = 0 : i64, scratch_operands = 0 : i64, tpu.core_type = #tpu.core_type<tc>, window_params = [{transform_indices = @transform_0, window_bounds = array<i64: 1, 1, 8, 72>}, {pipeline_mode = #tpu.pipeline_mode<synchronous>, transform_indices = @transform_1, window_bounds = array<i64: 2, 4, 8>}, {pipeline_mode = #tpu.pipeline_mode<synchronous>, transform_indices = @transform_2, window_bounds = array<i64: 4, 1>}, {transform_indices = @transform_3, window_bounds = array<i64: 1, 1, 4, 64>}]} {
    %c0 = arith.constant 0 : index
    %c0_0 = arith.constant 0 : index
    %c0_1 = arith.constant 0 : index
    %c0_2 = arith.constant 0 : index
    %0 = vector.load %arg2[%c0, %c0_0, %c0_1, %c0_2] : memref<1x1x8x72xbf16, #tpu.memory_space<vmem>>, vector<1x1x8x64xbf16>
    %1 = vector.shape_cast %0 : vector<1x1x8x64xbf16> to vector<8x64xbf16>
    %c0_3 = arith.constant 0 : index
    %c0_4 = arith.constant 0 : index
    %c0_5 = arith.constant 0 : index
    %2 = vector.load %arg3[%c0_3, %c0_4, %c0_5] : memref<2x4x8xbf16, #tpu.memory_space<vmem>>, vector<1x4x8xbf16>
    %3 = vector.shape_cast %2 : vector<1x4x8xbf16> to vector<4x8xbf16>
    %cst = arith.constant dense<0.000000e+00> : vector<4x64xf32>
    %4 = tpu.matmul %3, %1, %cst {dimension_numbers = #tpu.dot_dimension_numbers<[1], [0], [0], [1], [0, 0, 1, 1], [], []>} : vector<4x8xbf16>, vector<8x64xbf16>, vector<4x64xf32> -> vector<4x64xf32>
    %c0_6 = arith.constant 0 : index
    %c0_7 = arith.constant 0 : index
    %c0_8 = arith.constant 0 : index
    %c8 = arith.constant 8 : index
    %5 = vector.load %arg2[%c0_6, %c0_7, %c0_8, %c8] : memref<1x1x8x72xbf16, #tpu.memory_space<vmem>>, vector<1x1x8x64xbf16>
    %6 = vector.shape_cast %5 : vector<1x1x8x64xbf16> to vector<8x64xbf16>
    %c1 = arith.constant 1 : index
    %c0_9 = arith.constant 0 : index
    %c0_10 = arith.constant 0 : index
    %7 = vector.load %arg3[%c1, %c0_9, %c0_10] : memref<2x4x8xbf16, #tpu.memory_space<vmem>>, vector<1x4x8xbf16>
    %8 = vector.shape_cast %7 : vector<1x4x8xbf16> to vector<4x8xbf16>
    %cst_11 = arith.constant dense<0.000000e+00> : vector<4x64xf32>
    %9 = tpu.matmul %8, %6, %cst_11 {dimension_numbers = #tpu.dot_dimension_numbers<[1], [0], [0], [1], [0, 0, 1, 1], [], []>} : vector<4x8xbf16>, vector<8x64xbf16>, vector<4x64xf32> -> vector<4x64xf32>
    %10 = arith.addf %4, %9 : vector<4x64xf32>
    %c0_12 = arith.constant 0 : index
    %c0_13 = arith.constant 0 : index
    %11 = vector.load %arg4[%c0_12, %c0_13] : memref<4x1xf32, #tpu.memory_space<vmem>>, vector<4x1xf32>
    %12 = vector.broadcast %11 : vector<4x1xf32> to vector<4x64xf32>
    %13 = arith.addf %10, %12 : vector<4x64xf32>
    %14 = arith.truncf %13 : vector<4x64xf32> to vector<4x64xbf16>
    %c0_14 = arith.constant 0 : index
    %c0_15 = arith.constant 0 : index
    %c0_16 = arith.constant 0 : index
    %c0_17 = arith.constant 0 : index
    %15 = vector.load %arg5[%c0_14, %c0_15, %c0_16, %c0_17] : memref<1x1x4x64xbf16, #tpu.memory_space<vmem>>, vector<1x1x4x64xbf16>
    %16 = vector.shape_cast %15 : vector<1x1x4x64xbf16> to vector<4x64xbf16>
    %17 = vector.shape_cast %14 : vector<4x64xbf16> to vector<1x1x4x64xbf16>
    tpu.vector_store %arg5[%c0_14, %c0_15, %c0_16, %c0_17], %17 {strides = array<i32>} : memref<1x1x4x64xbf16, #tpu.memory_space<vmem>>, vector<1x1x4x64xbf16>,
    return
  }
  func.func @transform_0(%arg0: i32, %arg1: i32) -> (i32, i32, i32, i32) {
    %c1_i32 = arith.constant 1 : i32
    %0 = arith.muli %arg1, %c1_i32 : i32
    %c0_i32 = arith.constant 0 : i32
    %1 = arith.addi %0, %c0_i32 : i32
    %c0_i32_0 = arith.constant 0 : i32
    %c0_i32_1 = arith.constant 0 : i32
    %c0_i32_2 = arith.constant 0 : i32
    return %arg0, %1, %c0_i32_0, %c0_i32_1 : i32, i32, i32, i32
  }
  func.func @transform_1(%arg0: i32, %arg1: i32) -> (i32, i32, i32) {
    %c0_i32 = arith.constant 0 : i32
    %c0_i32_0 = arith.constant 0 : i32
    %c0_i32_1 = arith.constant 0 : i32
    %c0_i32_2 = arith.constant 0 : i32
    return %c0_i32, %c0_i32_0, %c0_i32_1 : i32, i32, i32
  }
  func.func @transform_2(%arg0: i32, %arg1: i32) -> (i32, i32) {
    %c0_i32 = arith.constant 0 : i32
    %c0_i32_0 = arith.constant 0 : i32
    %c0_i32_1 = arith.constant 0 : i32
    return %c0_i32, %c0_i32_0 : i32, i32
  }
  func.func @transform_3(%arg0: i32, %arg1: i32) -> (i32, i32, i32, i32) {
    %c0_i32 = arith.constant 0 : i32
    %c0_i32_0 = arith.constant 0 : i32
    %c0_i32_1 = arith.constant 0 : i32
    return %arg0, %arg1, %c0_i32, %c0_i32_0 : i32, i32, i32, i32
  }
}

module attributes {stable_mosaic.version = 11 : i64} {
  func.func @_fused_conv_kernel(%arg0: i32, %arg1: i32, %arg2: memref<1x1x8x64xbf16, #tpu.memory_space<vmem>>, %arg3: memref<1x1x8x64xbf16, #tpu.memory_space<vmem>>, %arg4: memref<2x4x8xbf16, #tpu.memory_space<vmem>>, %arg5: memref<4x1xf32, #tpu.memory_space<vmem>>, %arg6: memref<1x1x4x64xbf16, #tpu.memory_space<vmem>>) attributes {dimension_semantics = [#tpu.dimension_semantics<parallel>, #tpu.dimension_semantics<parallel>], iteration_bounds = array<i64: 2, 4>, scalar_prefetch = 0 : i64, scratch_operands = 0 : i64, tpu.core_type = #tpu.core_type<tc>, window_params = [{transform_indices = @transform_0, window_bounds = array<i64: 1, 1, 8, 64>}, {transform_indices = @transform_1, window_bounds = array<i64: 1, 1, 8, 64>}, {pipeline_mode = #tpu.pipeline_mode<synchronous>, transform_indices = @transform_2, window_bounds = array<i64: 2, 4, 8>}, {pipeline_mode = #tpu.pipeline_mode<synchronous>, transform_indices = @transform_3, window_bounds = array<i64: 4, 1>}, {transform_indices = @transform_4, window_bounds = array<i64: 1, 1, 4, 64>}]} {
    %c0 = arith.constant 0 : index
    %c0_0 = arith.constant 0 : index
    %c0_1 = arith.constant 0 : index
    %c0_2 = arith.constant 0 : index
    %0 = vector.load %arg2[%c0, %c0_0, %c0_1, %c0_2] : memref<1x1x8x64xbf16, #tpu.memory_space<vmem>>, vector<1x1x8x64xbf16>
    %1 = vector.shape_cast %0 : vector<1x1x8x64xbf16> to vector<8x64xbf16>
    %c0_3 = arith.constant 0 : index
    %c0_4 = arith.constant 0 : index
    %c0_5 = arith.constant 0 : index
    %2 = vector.load %arg4[%c0_3, %c0_4, %c0_5] : memref<2x4x8xbf16, #tpu.memory_space<vmem>>, vector<1x4x8xbf16>
    %3 = vector.shape_cast %2 : vector<1x4x8xbf16> to vector<4x8xbf16>
    %cst = arith.constant dense<0.000000e+00> : vector<4x64xf32>
    %4 = tpu.matmul %3, %1, %cst {dimension_numbers = #tpu.dot_dimension_numbers<[1], [0], [0], [1], [0, 0, 1, 1], [], []>} : vector<4x8xbf16>, vector<8x64xbf16>, vector<4x64xf32> -> vector<4x64xf32>
    %c0_6 = arith.constant 0 : index
    %c0_7 = arith.constant 0 : index
    %c0_8 = arith.constant 0 : index
    %c0_9 = arith.constant 0 : index
    %5 = vector.load %arg3[%c0_6, %c0_7, %c0_8, %c0_9] : memref<1x1x8x64xbf16, #tpu.memory_space<vmem>>, vector<1x1x8x64xbf16>
    %6 = vector.shape_cast %5 : vector<1x1x8x64xbf16> to vector<8x64xbf16>
    %c1 = arith.constant 1 : index
    %c0_10 = arith.constant 0 : index
    %c0_11 = arith.constant 0 : index
    %7 = vector.load %arg4[%c1, %c0_10, %c0_11] : memref<2x4x8xbf16, #tpu.memory_space<vmem>>, vector<1x4x8xbf16>
    %8 = vector.shape_cast %7 : vector<1x4x8xbf16> to vector<4x8xbf16>
    %cst_12 = arith.constant dense<0.000000e+00> : vector<4x64xf32>
    %9 = tpu.matmul %8, %6, %cst_12 {dimension_numbers = #tpu.dot_dimension_numbers<[1], [0], [0], [1], [0, 0, 1, 1], [], []>} : vector<4x8xbf16>, vector<8x64xbf16>, vector<4x64xf32> -> vector<4x64xf32>
    %10 = arith.addf %4, %9 : vector<4x64xf32>
    %c0_13 = arith.constant 0 : index
    %c0_14 = arith.constant 0 : index
    %11 = vector.load %arg5[%c0_13, %c0_14] : memref<4x1xf32, #tpu.memory_space<vmem>>, vector<4x1xf32>
    %12 = vector.broadcast %11 : vector<4x1xf32> to vector<4x64xf32>
    %13 = arith.addf %10, %12 : vector<4x64xf32>
    %14 = arith.truncf %13 : vector<4x64xf32> to vector<4x64xbf16>
    %c0_15 = arith.constant 0 : index
    %c0_16 = arith.constant 0 : index
    %c0_17 = arith.constant 0 : index
    %c0_18 = arith.constant 0 : index
    %15 = vector.load %arg6[%c0_15, %c0_16, %c0_17, %c0_18] : memref<1x1x4x64xbf16, #tpu.memory_space<vmem>>, vector<1x1x4x64xbf16>
    %16 = vector.shape_cast %15 : vector<1x1x4x64xbf16> to vector<4x64xbf16>
    %17 = vector.shape_cast %14 : vector<4x64xbf16> to vector<1x1x4x64xbf16>
    tpu.vector_store %arg6[%c0_15, %c0_16, %c0_17, %c0_18], %17 {strides = array<i32>} : memref<1x1x4x64xbf16, #tpu.memory_space<vmem>>, vector<1x1x4x64xbf16>,
    return
  }
  func.func @transform_0(%arg0: i32, %arg1: i32) -> (i32, i32, i32, i32) {
    %c1_i32 = arith.constant 1 : i32
    %0 = arith.muli %arg1, %c1_i32 : i32
    %c0_i32 = arith.constant 0 : i32
    %1 = arith.addi %0, %c0_i32 : i32
    %c0_i32_0 = arith.constant 0 : i32
    %c0_i32_1 = arith.constant 0 : i32
    %c0_i32_2 = arith.constant 0 : i32
    return %arg0, %1, %c0_i32_0, %c0_i32_1 : i32, i32, i32, i32
  }
  func.func @transform_1(%arg0: i32, %arg1: i32) -> (i32, i32, i32, i32) {
    %c1_i32 = arith.constant 1 : i32
    %0 = arith.muli %arg1, %c1_i32 : i32
    %c1_i32_0 = arith.constant 1 : i32
    %1 = arith.addi %0, %c1_i32_0 : i32
    %c0_i32 = arith.constant 0 : i32
    %c0_i32_1 = arith.constant 0 : i32
    %c0_i32_2 = arith.constant 0 : i32
    return %arg0, %1, %c0_i32, %c0_i32_1 : i32, i32, i32, i32
  }
  func.func @transform_2(%arg0: i32, %arg1: i32) -> (i32, i32, i32) {
    %c0_i32 = arith.constant 0 : i32
    %c0_i32_0 = arith.constant 0 : i32
    %c0_i32_1 = arith.constant 0 : i32
    %c0_i32_2 = arith.constant 0 : i32
    return %c0_i32, %c0_i32_0, %c0_i32_1 : i32, i32, i32
  }
  func.func @transform_3(%arg0: i32, %arg1: i32) -> (i32, i32) {
    %c0_i32 = arith.constant 0 : i32
    %c0_i32_0 = arith.constant 0 : i32
    %c0_i32_1 = arith.constant 0 : i32
    return %c0_i32, %c0_i32_0 : i32, i32
  }
  func.func @transform_4(%arg0: i32, %arg1: i32) -> (i32, i32, i32, i32) {
    %c0_i32 = arith.constant 0 : i32
    %c0_i32_0 = arith.constant 0 : i32
    %c0_i32_1 = arith.constant 0 : i32
    return %arg0, %arg1, %c0_i32, %c0_i32_0 : i32, i32, i32, i32
  }
}

module attributes {stable_mosaic.version = 11 : i64} {
  func.func @_fused_conv_kernel(%arg0: i32, %arg1: i32, %arg2: memref<1x1x8x72xbf16, #tpu.memory_space<vmem>>, %arg3: memref<1x1x8x72xbf16, #tpu.memory_space<vmem>>, %arg4: memref<4x4x8xbf16, #tpu.memory_space<vmem>>, %arg5: memref<4x1xf32, #tpu.memory_space<vmem>>, %arg6: memref<1x1x4x64xbf16, #tpu.memory_space<vmem>>) attributes {dimension_semantics = [#tpu.dimension_semantics<parallel>, #tpu.dimension_semantics<parallel>], iteration_bounds = array<i64: 2, 4>, scalar_prefetch = 0 : i64, scratch_operands = 0 : i64, tpu.core_type = #tpu.core_type<tc>, window_params = [{transform_indices = @transform_0, window_bounds = array<i64: 1, 1, 8, 72>}, {transform_indices = @transform_1, window_bounds = array<i64: 1, 1, 8, 72>}, {pipeline_mode = #tpu.pipeline_mode<synchronous>, transform_indices = @transform_2, window_bounds = array<i64: 4, 4, 8>}, {pipeline_mode = #tpu.pipeline_mode<synchronous>, transform_indices = @transform_3, window_bounds = array<i64: 4, 1>}, {transform_indices = @transform_4, window_bounds = array<i64: 1, 1, 4, 64>}]} {
    %c0 = arith.constant 0 : index
    %c0_0 = arith.constant 0 : index
    %c0_1 = arith.constant 0 : index
    %c0_2 = arith.constant 0 : index
    %0 = vector.load %arg2[%c0, %c0_0, %c0_1, %c0_2] : memref<1x1x8x72xbf16, #tpu.memory_space<vmem>>, vector<1x1x8x64xbf16>
    %1 = vector.shape_cast %0 : vector<1x1x8x64xbf16> to vector<8x64xbf16>
    %c0_3 = arith.constant 0 : index
    %c0_4 = arith.constant 0 : index
    %c0_5 = arith.constant 0 : index
    %2 = vector.load %arg4[%c0_3, %c0_4, %c0_5] : memref<4x4x8xbf16, #tpu.memory_space<vmem>>, vector<1x4x8xbf16>
    %3 = vector.shape_cast %2 : vector<1x4x8xbf16> to vector<4x8xbf16>
    %cst = arith.constant dense<0.000000e+00> : vector<4x64xf32>
    %4 = tpu.matmul %3, %1, %cst {dimension_numbers = #tpu.dot_dimension_numbers<[1], [0], [0], [1], [0, 0, 1, 1], [], []>} : vector<4x8xbf16>, vector<8x64xbf16>, vector<4x64xf32> -> vector<4x64xf32>
    %c0_6 = arith.constant 0 : index
    %c0_7 = arith.constant 0 : index
    %c0_8 = arith.constant 0 : index
    %c8 = arith.constant 8 : index
    %5 = vector.load %arg2[%c0_6, %c0_7, %c0_8, %c8] : memref<1x1x8x72xbf16, #tpu.memory_space<vmem>>, vector<1x1x8x64xbf16>
    %6 = vector.shape_cast %5 : vector<1x1x8x64xbf16> to vector<8x64xbf16>
    %c1 = arith.constant 1 : index
    %c0_9 = arith.constant 0 : index
    %c0_10 = arith.constant 0 : index
    %7 = vector.load %arg4[%c1, %c0_9, %c0_10] : memref<4x4x8xbf16, #tpu.memory_space<vmem>>, vector<1x4x8xbf16>
    %8 = vector.shape_cast %7 : vector<1x4x8xbf16> to vector<4x8xbf16>
    %cst_11 = arith.constant dense<0.000000e+00> : vector<4x64xf32>
    %9 = tpu.matmul %8, %6, %cst_11 {dimension_numbers = #tpu.dot_dimension_numbers<[1], [0], [0], [1], [0, 0, 1, 1], [], []>} : vector<4x8xbf16>, vector<8x64xbf16>, vector<4x64xf32> -> vector<4x64xf32>
    %10 = arith.addf %4, %9 : vector<4x64xf32>
    %c0_12 = arith.constant 0 : index
    %c0_13 = arith.constant 0 : index
    %c0_14 = arith.constant 0 : index
    %c0_15 = arith.constant 0 : index
    %11 = vector.load %arg3[%c0_12, %c0_13, %c0_14, %c0_15] : memref<1x1x8x72xbf16, #tpu.memory_space<vmem>>, vector<1x1x8x64xbf16>
    %12 = vector.shape_cast %11 : vector<1x1x8x64xbf16> to vector<8x64xbf16>
    %c2 = arith.constant 2 : index
    %c0_16 = arith.constant 0 : index
    %c0_17 = arith.constant 0 : index
    %13 = vector.load %arg4[%c2, %c0_16, %c0_17] : memref<4x4x8xbf16, #tpu.memory_space<vmem>>, vector<1x4x8xbf16>
    %14 = vector.shape_cast %13 : vector<1x4x8xbf16> to vector<4x8xbf16>
    %cst_18 = arith.constant dense<0.000000e+00> : vector<4x64xf32>
    %15 = tpu.matmul %14, %12, %cst_18 {dimension_numbers = #tpu.dot_dimension_numbers<[1], [0], [0], [1], [0, 0, 1, 1], [], []>} : vector<4x8xbf16>, vector<8x64xbf16>, vector<4x64xf32> -> vector<4x64xf32>
    %16 = arith.addf %10, %15 : vector<4x64xf32>
    %c0_19 = arith.constant 0 : index
    %c0_20 = arith.constant 0 : index
    %c0_21 = arith.constant 0 : index
    %c8_22 = arith.constant 8 : index
    %17 = vector.load %arg3[%c0_19, %c0_20, %c0_21, %c8_22] : memref<1x1x8x72xbf16, #tpu.memory_space<vmem>>, vector<1x1x8x64xbf16>
    %18 = vector.shape_cast %17 : vector<1x1x8x64xbf16> to vector<8x64xbf16>
    %c3 = arith.constant 3 : index
    %c0_23 = arith.constant 0 : index
    %c0_24 = arith.constant 0 : index
    %19 = vector.load %arg4[%c3, %c0_23, %c0_24] : memref<4x4x8xbf16, #tpu.memory_space<vmem>>, vector<1x4x8xbf16>
    %20 = vector.shape_cast %19 : vector<1x4x8xbf16> to vector<4x8xbf16>
    %cst_25 = arith.constant dense<0.000000e+00> : vector<4x64xf32>
    %21 = tpu.matmul %20, %18, %cst_25 {dimension_numbers = #tpu.dot_dimension_numbers<[1], [0], [0], [1], [0, 0, 1, 1], [], []>} : vector<4x8xbf16>, vector<8x64xbf16>, vector<4x64xf32> -> vector<4x64xf32>
    %22 = arith.addf %16, %21 : vector<4x64xf32>
    %c0_26 = arith.constant 0 : index
    %c0_27 = arith.constant 0 : index
    %23 = vector.load %arg5[%c0_26, %c0_27] : memref<4x1xf32, #tpu.memory_space<vmem>>, vector<4x1xf32>
    %24 = vector.broadcast %23 : vector<4x1xf32> to vector<4x64xf32>
    %25 = arith.addf %22, %24 : vector<4x64xf32>
    %26 = arith.truncf %25 : vector<4x64xf32> to vector<4x64xbf16>
    %c0_28 = arith.constant 0 : index
    %c0_29 = arith.constant 0 : index
    %c0_30 = arith.constant 0 : index
    %c0_31 = arith.constant 0 : index
    %27 = vector.load %arg6[%c0_28, %c0_29, %c0_30, %c0_31] : memref<1x1x4x64xbf16, #tpu.memory_space<vmem>>, vector<1x1x4x64xbf16>
    %28 = vector.shape_cast %27 : vector<1x1x4x64xbf16> to vector<4x64xbf16>
    %29 = vector.shape_cast %26 : vector<4x64xbf16> to vector<1x1x4x64xbf16>
    tpu.vector_store %arg6[%c0_28, %c0_29, %c0_30, %c0_31], %29 {strides = array<i32>} : memref<1x1x4x64xbf16, #tpu.memory_space<vmem>>, vector<1x1x4x64xbf16>,
    return
  }
  func.func @transform_0(%arg0: i32, %arg1: i32) -> (i32, i32, i32, i32) {
    %c1_i32 = arith.constant 1 : i32
    %0 = arith.muli %arg1, %c1_i32 : i32
    %c0_i32 = arith.constant 0 : i32
    %1 = arith.addi %0, %c0_i32 : i32
    %c0_i32_0 = arith.constant 0 : i32
    %c0_i32_1 = arith.constant 0 : i32
    %c0_i32_2 = arith.constant 0 : i32
    return %arg0, %1, %c0_i32_0, %c0_i32_1 : i32, i32, i32, i32
  }
  func.func @transform_1(%arg0: i32, %arg1: i32) -> (i32, i32, i32, i32) {
    %c1_i32 = arith.constant 1 : i32
    %0 = arith.muli %arg1, %c1_i32 : i32
    %c1_i32_0 = arith.constant 1 : i32
    %1 = arith.addi %0, %c1_i32_0 : i32
    %c0_i32 = arith.constant 0 : i32
    %c0_i32_1 = arith.constant 0 : i32
    %c0_i32_2 = arith.constant 0 : i32
    return %arg0, %1, %c0_i32, %c0_i32_1 : i32, i32, i32, i32
  }
  func.func @transform_2(%arg0: i32, %arg1: i32) -> (i32, i32, i32) {
    %c0_i32 = arith.constant 0 : i32
    %c0_i32_0 = arith.constant 0 : i32
    %c0_i32_1 = arith.constant 0 : i32
    %c0_i32_2 = arith.constant 0 : i32
    return %c0_i32, %c0_i32_0, %c0_i32_1 : i32, i32, i32
  }
  func.func @transform_3(%arg0: i32, %arg1: i32) -> (i32, i32) {
    %c0_i32 = arith.constant 0 : i32
    %c0_i32_0 = arith.constant 0 : i32
    %c0_i32_1 = arith.constant 0 : i32
    return %c0_i32, %c0_i32_0 : i32, i32
  }
  func.func @transform_4(%arg0: i32, %arg1: i32) -> (i32, i32, i32, i32) {
    %c0_i32 = arith.constant 0 : i32
    %c0_i32_0 = arith.constant 0 : i32
    %c0_i32_1 = arith.constant 0 : i32
    return %arg0, %arg1, %c0_i32, %c0_i32_0 : i32, i32, i32, i32
  }
}

module attributes {stable_mosaic.version = 11 : i64} {
  func.func @_fused_conv_kernel(%arg0: i32, %arg1: i32, %arg2: memref<1x1x8x72xbf16, #tpu.memory_space<vmem>>, %arg3: memref<2x4x8xbf16, #tpu.memory_space<vmem>>, %arg4: memref<4x1xf32, #tpu.memory_space<vmem>>, %arg5: memref<1x1x4x71xbf16, #tpu.memory_space<vmem>>) attributes {dimension_semantics = [#tpu.dimension_semantics<parallel>, #tpu.dimension_semantics<parallel>], iteration_bounds = array<i64: 2, 4>, scalar_prefetch = 0 : i64, scratch_operands = 0 : i64, tpu.core_type = #tpu.core_type<tc>, window_params = [{transform_indices = @transform_0, window_bounds = array<i64: 1, 1, 8, 72>}, {pipeline_mode = #tpu.pipeline_mode<synchronous>, transform_indices = @transform_1, window_bounds = array<i64: 2, 4, 8>}, {pipeline_mode = #tpu.pipeline_mode<synchronous>, transform_indices = @transform_2, window_bounds = array<i64: 4, 1>}, {transform_indices = @transform_3, window_bounds = array<i64: 1, 1, 4, 71>}]} {
    %c0 = arith.constant 0 : index
    %c0_0 = arith.constant 0 : index
    %c0_1 = arith.constant 0 : index
    %c0_2 = arith.constant 0 : index
    %0 = vector.load %arg2[%c0, %c0_0, %c0_1, %c0_2] : memref<1x1x8x72xbf16, #tpu.memory_space<vmem>>, vector<1x1x8x71xbf16>
    %1 = vector.shape_cast %0 : vector<1x1x8x71xbf16> to vector<8x71xbf16>
    %c0_3 = arith.constant 0 : index
    %c0_4 = arith.constant 0 : index
    %c0_5 = arith.constant 0 : index
    %2 = vector.load %arg3[%c0_3, %c0_4, %c0_5] : memref<2x4x8xbf16, #tpu.memory_space<vmem>>, vector<1x4x8xbf16>
    %3 = vector.shape_cast %2 : vector<1x4x8xbf16> to vector<4x8xbf16>
    %cst = arith.constant dense<0.000000e+00> : vector<4x71xf32>
    %4 = tpu.matmul %3, %1, %cst {dimension_numbers = #tpu.dot_dimension_numbers<[1], [0], [0], [1], [0, 0, 1, 1], [], []>} : vector<4x8xbf16>, vector<8x71xbf16>, vector<4x71xf32> -> vector<4x71xf32>
    %c0_6 = arith.constant 0 : index
    %c0_7 = arith.constant 0 : index
    %c0_8 = arith.constant 0 : index
    %c1 = arith.constant 1 : index
    %5 = vector.load %arg2[%c0_6, %c0_7, %c0_8, %c1] : memref<1x1x8x72xbf16, #tpu.memory_space<vmem>>, vector<1x1x8x71xbf16>
    %6 = vector.shape_cast %5 : vector<1x1x8x71xbf16> to vector<8x71xbf16>
    %c1_9 = arith.constant 1 : index
    %c0_10 = arith.constant 0 : index
    %c0_11 = arith.constant 0 : index
    %7 = vector.load %arg3[%c1_9, %c0_10, %c0_11] : memref<2x4x8xbf16, #tpu.memory_space<vmem>>, vector<1x4x8xbf16>
    %8 = vector.shape_cast %7 : vector<1x4x8xbf16> to vector<4x8xbf16>
    %cst_12 = arith.constant dense<0.000000e+00> : vector<4x71xf32>
    %9 = tpu.matmul %8, %6, %cst_12 {dimension_numbers = #tpu.dot_dimension_numbers<[1], [0], [0], [1], [0, 0, 1, 1], [], []>} : vector<4x8xbf16>, vector<8x71xbf16>, vector<4x71xf32> -> vector<4x71xf32>
    %10 = arith.addf %4, %9 : vector<4x71xf32>
    %c0_13 = arith.constant 0 : index
    %c0_14 = arith.constant 0 : index
    %11 = vector.load %arg4[%c0_13, %c0_14] : memref<4x1xf32, #tpu.memory_space<vmem>>, vector<4x1xf32>
    %12 = vector.broadcast %11 : vector<4x1xf32> to vector<4x71xf32>
    %13 = arith.addf %10, %12 : vector<4x71xf32>
    %14 = arith.truncf %13 : vector<4x71xf32> to vector<4x71xbf16>
    %c0_15 = arith.constant 0 : index
    %c0_16 = arith.constant 0 : index
    %c0_17 = arith.constant 0 : index
    %c0_18 = arith.constant 0 : index
    %15 = vector.load %arg5[%c0_15, %c0_16, %c0_17, %c0_18] : memref<1x1x4x71xbf16, #tpu.memory_space<vmem>>, vector<1x1x4x71xbf16>
    %16 = vector.shape_cast %15 : vector<1x1x4x71xbf16> to vector<4x71xbf16>
    %17 = vector.shape_cast %14 : vector<4x71xbf16> to vector<1x1x4x71xbf16>
    tpu.vector_store %arg5[%c0_15, %c0_16, %c0_17, %c0_18], %17 {strides = array<i32>} : memref<1x1x4x71xbf16, #tpu.memory_space<vmem>>, vector<1x1x4x71xbf16>,
    return
  }
  func.func @transform_0(%arg0: i32, %arg1: i32) -> (i32, i32, i32, i32) {
    %c1_i32 = arith.constant 1 : i32
    %0 = arith.muli %arg1, %c1_i32 : i32
    %c0_i32 = arith.constant 0 : i32
    %1 = arith.addi %0, %c0_i32 : i32
    %c0_i32_0 = arith.constant 0 : i32
    %c0_i32_1 = arith.constant 0 : i32
    %c0_i32_2 = arith.constant 0 : i32
    return %arg0, %1, %c0_i32_0, %c0_i32_1 : i32, i32, i32, i32
  }
  func.func @transform_1(%arg0: i32, %arg1: i32) -> (i32, i32, i32) {
    %c0_i32 = arith.constant 0 : i32
    %c0_i32_0 = arith.constant 0 : i32
    %c0_i32_1 = arith.constant 0 : i32
    %c0_i32_2 = arith.constant 0 : i32
    return %c0_i32, %c0_i32_0, %c0_i32_1 : i32, i32, i32
  }
  func.func @transform_2(%arg0: i32, %arg1: i32) -> (i32, i32) {
    %c0_i32 = arith.constant 0 : i32
    %c0_i32_0 = arith.constant 0 : i32
    %c0_i32_1 = arith.constant 0 : i32
    return %c0_i32, %c0_i32_0 : i32, i32
  }
  func.func @transform_3(%arg0: i32, %arg1: i32) -> (i32, i32, i32, i32) {
    %c0_i32 = arith.constant 0 : i32
    %c0_i32_0 = arith.constant 0 : i32
    %c0_i32_1 = arith.constant 0 : i32
    return %arg0, %arg1, %c0_i32, %c0_i32_0 : i32, i32, i32, i32
  }
}

module attributes {stable_mosaic.version = 11 : i64} {
  func.func @_fused_conv_kernel(%arg0: i32, %arg1: i32, %arg2: memref<1x1x8x81xbf16, #tpu.memory_space<vmem>>, %arg3: memref<4x4x8xbf16, #tpu.memory_space<vmem>>, %arg4: memref<4x1xf32, #tpu.memory_space<vmem>>, %arg5: memref<1x1x4x71xbf16, #tpu.memory_space<vmem>>) attributes {dimension_semantics = [#tpu.dimension_semantics<parallel>, #tpu.dimension_semantics<parallel>], iteration_bounds = array<i64: 2, 4>, scalar_prefetch = 0 : i64, scratch_operands = 0 : i64, tpu.core_type = #tpu.core_type<tc>, window_params = [{transform_indices = @transform_0, window_bounds = array<i64: 1, 1, 8, 81>}, {pipeline_mode = #tpu.pipeline_mode<synchronous>, transform_indices = @transform_1, window_bounds = array<i64: 4, 4, 8>}, {pipeline_mode = #tpu.pipeline_mode<synchronous>, transform_indices = @transform_2, window_bounds = array<i64: 4, 1>}, {transform_indices = @transform_3, window_bounds = array<i64: 1, 1, 4, 71>}]} {
    %c0 = arith.constant 0 : index
    %c0_0 = arith.constant 0 : index
    %c0_1 = arith.constant 0 : index
    %c0_2 = arith.constant 0 : index
    %0 = vector.load %arg2[%c0, %c0_0, %c0_1, %c0_2] : memref<1x1x8x81xbf16, #tpu.memory_space<vmem>>, vector<1x1x8x71xbf16>
    %1 = vector.shape_cast %0 : vector<1x1x8x71xbf16> to vector<8x71xbf16>
    %c0_3 = arith.constant 0 : index
    %c0_4 = arith.constant 0 : index
    %c0_5 = arith.constant 0 : index
    %2 = vector.load %arg3[%c0_3, %c0_4, %c0_5] : memref<4x4x8xbf16, #tpu.memory_space<vmem>>, vector<1x4x8xbf16>
    %3 = vector.shape_cast %2 : vector<1x4x8xbf16> to vector<4x8xbf16>
    %cst = arith.constant dense<0.000000e+00> : vector<4x71xf32>
    %4 = tpu.matmul %3, %1, %cst {dimension_numbers = #tpu.dot_dimension_numbers<[1], [0], [0], [1], [0, 0, 1, 1], [], []>} : vector<4x8xbf16>, vector<8x71xbf16>, vector<4x71xf32> -> vector<4x71xf32>
    %c0_6 = arith.constant 0 : index
    %c0_7 = arith.constant 0 : index
    %c0_8 = arith.constant 0 : index
    %c1 = arith.constant 1 : index
    %5 = vector.load %arg2[%c0_6, %c0_7, %c0_8, %c1] : memref<1x1x8x81xbf16, #tpu.memory_space<vmem>>, vector<1x1x8x71xbf16>
    %6 = vector.shape_cast %5 : vector<1x1x8x71xbf16> to vector<8x71xbf16>
    %c1_9 = arith.constant 1 : index
    %c0_10 = arith.constant 0 : index
    %c0_11 = arith.constant 0 : index
    %7 = vector.load %arg3[%c1_9, %c0_10, %c0_11] : memref<4x4x8xbf16, #tpu.memory_space<vmem>>, vector<1x4x8xbf16>
    %8 = vector.shape_cast %7 : vector<1x4x8xbf16> to vector<4x8xbf16>
    %cst_12 = arith.constant dense<0.000000e+00> : vector<4x71xf32>
    %9 = tpu.matmul %8, %6, %cst_12 {dimension_numbers = #tpu.dot_dimension_numbers<[1], [0], [0], [1], [0, 0, 1, 1], [], []>} : vector<4x8xbf16>, vector<8x71xbf16>, vector<4x71xf32> -> vector<4x71xf32>
    %10 = arith.addf %4, %9 : vector<4x71xf32>
    %c0_13 = arith.constant 0 : index
    %c0_14 = arith.constant 0 : index
    %c0_15 = arith.constant 0 : index
    %c9 = arith.constant 9 : index
    %11 = vector.load %arg2[%c0_13, %c0_14, %c0_15, %c9] : memref<1x1x8x81xbf16, #tpu.memory_space<vmem>>, vector<1x1x8x71xbf16>
    %12 = vector.shape_cast %11 : vector<1x1x8x71xbf16> to vector<8x71xbf16>
    %c2 = arith.constant 2 : index
    %c0_16 = arith.constant 0 : index
    %c0_17 = arith.constant 0 : index
    %13 = vector.load %arg3[%c2, %c0_16, %c0_17] : memref<4x4x8xbf16, #tpu.memory_space<vmem>>, vector<1x4x8xbf16>
    %14 = vector.shape_cast %13 : vector<1x4x8xbf16> to vector<4x8xbf16>
    %cst_18 = arith.constant dense<0.000000e+00> : vector<4x71xf32>
    %15 = tpu.matmul %14, %12, %cst_18 {dimension_numbers = #tpu.dot_dimension_numbers<[1], [0], [0], [1], [0, 0, 1, 1], [], []>} : vector<4x8xbf16>, vector<8x71xbf16>, vector<4x71xf32> -> vector<4x71xf32>
    %16 = arith.addf %10, %15 : vector<4x71xf32>
    %c0_19 = arith.constant 0 : index
    %c0_20 = arith.constant 0 : index
    %c0_21 = arith.constant 0 : index
    %c10 = arith.constant 10 : index
    %17 = vector.load %arg2[%c0_19, %c0_20, %c0_21, %c10] : memref<1x1x8x81xbf16, #tpu.memory_space<vmem>>, vector<1x1x8x71xbf16>
    %18 = vector.shape_cast %17 : vector<1x1x8x71xbf16> to vector<8x71xbf16>
    %c3 = arith.constant 3 : index
    %c0_22 = arith.constant 0 : index
    %c0_23 = arith.constant 0 : index
    %19 = vector.load %arg3[%c3, %c0_22, %c0_23] : memref<4x4x8xbf16, #tpu.memory_space<vmem>>, vector<1x4x8xbf16>
    %20 = vector.shape_cast %19 : vector<1x4x8xbf16> to vector<4x8xbf16>
    %cst_24 = arith.constant dense<0.000000e+00> : vector<4x71xf32>
    %21 = tpu.matmul %20, %18, %cst_24 {dimension_numbers = #tpu.dot_dimension_numbers<[1], [0], [0], [1], [0, 0, 1, 1], [], []>} : vector<4x8xbf16>, vector<8x71xbf16>, vector<4x71xf32> -> vector<4x71xf32>
    %22 = arith.addf %16, %21 : vector<4x71xf32>
    %c0_25 = arith.constant 0 : index
    %c0_26 = arith.constant 0 : index
    %23 = vector.load %arg4[%c0_25, %c0_26] : memref<4x1xf32, #tpu.memory_space<vmem>>, vector<4x1xf32>
    %24 = vector.broadcast %23 : vector<4x1xf32> to vector<4x71xf32>
    %25 = arith.addf %22, %24 : vector<4x71xf32>
    %26 = arith.truncf %25 : vector<4x71xf32> to vector<4x71xbf16>
    %c0_27 = arith.constant 0 : index
    %c0_28 = arith.constant 0 : index
    %c0_29 = arith.constant 0 : index
    %c0_30 = arith.constant 0 : index
    %27 = vector.load %arg5[%c0_27, %c0_28, %c0_29, %c0_30] : memref<1x1x4x71xbf16, #tpu.memory_space<vmem>>, vector<1x1x4x71xbf16>
    %28 = vector.shape_cast %27 : vector<1x1x4x71xbf16> to vector<4x71xbf16>
    %29 = vector.shape_cast %26 : vector<4x71xbf16> to vector<1x1x4x71xbf16>
    tpu.vector_store %arg5[%c0_27, %c0_28, %c0_29, %c0_30], %29 {strides = array<i32>} : memref<1x1x4x71xbf16, #tpu.memory_space<vmem>>, vector<1x1x4x71xbf16>,
    return
  }
  func.func @transform_0(%arg0: i32, %arg1: i32) -> (i32, i32, i32, i32) {
    %c1_i32 = arith.constant 1 : i32
    %0 = arith.muli %arg1, %c1_i32 : i32
    %c0_i32 = arith.constant 0 : i32
    %1 = arith.addi %0, %c0_i32 : i32
    %c0_i32_0 = arith.constant 0 : i32
    %c0_i32_1 = arith.constant 0 : i32
    %c0_i32_2 = arith.constant 0 : i32
    return %arg0, %1, %c0_i32_0, %c0_i32_1 : i32, i32, i32, i32
  }
  func.func @transform_1(%arg0: i32, %arg1: i32) -> (i32, i32, i32) {
    %c0_i32 = arith.constant 0 : i32
    %c0_i32_0 = arith.constant 0 : i32
    %c0_i32_1 = arith.constant 0 : i32
    %c0_i32_2 = arith.constant 0 : i32
    return %c0_i32, %c0_i32_0, %c0_i32_1 : i32, i32, i32
  }
  func.func @transform_2(%arg0: i32, %arg1: i32) -> (i32, i32) {
    %c0_i32 = arith.constant 0 : i32
    %c0_i32_0 = arith.constant 0 : i32
    %c0_i32_1 = arith.constant 0 : i32
    return %c0_i32, %c0_i32_0 : i32, i32
  }
  func.func @transform_3(%arg0: i32, %arg1: i32) -> (i32, i32, i32, i32) {
    %c0_i32 = arith.constant 0 : i32
    %c0_i32_0 = arith.constant 0 : i32
    %c0_i32_1 = arith.constant 0 : i32
    return %arg0, %arg1, %c0_i32, %c0_i32_0 : i32, i32, i32, i32
  }
}

module attributes {stable_mosaic.version = 11 : i64} {
  func.func @_fused_conv_kernel(%arg0: i32, %arg1: i32, %arg2: memref<1x1x8x72xbf16, #tpu.memory_space<vmem>>, %arg3: memref<1x1x8x72xbf16, #tpu.memory_space<vmem>>, %arg4: memref<4x4x8xbf16, #tpu.memory_space<vmem>>, %arg5: memref<4x1xf32, #tpu.memory_space<vmem>>, %arg6: memref<1x1x4x71xbf16, #tpu.memory_space<vmem>>) attributes {dimension_semantics = [#tpu.dimension_semantics<parallel>, #tpu.dimension_semantics<parallel>], iteration_bounds = array<i64: 2, 4>, scalar_prefetch = 0 : i64, scratch_operands = 0 : i64, tpu.core_type = #tpu.core_type<tc>, window_params = [{transform_indices = @transform_0, window_bounds = array<i64: 1, 1, 8, 72>}, {transform_indices = @transform_1, window_bounds = array<i64: 1, 1, 8, 72>}, {pipeline_mode = #tpu.pipeline_mode<synchronous>, transform_indices = @transform_2, window_bounds = array<i64: 4, 4, 8>}, {pipeline_mode = #tpu.pipeline_mode<synchronous>, transform_indices = @transform_3, window_bounds = array<i64: 4, 1>}, {transform_indices = @transform_4, window_bounds = array<i64: 1, 1, 4, 71>}]} {
    %c0 = arith.constant 0 : index
    %c0_0 = arith.constant 0 : index
    %c0_1 = arith.constant 0 : index
    %c0_2 = arith.constant 0 : index
    %0 = vector.load %arg2[%c0, %c0_0, %c0_1, %c0_2] : memref<1x1x8x72xbf16, #tpu.memory_space<vmem>>, vector<1x1x8x71xbf16>
    %1 = vector.shape_cast %0 : vector<1x1x8x71xbf16> to vector<8x71xbf16>
    %c0_3 = arith.constant 0 : index
    %c0_4 = arith.constant 0 : index
    %c0_5 = arith.constant 0 : index
    %2 = vector.load %arg4[%c0_3, %c0_4, %c0_5] : memref<4x4x8xbf16, #tpu.memory_space<vmem>>, vector<1x4x8xbf16>
    %3 = vector.shape_cast %2 : vector<1x4x8xbf16> to vector<4x8xbf16>
    %cst = arith.constant dense<0.000000e+00> : vector<4x71xf32>
    %4 = tpu.matmul %3, %1, %cst {dimension_numbers = #tpu.dot_dimension_numbers<[1], [0], [0], [1], [0, 0, 1, 1], [], []>} : vector<4x8xbf16>, vector<8x71xbf16>, vector<4x71xf32> -> vector<4x71xf32>
    %c0_6 = arith.constant 0 : index
    %c0_7 = arith.constant 0 : index
    %c0_8 = arith.constant 0 : index
    %c1 = arith.constant 1 : index
    %5 = vector.load %arg2[%c0_6, %c0_7, %c0_8, %c1] : memref<1x1x8x72xbf16, #tpu.memory_space<vmem>>, vector<1x1x8x71xbf16>
    %6 = vector.shape_cast %5 : vector<1x1x8x71xbf16> to vector<8x71xbf16>
    %c1_9 = arith.constant 1 : index
    %c0_10 = arith.constant 0 : index
    %c0_11 = arith.constant 0 : index
    %7 = vector.load %arg4[%c1_9, %c0_10, %c0_11] : memref<4x4x8xbf16, #tpu.memory_space<vmem>>, vector<1x4x8xbf16>
    %8 = vector.shape_cast %7 : vector<1x4x8xbf16> to vector<4x8xbf16>
    %cst_12 = arith.constant dense<0.000000e+00> : vector<4x71xf32>
    %9 = tpu.matmul %8, %6, %cst_12 {dimension_numbers = #tpu.dot_dimension_numbers<[1], [0], [0], [1], [0, 0, 1, 1], [], []>} : vector<4x8xbf16>, vector<8x71xbf16>, vector<4x71xf32> -> vector<4x71xf32>
    %10 = arith.addf %4, %9 : vector<4x71xf32>
    %c0_13 = arith.constant 0 : index
    %c0_14 = arith.constant 0 : index
    %c0_15 = arith.constant 0 : index
    %c0_16 = arith.constant 0 : index
    %11 = vector.load %arg3[%c0_13, %c0_14, %c0_15, %c0_16] : memref<1x1x8x72xbf16, #tpu.memory_space<vmem>>, vector<1x1x8x71xbf16>
    %12 = vector.shape_cast %11 : vector<1x1x8x71xbf16> to vector<8x71xbf16>
    %c2 = arith.constant 2 : index
    %c0_17 = arith.constant 0 : index
    %c0_18 = arith.constant 0 : index
    %13 = vector.load %arg4[%c2, %c0_17, %c0_18] : memref<4x4x8xbf16, #tpu.memory_space<vmem>>, vector<1x4x8xbf16>
    %14 = vector.shape_cast %13 : vector<1x4x8xbf16> to vector<4x8xbf16>
    %cst_19 = arith.constant dense<0.000000e+00> : vector<4x71xf32>
    %15 = tpu.matmul %14, %12, %cst_19 {dimension_numbers = #tpu.dot_dimension_numbers<[1], [0], [0], [1], [0, 0, 1, 1], [], []>} : vector<4x8xbf16>, vector<8x71xbf16>, vector<4x71xf32> -> vector<4x71xf32>
    %16 = arith.addf %10, %15 : vector<4x71xf32>
    %c0_20 = arith.constant 0 : index
    %c0_21 = arith.constant 0 : index
    %c0_22 = arith.constant 0 : index
    %c1_23 = arith.constant 1 : index
    %17 = vector.load %arg3[%c0_20, %c0_21, %c0_22, %c1_23] : memref<1x1x8x72xbf16, #tpu.memory_space<vmem>>, vector<1x1x8x71xbf16>
    %18 = vector.shape_cast %17 : vector<1x1x8x71xbf16> to vector<8x71xbf16>
    %c3 = arith.constant 3 : index
    %c0_24 = arith.constant 0 : index
    %c0_25 = arith.constant 0 : index
    %19 = vector.load %arg4[%c3, %c0_24, %c0_25] : memref<4x4x8xbf16, #tpu.memory_space<vmem>>, vector<1x4x8xbf16>
    %20 = vector.shape_cast %19 : vector<1x4x8xbf16> to vector<4x8xbf16>
    %cst_26 = arith.constant dense<0.000000e+00> : vector<4x71xf32>
    %21 = tpu.matmul %20, %18, %cst_26 {dimension_numbers = #tpu.dot_dimension_numbers<[1], [0], [0], [1], [0, 0, 1, 1], [], []>} : vector<4x8xbf16>, vector<8x71xbf16>, vector<4x71xf32> -> vector<4x71xf32>
    %22 = arith.addf %16, %21 : vector<4x71xf32>
    %c0_27 = arith.constant 0 : index
    %c0_28 = arith.constant 0 : index
    %23 = vector.load %arg5[%c0_27, %c0_28] : memref<4x1xf32, #tpu.memory_space<vmem>>, vector<4x1xf32>
    %24 = vector.broadcast %23 : vector<4x1xf32> to vector<4x71xf32>
    %25 = arith.addf %22, %24 : vector<4x71xf32>
    %26 = arith.truncf %25 : vector<4x71xf32> to vector<4x71xbf16>
    %c0_29 = arith.constant 0 : index
    %c0_30 = arith.constant 0 : index
    %c0_31 = arith.constant 0 : index
    %c0_32 = arith.constant 0 : index
    %27 = vector.load %arg6[%c0_29, %c0_30, %c0_31, %c0_32] : memref<1x1x4x71xbf16, #tpu.memory_space<vmem>>, vector<1x1x4x71xbf16>
    %28 = vector.shape_cast %27 : vector<1x1x4x71xbf16> to vector<4x71xbf16>
    %29 = vector.shape_cast %26 : vector<4x71xbf16> to vector<1x1x4x71xbf16>
    tpu.vector_store %arg6[%c0_29, %c0_30, %c0_31, %c0_32], %29 {strides = array<i32>} : memref<1x1x4x71xbf16, #tpu.memory_space<vmem>>, vector<1x1x4x71xbf16>,
    return
  }
  func.func @transform_0(%arg0: i32, %arg1: i32) -> (i32, i32, i32, i32) {
    %c1_i32 = arith.constant 1 : i32
    %0 = arith.muli %arg1, %c1_i32 : i32
    %c0_i32 = arith.constant 0 : i32
    %1 = arith.addi %0, %c0_i32 : i32
    %c0_i32_0 = arith.constant 0 : i32
    %c0_i32_1 = arith.constant 0 : i32
    %c0_i32_2 = arith.constant 0 : i32
    return %arg0, %1, %c0_i32_0, %c0_i32_1 : i32, i32, i32, i32
  }
  func.func @transform_1(%arg0: i32, %arg1: i32) -> (i32, i32, i32, i32) {
    %c1_i32 = arith.constant 1 : i32
    %0 = arith.muli %arg1, %c1_i32 : i32
    %c1_i32_0 = arith.constant 1 : i32
    %1 = arith.addi %0, %c1_i32_0 : i32
    %c0_i32 = arith.constant 0 : i32
    %c0_i32_1 = arith.constant 0 : i32
    %c0_i32_2 = arith.constant 0 : i32
    return %arg0, %1, %c0_i32, %c0_i32_1 : i32, i32, i32, i32
  }
  func.func @transform_2(%arg0: i32, %arg1: i32) -> (i32, i32, i32) {
    %c0_i32 = arith.constant 0 : i32
    %c0_i32_0 = arith.constant 0 : i32
    %c0_i32_1 = arith.constant 0 : i32
    %c0_i32_2 = arith.constant 0 : i32
    return %c0_i32, %c0_i32_0, %c0_i32_1 : i32, i32, i32
  }
  func.func @transform_3(%arg0: i32, %arg1: i32) -> (i32, i32) {
    %c0_i32 = arith.constant 0 : i32
    %c0_i32_0 = arith.constant 0 : i32
    %c0_i32_1 = arith.constant 0 : i32
    return %c0_i32, %c0_i32_0 : i32, i32
  }
  func.func @transform_4(%arg0: i32, %arg1: i32) -> (i32, i32, i32, i32) {
    %c0_i32 = arith.constant 0 : i32
    %c0_i32_0 = arith.constant 0 : i32
    %c0_i32_1 = arith.constant 0 : i32
    return %arg0, %arg1, %c0_i32, %c0_i32_0 : i32, i32, i32, i32
  }
}

module attributes {stable_mosaic.version = 11 : i64} {
  func.func @_fused_conv_kernel(%arg0: i32, %arg1: i32, %arg2: memref<1x1x8x81xbf16, #tpu.memory_space<vmem>>, %arg3: memref<1x1x8x81xbf16, #tpu.memory_space<vmem>>, %arg4: memref<8x4x8xbf16, #tpu.memory_space<vmem>>, %arg5: memref<4x1xf32, #tpu.memory_space<vmem>>, %arg6: memref<1x1x4x71xbf16, #tpu.memory_space<vmem>>) attributes {dimension_semantics = [#tpu.dimension_semantics<parallel>, #tpu.dimension_semantics<parallel>], iteration_bounds = array<i64: 2, 4>, scalar_prefetch = 0 : i64, scratch_operands = 0 : i64, tpu.core_type = #tpu.core_type<tc>, window_params = [{transform_indices = @transform_0, window_bounds = array<i64: 1, 1, 8, 81>}, {transform_indices = @transform_1, window_bounds = array<i64: 1, 1, 8, 81>}, {pipeline_mode = #tpu.pipeline_mode<synchronous>, transform_indices = @transform_2, window_bounds = array<i64: 8, 4, 8>}, {pipeline_mode = #tpu.pipeline_mode<synchronous>, transform_indices = @transform_3, window_bounds = array<i64: 4, 1>}, {transform_indices = @transform_4, window_bounds = array<i64: 1, 1, 4, 71>}]} {
    %c0 = arith.constant 0 : index
    %c0_0 = arith.constant 0 : index
    %c0_1 = arith.constant 0 : index
    %c0_2 = arith.constant 0 : index
    %0 = vector.load %arg2[%c0, %c0_0, %c0_1, %c0_2] : memref<1x1x8x81xbf16, #tpu.memory_space<vmem>>, vector<1x1x8x71xbf16>
    %1 = vector.shape_cast %0 : vector<1x1x8x71xbf16> to vector<8x71xbf16>
    %c0_3 = arith.constant 0 : index
    %c0_4 = arith.constant 0 : index
    %c0_5 = arith.constant 0 : index
    %2 = vector.load %arg4[%c0_3, %c0_4, %c0_5] : memref<8x4x8xbf16, #tpu.memory_space<vmem>>, vector<1x4x8xbf16>
    %3 = vector.shape_cast %2 : vector<1x4x8xbf16> to vector<4x8xbf16>
    %cst = arith.constant dense<0.000000e+00> : vector<4x71xf32>
    %4 = tpu.matmul %3, %1, %cst {dimension_numbers = #tpu.dot_dimension_numbers<[1], [0], [0], [1], [0, 0, 1, 1], [], []>} : vector<4x8xbf16>, vector<8x71xbf16>, vector<4x71xf32> -> vector<4x71xf32>
    %c0_6 = arith.constant 0 : index
    %c0_7 = arith.constant 0 : index
    %c0_8 = arith.constant 0 : index
    %c1 = arith.constant 1 : index
    %5 = vector.load %arg2[%c0_6, %c0_7, %c0_8, %c1] : memref<1x1x8x81xbf16, #tpu.memory_space<vmem>>, vector<1x1x8x71xbf16>
    %6 = vector.shape_cast %5 : vector<1x1x8x71xbf16> to vector<8x71xbf16>
    %c1_9 = arith.constant 1 : index
    %c0_10 = arith.constant 0 : index
    %c0_11 = arith.constant 0 : index
    %7 = vector.load %arg4[%c1_9, %c0_10, %c0_11] : memref<8x4x8xbf16, #tpu.memory_space<vmem>>, vector<1x4x8xbf16>
    %8 = vector.shape_cast %7 : vector<1x4x8xbf16> to vector<4x8xbf16>
    %cst_12 = arith.constant dense<0.000000e+00> : vector<4x71xf32>
    %9 = tpu.matmul %8, %6, %cst_12 {dimension_numbers = #tpu.dot_dimension_numbers<[1], [0], [0], [1], [0, 0, 1, 1], [], []>} : vector<4x8xbf16>, vector<8x71xbf16>, vector<4x71xf32> -> vector<4x71xf32>
    %10 = arith.addf %4, %9 : vector<4x71xf32>
    %c0_13 = arith.constant 0 : index
    %c0_14 = arith.constant 0 : index
    %c0_15 = arith.constant 0 : index
    %c9 = arith.constant 9 : index
    %11 = vector.load %arg2[%c0_13, %c0_14, %c0_15, %c9] : memref<1x1x8x81xbf16, #tpu.memory_space<vmem>>, vector<1x1x8x71xbf16>
    %12 = vector.shape_cast %11 : vector<1x1x8x71xbf16> to vector<8x71xbf16>
    %c2 = arith.constant 2 : index
    %c0_16 = arith.constant 0 : index
    %c0_17 = arith.constant 0 : index
    %13 = vector.load %arg4[%c2, %c0_16, %c0_17] : memref<8x4x8xbf16, #tpu.memory_space<vmem>>, vector<1x4x8xbf16>
    %14 = vector.shape_cast %13 : vector<1x4x8xbf16> to vector<4x8xbf16>
    %cst_18 = arith.constant dense<0.000000e+00> : vector<4x71xf32>
    %15 = tpu.matmul %14, %12, %cst_18 {dimension_numbers = #tpu.dot_dimension_numbers<[1], [0], [0], [1], [0, 0, 1, 1], [], []>} : vector<4x8xbf16>, vector<8x71xbf16>, vector<4x71xf32> -> vector<4x71xf32>
    %16 = arith.addf %10, %15 : vector<4x71xf32>
    %c0_19 = arith.constant 0 : index
    %c0_20 = arith.constant 0 : index
    %c0_21 = arith.constant 0 : index
    %c10 = arith.constant 10 : index
    %17 = vector.load %arg2[%c0_19, %c0_20, %c0_21, %c10] : memref<1x1x8x81xbf16, #tpu.memory_space<vmem>>, vector<1x1x8x71xbf16>
    %18 = vector.shape_cast %17 : vector<1x1x8x71xbf16> to vector<8x71xbf16>
    %c3 = arith.constant 3 : index
    %c0_22 = arith.constant 0 : index
    %c0_23 = arith.constant 0 : index
    %19 = vector.load %arg4[%c3, %c0_22, %c0_23] : memref<8x4x8xbf16, #tpu.memory_space<vmem>>, vector<1x4x8xbf16>
    %20 = vector.shape_cast %19 : vector<1x4x8xbf16> to vector<4x8xbf16>
    %cst_24 = arith.constant dense<0.000000e+00> : vector<4x71xf32>
    %21 = tpu.matmul %20, %18, %cst_24 {dimension_numbers = #tpu.dot_dimension_numbers<[1], [0], [0], [1], [0, 0, 1, 1], [], []>} : vector<4x8xbf16>, vector<8x71xbf16>, vector<4x71xf32> -> vector<4x71xf32>
    %22 = arith.addf %16, %21 : vector<4x71xf32>
    %c0_25 = arith.constant 0 : index
    %c0_26 = arith.constant 0 : index
    %c0_27 = arith.constant 0 : index
    %c0_28 = arith.constant 0 : index
    %23 = vector.load %arg3[%c0_25, %c0_26, %c0_27, %c0_28] : memref<1x1x8x81xbf16, #tpu.memory_space<vmem>>, vector<1x1x8x71xbf16>
    %24 = vector.shape_cast %23 : vector<1x1x8x71xbf16> to vector<8x71xbf16>
    %c4 = arith.constant 4 : index
    %c0_29 = arith.constant 0 : index
    %c0_30 = arith.constant 0 : index
    %25 = vector.load %arg4[%c4, %c0_29, %c0_30] : memref<8x4x8xbf16, #tpu.memory_space<vmem>>, vector<1x4x8xbf16>
    %26 = vector.shape_cast %25 : vector<1x4x8xbf16> to vector<4x8xbf16>
    %cst_31 = arith.constant dense<0.000000e+00> : vector<4x71xf32>
    %27 = tpu.matmul %26, %24, %cst_31 {dimension_numbers = #tpu.dot_dimension_numbers<[1], [0], [0], [1], [0, 0, 1, 1], [], []>} : vector<4x8xbf16>, vector<8x71xbf16>, vector<4x71xf32> -> vector<4x71xf32>
    %28 = arith.addf %22, %27 : vector<4x71xf32>
    %c0_32 = arith.constant 0 : index
    %c0_33 = arith.constant 0 : index
    %c0_34 = arith.constant 0 : index
    %c1_35 = arith.constant 1 : index
    %29 = vector.load %arg3[%c0_32, %c0_33, %c0_34, %c1_35] : memref<1x1x8x81xbf16, #tpu.memory_space<vmem>>, vector<1x1x8x71xbf16>
    %30 = vector.shape_cast %29 : vector<1x1x8x71xbf16> to vector<8x71xbf16>
    %c5 = arith.constant 5 : index
    %c0_36 = arith.constant 0 : index
    %c0_37 = arith.constant 0 : index
    %31 = vector.load %arg4[%c5, %c0_36, %c0_37] : memref<8x4x8xbf16, #tpu.memory_space<vmem>>, vector<1x4x8xbf16>
    %32 = vector.shape_cast %31 : vector<1x4x8xbf16> to vector<4x8xbf16>
    %cst_38 = arith.constant dense<0.000000e+00> : vector<4x71xf32>
    %33 = tpu.matmul %32, %30, %cst_38 {dimension_numbers = #tpu.dot_dimension_numbers<[1], [0], [0], [1], [0, 0, 1, 1], [], []>} : vector<4x8xbf16>, vector<8x71xbf16>, vector<4x71xf32> -> vector<4x71xf32>
    %34 = arith.addf %28, %33 : vector<4x71xf32>
    %c0_39 = arith.constant 0 : index
    %c0_40 = arith.constant 0 : index
    %c0_41 = arith.constant 0 : index
    %c9_42 = arith.constant 9 : index
    %35 = vector.load %arg3[%c0_39, %c0_40, %c0_41, %c9_42] : memref<1x1x8x81xbf16, #tpu.memory_space<vmem>>, vector<1x1x8x71xbf16>
    %36 = vector.shape_cast %35 : vector<1x1x8x71xbf16> to vector<8x71xbf16>
    %c6 = arith.constant 6 : index
    %c0_43 = arith.constant 0 : index
    %c0_44 = arith.constant 0 : index
    %37 = vector.load %arg4[%c6, %c0_43, %c0_44] : memref<8x4x8xbf16, #tpu.memory_space<vmem>>, vector<1x4x8xbf16>
    %38 = vector.shape_cast %37 : vector<1x4x8xbf16> to vector<4x8xbf16>
    %cst_45 = arith.constant dense<0.000000e+00> : vector<4x71xf32>
    %39 = tpu.matmul %38, %36, %cst_45 {dimension_numbers = #tpu.dot_dimension_numbers<[1], [0], [0], [1], [0, 0, 1, 1], [], []>} : vector<4x8xbf16>, vector<8x71xbf16>, vector<4x71xf32> -> vector<4x71xf32>
    %40 = arith.addf %34, %39 : vector<4x71xf32>
    %c0_46 = arith.constant 0 : index
    %c0_47 = arith.constant 0 : index
    %c0_48 = arith.constant 0 : index
    %c10_49 = arith.constant 10 : index
    %41 = vector.load %arg3[%c0_46, %c0_47, %c0_48, %c10_49] : memref<1x1x8x81xbf16, #tpu.memory_space<vmem>>, vector<1x1x8x71xbf16>
    %42 = vector.shape_cast %41 : vector<1x1x8x71xbf16> to vector<8x71xbf16>
    %c7 = arith.constant 7 : index
    %c0_50 = arith.constant 0 : index
    %c0_51 = arith.constant 0 : index
    %43 = vector.load %arg4[%c7, %c0_50, %c0_51] : memref<8x4x8xbf16, #tpu.memory_space<vmem>>, vector<1x4x8xbf16>
    %44 = vector.shape_cast %43 : vector<1x4x8xbf16> to vector<4x8xbf16>
    %cst_52 = arith.constant dense<0.000000e+00> : vector<4x71xf32>
    %45 = tpu.matmul %44, %42, %cst_52 {dimension_numbers = #tpu.dot_dimension_numbers<[1], [0], [0], [1], [0, 0, 1, 1], [], []>} : vector<4x8xbf16>, vector<8x71xbf16>, vector<4x71xf32> -> vector<4x71xf32>
    %46 = arith.addf %40, %45 : vector<4x71xf32>
    %c0_53 = arith.constant 0 : index
    %c0_54 = arith.constant 0 : index
    %47 = vector.load %arg5[%c0_53, %c0_54] : memref<4x1xf32, #tpu.memory_space<vmem>>, vector<4x1xf32>
    %48 = vector.broadcast %47 : vector<4x1xf32> to vector<4x71xf32>
    %49 = arith.addf %46, %48 : vector<4x71xf32>
    %50 = arith.truncf %49 : vector<4x71xf32> to vector<4x71xbf16>
    %c0_55 = arith.constant 0 : index
    %c0_56 = arith.constant 0 : index
    %c0_57 = arith.constant 0 : index
    %c0_58 = arith.constant 0 : index
    %51 = vector.load %arg6[%c0_55, %c0_56, %c0_57, %c0_58] : memref<1x1x4x71xbf16, #tpu.memory_space<vmem>>, vector<1x1x4x71xbf16>
    %52 = vector.shape_cast %51 : vector<1x1x4x71xbf16> to vector<4x71xbf16>
    %53 = vector.shape_cast %50 : vector<4x71xbf16> to vector<1x1x4x71xbf16>
    tpu.vector_store %arg6[%c0_55, %c0_56, %c0_57, %c0_58], %53 {strides = array<i32>} : memref<1x1x4x71xbf16, #tpu.memory_space<vmem>>, vector<1x1x4x71xbf16>,
    return
  }
  func.func @transform_0(%arg0: i32, %arg1: i32) -> (i32, i32, i32, i32) {
    %c1_i32 = arith.constant 1 : i32
    %0 = arith.muli %arg1, %c1_i32 : i32
    %c0_i32 = arith.constant 0 : i32
    %1 = arith.addi %0, %c0_i32 : i32
    %c0_i32_0 = arith.constant 0 : i32
    %c0_i32_1 = arith.constant 0 : i32
    %c0_i32_2 = arith.constant 0 : i32
    return %arg0, %1, %c0_i32_0, %c0_i32_1 : i32, i32, i32, i32
  }
  func.func @transform_1(%arg0: i32, %arg1: i32) -> (i32, i32, i32, i32) {
    %c1_i32 = arith.constant 1 : i32
    %0 = arith.muli %arg1, %c1_i32 : i32
    %c1_i32_0 = arith.constant 1 : i32
    %1 = arith.addi %0, %c1_i32_0 : i32
    %c0_i32 = arith.constant 0 : i32
    %c0_i32_1 = arith.constant 0 : i32
    %c0_i32_2 = arith.constant 0 : i32
    return %arg0, %1, %c0_i32, %c0_i32_1 : i32, i32, i32, i32
  }
  func.func @transform_2(%arg0: i32, %arg1: i32) -> (i32, i32, i32) {
    %c0_i32 = arith.constant 0 : i32
    %c0_i32_0 = arith.constant 0 : i32
    %c0_i32_1 = arith.constant 0 : i32
    %c0_i32_2 = arith.constant 0 : i32
    return %c0_i32, %c0_i32_0, %c0_i32_1 : i32, i32, i32
  }
  func.func @transform_3(%arg0: i32, %arg1: i32) -> (i32, i32) {
    %c0_i32 = arith.constant 0 : i32
    %c0_i32_0 = arith.constant 0 : i32
    %c0_i32_1 = arith.constant 0 : i32
    return %c0_i32, %c0_i32_0 : i32, i32
  }
  func.func @transform_4(%arg0: i32, %arg1: i32) -> (i32, i32, i32, i32) {
    %c0_i32 = arith.constant 0 : i32
    %c0_i32_0 = arith.constant 0 : i32
    %c0_i32_1 = arith.constant 0 : i32
    return %arg0, %arg1, %c0_i32, %c0_i32_0 : i32, i32, i32, i32
  }
}

</mosaic_0001>

<bundles_post_ra>
// kernel: _lambda_.20
= control target key start
LH: loop header
LB: loop body
LE: loop exit
PB: predicated region body
PF: predicated region fallthrough
CT: control target
= control target key end

     0   :  { %s3276_s29 = smov 0   ;;  %s3278_s30 = smov 0   ;;  %s3664_s0 = inlined_call_operand.vmem [shape: bf16[2,10,4,81], index: 0, kind: input, shape index: {}, may-alias: {0,1,2}]   ;;  %s3665_s1 = inlined_call_operand.vmem [shape: bf16[2,10,4,81], index: 1, kind: input, shape index: {}, may-alias: {0,1,2}]   ;;  %s3666_s2 = inlined_call_operand.vmem [shape: bf16[2,10,4,81], index: 2, kind: input, shape index: {}, may-alias: {0,1,2}]   ;;  %s3667_s3 = inlined_call_operand.vmem [shape: bf16[2,10,4,81], index: 3, kind: input, shape index: {}, may-alias: {3,4,5}]   ;;  %s3668_s4 = inlined_call_operand.vmem [shape: bf16[2,10,4,81], index: 4, kind: input, shape index: {}, may-alias: {3,4,5}]   ;;  %s3669_s5 = inlined_call_operand.vmem [shape: bf16[2,10,4,81], index: 5, kind: input, shape index: {}, may-alias: {3,4,5}]   ;;  %s3670_s6 = inlined_call_operand.vmem [shape: bf16[2,10,4,81], index: 6, kind: input, shape index: {}, may-alias: {6,7,8}]   ;;  %s3671_s7 = inlined_call_operand.vmem [shape: bf16[2,10,4,81], index: 7, kind: input, shape index: {}, may-alias: {6,7,8}]   ;;  %s3672_s8 = inlined_call_operand.vmem [shape: bf16[2,10,4,81], index: 8, kind: input, shape index: {}, may-alias: {6,7,8}]   ;;  %s3673_s9 = inlined_call_operand.vmem [shape: bf16[2,10,4,81], index: 9, kind: input, shape index: {}, may-alias: {9,10,11}]   ;;  %s3674_s10 = inlined_call_operand.vmem [shape: bf16[2,10,4,81], index: 10, kind: input, shape index: {}, may-alias: {9,10,11}]   ;;  %s3675_s11 = inlined_call_operand.vmem [shape: bf16[2,10,4,81], index: 11, kind: input, shape index: {}, may-alias: {9,10,11}]   ;;  %s3676_s12 = inlined_call_operand.vmem [shape: bf16[27,8,4], index: 12, kind: input, shape index: {}]   ;;  %s3677_s13 = inlined_call_operand.vmem [shape: f32[8,1], index: 13, kind: input, shape index: {}]   ;;  %s3678_s14 = inlined_call_operand.vmem [shape: bf16[2,4,8,71], index: 14, kind: output, shape index: {}]  }
   0x1   :  { %3684 = sst [smem:[#allocation7_spill]] %s3678_s14  ;;  %s3280_s15 = smov 0  }
   0x2   :  { %s3282_s16 = smov 0   ;;  %s3284_s17 = smov 0  }
   0x3 LB: > { %3685 = sst [smem:[#allocation2_spill]] %s3184_s15  ;;  %s33_s18 = sadd.s32 1, %s3184_s15  ;;  %s3192_s17 = sphi %s3284_s17, %s24_s17   ;;  %s3188_s16 = sphi %s3282_s16, %s3696_s16   ;;  %s3184_s15 = sphi %s3280_s15, %s3695_s15   ;;  %s3180_s30 = sphi %s3278_s30, %s3694_s30   ;;  %s3176_s29 = sphi %s3276_s29, %s3693_s29  }
   0x4   : > { %3686 = sst [smem:[#allocation3_spill]] %s3188_s16  ;;  %s36_s19 = sadd.s32 1, %s3188_s16 }
   0x5   : > { %3687 = sst [smem:[#allocation4_spill]] %s3192_s17  ;;  %p34_p0 = scmp.ge.s32.totalorder %s33_s18, 4 }
   0x6   : > { %p2797_p1 = scmp.ge.s32.totalorder %s3192_s17, 1  ;;  %p676_p2 = scmp.lt.s32.totalorder %s3192_s17, 9 }
   0x7   : > { %s3698_s18 = smov (%p34_p0, %s33_s18), 0  ;;  %s3700_s19 = smov (!%p34_p0, %s36_s19), %s3188_s16 }
   0x8   : > { %3688 = sst [smem:[#allocation5_spill]] %s3698_s18  ;;  %p677_p3 = pnand %p2797_p1, %p676_p2 }
   0x9   : > { %p38_p4 = scmp.ge.s32.totalorder %s3700_s19, 2  ;;  %s3309_s20 = sshll.u32 (!%p677_p3), %s3176_s29, 1  ;;  %v1086_v0 = vlaneseq (!%p677_p3)  ;;  %v3194_v1 = vmov (!%p677_p3), 1983009808   ;;  %v3195_v3 = vmov (!%p677_p3), 0.0   ;;  %vm3196_vm0 = vmmov (!%p677_p3), 0  }
   0xa   : > { %680 = sbr.rel (%p677_p3) target bundleno = 463 (0x1cf), region = 76  ;;  %p837_p5 = scmp.lt.s32.totalorder (!%p677_p3), %s3180_s30, 1  ;;  %v1084_v2 = vunpack.c.l.s4 (!%p677_p3), %v3194_v1  ;;  %2942 = vmatprep.subr.bf16.mxu0 (!%p677_p3), %v3195_v3  ;;  %2948 = vmatprep.subr.bf16.mxu1 (!%p677_p3), %v3195_v3  ;;  %vm990_vm1 = vcmask (!%p677_p3), 1041408   ;;  %v982_v12 = vld [vmem:[%s3676_s12] sm:$0xf] (!%p677_p3)  ;;  %vm986_vm2 = vcmask (!%p677_p3), 31744  }
   0xb   : > { %s3702_s19 = smov (%p38_p4, %s3700_s19), 0  ;;  %p839_p6 = scmp.lt.s32.totalorder (!%p677_p3), %s3309_s20, 9  ;;  %v1087_v4 = vshrl.u32 (!%p677_p3), %v1086_v0, 7  ;;  %2944 = vmatprep.mubr.msk.bf16.mxu0 (!%p677_p3), %vm3196_vm0, %v3195_v3  ;;  %2950 = vmatprep.mubr.msk.bf16.mxu1 (!%p677_p3), %vm3196_vm0, %v3195_v3  ;;  %v2824_v18 = vld [vmem:[%s3676_s12 + $0x4] sm:$0xf] (!%p677_p3)  ;;  %v3200_v33 = vmov (!%p677_p3), 0  }
   0xc   : > { %3689 = sst [smem:[#allocation6_spill]] %s3702_s19  ;;  %v1085_v5 = vunpack.c.0.s8 (!%p677_p3), %v1084_v2  ;;  %s847_s23 = sadd.s32 (!%p677_p3), 1, %s3309_s20  ;;  %v2829_v22 = vld [vmem:[%s3676_s12 + $0xc] sm:$0xf] (!%p677_p3)  ;;  %v2474_v32 = vld [vmem:[%s3677_s13] sm:$0xff] (!%p677_p3)  ;;  %3152 = vset.pattern.permute.xlu1 (!%p677_p3), %v3200_v33  ;;  %3153 = vset.pattern.permute.xlu0 (!%p677_p3), %v3200_v33  ;;  %vm2483_vm3 = vcmask (!%p677_p3), 576512  }
   0xd   : > { %p850_p7 = scmp.lt.s32.totalorder (!%p677_p3), %s847_s23, 9  ;;  %s859_s26 = sadd.s32 (!%p677_p3), 2, %s3309_s20  ;;  %v2827_v38 = vld [vmem:[%s3676_s12 + $0x8] sm:$0xf] (!%p677_p3)  ;;  %v2833_v43 = vld [vmem:[%s3676_s12 + $0x14] sm:$0xf] (!%p677_p3) }
   0xe   : > { %v3326_v6 = vsub.s32 (!%p677_p3), %v1085_v5, %v1087_v4  ;;  %p862_p8 = scmp.lt.s32.totalorder (!%p677_p3), %s859_s26, 9  ;;  %s3682_s17 = smov (!%p677_p3), 127   ;;  %v2831_v45 = vld [vmem:[%s3676_s12 + $0x10] sm:$0xf] (!%p677_p3)  ;;  %v2838_v47 = vld [vmem:[%s3676_s12 + $0x1c] sm:$0xf] (!%p677_p3) }
   0xf   : > { %v2835_v50 = vld [vmem:[%s3676_s12 + $0x18] sm:$0xf] (!%p677_p3)  ;;  %v2844_v53 = vld [vmem:[%s3676_s12 + $0x24] sm:$0xf] (!%p677_p3)  ;;  %v2841_v56 = vld [vmem:[%s3676_s12 + $0x20] sm:$0xf] (!%p677_p3) }
  0x10   : > { %v2848_v59 = vld [vmem:[%s3676_s12 + $0x2c] sm:$0xf] (!%p677_p3)  ;;  %v2846_v61 = vld [vmem:[%s3676_s12 + $0x28] sm:$0xf] (!%p677_p3)  ;;  %v2852_v0 = vld [vmem:[%s3676_s12 + $0x34] sm:$0xf] (!%p677_p3) }
  0x11   : > { %s3704_s30 = smov (!%p837_p5, %s3180_s30), 1  ;;  %s3706_s23 = smov (!%p850_p7, %s847_s23), 9  ;;  %v2850_v4 = vld [vmem:[%s3676_s12 + $0x30] sm:$0xf] }
  0x12   : > { %s840_s21 = scalar_select %p839_p6, %s3309_s20, 9 }
  0x13   : > { %s3322_s22 = smul.u32 10, %s3704_s30  ;;  %s3197_s20 = smov 119  }
  0x14   : > { %s3708_s26 = smov (!%p862_p8, %s859_s26), 9  ;;  %p974_p9 = scmp.lt.s32.totalorder %s3176_s29, 3 }
  0x15   : > { %s842_s24 = sadd.s32 %s3322_s22, %s840_s21  ;;  %s853_s18 = sadd.s32 %s3322_s22, %s3706_s23 }
  0x16   : > { %s3328_s25 = sshll.u32 %s842_s24, 1  ;;  %s3710_s29 = smov (!%p974_p9, %s3176_s29), 3 }
  0x17   : > { %s844_s19 = scalar_lea.vmem %s3664_s0, %s3328_s25  ;;  %s912_s15 = scalar_lea.vmem %s3670_s6, %s3328_s25 }
  0x18   : > { %v981_v7 = vld [vmem:[%s844_s19] sm:$0x3]  ;;  %s878_s14 = scalar_lea.vmem %s3667_s3, %s3328_s25 }
  0x19   : > { %v1139_v8 = vld [vmem:[%s912_s15] sm:$0x3]  ;;  %v1089_v9 = vrot.slane %v981_v7, %v3326_v6  ;;  %v1038_v11 = vsel %vm990_vm1, %v981_v7, 0  ;;  %v2856_v7 = vld [vmem:[%s3676_s12 + $0x3c] sm:$0xf] }
  0x1a   : > { %v2836_v10 = vld.sshfl [vmem:[%s844_s19] sm:$0x3 pattern:$0x76325410]  ;;  %2949 = vmatpush3.bf16.msra.mxu1 %v1038_v11  ;;  %v1248_v13 = vrot.slane %v1139_v8, %v3326_v6  ;;  %s3355_s19 = sshll.u32 %s853_s18, 1  ;;  %v1146_v17 = vsel %vm990_vm1, %v1139_v8, 0  ;;  %s865_s18 = sadd.s32 %s3322_s22, %s3708_s26 }
  0x1b   : > { %1309 = vrot.lane.b32.xlu1 %v2836_v10, %s3197_s20  ;;  %1090 = vrot.lane.b32.xlu0 %v1089_v9, %s3682_s17  ;;  %v2839_v14 = vld.sshfl [vmem:[%s878_s14] sm:$0x3 pattern:$0x76325410]  ;;  %s855_s28 = scalar_lea.vmem %s3665_s1, %s3355_s19  ;;  %s3389_s24 = sshll.u32 %s865_s18, 1 }
  0x1c   : > { %v983_v15 = vld [vmem:[%s878_s14] sm:$0x3]  ;;  %2960 = vmatprep.subr.bf16.mxu1 %v3195_v3  ;;  %s923_s14 = scalar_lea.vmem %s3671_s7, %s3355_s19  ;;  %s3199_s22 = smov 118  }
  0x1d   : > { %v992_v16 = vsel %vm990_vm1, %v983_v15, 0  ;;  %2951 = vmatmul.mubr.msk.bf16.vlgmr.msra.gmra.mrb[0].mxu1 %vm986_vm2, %v982_v12  ;;  %v3372_v19 = vld [vmem:[%s855_s28] sm:$0x3]  ;;  %s3404_s18 = scalar_lea.vmem %s3668_s4, %s3355_s19  ;;  %s3429_s15 = scalar_lea.vmem %s3669_s5, %s3389_s24 }
  0x1e   : > { %2943 = vmatpush3.bf16.msra.mxu0 %v992_v16  ;;  %v1587_v20 = vrot.slane %v3372_v19, %v3326_v6  ;;  %2961 = vmatpush3.bf16.msra.mxu1 %v1146_v17  ;;  %v3380_v21 = vld [vmem:[%s923_s14] sm:$0x3]  ;;  %s935_s14 = scalar_lea.vmem %s3672_s8, %s3389_s24  ;;  %s946_s26 = scalar_lea.vmem %s3673_s9, %s3328_s25  ;;  %v1485_v49 = vsel %vm990_vm1, %v3372_v19, 0  ;;  %v2867_v17 = vld [vmem:[%s3676_s12 + $0x4c] sm:$0xf] }
  0x1f   : > { %1369 = vrot.lane.b32.xlu1 %v2839_v14, %s3197_s20  ;;  %2954 = vmatprep.subr.bf16.mxu0 %v3195_v3  ;;  %v1746_v23 = vrot.slane %v3380_v21, %v3326_v6  ;;  %v2857_v24 = vld.sshfl [vmem:[%s855_s28] sm:$0x3 pattern:$0x76325410]  ;;  %s3690_s28 = smov 127   ;;  %s957_s23 = scalar_lea.vmem %s3674_s10, %s3355_s19  ;;  %v1644_v62 = vsel %vm990_vm1, %v3380_v21, 0 }
  0x20   : > { %1249 = vrot.lane.b32.xlu0 %v1248_v13, %s3682_s17  ;;  %2962 = vmatprep.mubr.msk.bf16.mxu1 %vm3196_vm0, %v3195_v3  ;;  %v3415_v25 = vld [vmem:[%s935_s14] sm:$0x3]  ;;  %v2862_v13 = vld [vmem:[%s3676_s12 + $0x44] sm:$0xf] }
  0x21   : > { %2945 = vmatmul.mubr.msk.bf16.vlgmr.msra.gmra.mrb[0].mxu0 %vm986_vm2, %v2824_v18  ;;  %2972 = vmatprep.subr.bf16.mxu1 %v3195_v3  ;;  %v2860_v26 = vld.sshfl [vmem:[%s3404_s18] sm:$0x3 pattern:$0x76325410]  ;;  %v2244_v28 = vrot.slane %v3415_v25, %v3326_v6  ;;  %v2142_v19 = vsel %vm990_vm1, %v3415_v25, 0 }
  0x22   : > { %2956 = vmatprep.mubr.msk.bf16.mxu0 %vm3196_vm0, %v3195_v3  ;;  %v2881_v30 = vld.sshfl [vmem:[%s3429_s15] sm:$0x3 pattern:$0x76325410] }
  0x23   : > { %1588 = vrot.lane.b32.xlu1 %v1587_v20, %s3682_s17  ;;  %s867_s17 = scalar_lea.vmem %s3666_s2, %s3389_s24  ;;  %v1189_v36 = vld [vmem:[%s946_s26] sm:$0x3]  ;;  %v2865_v20 = vld [vmem:[%s3676_s12 + $0x48] sm:$0xf] }
  0x24   : > { %1429 = vrot.lane.b32.xlu0 %v2836_v10, %s3199_s22  ;;  %v3418_v27 = vld [vmem:[%s867_s17] sm:$0x3]  ;;  %v1196_v39 = vsel %vm990_vm1, %v1189_v36, 0  ;;  %v2854_v10 = vld [vmem:[%s3676_s12 + $0x38] sm:$0xf] }
  0x25   : > { %2963 = vmatmul.mubr.msk.bf16.vlgmr.msra.gmra.mrb[4].mxu1 %vm986_vm2, %v2829_v22  ;;  %v2085_v29 = vrot.slane %v3418_v27, %v3326_v6  ;;  %v2878_v31 = vld.sshfl [vmem:[%s867_s17] sm:$0x3 pattern:$0x76325410]  ;;  %v1983_v16 = vsel %vm990_vm1, %v3418_v27, 0  ;;  %s969_s17 = scalar_lea.vmem %s3675_s11, %s3389_s24  ;;  %s3691_s24 = sld [smem:[#allocation7_spill]] }
  0x26   : > { %2974 = vmatprep.mubr.msk.bf16.mxu1 %vm3196_vm0, %v3195_v3  ;;  %v1528_v54 = vld [vmem:[%s3404_s18] sm:$0x3] }
  0x27   : > { %1807 = vrot.lane.b32.xlu1 %v2857_v24, %s3197_s20  ;;  %v1535_v57 = vsel %vm990_vm1, %v1528_v54, 0  ;;  %v1687_v58 = vld [vmem:[%s957_s23] sm:$0x3] }
  0x28   : > { %1747 = vrot.lane.b32.xlu0 %v1746_v23, %s3690_s28  ;;  %v1694_v60 = vsel %vm990_vm1, %v1687_v58, 0  ;;  %v2026_v12 = vld [vmem:[%s3429_s15] sm:$0x3]  ;;  %v2871_v23 = vld [vmem:[%s3676_s12 + $0x54] sm:$0xf] }
  0x29   : > { %v2033_v14 = vsel %vm990_vm1, %v2026_v12, 0  ;;  %v2859_v15 = vld [vmem:[%s3676_s12 + $0x40] sm:$0xf] }
  0x2a   : > { %v2185_v25 = vld [vmem:[%s969_s17] sm:$0x3]  ;;  %s2822_s17 = sshll.u32 %s3704_s30, 2 }
  0x2b   : > { %1927 = vrot.lane.b32.xlu1 %v2857_v24, %s3199_s22  ;;  %v2192_v27 = vsel %vm990_vm1, %v2185_v25, 0  ;;  %v2877_v36 = vld [vmem:[%s3676_s12 + $0x60] sm:$0xf]  ;;  %s977_s25 = sadd.s32 %s2822_s17, %s3710_s29 }
  0x2c   : > { %1867 = vrot.lane.b32.xlu0 %v2860_v26, %s3197_s20  ;;  %v2869_v26 = vld [vmem:[%s3676_s12 + $0x50] sm:$0xf] }
  0x2f   : > { %2245 = vrot.lane.b32.xlu1 %v2244_v28, %s3690_s28 }
  0x30   : > { %2086 = vrot.lane.b32.xlu0 %v2085_v29, %s3690_s28  ;;  %v2875_v29 = vld [vmem:[%s3676_s12 + $0x5c] sm:$0xf] }
  0x33   : > { %2365 = vrot.lane.b32.xlu1 %v2881_v30, %s3197_s20 }
  0x34   : > { %2305 = vrot.lane.b32.xlu0 %v2878_v31, %s3197_s20 }
  0x37   : > { %2477 = vperm.xlu1 %3152, %v2474_v32   ;;  %v2873_v32 = vld [vmem:[%s3676_s12 + $0x58] sm:$0xf] }
  0x38   : > { %2425 = vrot.lane.b32.xlu0 %v2878_v31, %s3199_s22  ;;  %s2823_s22 = sshll.u32 %s977_s25, 2 }
  0x39   : > { %s979_s18 = scalar_lea.vmem %s3691_s24, %s2823_s22 }
  0x8d   : > { %v1310_v34 = vpop.permute.xlu1 %1309  ;;  %v1091_v35 = vpop.permute.xlu0 %1090 }
  0x8e   : > { %v1096_v37 = vsel %vm990_vm1, %v1091_v35, 0  ;;  %v1315_v46 = vsel %vm990_vm1, %v1310_v34, 0  ;;  %v2880_v34 = vld [vmem:[%s3676_s12 + $0x64] sm:$0xf] }
  0x8f   : > { %2955 = vmatpush3.bf16.msra.mxu0 %v1096_v37 }
  0x90   : > { %2966 = vmatprep.subr.bf16.mxu0 %v3195_v3 }
  0x91   : > { %v1370_v42 = vpop.permute.xlu1 %1369 }
  0x92   : > { %v1250_v40 = vpop.permute.xlu0 %1249  ;;  %2957 = vmatmul.mubr.msk.bf16.vlgmr.msra.gmra.mrb[4].mxu0 %vm986_vm2, %v2827_v38  ;;  %v1375_v44 = vsel %vm990_vm1, %v1370_v42, 0  ;;  %v2883_v38 = vld [vmem:[%s3676_s12 + $0x68] sm:$0xf] }
  0x93   : > { %v1255_v41 = vsel %vm990_vm1, %v1250_v40, 0  ;;  %2967 = vmatpush3.bf16.msra.mxu0 %v1196_v39  ;;  %2968 = vmatprep.mubr.msk.bf16.mxu0 %vm3196_vm0, %v3195_v3 }
  0x94   : > { %2973 = vmatpush3.bf16.msra.mxu1 %v1255_v41  ;;  %2978 = vmatprep.subr.bf16.mxu0 %v3195_v3 }
  0x95   : > { %2984 = vmatprep.subr.bf16.mxu1 %v3195_v3  ;;  %v1589_v52 = vpop.permute.xlu1 %1588 }
  0x96   : > { %v1430_v48 = vpop.permute.xlu0 %1429  ;;  %v1594_v55 = vsel %vm990_vm1, %v1589_v52, 0 }
  0x97   : > { %2975 = vmatmul.mubr.msk.bf16.vlgmr.msra.gmra.mrb[8].mxu1 %vm986_vm2, %v2833_v43  ;;  %v1435_v51 = vsel %vm990_vm1, %v1430_v48, 0 }
  0x98   : > { %2985 = vmatpush3.bf16.msra.mxu1 %v1375_v44  ;;  %2986 = vmatprep.mubr.msk.bf16.mxu1 %vm3196_vm0, %v3195_v3 }
  0x99   : > { %2996 = vmatprep.subr.bf16.mxu1 %v3195_v3  ;;  %v1808_v63 = vpop.permute.xlu1 %1807 }
  0x9a   : > { %2969 = vmatmul.mubr.msk.bf16.vlgmr.msra.gmra.mrb[8].mxu0 %vm986_vm2, %v2831_v45  ;;  %v1748_v1 = vpop.permute.xlu0 %1747  ;;  %v1813_v2 = vsel %vm990_vm1, %v1808_v63, 0 }
  0x9b   : > { %2979 = vmatpush3.bf16.msra.mxu0 %v1315_v46  ;;  %2980 = vmatprep.mubr.msk.bf16.mxu0 %vm3196_vm0, %v3195_v3  ;;  %v1753_v5 = vsel %vm990_vm1, %v1748_v1, 0 }
  0x9c   : > { %2990 = vmatprep.subr.bf16.mxu0 %v3195_v3 }
  0x9d   : > { %v1928_v6 = vpop.permute.xlu1 %1927 }
  0x9e   : > { %v1868_v8 = vpop.permute.xlu0 %1867  ;;  %v1933_v9 = vsel %vm990_vm1, %v1928_v6, 0 }
  0x9f   : > { %2987 = vmatmul.mubr.msk.bf16.vlgmr.msra.gmra.mrb[12].mxu1 %vm986_vm2, %v2838_v47  ;;  %v1873_v11 = vsel %vm990_vm1, %v1868_v8, 0 }
  0xa0   : > { %2997 = vmatpush3.bf16.msra.mxu1 %v1485_v49  ;;  %2998 = vmatprep.mubr.msk.bf16.mxu1 %vm3196_vm0, %v3195_v3 }
  0xa1   : > { %3008 = vmatprep.subr.bf16.mxu1 %v3195_v3  ;;  %v2246_v22 = vpop.permute.xlu1 %2245 }
  0xa2   : > { %2981 = vmatmul.mubr.msk.bf16.vlgmr.msra.gmra.mrb[12].mxu0 %vm986_vm2, %v2835_v50  ;;  %v2087_v18 = vpop.permute.xlu0 %2086  ;;  %v2251_v24 = vsel %vm990_vm1, %v2246_v22, 0 }
  0xa3   : > { %2991 = vmatpush3.bf16.msra.mxu0 %v1435_v51  ;;  %2992 = vmatprep.mubr.msk.bf16.mxu0 %vm3196_vm0, %v3195_v3  ;;  %v2092_v21 = vsel %vm990_vm1, %v2087_v18, 0 }
  0xa4   : > { %3002 = vmatprep.subr.bf16.mxu0 %v3195_v3 }
  0xa5   : > { %v2366_v28 = vpop.permute.xlu1 %2365 }
  0xa6   : > { %v2306_v30 = vpop.permute.xlu0 %2305  ;;  %v2371_v31 = vsel %vm990_vm1, %v2366_v28, 0 }
  0xa7   : > { %2999 = vmatmul.mubr.msk.bf16.vlgmr.msra.gmra.mrb[16].mxu1 %vm986_vm2, %v2844_v53  ;;  %v2311_v33 = vsel %vm990_vm1, %v2306_v30, 0 }
  0xa8   : > { %3009 = vmatpush3.bf16.msra.mxu1 %v1594_v55  ;;  %3010 = vmatprep.mubr.msk.bf16.mxu1 %vm3196_vm0, %v3195_v3 }
  0xa9   : > { %3020 = vmatprep.subr.bf16.mxu1 %v3195_v3 }
  0xaa   : > { %2993 = vmatmul.mubr.msk.bf16.vlgmr.msra.gmra.mrb[16].mxu0 %vm986_vm2, %v2841_v56  ;;  %v2426_v35 = vpop.permute.xlu0 %2425 }
  0xab   : > { %3003 = vmatpush3.bf16.msra.mxu0 %v1535_v57  ;;  %3004 = vmatprep.mubr.msk.bf16.mxu0 %vm3196_vm0, %v3195_v3  ;;  %v2431_v37 = vsel %vm990_vm1, %v2426_v35, 0 }
  0xac   : > { %3014 = vmatprep.subr.bf16.mxu0 %v3195_v3 }
  0xaf   : > { %3011 = vmatmul.mubr.msk.bf16.vlgmr.msra.gmra.mrb[20].mxu1 %vm986_vm2, %v2848_v59 }
  0xb0   : > { %3021 = vmatpush3.bf16.msra.mxu1 %v1694_v60  ;;  %3022 = vmatprep.mubr.msk.bf16.mxu1 %vm3196_vm0, %v3195_v3 }
  0xb1   : > { %3032 = vmatprep.subr.bf16.mxu1 %v3195_v3 }
  0xb2   : > { %3005 = vmatmul.mubr.msk.bf16.vlgmr.msra.gmra.mrb[20].mxu0 %vm986_vm2, %v2846_v61 }
  0xb3   : > { %3015 = vmatpush3.bf16.msra.mxu0 %v1644_v62  ;;  %3016 = vmatprep.mubr.msk.bf16.mxu0 %vm3196_vm0, %v3195_v3 }
  0xb4   : > { %3026 = vmatprep.subr.bf16.mxu0 %v3195_v3 }
  0xb7   : > { %3023 = vmatmul.mubr.msk.bf16.vlgmr.msra.gmra.mrb[24].mxu1 %vm986_vm2, %v2852_v0 }
  0xb8   : > { %3033 = vmatpush3.bf16.msra.mxu1 %v1813_v2  ;;  %3034 = vmatprep.mubr.msk.bf16.mxu1 %vm3196_vm0, %v3195_v3 }
  0xb9   : > { %3044 = vmatprep.subr.bf16.mxu1 %v3195_v3 }
  0xba   : > { %3017 = vmatmul.mubr.msk.bf16.vlgmr.msra.gmra.mrb[24].mxu0 %vm986_vm2, %v2850_v4 }
  0xbb   : > { %3027 = vmatpush3.bf16.msra.mxu0 %v1753_v5  ;;  %3028 = vmatprep.mubr.msk.bf16.mxu0 %vm3196_vm0, %v3195_v3 }
  0xbc   : > { %3038 = vmatprep.subr.bf16.mxu0 %v3195_v3 }
  0xbf   : > { %3035 = vmatmul.mubr.msk.bf16.vlgmr.msra.gmra.mrb[28].mxu1 %vm986_vm2, %v2856_v7 }
  0xc0   : > { %3045 = vmatpush3.bf16.msra.mxu1 %v1933_v9  ;;  %3046 = vmatprep.mubr.msk.bf16.mxu1 %vm3196_vm0, %v3195_v3 }
  0xc1   : > { %3056 = vmatprep.subr.bf16.mxu1 %v3195_v3 }
  0xc2   : > { %3029 = vmatmul.mubr.msk.bf16.vlgmr.msra.gmra.mrb[28].mxu0 %vm986_vm2, %v2854_v10 }
  0xc3   : > { %3039 = vmatpush3.bf16.msra.mxu0 %v1873_v11  ;;  %3040 = vmatprep.mubr.msk.bf16.mxu0 %vm3196_vm0, %v3195_v3 }
  0xc4   : > { %3050 = vmatprep.subr.bf16.mxu0 %v3195_v3 }
  0xc7   : > { %3047 = vmatmul.mubr.msk.bf16.vlgmr.msra.gmra.mrb[32].mxu1 %vm986_vm2, %v2862_v13 }
  0xc8   : > { %3057 = vmatpush3.bf16.msra.mxu1 %v2033_v14  ;;  %3058 = vmatprep.mubr.msk.bf16.mxu1 %vm3196_vm0, %v3195_v3 }
  0xc9   : > { %3068 = vmatprep.subr.bf16.mxu1 %v3195_v3 }
  0xca   : > { %3041 = vmatmul.mubr.msk.bf16.vlgmr.msra.gmra.mrb[32].mxu0 %vm986_vm2, %v2859_v15 }
  0xcb   : > { %3051 = vmatpush3.bf16.msra.mxu0 %v1983_v16  ;;  %3052 = vmatprep.mubr.msk.bf16.mxu0 %vm3196_vm0, %v3195_v3 }
  0xcc   : > { %3062 = vmatprep.subr.bf16.mxu0 %v3195_v3 }
  0xcf   : > { %3059 = vmatmul.mubr.msk.bf16.vlgmr.msra.gmra.mrb[36].mxu1 %vm986_vm2, %v2867_v17 }
  0xd0   : > { %3069 = vmatpush3.bf16.msra.mxu1 %v2142_v19  ;;  %3070 = vmatprep.mubr.msk.bf16.mxu1 %vm3196_vm0, %v3195_v3 }
  0xd1   : > { %3080 = vmatprep.subr.bf16.mxu1 %v3195_v3 }
  0xd2   : > { %3053 = vmatmul.mubr.msk.bf16.vlgmr.msra.gmra.mrb[36].mxu0 %vm986_vm2, %v2865_v20 }
  0xd3   : > { %3063 = vmatpush3.bf16.msra.mxu0 %v2092_v21  ;;  %3064 = vmatprep.mubr.msk.bf16.mxu0 %vm3196_vm0, %v3195_v3 }
  0xd4   : > { %3074 = vmatprep.subr.bf16.mxu0 %v3195_v3 }
  0xd7   : > { %3071 = vmatmul.mubr.msk.bf16.vlgmr.msra.gmra.mrb[40].mxu1 %vm986_vm2, %v2871_v23 }
  0xd8   : > { %3081 = vmatpush3.bf16.msra.mxu1 %v2251_v24  ;;  %3082 = vmatprep.mubr.msk.bf16.mxu1 %vm3196_vm0, %v3195_v3 }
  0xd9   : > { %3092 = vmatprep.subr.bf16.mxu1 %v3195_v3 }
  0xda   : > { %3065 = vmatmul.mubr.msk.bf16.vlgmr.msra.gmra.mrb[40].mxu0 %vm986_vm2, %v2869_v26 }
  0xdb   : > { %3075 = vmatpush3.bf16.msra.mxu0 %v2192_v27  ;;  %3076 = vmatprep.mubr.msk.bf16.mxu0 %vm3196_vm0, %v3195_v3 }
  0xdc   : > { %3086 = vmatprep.subr.bf16.mxu0 %v3195_v3 }
  0xdf   : > { %3083 = vmatmul.mubr.msk.bf16.vlgmr.msra.gmra.mrb[44].mxu1 %vm986_vm2, %v2875_v29 }
  0xe0   : > { %3093 = vmatpush3.bf16.msra.mxu1 %v2371_v31  ;;  %3094 = vmatprep.mubr.msk.bf16.mxu1 %vm3196_vm0, %v3195_v3 }
  0xe2   : > { %3077 = vmatmul.mubr.msk.bf16.vlgmr.msra.gmra.mrb[44].mxu0 %vm986_vm2, %v2873_v32 }
  0xe3   : > { %3087 = vmatpush3.bf16.msra.mxu0 %v2311_v33  ;;  %3088 = vmatprep.mubr.msk.bf16.mxu0 %vm3196_vm0, %v3195_v3 }
  0xe4   : > { %3098 = vmatprep.subr.bf16.mxu0 %v3195_v3 }
  0xe7   : > { %3095 = vmatmul.mubr.msk.bf16.vlgmr.msra.gmra.mrb[48].mxu1 %vm986_vm2, %v2880_v34 }
  0xea   : > { %3089 = vmatmul.mubr.msk.bf16.vlgmr.msra.gmra.mrb[48].mxu0 %vm986_vm2, %v2877_v36 }
  0xeb   : > { %3099 = vmatpush3.bf16.msra.mxu0 %v2431_v37  ;;  %3100 = vmatprep.mubr.msk.bf16.mxu0 %vm3196_vm0, %v3195_v3 }
  0xf0   : > { %v1074_v39 = vpop.f32.mrb[0].mxu1 }
  0xf1   : > { %v2952_v40 = vpop.f32.mrb[1].mxu1 }
  0xf2   : > { %3101 = vmatmul.mubr.msk.bf16.vlgmr.msra.gmra.mrb[52].mxu0 %vm986_vm2, %v2883_v38  ;;  %v1077_v41 = vpop.f32.mrb[2].mxu1 }
  0xf3   : > { %v2953_v43 = vpop.f32.mrb[3].mxu1 }
  0xf4   : > { %v1028_v42 = vpop.f32.mrb[0].mxu0 }
  0xf5   : > { %v2946_v44 = vpop.f32.mrb[1].mxu0  ;;  %v1075_v45 = vadd.f32 %v1074_v39, %v1028_v42 }
  0xf6   : > { %v1031_v46 = vpop.f32.mrb[2].mxu0 }
  0xf7   : > { %v2947_v47 = vpop.f32.mrb[3].mxu0 }
  0xf8   : > { %v1182_v48 = vpop.f32.mrb[4].mxu1 }
  0xf9   : > { %v2964_v49 = vpop.f32.mrb[5].mxu1 }
  0xfa   : > { %v1185_v50 = vpop.f32.mrb[6].mxu1 }
  0xfb   : > { %v2965_v51 = vpop.f32.mrb[7].mxu1 }
 0x165   : > { %v1132_v3 = vpop.f32.mrb[4].mxu0 }
 0x166   : > { %v1138_v52 = vadd.f32 %v1132_v3, %v1075_v45  ;;  %v2958_v53 = vpop.f32.mrb[5].mxu0 }
 0x167   : > { %v1135_v54 = vpop.f32.mrb[6].mxu0 }
 0x168   : > { %v1188_v55 = vadd.f32 %v1182_v48, %v1138_v52  ;;  %v2959_v56 = vpop.f32.mrb[7].mxu0 }
 0x16a   : > { %v1291_v57 = vpop.f32.mrb[8].mxu1 }
 0x16b   : > { %v2976_v58 = vpop.f32.mrb[9].mxu1 }
 0x16c   : > { %v1294_v59 = vpop.f32.mrb[10].mxu1 }
 0x16d   : > { %v1232_v60 = vpop.f32.mrb[8].mxu0  ;;  %v2977_v61 = vpop.f32.mrb[11].mxu1 }
 0x16e   : > { %v1238_v62 = vadd.f32 %v1232_v60, %v1188_v55  ;;  %v2970_v63 = vpop.f32.mrb[9].mxu0 }
 0x16f   : > { %v1235_v0 = vpop.f32.mrb[10].mxu0 }
 0x170   : > { %v1297_v1 = vadd.f32 %v1291_v57, %v1238_v62  ;;  %v2971_v2 = vpop.f32.mrb[11].mxu0 }
 0x172   : > { %v1411_v4 = vpop.f32.mrb[12].mxu1 }
 0x173   : > { %v2988_v5 = vpop.f32.mrb[13].mxu1 }
 0x174   : > { %v1414_v6 = vpop.f32.mrb[14].mxu1 }
 0x175   : > { %v1351_v7 = vpop.f32.mrb[12].mxu0  ;;  %v2989_v8 = vpop.f32.mrb[15].mxu1 }
 0x176   : > { %v1357_v9 = vadd.f32 %v1351_v7, %v1297_v1  ;;  %v2982_v10 = vpop.f32.mrb[13].mxu0 }
 0x177   : > { %v1354_v11 = vpop.f32.mrb[14].mxu0 }
 0x178   : > { %v1417_v12 = vadd.f32 %v1411_v4, %v1357_v9  ;;  %v2983_v13 = vpop.f32.mrb[15].mxu0 }
 0x17a   : > { %v1521_v14 = vpop.f32.mrb[16].mxu1 }
 0x17b   : > { %v3000_v15 = vpop.f32.mrb[17].mxu1 }
 0x17c   : > { %v1524_v16 = vpop.f32.mrb[18].mxu1 }
 0x17d   : > { %v1471_v17 = vpop.f32.mrb[16].mxu0  ;;  %v3001_v18 = vpop.f32.mrb[19].mxu1 }
 0x17e   : > { %v1477_v19 = vadd.f32 %v1471_v17, %v1417_v12  ;;  %v2994_v20 = vpop.f32.mrb[17].mxu0 }
 0x17f   : > { %v1474_v21 = vpop.f32.mrb[18].mxu0 }
 0x180   : > { %v1527_v22 = vadd.f32 %v1521_v14, %v1477_v19  ;;  %v2995_v23 = vpop.f32.mrb[19].mxu0 }
 0x182   : > { %v1630_v24 = vpop.f32.mrb[20].mxu1 }
 0x183   : > { %v3012_v25 = vpop.f32.mrb[21].mxu1 }
 0x184   : > { %v1633_v26 = vpop.f32.mrb[22].mxu1 }
 0x185   : > { %v1571_v27 = vpop.f32.mrb[20].mxu0  ;;  %v3013_v28 = vpop.f32.mrb[23].mxu1 }
 0x186   : > { %v1577_v29 = vadd.f32 %v1571_v27, %v1527_v22  ;;  %v3006_v30 = vpop.f32.mrb[21].mxu0 }
 0x187   : > { %v1574_v31 = vpop.f32.mrb[22].mxu0 }
 0x188   : > { %v1636_v32 = vadd.f32 %v1630_v24, %v1577_v29  ;;  %v3007_v33 = vpop.f32.mrb[23].mxu0 }
 0x18a   : > { %v1730_v34 = vpop.f32.mrb[24].mxu1 }
 0x18b   : > { %v3024_v35 = vpop.f32.mrb[25].mxu1 }
 0x18c   : > { %v1733_v36 = vpop.f32.mrb[26].mxu1 }
 0x18d   : > { %v1680_v37 = vpop.f32.mrb[24].mxu0  ;;  %v3025_v38 = vpop.f32.mrb[27].mxu1 }
 0x18e   : > { %v1686_v39 = vadd.f32 %v1680_v37, %v1636_v32  ;;  %v3018_v40 = vpop.f32.mrb[25].mxu0 }
 0x18f   : > { %v1683_v41 = vpop.f32.mrb[26].mxu0 }
 0x190   : > { %v1736_v42 = vadd.f32 %v1730_v34, %v1686_v39  ;;  %v3019_v43 = vpop.f32.mrb[27].mxu0  ;;  %v2478_v41 = vpop.permute.xlu1 %2477 }
 0x192   : > { %v1849_v44 = vpop.f32.mrb[28].mxu1 }
 0x193   : > { %v3036_v45 = vpop.f32.mrb[29].mxu1 }
 0x194   : > { %v1852_v46 = vpop.f32.mrb[30].mxu1 }
 0x195   : > { %v1789_v47 = vpop.f32.mrb[28].mxu0  ;;  %v3037_v48 = vpop.f32.mrb[31].mxu1 }
 0x196   : > { %v1795_v49 = vadd.f32 %v1789_v47, %v1736_v42  ;;  %v3030_v50 = vpop.f32.mrb[29].mxu0 }
 0x197   : > { %v1792_v51 = vpop.f32.mrb[30].mxu0 }
 0x198   : > { %v1855_v3 = vadd.f32 %v1849_v44, %v1795_v49  ;;  %v3031_v52 = vpop.f32.mrb[31].mxu0 }
 0x19a   : > { %v1969_v53 = vpop.f32.mrb[32].mxu1 }
 0x19b   : > { %v3048_v54 = vpop.f32.mrb[33].mxu1 }
 0x19c   : > { %v1972_v55 = vpop.f32.mrb[34].mxu1 }
 0x19d   : > { %v1909_v56 = vpop.f32.mrb[32].mxu0  ;;  %v3049_v57 = vpop.f32.mrb[35].mxu1 }
 0x19e   : > { %v1915_v58 = vadd.f32 %v1909_v56, %v1855_v3  ;;  %v3042_v59 = vpop.f32.mrb[33].mxu0 }
 0x19f   : > { %v1912_v60 = vpop.f32.mrb[34].mxu0 }
 0x1a0   : > { %v1975_v61 = vadd.f32 %v1969_v53, %v1915_v58  ;;  %v3043_v62 = vpop.f32.mrb[35].mxu0 }
 0x1a2   : > { %v2069_v63 = vpop.f32.mrb[36].mxu1 }
 0x1a3   : > { %v3060_v0 = vpop.f32.mrb[37].mxu1 }
 0x1a4   : > { %v2072_v1 = vpop.f32.mrb[38].mxu1 }
 0x1a5   : > { %v2019_v2 = vpop.f32.mrb[36].mxu0  ;;  %v3061_v4 = vpop.f32.mrb[39].mxu1 }
 0x1a6   : > { %v2025_v5 = vadd.f32 %v2019_v2, %v1975_v61  ;;  %v3054_v6 = vpop.f32.mrb[37].mxu0 }
 0x1a7   : > { %v2022_v7 = vpop.f32.mrb[38].mxu0 }
 0x1a8   : > { %v2075_v8 = vadd.f32 %v2069_v63, %v2025_v5  ;;  %v3055_v9 = vpop.f32.mrb[39].mxu0 }
 0x1aa   : > { %v2178_v10 = vpop.f32.mrb[40].mxu1 }
 0x1ab   : > { %v3072_v11 = vpop.f32.mrb[41].mxu1 }
 0x1ac   : > { %v2181_v12 = vpop.f32.mrb[42].mxu1 }
 0x1ad   : > { %v2128_v13 = vpop.f32.mrb[40].mxu0  ;;  %v3073_v14 = vpop.f32.mrb[43].mxu1 }
 0x1ae   : > { %v2134_v15 = vadd.f32 %v2128_v13, %v2075_v8  ;;  %v3066_v16 = vpop.f32.mrb[41].mxu0 }
 0x1af   : > { %v2131_v17 = vpop.f32.mrb[42].mxu0 }
 0x1b0   : > { %v2184_v18 = vadd.f32 %v2178_v10, %v2134_v15  ;;  %v3067_v19 = vpop.f32.mrb[43].mxu0 }
 0x1b2   : > { %v2287_v20 = vpop.f32.mrb[44].mxu1 }
 0x1b3   : > { %v3084_v21 = vpop.f32.mrb[45].mxu1 }
 0x1b4   : > { %v2290_v22 = vpop.f32.mrb[46].mxu1 }
 0x1b5   : > { %v2228_v23 = vpop.f32.mrb[44].mxu0  ;;  %v3085_v24 = vpop.f32.mrb[47].mxu1 }
 0x1b6   : > { %v2234_v25 = vadd.f32 %v2228_v23, %v2184_v18  ;;  %v3078_v26 = vpop.f32.mrb[45].mxu0 }
 0x1b7   : > { %v2231_v27 = vpop.f32.mrb[46].mxu0 }
 0x1b8   : > { %v2293_v28 = vadd.f32 %v2287_v20, %v2234_v25  ;;  %v3079_v29 = vpop.f32.mrb[47].mxu0 }
 0x1ba   : > { %v2407_v30 = vpop.f32.mrb[48].mxu1 }
 0x1bb   : > { %v3096_v31 = vpop.f32.mrb[49].mxu1 }
 0x1bc   : > { %v2410_v32 = vpop.f32.mrb[50].mxu1 }
 0x1bd   : > { %v2347_v33 = vpop.f32.mrb[48].mxu0  ;;  %v3097_v34 = vpop.f32.mrb[51].mxu1 }
 0x1be   : > { %v2353_v35 = vadd.f32 %v2347_v33, %v2293_v28  ;;  %v3090_v36 = vpop.f32.mrb[49].mxu0 }
 0x1bf   : > { %v2350_v37 = vpop.f32.mrb[50].mxu0 }
 0x1c0   : > { %v2413_v38 = vadd.f32 %v2407_v30, %v2353_v35  ;;  %v3091_v39 = vpop.f32.mrb[51].mxu0 }
 0x1c5   : > { %v2467_v40 = vpop.f32.mrb[52].mxu0 }
 0x1c6   : > { %v2473_v42 = vadd.f32 %v2467_v40, %v2413_v38  ;;  %v3102_v43 = vpop.f32.mrb[53].mxu0 }
 0x1c7   : > { %v2470_v44 = vpop.f32.mrb[54].mxu0 }
 0x1c8   : > { %v2480_v45 = vadd.f32 %v2478_v41, %v2473_v42  ;;  %v3103_v46 = vpop.f32.mrb[55].mxu0 }
 0x1ca   : > { %v2481_v47 = vmax.f32 %v2480_v45, 0.0 }
 0x1cc   : > { %v2482_v48 = vpack.c.bf16 %v2481_v47, %v2481_v47 }
 0x1ce   : > { %2484 = vst.msk [vmem:[%s979_s18] sm:$0xf] %vm2483_vm3, %v2482_v48 }
 0x1cf PF: > { %s3692_s14 = sld [smem:[#allocation4_spill]]  ;;  %s3693_s29 = sld [smem:[#allocation2_spill]] }
 0x1d0   : > { %s3694_s30 = sld [smem:[#allocation3_spill]]  ;;  %s3695_s15 = sld [smem:[#allocation5_spill]] }
 0x1d1   : > { %s3696_s16 = sld [smem:[#allocation6_spill]] }
 0x1d5   : > { %s24_s17 = sadd.s32 1, %s3692_s14  }
 0x1d6   : > { %p21_p10 = scmp.ge.s32.totalorder %s24_s17, 10  }
 0x1d8   :  { %23 = sbr.rel (!%p21_p10) target bundleno = 3 (0x3), region = 165 }

// kernel: _lambda_.21
= control target key start
LH: loop header
LB: loop body
LE: loop exit
PB: predicated region body
PF: predicated region fallthrough
CT: control target
= control target key end

     0   :  { %s2269_s18 = smov 0   ;;  %s2271_s19 = smov 0   ;;  %s2584_s0 = inlined_call_operand.vmem [shape: bf16[2,6,8,100], index: 0, kind: input, shape index: {}, may-alias: {0,1,2}]   ;;  %s2585_s1 = inlined_call_operand.vmem [shape: bf16[2,6,8,100], index: 1, kind: input, shape index: {}, may-alias: {0,1,2}]   ;;  %s2586_s2 = inlined_call_operand.vmem [shape: bf16[2,6,8,100], index: 2, kind: input, shape index: {}, may-alias: {0,1,2}]   ;;  %s2587_s3 = inlined_call_operand.vmem [shape: bf16[27,8,8], index: 3, kind: input, shape index: {}]   ;;  %s2588_s4 = inlined_call_operand.vmem [shape: f32[8,1], index: 4, kind: input, shape index: {}]   ;;  %s2589_s5 = inlined_call_operand.vmem [shape: bf16[2,4,8,78], index: 5, kind: output, shape index: {}]  }
   0x1   :  { %s2273_s20 = smov 0   ;;  %s2275_s21 = smov 0  }
   0x2   :  { %s2277_s22 = smov 0  }
   0x3 LB: > { %s24_s23 = sadd.s32 1, %s2218_s20  ;;  %s27_s24 = sadd.s32 1, %s2222_s21  ;;  %s2226_s22 = sphi %s2277_s22, %s15_s22   ;;  %s2222_s21 = sphi %s2275_s21, %s2593_s21   ;;  %s2218_s20 = sphi %s2273_s20, %s2592_s20   ;;  %s2214_s19 = sphi %s2271_s19, %s2591_s19   ;;  %s2210_s18 = sphi %s2269_s18, %s2590_s18  }
   0x4   : > { %p25_p0 = scmp.ge.s32.totalorder %s24_s23, 4  ;;  %p1852_p1 = scmp.ge.s32.totalorder %s2226_s22, 1 }
   0x5   : > { %p244_p2 = scmp.lt.s32.totalorder %s2226_s22, 9 }
   0x6   : > { %s2595_s23 = smov (%p25_p0, %s24_s23), 0  ;;  %s2597_s24 = smov (!%p25_p0, %s27_s24), %s2222_s21 }
   0x7   : > { %p245_p3 = pnand %p1852_p1, %p244_p2  ;;  %p29_p4 = scmp.ge.s32.totalorder %s2597_s24, 2 }
   0x8   : > { %p296_p5 = scmp.lt.s32.totalorder (!%p245_p3), %s2214_s19, 1  ;;  %p298_p6 = scmp.lt.s32.totalorder (!%p245_p3), %s2210_s18, 5  ;;  %v2228_v0 = vmov (!%p245_p3), 0.0   ;;  %vm2229_vm0 = vmmov (!%p245_p3), 0   ;;  %vm346_vm1 = vcmask (!%p245_p3), 1043456   ;;  %vm342_vm2 = vcmask (!%p245_p3), 64512  }
   0x9   : > { %s2599_s24 = smov (%p29_p4, %s2597_s24), 0  ;;  %248 = sbr.rel (%p245_p3) target bundleno = 470 (0x1d6), region = 40 }
   0xa   : > { %1970 = vmatprep.subr.bf16.mxu0 (!%p245_p3), %v2228_v0  ;;  %1976 = vmatprep.subr.bf16.mxu1 (!%p245_p3), %v2228_v0  ;;  %s304_s7 = sadd.s32 (!%p245_p3), 1, %s2210_s18  ;;  %v334_v4 = vld [vmem:[%s2587_s3] sm:$0xf] (!%p245_p3)  ;;  %s2230_s10 = smov (!%p245_p3), 127   ;;  %v2238_v10 = vmov (!%p245_p3), 0   ;;  %vm1724_vm3 = vcmask (!%p245_p3), 633856  }
   0xb   : > { %1972 = vmatprep.mubr.msk.bf16.mxu0 (!%p245_p3), %vm2229_vm0, %v2228_v0  ;;  %1978 = vmatprep.mubr.msk.bf16.mxu1 (!%p245_p3), %vm2229_vm0, %v2228_v0  ;;  %p307_p7 = scmp.lt.s32.totalorder (!%p245_p3), %s304_s7, 5  ;;  %s2231_s11 = smov (!%p245_p3), 118   ;;  %v1715_v9 = vld [vmem:[%s2588_s4] sm:$0xff] (!%p245_p3)  ;;  %v1864_v16 = vld [vmem:[%s2587_s3 + $0xc] sm:$0xf] (!%p245_p3) }
   0xc   : > { %s2232_s14 = smov (!%p245_p3), 126   ;;  %s2233_s15 = smov (!%p245_p3), 117   ;;  %2184 = vset.pattern.permute.xlu0 (!%p245_p3), %v2238_v10  ;;  %v1858_v15 = vld [vmem:[%s2587_s3 + $0x4] sm:$0xf] (!%p245_p3)  ;;  %v1862_v22 = vld [vmem:[%s2587_s3 + $0x8] sm:$0xf] (!%p245_p3) }
   0xd   : > { %s314_s16 = sadd.s32 (!%p245_p3), 2, %s2210_s18  ;;  %s2235_s29 = smov (!%p245_p3), 108   ;;  %v1868_v23 = vld [vmem:[%s2587_s3 + $0x14] sm:$0xf] (!%p245_p3)  ;;  %v1866_v28 = vld [vmem:[%s2587_s3 + $0x10] sm:$0xf] (!%p245_p3) }
   0xe   : > { %p317_p8 = scmp.lt.s32.totalorder (!%p245_p3), %s314_s16, 5  ;;  %s2236_s30 = smov (!%p245_p3), 107   ;;  %v1872_v29 = vld [vmem:[%s2587_s3 + $0x1c] sm:$0xf] (!%p245_p3)  ;;  %v1870_v34 = vld [vmem:[%s2587_s3 + $0x18] sm:$0xf] (!%p245_p3) }
   0xf   : > { %v1876_v35 = vld [vmem:[%s2587_s3 + $0x24] sm:$0xf] (!%p245_p3)  ;;  %v1874_v40 = vld [vmem:[%s2587_s3 + $0x20] sm:$0xf] (!%p245_p3)  ;;  %v1881_v41 = vld [vmem:[%s2587_s3 + $0x2c] sm:$0xf] (!%p245_p3) }
  0x10   : > { %s2601_s19 = smov (!%p296_p5, %s2214_s19), 1  ;;  %s2603_s7 = smov (!%p307_p7, %s304_s7), 5  ;;  %v1878_v46 = vld [vmem:[%s2587_s3 + $0x28] sm:$0xf]  ;;  %v1885_v47 = vld [vmem:[%s2587_s3 + $0x34] sm:$0xf] }
  0x11   : > { %s299_s25 = scalar_select %p298_p6, %s2210_s18, 5  ;;  %v1883_v52 = vld [vmem:[%s2587_s3 + $0x30] sm:$0xf]  ;;  %v1889_v53 = vld [vmem:[%s2587_s3 + $0x3c] sm:$0xf] }
  0x12   : > { %s2312_s26 = smul.u32 6, %s2601_s19  ;;  %s2605_s16 = smov (!%p317_p8, %s314_s16), 5  ;;  %v1887_v58 = vld [vmem:[%s2587_s3 + $0x38] sm:$0xf]  ;;  %v1893_v59 = vld [vmem:[%s2587_s3 + $0x44] sm:$0xf] }
  0x13   : > { %v1891_v63 = vld [vmem:[%s2587_s3 + $0x40] sm:$0xf]  ;;  %p326_p9 = scmp.lt.s32.totalorder %s2210_s18, 3 }
  0x14   : > { %s301_s27 = sadd.s32 %s2312_s26, %s299_s25  ;;  %s310_s12 = sadd.s32 %s2312_s26, %s2603_s7 }
  0x15   : > { %s1853_s28 = sshll.u32 %s301_s27, 2  ;;  %s1854_s13 = sshll.u32 %s310_s12, 2 }
  0x16   : > { %s303_s6 = scalar_lea.vmem %s2584_s0, %s1853_s28  ;;  %s312_s27 = scalar_lea.vmem %s2585_s1, %s1854_s13 }
  0x17   : > { %v333_v1 = vld [vmem:[%s303_s6] sm:$0xf]  ;;  %s2234_s28 = smov 116   ;;  %s2237_s6 = smov 106  }
  0x18   : > { %v1859_v2 = vcombine.low %v333_v1, %v333_v1  ;;  %v394_v3 = vsel %vm346_vm1, %v333_v1, 0  ;;  %v2336_v5 = vld [vmem:[%s312_s27] sm:$0xf]  ;;  %s320_s7 = sadd.s32 %s2312_s26, %s2605_s16  ;;  %v1897_v1 = vld [vmem:[%s2587_s3 + $0x4c] sm:$0xf]  ;;  %s2607_s18 = smov (!%p326_p9, %s2210_s18), 3 }
  0x19   : > { %1977 = vmatpush3.bf16.msra.mxu1 %v394_v3  ;;  %v1879_v6 = vcombine.low %v2336_v5, %v2336_v5  ;;  %s1855_s8 = sshll.u32 %s320_s7, 2  ;;  %v800_v31 = vsel %vm346_vm1, %v2336_v5, 0  ;;  %s1856_s26 = sshll.u32 %s2601_s19, 2 }
  0x1a   : > { %340 = vrot.lane.b32.xlu0 %v1859_v2, %s2230_s10  ;;  %489 = vrot.lane.b32.xlu1 %v1859_v2, %s2231_s11  ;;  %s322_s13 = scalar_lea.vmem %s2586_s2, %s1855_s8  ;;  %s329_s16 = sadd.s32 %s1856_s26, %s2607_s18 }
  0x1b   : > { %1988 = vmatprep.subr.bf16.mxu1 %v2228_v0  ;;  %v2348_v7 = vld [vmem:[%s322_s13] sm:$0xf] }
  0x1c   : > { %1979 = vmatmul.mubr.msk.bf16.vlgmr.msra.gmra.mrb[0].mxu1 %vm342_vm2, %v334_v4  ;;  %v1898_v8 = vcombine.low %v2348_v7, %v2348_v7 }
  0x1d   : > { %1990 = vmatprep.mubr.msk.bf16.mxu1 %vm2229_vm0, %v2228_v0 }
  0x1e   : > { %438 = vrot.lane.b32.xlu0 %v1859_v2, %s2232_s14  ;;  %540 = vrot.lane.b32.xlu1 %v1859_v2, %s2233_s15 }
  0x22   : > { %591 = vrot.lane.b32.xlu0 %v1859_v2, %s2234_s28  ;;  %642 = vrot.lane.b32.xlu1 %v1859_v2, %s2235_s29 }
  0x26   : > { %693 = vrot.lane.b32.xlu0 %v1859_v2, %s2236_s30  ;;  %744 = vrot.lane.b32.xlu1 %v1859_v2, %s2237_s6  ;;  %v1261_v2 = vsel %vm346_vm1, %v2348_v7, 0  ;;  %v1902_v7 = vld [vmem:[%s2587_s3 + $0x54] sm:$0xf] }
  0x2a   : > { %848 = vrot.lane.b32.xlu0 %v1879_v6, %s2230_s10  ;;  %899 = vrot.lane.b32.xlu1 %v1879_v6, %s2232_s14 }
  0x2e   : > { %950 = vrot.lane.b32.xlu0 %v1879_v6, %s2231_s11  ;;  %1001 = vrot.lane.b32.xlu1 %v1879_v6, %s2233_s15 }
  0x32   : > { %1052 = vrot.lane.b32.xlu0 %v1879_v6, %s2234_s28  ;;  %1103 = vrot.lane.b32.xlu1 %v1879_v6, %s2235_s29 }
  0x36   : > { %1154 = vrot.lane.b32.xlu0 %v1879_v6, %s2236_s30  ;;  %1205 = vrot.lane.b32.xlu1 %v1879_v6, %s2237_s6  ;;  %v1895_v6 = vld [vmem:[%s2587_s3 + $0x48] sm:$0xf] }
  0x3a   : > { %1309 = vrot.lane.b32.xlu0 %v1898_v8, %s2230_s10  ;;  %1360 = vrot.lane.b32.xlu1 %v1898_v8, %s2232_s14  ;;  %s1857_s10 = sshll.u32 %s329_s16, 2 }
  0x3e   : > { %1411 = vrot.lane.b32.xlu0 %v1898_v8, %s2231_s11  ;;  %1462 = vrot.lane.b32.xlu1 %v1898_v8, %s2233_s15  ;;  %s331_s15 = scalar_lea.vmem %s2589_s5, %s1857_s10 }
  0x42   : > { %1513 = vrot.lane.b32.xlu0 %v1898_v8, %s2234_s28  ;;  %1564 = vrot.lane.b32.xlu1 %v1898_v8, %s2235_s29 }
  0x46   : > { %1615 = vrot.lane.b32.xlu0 %v1898_v8, %s2236_s30  ;;  %1666 = vrot.lane.b32.xlu1 %v1898_v8, %s2237_s6 }
  0x4a   : > { %1718 = vperm.xlu0 %2184, %v1715_v9  }
  0x8c   : > { %v341_v11 = vpop.permute.xlu0 %340  ;;  %v490_v12 = vpop.permute.xlu1 %489 }
  0x8d   : > { %v348_v13 = vsel %vm346_vm1, %v341_v11, 0  ;;  %v495_v14 = vsel %vm346_vm1, %v490_v12, 0  ;;  %v1900_v12 = vld [vmem:[%s2587_s3 + $0x50] sm:$0xf] }
  0x8e   : > { %1971 = vmatpush3.bf16.msra.mxu0 %v348_v13  ;;  %1989 = vmatpush3.bf16.msra.mxu1 %v495_v14  ;;  %v1906_v13 = vld [vmem:[%s2587_s3 + $0x5c] sm:$0xf] }
  0x8f   : > { %1982 = vmatprep.subr.bf16.mxu0 %v2228_v0  ;;  %2000 = vmatprep.subr.bf16.mxu1 %v2228_v0 }
  0x90   : > { %v439_v17 = vpop.permute.xlu0 %438  ;;  %v541_v19 = vpop.permute.xlu1 %540 }
  0x91   : > { %v444_v18 = vsel %vm346_vm1, %v439_v17, 0  ;;  %1973 = vmatmul.mubr.msk.bf16.vlgmr.msra.gmra.mrb[0].mxu0 %vm342_vm2, %v1858_v15  ;;  %1991 = vmatmul.mubr.msk.bf16.vlgmr.msra.gmra.mrb[4].mxu1 %vm342_vm2, %v1864_v16  ;;  %v546_v24 = vsel %vm346_vm1, %v541_v19, 0  ;;  %v1904_v17 = vld [vmem:[%s2587_s3 + $0x58] sm:$0xf] }
  0x92   : > { %1983 = vmatpush3.bf16.msra.mxu0 %v444_v18  ;;  %1984 = vmatprep.mubr.msk.bf16.mxu0 %vm2229_vm0, %v2228_v0  ;;  %v1910_v18 = vld [vmem:[%s2587_s3 + $0x64] sm:$0xf] }
  0x93   : > { %1994 = vmatprep.subr.bf16.mxu0 %v2228_v0  ;;  %2002 = vmatprep.mubr.msk.bf16.mxu1 %vm2229_vm0, %v2228_v0 }
  0x94   : > { %v592_v20 = vpop.permute.xlu0 %591  ;;  %v643_v27 = vpop.permute.xlu1 %642 }
  0x95   : > { %v597_v21 = vsel %vm346_vm1, %v592_v20, 0  ;;  %v648_v30 = vsel %vm346_vm1, %v643_v27, 0  ;;  %v1912_v27 = vld [vmem:[%s2587_s3 + $0x68] sm:$0xf] }
  0x96   : > { %2001 = vmatpush3.bf16.msra.mxu1 %v597_v21  ;;  %v1908_v21 = vld [vmem:[%s2587_s3 + $0x60] sm:$0xf] }
  0x97   : > { %2012 = vmatprep.subr.bf16.mxu1 %v2228_v0 }
  0x98   : > { %v694_v25 = vpop.permute.xlu0 %693  ;;  %v745_v32 = vpop.permute.xlu1 %744 }
  0x99   : > { %1985 = vmatmul.mubr.msk.bf16.vlgmr.msra.gmra.mrb[4].mxu0 %vm342_vm2, %v1862_v22  ;;  %2003 = vmatmul.mubr.msk.bf16.vlgmr.msra.gmra.mrb[8].mxu1 %vm342_vm2, %v1868_v23  ;;  %v699_v26 = vsel %vm346_vm1, %v694_v25, 0  ;;  %v750_v36 = vsel %vm346_vm1, %v745_v32, 0 }
  0x9a   : > { %1995 = vmatpush3.bf16.msra.mxu0 %v546_v24  ;;  %1996 = vmatprep.mubr.msk.bf16.mxu0 %vm2229_vm0, %v2228_v0 }
  0x9b   : > { %2006 = vmatprep.subr.bf16.mxu0 %v2228_v0  ;;  %2013 = vmatpush3.bf16.msra.mxu1 %v699_v26 }
  0x9c   : > { %2014 = vmatprep.mubr.msk.bf16.mxu1 %vm2229_vm0, %v2228_v0  ;;  %2024 = vmatprep.subr.bf16.mxu1 %v2228_v0  ;;  %v900_v33 = vpop.permute.xlu1 %899  ;;  %v849_v38 = vpop.permute.xlu0 %848 }
  0x9d   : > { %v905_v37 = vsel %vm346_vm1, %v900_v33, 0  ;;  %v854_v42 = vsel %vm346_vm1, %v849_v38, 0 }
  0xa0   : > { %v1002_v39 = vpop.permute.xlu1 %1001  ;;  %v951_v44 = vpop.permute.xlu0 %950 }
  0xa1   : > { %1997 = vmatmul.mubr.msk.bf16.vlgmr.msra.gmra.mrb[8].mxu0 %vm342_vm2, %v1866_v28  ;;  %2015 = vmatmul.mubr.msk.bf16.vlgmr.msra.gmra.mrb[12].mxu1 %vm342_vm2, %v1872_v29  ;;  %v1007_v43 = vsel %vm346_vm1, %v1002_v39, 0  ;;  %v956_v48 = vsel %vm346_vm1, %v951_v44, 0 }
  0xa2   : > { %2007 = vmatpush3.bf16.msra.mxu0 %v648_v30  ;;  %2008 = vmatprep.mubr.msk.bf16.mxu0 %vm2229_vm0, %v2228_v0 }
  0xa3   : > { %2018 = vmatprep.subr.bf16.mxu0 %v2228_v0  ;;  %2025 = vmatpush3.bf16.msra.mxu1 %v800_v31 }
  0xa4   : > { %2026 = vmatprep.mubr.msk.bf16.mxu1 %vm2229_vm0, %v2228_v0  ;;  %2036 = vmatprep.subr.bf16.mxu1 %v2228_v0  ;;  %v1104_v45 = vpop.permute.xlu1 %1103  ;;  %v1053_v50 = vpop.permute.xlu0 %1052 }
  0xa5   : > { %v1109_v49 = vsel %vm346_vm1, %v1104_v45, 0  ;;  %v1058_v54 = vsel %vm346_vm1, %v1053_v50, 0 }
  0xa8   : > { %v1206_v51 = vpop.permute.xlu1 %1205  ;;  %v1155_v56 = vpop.permute.xlu0 %1154 }
  0xa9   : > { %2009 = vmatmul.mubr.msk.bf16.vlgmr.msra.gmra.mrb[12].mxu0 %vm342_vm2, %v1870_v34  ;;  %2027 = vmatmul.mubr.msk.bf16.vlgmr.msra.gmra.mrb[16].mxu1 %vm342_vm2, %v1876_v35  ;;  %v1211_v55 = vsel %vm346_vm1, %v1206_v51, 0  ;;  %v1160_v60 = vsel %vm346_vm1, %v1155_v56, 0 }
  0xaa   : > { %2019 = vmatpush3.bf16.msra.mxu0 %v750_v36  ;;  %2020 = vmatprep.mubr.msk.bf16.mxu0 %vm2229_vm0, %v2228_v0 }
  0xab   : > { %2030 = vmatprep.subr.bf16.mxu0 %v2228_v0  ;;  %2037 = vmatpush3.bf16.msra.mxu1 %v905_v37 }
  0xac   : > { %2038 = vmatprep.mubr.msk.bf16.mxu1 %vm2229_vm0, %v2228_v0  ;;  %2048 = vmatprep.subr.bf16.mxu1 %v2228_v0  ;;  %v1310_v57 = vpop.permute.xlu0 %1309  ;;  %v1361_v4 = vpop.permute.xlu1 %1360 }
  0xad   : > { %v1315_v61 = vsel %vm346_vm1, %v1310_v57, 0  ;;  %v1366_v8 = vsel %vm346_vm1, %v1361_v4, 0 }
  0xb0   : > { %v1412_v62 = vpop.permute.xlu0 %1411  ;;  %v1463_v10 = vpop.permute.xlu1 %1462 }
  0xb1   : > { %2021 = vmatmul.mubr.msk.bf16.vlgmr.msra.gmra.mrb[16].mxu0 %vm342_vm2, %v1874_v40  ;;  %2039 = vmatmul.mubr.msk.bf16.vlgmr.msra.gmra.mrb[20].mxu1 %vm342_vm2, %v1881_v41  ;;  %v1417_v3 = vsel %vm346_vm1, %v1412_v62, 0  ;;  %v1468_v14 = vsel %vm346_vm1, %v1463_v10, 0 }
  0xb2   : > { %2031 = vmatpush3.bf16.msra.mxu0 %v854_v42  ;;  %2032 = vmatprep.mubr.msk.bf16.mxu0 %vm2229_vm0, %v2228_v0 }
  0xb3   : > { %2042 = vmatprep.subr.bf16.mxu0 %v2228_v0  ;;  %2049 = vmatpush3.bf16.msra.mxu1 %v1007_v43 }
  0xb4   : > { %2050 = vmatprep.mubr.msk.bf16.mxu1 %vm2229_vm0, %v2228_v0  ;;  %2060 = vmatprep.subr.bf16.mxu1 %v2228_v0  ;;  %v1514_v5 = vpop.permute.xlu0 %1513  ;;  %v1565_v16 = vpop.permute.xlu1 %1564 }
  0xb5   : > { %v1519_v9 = vsel %vm346_vm1, %v1514_v5, 0  ;;  %v1570_v19 = vsel %vm346_vm1, %v1565_v16, 0 }
  0xb8   : > { %v1616_v11 = vpop.permute.xlu0 %1615  ;;  %v1667_v20 = vpop.permute.xlu1 %1666 }
  0xb9   : > { %2033 = vmatmul.mubr.msk.bf16.vlgmr.msra.gmra.mrb[20].mxu0 %vm342_vm2, %v1878_v46  ;;  %2051 = vmatmul.mubr.msk.bf16.vlgmr.msra.gmra.mrb[24].mxu1 %vm342_vm2, %v1885_v47  ;;  %v1621_v15 = vsel %vm346_vm1, %v1616_v11, 0  ;;  %v1672_v22 = vsel %vm346_vm1, %v1667_v20, 0 }
  0xba   : > { %2043 = vmatpush3.bf16.msra.mxu0 %v956_v48  ;;  %2044 = vmatprep.mubr.msk.bf16.mxu0 %vm2229_vm0, %v2228_v0 }
  0xbb   : > { %2054 = vmatprep.subr.bf16.mxu0 %v2228_v0  ;;  %2061 = vmatpush3.bf16.msra.mxu1 %v1109_v49 }
  0xbc   : > { %2062 = vmatprep.mubr.msk.bf16.mxu1 %vm2229_vm0, %v2228_v0  ;;  %2072 = vmatprep.subr.bf16.mxu1 %v2228_v0 }
  0xc1   : > { %2045 = vmatmul.mubr.msk.bf16.vlgmr.msra.gmra.mrb[24].mxu0 %vm342_vm2, %v1883_v52  ;;  %2063 = vmatmul.mubr.msk.bf16.vlgmr.msra.gmra.mrb[28].mxu1 %vm342_vm2, %v1889_v53 }
  0xc2   : > { %2055 = vmatpush3.bf16.msra.mxu0 %v1058_v54  ;;  %2056 = vmatprep.mubr.msk.bf16.mxu0 %vm2229_vm0, %v2228_v0 }
  0xc3   : > { %2066 = vmatprep.subr.bf16.mxu0 %v2228_v0  ;;  %2073 = vmatpush3.bf16.msra.mxu1 %v1211_v55 }
  0xc4   : > { %2074 = vmatprep.mubr.msk.bf16.mxu1 %vm2229_vm0, %v2228_v0  ;;  %2084 = vmatprep.subr.bf16.mxu1 %v2228_v0 }
  0xc9   : > { %2057 = vmatmul.mubr.msk.bf16.vlgmr.msra.gmra.mrb[28].mxu0 %vm342_vm2, %v1887_v58  ;;  %2075 = vmatmul.mubr.msk.bf16.vlgmr.msra.gmra.mrb[32].mxu1 %vm342_vm2, %v1893_v59 }
  0xca   : > { %2067 = vmatpush3.bf16.msra.mxu0 %v1160_v60  ;;  %2068 = vmatprep.mubr.msk.bf16.mxu0 %vm2229_vm0, %v2228_v0 }
  0xcb   : > { %2078 = vmatprep.subr.bf16.mxu0 %v2228_v0  ;;  %2085 = vmatpush3.bf16.msra.mxu1 %v1315_v61 }
  0xcc   : > { %2086 = vmatprep.mubr.msk.bf16.mxu1 %vm2229_vm0, %v2228_v0  ;;  %2096 = vmatprep.subr.bf16.mxu1 %v2228_v0 }
  0xd1   : > { %2069 = vmatmul.mubr.msk.bf16.vlgmr.msra.gmra.mrb[32].mxu0 %vm342_vm2, %v1891_v63  ;;  %2087 = vmatmul.mubr.msk.bf16.vlgmr.msra.gmra.mrb[36].mxu1 %vm342_vm2, %v1897_v1 }
  0xd2   : > { %2079 = vmatpush3.bf16.msra.mxu0 %v1261_v2  ;;  %2080 = vmatprep.mubr.msk.bf16.mxu0 %vm2229_vm0, %v2228_v0 }
  0xd3   : > { %2090 = vmatprep.subr.bf16.mxu0 %v2228_v0  ;;  %2097 = vmatpush3.bf16.msra.mxu1 %v1417_v3 }
  0xd4   : > { %2098 = vmatprep.mubr.msk.bf16.mxu1 %vm2229_vm0, %v2228_v0  ;;  %2108 = vmatprep.subr.bf16.mxu1 %v2228_v0 }
  0xd9   : > { %2081 = vmatmul.mubr.msk.bf16.vlgmr.msra.gmra.mrb[36].mxu0 %vm342_vm2, %v1895_v6  ;;  %2099 = vmatmul.mubr.msk.bf16.vlgmr.msra.gmra.mrb[40].mxu1 %vm342_vm2, %v1902_v7 }
  0xda   : > { %2091 = vmatpush3.bf16.msra.mxu0 %v1366_v8  ;;  %2092 = vmatprep.mubr.msk.bf16.mxu0 %vm2229_vm0, %v2228_v0 }
  0xdb   : > { %2102 = vmatprep.subr.bf16.mxu0 %v2228_v0  ;;  %2109 = vmatpush3.bf16.msra.mxu1 %v1519_v9 }
  0xdc   : > { %2110 = vmatprep.mubr.msk.bf16.mxu1 %vm2229_vm0, %v2228_v0  ;;  %2120 = vmatprep.subr.bf16.mxu1 %v2228_v0 }
  0xe1   : > { %2093 = vmatmul.mubr.msk.bf16.vlgmr.msra.gmra.mrb[40].mxu0 %vm342_vm2, %v1900_v12  ;;  %2111 = vmatmul.mubr.msk.bf16.vlgmr.msra.gmra.mrb[44].mxu1 %vm342_vm2, %v1906_v13 }
  0xe2   : > { %2103 = vmatpush3.bf16.msra.mxu0 %v1468_v14  ;;  %2104 = vmatprep.mubr.msk.bf16.mxu0 %vm2229_vm0, %v2228_v0 }
  0xe3   : > { %2114 = vmatprep.subr.bf16.mxu0 %v2228_v0  ;;  %2121 = vmatpush3.bf16.msra.mxu1 %v1621_v15 }
  0xe4   : > { %2122 = vmatprep.mubr.msk.bf16.mxu1 %vm2229_vm0, %v2228_v0 }
  0xe9   : > { %2105 = vmatmul.mubr.msk.bf16.vlgmr.msra.gmra.mrb[44].mxu0 %vm342_vm2, %v1904_v17  ;;  %2123 = vmatmul.mubr.msk.bf16.vlgmr.msra.gmra.mrb[48].mxu1 %vm342_vm2, %v1910_v18 }
  0xea   : > { %2115 = vmatpush3.bf16.msra.mxu0 %v1570_v19  ;;  %2116 = vmatprep.mubr.msk.bf16.mxu0 %vm2229_vm0, %v2228_v0 }
  0xeb   : > { %2126 = vmatprep.subr.bf16.mxu0 %v2228_v0 }
  0xef   : > { %v430_v23 = vpop.f32.mrb[0].mxu1 }
  0xf0   : > { %v1980_v24 = vpop.f32.mrb[1].mxu1 }
  0xf1   : > { %2117 = vmatmul.mubr.msk.bf16.vlgmr.msra.gmra.mrb[48].mxu0 %vm342_vm2, %v1908_v21  ;;  %v433_v25 = vpop.f32.mrb[2].mxu1 }
  0xf2   : > { %2127 = vmatpush3.bf16.msra.mxu0 %v1672_v22  ;;  %2128 = vmatprep.mubr.msk.bf16.mxu0 %vm2229_vm0, %v2228_v0  ;;  %v1981_v26 = vpop.f32.mrb[3].mxu1 }
  0xf9   : > { %2129 = vmatmul.mubr.msk.bf16.vlgmr.msra.gmra.mrb[52].mxu0 %vm342_vm2, %v1912_v27 }
 0x164   : > { %v384_v28 = vpop.f32.mrb[0].mxu0  ;;  %v531_v29 = vpop.f32.mrb[4].mxu1 }
 0x165   : > { %v1974_v30 = vpop.f32.mrb[1].mxu0  ;;  %v431_v31 = vadd.f32 %v430_v23, %v384_v28  ;;  %v1992_v32 = vpop.f32.mrb[5].mxu1 }
 0x166   : > { %v387_v33 = vpop.f32.mrb[2].mxu0  ;;  %v534_v34 = vpop.f32.mrb[6].mxu1 }
 0x167   : > { %v1975_v35 = vpop.f32.mrb[3].mxu0  ;;  %v1993_v36 = vpop.f32.mrb[7].mxu1 }
 0x16c   : > { %v480_v37 = vpop.f32.mrb[4].mxu0  ;;  %v633_v38 = vpop.f32.mrb[8].mxu1 }
 0x16d   : > { %v486_v39 = vadd.f32 %v480_v37, %v431_v31  ;;  %v1986_v0 = vpop.f32.mrb[5].mxu0  ;;  %v2004_v40 = vpop.f32.mrb[9].mxu1 }
 0x16e   : > { %v483_v41 = vpop.f32.mrb[6].mxu0  ;;  %v636_v42 = vpop.f32.mrb[10].mxu1 }
 0x16f   : > { %v537_v43 = vadd.f32 %v531_v29, %v486_v39  ;;  %v1987_v44 = vpop.f32.mrb[7].mxu0  ;;  %v2005_v45 = vpop.f32.mrb[11].mxu1 }
 0x174   : > { %v582_v46 = vpop.f32.mrb[8].mxu0  ;;  %v735_v47 = vpop.f32.mrb[12].mxu1 }
 0x175   : > { %v588_v48 = vadd.f32 %v582_v46, %v537_v43  ;;  %v1998_v49 = vpop.f32.mrb[9].mxu0  ;;  %v2016_v50 = vpop.f32.mrb[13].mxu1 }
 0x176   : > { %v585_v51 = vpop.f32.mrb[10].mxu0  ;;  %v738_v52 = vpop.f32.mrb[14].mxu1 }
 0x177   : > { %v639_v53 = vadd.f32 %v633_v38, %v588_v48  ;;  %v1999_v54 = vpop.f32.mrb[11].mxu0  ;;  %v2017_v55 = vpop.f32.mrb[15].mxu1 }
 0x17c   : > { %v684_v56 = vpop.f32.mrb[12].mxu0  ;;  %v836_v57 = vpop.f32.mrb[16].mxu1 }
 0x17d   : > { %v690_v58 = vadd.f32 %v684_v56, %v639_v53  ;;  %v2010_v59 = vpop.f32.mrb[13].mxu0  ;;  %v2028_v60 = vpop.f32.mrb[17].mxu1 }
 0x17e   : > { %v687_v61 = vpop.f32.mrb[14].mxu0  ;;  %v839_v62 = vpop.f32.mrb[18].mxu1 }
 0x17f   : > { %v741_v63 = vadd.f32 %v735_v47, %v690_v58  ;;  %v2011_v1 = vpop.f32.mrb[15].mxu0  ;;  %v2029_v2 = vpop.f32.mrb[19].mxu1 }
 0x184   : > { %v786_v3 = vpop.f32.mrb[16].mxu0  ;;  %v941_v4 = vpop.f32.mrb[20].mxu1 }
 0x185   : > { %v792_v5 = vadd.f32 %v786_v3, %v741_v63  ;;  %v2022_v6 = vpop.f32.mrb[17].mxu0  ;;  %v2040_v7 = vpop.f32.mrb[21].mxu1 }
 0x186   : > { %v789_v8 = vpop.f32.mrb[18].mxu0  ;;  %v944_v9 = vpop.f32.mrb[22].mxu1 }
 0x187   : > { %v842_v10 = vadd.f32 %v836_v57, %v792_v5  ;;  %v2023_v11 = vpop.f32.mrb[19].mxu0  ;;  %v2041_v12 = vpop.f32.mrb[23].mxu1 }
 0x18c   : > { %v890_v13 = vpop.f32.mrb[20].mxu0  ;;  %v1043_v14 = vpop.f32.mrb[24].mxu1 }
 0x18d   : > { %v896_v15 = vadd.f32 %v890_v13, %v842_v10  ;;  %v2034_v16 = vpop.f32.mrb[21].mxu0  ;;  %v2052_v17 = vpop.f32.mrb[25].mxu1 }
 0x18e   : > { %v893_v18 = vpop.f32.mrb[22].mxu0  ;;  %v1046_v19 = vpop.f32.mrb[26].mxu1 }
 0x18f   : > { %v947_v20 = vadd.f32 %v941_v4, %v896_v15  ;;  %v2035_v21 = vpop.f32.mrb[23].mxu0  ;;  %v2053_v22 = vpop.f32.mrb[27].mxu1 }
 0x194   : > { %v992_v23 = vpop.f32.mrb[24].mxu0  ;;  %v1145_v24 = vpop.f32.mrb[28].mxu1 }
 0x195   : > { %v998_v25 = vadd.f32 %v992_v23, %v947_v20  ;;  %v2046_v26 = vpop.f32.mrb[25].mxu0  ;;  %v2064_v27 = vpop.f32.mrb[29].mxu1 }
 0x196   : > { %v995_v28 = vpop.f32.mrb[26].mxu0  ;;  %v1148_v29 = vpop.f32.mrb[30].mxu1 }
 0x197   : > { %v1049_v30 = vadd.f32 %v1043_v14, %v998_v25  ;;  %v2047_v31 = vpop.f32.mrb[27].mxu0  ;;  %v2065_v32 = vpop.f32.mrb[31].mxu1 }
 0x198   : > { %v1719_v26 = vpop.permute.xlu0 %1718 }
 0x19c   : > { %v1094_v33 = vpop.f32.mrb[28].mxu0  ;;  %v1247_v34 = vpop.f32.mrb[32].mxu1 }
 0x19d   : > { %v1100_v35 = vadd.f32 %v1094_v33, %v1049_v30  ;;  %v2058_v36 = vpop.f32.mrb[29].mxu0  ;;  %v2076_v37 = vpop.f32.mrb[33].mxu1 }
 0x19e   : > { %v1097_v38 = vpop.f32.mrb[30].mxu0  ;;  %v1250_v39 = vpop.f32.mrb[34].mxu1 }
 0x19f   : > { %v1151_v0 = vadd.f32 %v1145_v24, %v1100_v35  ;;  %v2059_v40 = vpop.f32.mrb[31].mxu0  ;;  %v2077_v41 = vpop.f32.mrb[35].mxu1 }
 0x1a4   : > { %v1196_v42 = vpop.f32.mrb[32].mxu0  ;;  %v1351_v43 = vpop.f32.mrb[36].mxu1 }
 0x1a5   : > { %v1202_v44 = vadd.f32 %v1196_v42, %v1151_v0  ;;  %v2070_v45 = vpop.f32.mrb[33].mxu0  ;;  %v2088_v46 = vpop.f32.mrb[37].mxu1 }
 0x1a6   : > { %v1199_v47 = vpop.f32.mrb[34].mxu0  ;;  %v1354_v48 = vpop.f32.mrb[38].mxu1 }
 0x1a7   : > { %v1253_v49 = vadd.f32 %v1247_v34, %v1202_v44  ;;  %v2071_v50 = vpop.f32.mrb[35].mxu0  ;;  %v2089_v51 = vpop.f32.mrb[39].mxu1 }
 0x1ac   : > { %v1297_v52 = vpop.f32.mrb[36].mxu0  ;;  %v1453_v53 = vpop.f32.mrb[40].mxu1 }
 0x1ad   : > { %v1303_v54 = vadd.f32 %v1297_v52, %v1253_v49  ;;  %v2082_v55 = vpop.f32.mrb[37].mxu0  ;;  %v2100_v56 = vpop.f32.mrb[41].mxu1 }
 0x1ae   : > { %v1300_v57 = vpop.f32.mrb[38].mxu0  ;;  %v1456_v58 = vpop.f32.mrb[42].mxu1 }
 0x1af   : > { %v1357_v59 = vadd.f32 %v1351_v43, %v1303_v54  ;;  %v2083_v60 = vpop.f32.mrb[39].mxu0  ;;  %v2101_v61 = vpop.f32.mrb[43].mxu1 }
 0x1b4   : > { %v1402_v62 = vpop.f32.mrb[40].mxu0  ;;  %v1555_v63 = vpop.f32.mrb[44].mxu1 }
 0x1b5   : > { %v1408_v1 = vadd.f32 %v1402_v62, %v1357_v59  ;;  %v2094_v2 = vpop.f32.mrb[41].mxu0  ;;  %v2112_v3 = vpop.f32.mrb[45].mxu1 }
 0x1b6   : > { %v1405_v4 = vpop.f32.mrb[42].mxu0  ;;  %v1558_v5 = vpop.f32.mrb[46].mxu1 }
 0x1b7   : > { %v1459_v6 = vadd.f32 %v1453_v53, %v1408_v1  ;;  %v2095_v7 = vpop.f32.mrb[43].mxu0  ;;  %v2113_v8 = vpop.f32.mrb[47].mxu1 }
 0x1bc   : > { %v1504_v9 = vpop.f32.mrb[44].mxu0  ;;  %v1657_v10 = vpop.f32.mrb[48].mxu1 }
 0x1bd   : > { %v1510_v11 = vadd.f32 %v1504_v9, %v1459_v6  ;;  %v2106_v12 = vpop.f32.mrb[45].mxu0  ;;  %v2124_v13 = vpop.f32.mrb[49].mxu1 }
 0x1be   : > { %v1507_v14 = vpop.f32.mrb[46].mxu0  ;;  %v1660_v15 = vpop.f32.mrb[50].mxu1 }
 0x1bf   : > { %v1561_v16 = vadd.f32 %v1555_v63, %v1510_v11  ;;  %v2107_v17 = vpop.f32.mrb[47].mxu0  ;;  %v2125_v18 = vpop.f32.mrb[51].mxu1 }
 0x1c4   : > { %v1606_v19 = vpop.f32.mrb[48].mxu0 }
 0x1c5   : > { %v1612_v20 = vadd.f32 %v1606_v19, %v1561_v16  ;;  %v2118_v21 = vpop.f32.mrb[49].mxu0 }
 0x1c6   : > { %v1609_v22 = vpop.f32.mrb[50].mxu0 }
 0x1c7   : > { %v1663_v23 = vadd.f32 %v1657_v10, %v1612_v20  ;;  %v2119_v24 = vpop.f32.mrb[51].mxu0 }
 0x1cc   : > { %v1708_v25 = vpop.f32.mrb[52].mxu0 }
 0x1cd   : > { %v1714_v27 = vadd.f32 %v1708_v25, %v1663_v23  ;;  %v2130_v28 = vpop.f32.mrb[53].mxu0 }
 0x1ce   : > { %v1711_v29 = vpop.f32.mrb[54].mxu0 }
 0x1cf   : > { %v1721_v30 = vadd.f32 %v1719_v26, %v1714_v27  ;;  %v2131_v31 = vpop.f32.mrb[55].mxu0 }
 0x1d1   : > { %v1722_v32 = vmax.f32 %v1721_v30, 0.0 }
 0x1d3   : > { %v1723_v33 = vpack.c.bf16 %v1722_v32, %v1722_v32 }
 0x1d5   : > { %1725 = vst.msk [vmem:[%s331_s15] sm:$0xf] %vm1724_vm3, %v1723_v33 }
 0x1d6 PF: > { %s15_s22 = sadd.s32 1, %s2226_s22   ;;  %s2590_s18 = smov %s2218_s20 }
 0x1d7   : > { %p12_p10 = scmp.ge.s32.totalorder %s15_s22, 10   ;;  %s2591_s19 = smov %s2222_s21 }
 0x1d8   : > { %s2592_s20 = smov %s2595_s23  ;;  %s2593_s21 = smov %s2599_s24 }
 0x1d9   :  { %14 = sbr.rel (!%p12_p10) target bundleno = 3 (0x3), region = 102 }

// kernel: _lambda_.22
= control target key start
LH: loop header
LB: loop body
LE: loop exit
PB: predicated region body
PF: predicated region fallthrough
CT: control target
= control target key end

     0   :  { %s3181_s29 = smov 0   ;;  %s3183_s30 = smov 0   ;;  %s3561_s0 = inlined_call_operand.vmem [shape: bf16[2,6,8,25], index: 0, kind: input, shape index: {}, may-alias: {0,1,2}]   ;;  %s3562_s1 = inlined_call_operand.vmem [shape: bf16[2,6,8,25], index: 1, kind: input, shape index: {}, may-alias: {0,1,2}]   ;;  %s3563_s2 = inlined_call_operand.vmem [shape: bf16[2,6,8,25], index: 2, kind: input, shape index: {}, may-alias: {0,1,2}]   ;;  %s3564_s3 = inlined_call_operand.vmem [shape: bf16[2,6,8,25], index: 3, kind: input, shape index: {}, may-alias: {3,4,5}]   ;;  %s3565_s4 = inlined_call_operand.vmem [shape: bf16[2,6,8,25], index: 4, kind: input, shape index: {}, may-alias: {3,4,5}]   ;;  %s3566_s5 = inlined_call_operand.vmem [shape: bf16[2,6,8,25], index: 5, kind: input, shape index: {}, may-alias: {3,4,5}]   ;;  %s3567_s6 = inlined_call_operand.vmem [shape: bf16[2,6,8,25], index: 6, kind: input, shape index: {}, may-alias: {6,7,8}]   ;;  %s3568_s7 = inlined_call_operand.vmem [shape: bf16[2,6,8,25], index: 7, kind: input, shape index: {}, may-alias: {6,7,8}]   ;;  %s3569_s8 = inlined_call_operand.vmem [shape: bf16[2,6,8,25], index: 8, kind: input, shape index: {}, may-alias: {6,7,8}]   ;;  %s3570_s9 = inlined_call_operand.vmem [shape: bf16[2,6,8,25], index: 9, kind: input, shape index: {}, may-alias: {9,10,11}]   ;;  %s3571_s10 = inlined_call_operand.vmem [shape: bf16[2,6,8,25], index: 10, kind: input, shape index: {}, may-alias: {9,10,11}]   ;;  %s3572_s11 = inlined_call_operand.vmem [shape: bf16[2,6,8,25], index: 11, kind: input, shape index: {}, may-alias: {9,10,11}]   ;;  %s3573_s12 = inlined_call_operand.vmem [shape: bf16[27,8,8], index: 12, kind: input, shape index: {}]   ;;  %s3574_s13 = inlined_call_operand.vmem [shape: f32[8,1], index: 13, kind: input, shape index: {}]   ;;  %s3575_s14 = inlined_call_operand.vmem [shape: bf16[2,2,8,19], index: 14, kind: output, shape index: {}]  }
   0x1   :  { %s3185_s15 = smov 0   ;;  %s3187_s16 = smov 0  }
   0x2   :  { %s3189_s17 = smov 0  }
   0x3 LB: > { %3581 = sst [smem:[#allocation2_spill]] %s3090_s15  ;;  %s33_s18 = sadd.s32 1, %s3090_s15  ;;  %s3098_s17 = sphi %s3189_s17, %s24_s17   ;;  %s3094_s16 = sphi %s3187_s16, %s3591_s16   ;;  %s3090_s15 = sphi %s3185_s15, %s3590_s15   ;;  %s3086_s30 = sphi %s3183_s30, %s3589_s30   ;;  %s3082_s29 = sphi %s3181_s29, %s3588_s29  }
   0x4   : > { %3582 = sst [smem:[#allocation3_spill]] %s3094_s16  ;;  %s36_s19 = sadd.s32 1, %s3094_s16 }
   0x5   : > { %3583 = sst [smem:[#allocation4_spill]] %s3098_s17  ;;  %p34_p0 = scmp.ge.s32.totalorder %s33_s18, 2 }
   0x6   : > { %p2695_p1 = scmp.ge.s32.totalorder %s3098_s17, 1  ;;  %p676_p2 = scmp.lt.s32.totalorder %s3098_s17, 5 }
   0x7   : > { %s3593_s18 = smov (%p34_p0, %s33_s18), 0  ;;  %s3595_s19 = smov (!%p34_p0, %s36_s19), %s3094_s16 }
   0x8   : > { %3584 = sst [smem:[#allocation5_spill]] %s3593_s18  ;;  %p677_p3 = pnand %p2695_p1, %p676_p2 }
   0x9   : > { %p38_p4 = scmp.ge.s32.totalorder %s3595_s19, 2  ;;  %s2696_s20 = sshll.u32 (!%p677_p3), %s3082_s29, 1  ;;  %v3100_v0 = vmov (!%p677_p3), 0.0   ;;  %vm3101_vm0 = vmmov (!%p677_p3), 0   ;;  %vm990_vm1 = vcmask (!%p677_p3), 1043456   ;;  %vm986_vm2 = vcmask (!%p677_p3), 64512  }
   0xa   : > { %680 = sbr.rel (%p677_p3) target bundleno = 463 (0x1cf), region = 76  ;;  %p837_p5 = scmp.lt.s32.totalorder (!%p677_p3), %s3086_s30, 1  ;;  %2840 = vmatprep.subr.bf16.mxu0 (!%p677_p3), %v3100_v0  ;;  %2846 = vmatprep.subr.bf16.mxu1 (!%p677_p3), %v3100_v0  ;;  %v982_v7 = vld [vmem:[%s3573_s12] sm:$0xf] (!%p677_p3)  ;;  %v2722_v11 = vld [vmem:[%s3573_s12 + $0x4] sm:$0xf] (!%p677_p3) }
   0xb   : > { %s3597_s19 = smov (%p38_p4, %s3595_s19), 0  ;;  %p839_p6 = scmp.lt.s32.totalorder (!%p677_p3), %s2696_s20, 5  ;;  %2842 = vmatprep.mubr.msk.bf16.mxu0 (!%p677_p3), %vm3101_vm0, %v3100_v0  ;;  %2848 = vmatprep.mubr.msk.bf16.mxu1 (!%p677_p3), %vm3101_vm0, %v3100_v0  ;;  %v2728_v15 = vld [vmem:[%s3573_s12 + $0xc] sm:$0xf] (!%p677_p3)  ;;  %v2372_v25 = vld [vmem:[%s3574_s13] sm:$0xff] (!%p677_p3)  ;;  %v3105_v26 = vmov (!%p677_p3), 0  }
   0xc   : > { %3585 = sst [smem:[#allocation6_spill]] %s3597_s19  ;;  %s847_s23 = sadd.s32 (!%p677_p3), 1, %s2696_s20  ;;  %3049 = vset.pattern.permute.xlu1 (!%p677_p3), %v3105_v26  ;;  %3050 = vset.pattern.permute.xlu0 (!%p677_p3), %v3105_v26  ;;  %v2725_v31 = vld [vmem:[%s3573_s12 + $0x8] sm:$0xf] (!%p677_p3)  ;;  %v2732_v36 = vld [vmem:[%s3573_s12 + $0x14] sm:$0xf] (!%p677_p3) }
   0xd   : > { %p850_p7 = scmp.lt.s32.totalorder (!%p677_p3), %s847_s23, 5  ;;  %s859_s26 = sadd.s32 (!%p677_p3), 2, %s2696_s20  ;;  %v2730_v38 = vld [vmem:[%s3573_s12 + $0x10] sm:$0xf] (!%p677_p3)  ;;  %v2737_v40 = vld [vmem:[%s3573_s12 + $0x1c] sm:$0xf] (!%p677_p3) }
   0xe   : > { %p862_p8 = scmp.lt.s32.totalorder (!%p677_p3), %s859_s26, 5  ;;  %s3579_s17 = smov (!%p677_p3), 123   ;;  %v2735_v43 = vld [vmem:[%s3573_s12 + $0x18] sm:$0xf] (!%p677_p3)  ;;  %v2742_v46 = vld [vmem:[%s3573_s12 + $0x24] sm:$0xf] (!%p677_p3) }
   0xf   : > { %v2740_v48 = vld [vmem:[%s3573_s12 + $0x20] sm:$0xf] (!%p677_p3)  ;;  %v2746_v51 = vld [vmem:[%s3573_s12 + $0x2c] sm:$0xf] (!%p677_p3)  ;;  %v2744_v53 = vld [vmem:[%s3573_s12 + $0x28] sm:$0xf] (!%p677_p3) }
  0x10   : > { %v2751_v56 = vld [vmem:[%s3573_s12 + $0x34] sm:$0xf] (!%p677_p3)  ;;  %v2749_v59 = vld [vmem:[%s3573_s12 + $0x30] sm:$0xf] (!%p677_p3)  ;;  %v2756_v62 = vld [vmem:[%s3573_s12 + $0x3c] sm:$0xf] (!%p677_p3) }
  0x11   : > { %s3599_s30 = smov (!%p837_p5, %s3086_s30), 1  ;;  %s3601_s23 = smov (!%p850_p7, %s847_s23), 5  ;;  %vm2381_vm3 = vcmask 150528  }
  0x12   : > { %s840_s21 = scalar_select %p839_p6, %s2696_s20, 5 }
  0x13   : > { %s3223_s22 = smul.u32 6, %s3599_s30  ;;  %s3603_s26 = smov (!%p862_p8, %s859_s26), 5 }
  0x14   : > { %p974_p9 = scmp.lt.s32.totalorder %s3082_s29, 1 }
  0x15   : > { %s842_s24 = sadd.s32 %s3223_s22, %s840_s21  ;;  %s865_s27 = sadd.s32 %s3223_s22, %s3603_s26 }
  0x16   : > { %s3226_s25 = sshll.u32 %s842_s24, 2  ;;  %s3605_s29 = smov (!%p974_p9, %s3082_s29), 1 }
  0x17   : > { %s844_s19 = scalar_lea.vmem %s3561_s0, %s3226_s25  ;;  %s912_s15 = scalar_lea.vmem %s3567_s6, %s3226_s25 }
  0x18   : > { %v981_v1 = vld [vmem:[%s844_s19] sm:$0xf]  ;;  %s878_s24 = scalar_lea.vmem %s3564_s3, %s3226_s25  ;;  %s853_s19 = sadd.s32 %s3223_s22, %s3601_s23 }
  0x19   : > { %v1134_v2 = vld [vmem:[%s912_s15] sm:$0xf]  ;;  %v2726_v3 = vcombine.low %v981_v1, %v981_v1  ;;  %v1038_v5 = vsel %vm990_vm1, %v981_v1, 0  ;;  %s3102_s15 = smov 127   ;;  %s3251_s20 = sshll.u32 %s853_s19, 2 }
  0x1a   : > { %v983_v4 = vld [vmem:[%s878_s24] sm:$0xf]  ;;  %2847 = vmatpush3.bf16.msra.mxu1 %v1038_v5  ;;  %v2733_v8 = vcombine.low %v1134_v2, %v1134_v2  ;;  %v1141_v10 = vsel %vm990_vm1, %v1134_v2, 0  ;;  %s855_s21 = scalar_lea.vmem %s3562_s1, %s3251_s20  ;;  %s923_s23 = scalar_lea.vmem %s3568_s7, %s3251_s20  ;;  %v2753_v2 = vld [vmem:[%s3573_s12 + $0x38] sm:$0xf] }
  0x1b   : > { %v992_v6 = vsel %vm990_vm1, %v983_v4, 0  ;;  %1085 = vrot.lane.b32.xlu0 %v2726_v3, %s3102_s15  ;;  %1290 = vrot.lane.b32.xlu1 %v2726_v3, %s3579_s17  ;;  %v2738_v9 = vcombine.low %v983_v4, %v983_v4  ;;  %v3267_v12 = vld [vmem:[%s855_s21] sm:$0xf]  ;;  %s3586_s19 = smov 123   ;;  %s889_s21 = scalar_lea.vmem %s3565_s4, %s3251_s20  ;;  %v2761_v4 = vld [vmem:[%s3573_s12 + $0x44] sm:$0xf] }
  0x1c   : > { %2841 = vmatpush3.bf16.msra.mxu0 %v992_v6  ;;  %2858 = vmatprep.subr.bf16.mxu1 %v3100_v0  ;;  %v2747_v13 = vcombine.low %v3267_v12, %v3267_v12  ;;  %v3277_v14 = vld [vmem:[%s923_s23] sm:$0xf]  ;;  %s3287_s24 = sshll.u32 %s865_s27, 2  ;;  %s3104_s22 = smov 122   ;;  %v1451_v42 = vsel %vm990_vm1, %v3267_v12, 0 }
  0x1d   : > { %2849 = vmatmul.mubr.msk.bf16.vlgmr.msra.gmra.mrb[0].mxu1 %vm986_vm2, %v982_v7  ;;  %2852 = vmatprep.subr.bf16.mxu0 %v3100_v0  ;;  %v2754_v16 = vcombine.low %v3277_v14, %v3277_v14  ;;  %v3295_v17 = vld [vmem:[%s889_s21] sm:$0xf]  ;;  %s867_s27 = scalar_lea.vmem %s3563_s2, %s3287_s24  ;;  %s935_s16 = scalar_lea.vmem %s3569_s8, %s3287_s24  ;;  %v1605_v54 = vsel %vm990_vm1, %v3277_v14, 0  ;;  %v2770_v14 = vld [vmem:[%s3573_s12 + $0x54] sm:$0xf] }
  0x1e   : > { %2859 = vmatpush3.bf16.msra.mxu1 %v1141_v10  ;;  %2860 = vmatprep.mubr.msk.bf16.mxu1 %vm3101_vm0, %v3100_v0  ;;  %v2759_v18 = vcombine.low %v3295_v17, %v3295_v17  ;;  %v3312_v19 = vld [vmem:[%s867_s27] sm:$0xf]  ;;  %s901_s26 = scalar_lea.vmem %s3566_s5, %s3287_s24  ;;  %s957_s21 = scalar_lea.vmem %s3571_s10, %s3251_s20  ;;  %v1501_v49 = vsel %vm990_vm1, %v3295_v17, 0  ;;  %v2767_v17 = vld [vmem:[%s3573_s12 + $0x50] sm:$0xf] }
  0x1f   : > { %1239 = vrot.lane.b32.xlu0 %v2733_v8, %s3102_s15  ;;  %1344 = vrot.lane.b32.xlu1 %v2738_v9, %s3586_s19  ;;  %v3314_v20 = vld [vmem:[%s935_s16] sm:$0xf]  ;;  %v2768_v21 = vcombine.low %v3312_v19, %v3312_v19  ;;  %v1915_v7 = vsel %vm990_vm1, %v3312_v19, 0  ;;  %v2765_v8 = vld [vmem:[%s3573_s12 + $0x4c] sm:$0xf] }
  0x20   : > { %2843 = vmatmul.mubr.msk.bf16.vlgmr.msra.gmra.mrb[0].mxu0 %vm986_vm2, %v2722_v11  ;;  %2870 = vmatprep.subr.bf16.mxu1 %v3100_v0  ;;  %v2775_v22 = vcombine.low %v3314_v20, %v3314_v20  ;;  %v3325_v23 = vld [vmem:[%s901_s26] sm:$0xf]  ;;  %v2069_v10 = vsel %vm990_vm1, %v3314_v20, 0  ;;  %v2763_v11 = vld [vmem:[%s3573_s12 + $0x48] sm:$0xf] }
  0x21   : > { %2854 = vmatprep.mubr.msk.bf16.mxu0 %vm3101_vm0, %v3100_v0  ;;  %v2780_v24 = vcombine.low %v3325_v23, %v3325_v23  ;;  %v1648_v50 = vld [vmem:[%s957_s21] sm:$0xf]  ;;  %v1965_v5 = vsel %vm990_vm1, %v3325_v23, 0  ;;  %v2774_v20 = vld [vmem:[%s3573_s12 + $0x5c] sm:$0xf] }
  0x22   : > { %v1655_v52 = vsel %vm990_vm1, %v1648_v50, 0  ;;  %v2758_v6 = vld [vmem:[%s3573_s12 + $0x40] sm:$0xf]  ;;  %v2772_v23 = vld [vmem:[%s3573_s12 + $0x58] sm:$0xf] }
  0x23   : > { %1395 = vrot.lane.b32.xlu0 %v2726_v3, %s3104_s22  ;;  %1549 = vrot.lane.b32.xlu1 %v2747_v13, %s3102_s15 }
  0x25   : > { %2861 = vmatmul.mubr.msk.bf16.vlgmr.msra.gmra.mrb[4].mxu1 %vm986_vm2, %v2728_v15 }
  0x26   : > { %2872 = vmatprep.mubr.msk.bf16.mxu1 %vm3101_vm0, %v3100_v0 }
  0x27   : > { %1703 = vrot.lane.b32.xlu0 %v2754_v16, %s3102_s15  ;;  %1754 = vrot.lane.b32.xlu1 %v2747_v13, %s3586_s19 }
  0x2b   : > { %1808 = vrot.lane.b32.xlu0 %v2759_v18, %s3586_s19  ;;  %1859 = vrot.lane.b32.xlu1 %v2747_v13, %s3104_s22 }
  0x2f   : > { %2013 = vrot.lane.b32.xlu0 %v2768_v21, %s3102_s15  ;;  %2167 = vrot.lane.b32.xlu1 %v2775_v22, %s3102_s15  ;;  %s946_s15 = scalar_lea.vmem %s3570_s9, %s3226_s25  ;;  %s2720_s25 = sshll.u32 %s3599_s30, 1 }
  0x30   : > { %v1184_v28 = vld [vmem:[%s946_s15] sm:$0xf]  ;;  %s977_s16 = sadd.s32 %s2720_s25, %s3605_s29 }
  0x31   : > { %v1191_v32 = vsel %vm990_vm1, %v1184_v28, 0  ;;  %s2721_s21 = sshll.u32 %s977_s16, 2 }
  0x32   : > { %s979_s26 = scalar_lea.vmem %s3575_s14, %s2721_s21 }
  0x33   : > { %2218 = vrot.lane.b32.xlu0 %v2768_v21, %s3586_s19  ;;  %2272 = vrot.lane.b32.xlu1 %v2780_v24, %s3586_s19 }
  0x37   : > { %2323 = vrot.lane.b32.xlu0 %v2768_v21, %s3104_s22  ;;  %2375 = vperm.xlu1 %3049, %v2372_v25   ;;  %s969_s22 = scalar_lea.vmem %s3572_s11, %s3287_s24  ;;  %v2779_v25 = vld [vmem:[%s3573_s12 + $0x64] sm:$0xf] }
  0x38   : > { %v2112_v16 = vld [vmem:[%s969_s22] sm:$0xf] }
  0x39   : > { %v2119_v18 = vsel %vm990_vm1, %v2112_v16, 0 }
  0x8d   : > { %v1086_v27 = vpop.permute.xlu0 %1085  ;;  %v1291_v29 = vpop.permute.xlu1 %1290 }
  0x8e   : > { %v1091_v30 = vsel %vm990_vm1, %v1086_v27, 0  ;;  %v1296_v39 = vsel %vm990_vm1, %v1291_v29, 0  ;;  %v2777_v27 = vld [vmem:[%s3573_s12 + $0x60] sm:$0xf]  ;;  %v2782_v29 = vld [vmem:[%s3573_s12 + $0x68] sm:$0xf] }
  0x8f   : > { %2853 = vmatpush3.bf16.msra.mxu0 %v1091_v30 }
  0x90   : > { %2864 = vmatprep.subr.bf16.mxu0 %v3100_v0 }
  0x91   : > { %v1240_v33 = vpop.permute.xlu0 %1239  ;;  %v1345_v35 = vpop.permute.xlu1 %1344 }
  0x92   : > { %2855 = vmatmul.mubr.msk.bf16.vlgmr.msra.gmra.mrb[4].mxu0 %vm986_vm2, %v2725_v31  ;;  %v1245_v34 = vsel %vm990_vm1, %v1240_v33, 0  ;;  %v1350_v37 = vsel %vm990_vm1, %v1345_v35, 0 }
  0x93   : > { %2865 = vmatpush3.bf16.msra.mxu0 %v1191_v32  ;;  %2866 = vmatprep.mubr.msk.bf16.mxu0 %vm3101_vm0, %v3100_v0 }
  0x94   : > { %2871 = vmatpush3.bf16.msra.mxu1 %v1245_v34  ;;  %2876 = vmatprep.subr.bf16.mxu0 %v3100_v0 }
  0x95   : > { %2882 = vmatprep.subr.bf16.mxu1 %v3100_v0  ;;  %v1396_v41 = vpop.permute.xlu0 %1395  ;;  %v1550_v45 = vpop.permute.xlu1 %1549 }
  0x96   : > { %v1401_v44 = vsel %vm990_vm1, %v1396_v41, 0  ;;  %v1555_v47 = vsel %vm990_vm1, %v1550_v45, 0 }
  0x97   : > { %2873 = vmatmul.mubr.msk.bf16.vlgmr.msra.gmra.mrb[8].mxu1 %vm986_vm2, %v2732_v36 }
  0x98   : > { %2883 = vmatpush3.bf16.msra.mxu1 %v1350_v37  ;;  %2884 = vmatprep.mubr.msk.bf16.mxu1 %vm3101_vm0, %v3100_v0 }
  0x99   : > { %2894 = vmatprep.subr.bf16.mxu1 %v3100_v0  ;;  %v1755_v55 = vpop.permute.xlu1 %1754  ;;  %v1704_v57 = vpop.permute.xlu0 %1703 }
  0x9a   : > { %2867 = vmatmul.mubr.msk.bf16.vlgmr.msra.gmra.mrb[8].mxu0 %vm986_vm2, %v2730_v38  ;;  %v1760_v58 = vsel %vm990_vm1, %v1755_v55, 0  ;;  %v1709_v60 = vsel %vm990_vm1, %v1704_v57, 0 }
  0x9b   : > { %2877 = vmatpush3.bf16.msra.mxu0 %v1296_v39  ;;  %2878 = vmatprep.mubr.msk.bf16.mxu0 %vm3101_vm0, %v3100_v0 }
  0x9c   : > { %2888 = vmatprep.subr.bf16.mxu0 %v3100_v0 }
  0x9d   : > { %v1860_v61 = vpop.permute.xlu1 %1859  ;;  %v1809_v63 = vpop.permute.xlu0 %1808 }
  0x9e   : > { %v1865_v1 = vsel %vm990_vm1, %v1860_v61, 0  ;;  %v1814_v3 = vsel %vm990_vm1, %v1809_v63, 0 }
  0x9f   : > { %2885 = vmatmul.mubr.msk.bf16.vlgmr.msra.gmra.mrb[12].mxu1 %vm986_vm2, %v2737_v40 }
  0xa0   : > { %2895 = vmatpush3.bf16.msra.mxu1 %v1451_v42  ;;  %2896 = vmatprep.mubr.msk.bf16.mxu1 %vm3101_vm0, %v3100_v0 }
  0xa1   : > { %2906 = vmatprep.subr.bf16.mxu1 %v3100_v0  ;;  %v2014_v9 = vpop.permute.xlu0 %2013  ;;  %v2168_v13 = vpop.permute.xlu1 %2167 }
  0xa2   : > { %2879 = vmatmul.mubr.msk.bf16.vlgmr.msra.gmra.mrb[12].mxu0 %vm986_vm2, %v2735_v43  ;;  %v2019_v12 = vsel %vm990_vm1, %v2014_v9, 0  ;;  %v2173_v15 = vsel %vm990_vm1, %v2168_v13, 0 }
  0xa3   : > { %2889 = vmatpush3.bf16.msra.mxu0 %v1401_v44  ;;  %2890 = vmatprep.mubr.msk.bf16.mxu0 %vm3101_vm0, %v3100_v0 }
  0xa4   : > { %2900 = vmatprep.subr.bf16.mxu0 %v3100_v0 }
  0xa5   : > { %v2273_v19 = vpop.permute.xlu1 %2272  ;;  %v2219_v21 = vpop.permute.xlu0 %2218 }
  0xa6   : > { %v2278_v22 = vsel %vm990_vm1, %v2273_v19, 0  ;;  %v2224_v24 = vsel %vm990_vm1, %v2219_v21, 0 }
  0xa7   : > { %2897 = vmatmul.mubr.msk.bf16.vlgmr.msra.gmra.mrb[16].mxu1 %vm986_vm2, %v2742_v46 }
  0xa8   : > { %2907 = vmatpush3.bf16.msra.mxu1 %v1555_v47  ;;  %2908 = vmatprep.mubr.msk.bf16.mxu1 %vm3101_vm0, %v3100_v0 }
  0xa9   : > { %2918 = vmatprep.subr.bf16.mxu1 %v3100_v0  ;;  %v2324_v26 = vpop.permute.xlu0 %2323 }
  0xaa   : > { %2891 = vmatmul.mubr.msk.bf16.vlgmr.msra.gmra.mrb[16].mxu0 %vm986_vm2, %v2740_v48  ;;  %v2329_v28 = vsel %vm990_vm1, %v2324_v26, 0 }
  0xab   : > { %2901 = vmatpush3.bf16.msra.mxu0 %v1501_v49  ;;  %2902 = vmatprep.mubr.msk.bf16.mxu0 %vm3101_vm0, %v3100_v0 }
  0xac   : > { %2912 = vmatprep.subr.bf16.mxu0 %v3100_v0 }
  0xaf   : > { %2909 = vmatmul.mubr.msk.bf16.vlgmr.msra.gmra.mrb[20].mxu1 %vm986_vm2, %v2746_v51 }
  0xb0   : > { %2919 = vmatpush3.bf16.msra.mxu1 %v1655_v52  ;;  %2920 = vmatprep.mubr.msk.bf16.mxu1 %vm3101_vm0, %v3100_v0 }
  0xb1   : > { %2930 = vmatprep.subr.bf16.mxu1 %v3100_v0 }
  0xb2   : > { %2903 = vmatmul.mubr.msk.bf16.vlgmr.msra.gmra.mrb[20].mxu0 %vm986_vm2, %v2744_v53 }
  0xb3   : > { %2913 = vmatpush3.bf16.msra.mxu0 %v1605_v54  ;;  %2914 = vmatprep.mubr.msk.bf16.mxu0 %vm3101_vm0, %v3100_v0 }
  0xb4   : > { %2924 = vmatprep.subr.bf16.mxu0 %v3100_v0 }
  0xb7   : > { %2921 = vmatmul.mubr.msk.bf16.vlgmr.msra.gmra.mrb[24].mxu1 %vm986_vm2, %v2751_v56 }
  0xb8   : > { %2931 = vmatpush3.bf16.msra.mxu1 %v1760_v58  ;;  %2932 = vmatprep.mubr.msk.bf16.mxu1 %vm3101_vm0, %v3100_v0 }
  0xb9   : > { %2942 = vmatprep.subr.bf16.mxu1 %v3100_v0 }
  0xba   : > { %2915 = vmatmul.mubr.msk.bf16.vlgmr.msra.gmra.mrb[24].mxu0 %vm986_vm2, %v2749_v59 }
  0xbb   : > { %2925 = vmatpush3.bf16.msra.mxu0 %v1709_v60  ;;  %2926 = vmatprep.mubr.msk.bf16.mxu0 %vm3101_vm0, %v3100_v0 }
  0xbc   : > { %2936 = vmatprep.subr.bf16.mxu0 %v3100_v0 }
  0xbf   : > { %2933 = vmatmul.mubr.msk.bf16.vlgmr.msra.gmra.mrb[28].mxu1 %vm986_vm2, %v2756_v62 }
  0xc0   : > { %2943 = vmatpush3.bf16.msra.mxu1 %v1865_v1  ;;  %2944 = vmatprep.mubr.msk.bf16.mxu1 %vm3101_vm0, %v3100_v0 }
  0xc1   : > { %2954 = vmatprep.subr.bf16.mxu1 %v3100_v0 }
  0xc2   : > { %2927 = vmatmul.mubr.msk.bf16.vlgmr.msra.gmra.mrb[28].mxu0 %vm986_vm2, %v2753_v2 }
  0xc3   : > { %2937 = vmatpush3.bf16.msra.mxu0 %v1814_v3  ;;  %2938 = vmatprep.mubr.msk.bf16.mxu0 %vm3101_vm0, %v3100_v0 }
  0xc4   : > { %2948 = vmatprep.subr.bf16.mxu0 %v3100_v0 }
  0xc7   : > { %2945 = vmatmul.mubr.msk.bf16.vlgmr.msra.gmra.mrb[32].mxu1 %vm986_vm2, %v2761_v4 }
  0xc8   : > { %2955 = vmatpush3.bf16.msra.mxu1 %v1965_v5  ;;  %2956 = vmatprep.mubr.msk.bf16.mxu1 %vm3101_vm0, %v3100_v0 }
  0xc9   : > { %2966 = vmatprep.subr.bf16.mxu1 %v3100_v0 }
  0xca   : > { %2939 = vmatmul.mubr.msk.bf16.vlgmr.msra.gmra.mrb[32].mxu0 %vm986_vm2, %v2758_v6 }
  0xcb   : > { %2949 = vmatpush3.bf16.msra.mxu0 %v1915_v7  ;;  %2950 = vmatprep.mubr.msk.bf16.mxu0 %vm3101_vm0, %v3100_v0 }
  0xcc   : > { %2960 = vmatprep.subr.bf16.mxu0 %v3100_v0 }
  0xcf   : > { %2957 = vmatmul.mubr.msk.bf16.vlgmr.msra.gmra.mrb[36].mxu1 %vm986_vm2, %v2765_v8 }
  0xd0   : > { %2967 = vmatpush3.bf16.msra.mxu1 %v2069_v10  ;;  %2968 = vmatprep.mubr.msk.bf16.mxu1 %vm3101_vm0, %v3100_v0 }
  0xd1   : > { %2978 = vmatprep.subr.bf16.mxu1 %v3100_v0 }
  0xd2   : > { %2951 = vmatmul.mubr.msk.bf16.vlgmr.msra.gmra.mrb[36].mxu0 %vm986_vm2, %v2763_v11 }
  0xd3   : > { %2961 = vmatpush3.bf16.msra.mxu0 %v2019_v12  ;;  %2962 = vmatprep.mubr.msk.bf16.mxu0 %vm3101_vm0, %v3100_v0 }
  0xd4   : > { %2972 = vmatprep.subr.bf16.mxu0 %v3100_v0 }
  0xd7   : > { %2969 = vmatmul.mubr.msk.bf16.vlgmr.msra.gmra.mrb[40].mxu1 %vm986_vm2, %v2770_v14 }
  0xd8   : > { %2979 = vmatpush3.bf16.msra.mxu1 %v2173_v15  ;;  %2980 = vmatprep.mubr.msk.bf16.mxu1 %vm3101_vm0, %v3100_v0 }
  0xd9   : > { %2990 = vmatprep.subr.bf16.mxu1 %v3100_v0 }
  0xda   : > { %2963 = vmatmul.mubr.msk.bf16.vlgmr.msra.gmra.mrb[40].mxu0 %vm986_vm2, %v2767_v17 }
  0xdb   : > { %2973 = vmatpush3.bf16.msra.mxu0 %v2119_v18  ;;  %2974 = vmatprep.mubr.msk.bf16.mxu0 %vm3101_vm0, %v3100_v0 }
  0xdc   : > { %2984 = vmatprep.subr.bf16.mxu0 %v3100_v0 }
  0xdf   : > { %2981 = vmatmul.mubr.msk.bf16.vlgmr.msra.gmra.mrb[44].mxu1 %vm986_vm2, %v2774_v20 }
  0xe0   : > { %2991 = vmatpush3.bf16.msra.mxu1 %v2278_v22  ;;  %2992 = vmatprep.mubr.msk.bf16.mxu1 %vm3101_vm0, %v3100_v0 }
  0xe2   : > { %2975 = vmatmul.mubr.msk.bf16.vlgmr.msra.gmra.mrb[44].mxu0 %vm986_vm2, %v2772_v23 }
  0xe3   : > { %2985 = vmatpush3.bf16.msra.mxu0 %v2224_v24  ;;  %2986 = vmatprep.mubr.msk.bf16.mxu0 %vm3101_vm0, %v3100_v0 }
  0xe4   : > { %2996 = vmatprep.subr.bf16.mxu0 %v3100_v0 }
  0xe7   : > { %2993 = vmatmul.mubr.msk.bf16.vlgmr.msra.gmra.mrb[48].mxu1 %vm986_vm2, %v2779_v25 }
  0xea   : > { %2987 = vmatmul.mubr.msk.bf16.vlgmr.msra.gmra.mrb[48].mxu0 %vm986_vm2, %v2777_v27 }
  0xeb   : > { %2997 = vmatpush3.bf16.msra.mxu0 %v2329_v28  ;;  %2998 = vmatprep.mubr.msk.bf16.mxu0 %vm3101_vm0, %v3100_v0 }
  0xf0   : > { %v1074_v30 = vpop.f32.mrb[0].mxu1 }
  0xf1   : > { %v2850_v31 = vpop.f32.mrb[1].mxu1 }
  0xf2   : > { %2999 = vmatmul.mubr.msk.bf16.vlgmr.msra.gmra.mrb[52].mxu0 %vm986_vm2, %v2782_v29  ;;  %v1077_v32 = vpop.f32.mrb[2].mxu1 }
  0xf3   : > { %v1028_v33 = vpop.f32.mrb[0].mxu0  ;;  %v2851_v34 = vpop.f32.mrb[3].mxu1 }
  0xf4   : > { %v2844_v35 = vpop.f32.mrb[1].mxu0  ;;  %v1075_v36 = vadd.f32 %v1074_v30, %v1028_v33 }
  0xf5   : > { %v1031_v37 = vpop.f32.mrb[2].mxu0 }
  0xf6   : > { %v2845_v38 = vpop.f32.mrb[3].mxu0 }
  0xf8   : > { %v1177_v39 = vpop.f32.mrb[4].mxu1 }
  0xf9   : > { %v2862_v40 = vpop.f32.mrb[5].mxu1 }
  0xfa   : > { %v1180_v41 = vpop.f32.mrb[6].mxu1 }
  0xfb   : > { %v2863_v42 = vpop.f32.mrb[7].mxu1 }
 0x165   : > { %v1127_v0 = vpop.f32.mrb[4].mxu0 }
 0x166   : > { %v1133_v43 = vadd.f32 %v1127_v0, %v1075_v36  ;;  %v2856_v44 = vpop.f32.mrb[5].mxu0 }
 0x167   : > { %v1130_v45 = vpop.f32.mrb[6].mxu0 }
 0x168   : > { %v1183_v46 = vadd.f32 %v1177_v39, %v1133_v43  ;;  %v2857_v47 = vpop.f32.mrb[7].mxu0 }
 0x16a   : > { %v1281_v48 = vpop.f32.mrb[8].mxu1 }
 0x16b   : > { %v2874_v49 = vpop.f32.mrb[9].mxu1 }
 0x16c   : > { %v1284_v50 = vpop.f32.mrb[10].mxu1 }
 0x16d   : > { %v1227_v51 = vpop.f32.mrb[8].mxu0  ;;  %v2875_v52 = vpop.f32.mrb[11].mxu1 }
 0x16e   : > { %v1233_v53 = vadd.f32 %v1227_v51, %v1183_v46  ;;  %v2868_v54 = vpop.f32.mrb[9].mxu0 }
 0x16f   : > { %v1230_v55 = vpop.f32.mrb[10].mxu0 }
 0x170   : > { %v1287_v56 = vadd.f32 %v1281_v48, %v1233_v53  ;;  %v2869_v57 = vpop.f32.mrb[11].mxu0 }
 0x172   : > { %v1386_v58 = vpop.f32.mrb[12].mxu1 }
 0x173   : > { %v2886_v59 = vpop.f32.mrb[13].mxu1 }
 0x174   : > { %v1389_v60 = vpop.f32.mrb[14].mxu1 }
 0x175   : > { %v1332_v61 = vpop.f32.mrb[12].mxu0  ;;  %v2887_v62 = vpop.f32.mrb[15].mxu1 }
 0x176   : > { %v1338_v63 = vadd.f32 %v1332_v61, %v1287_v56  ;;  %v2880_v1 = vpop.f32.mrb[13].mxu0 }
 0x177   : > { %v1335_v2 = vpop.f32.mrb[14].mxu0 }
 0x178   : > { %v1392_v3 = vadd.f32 %v1386_v58, %v1338_v63  ;;  %v2881_v4 = vpop.f32.mrb[15].mxu0 }
 0x17a   : > { %v1487_v5 = vpop.f32.mrb[16].mxu1 }
 0x17b   : > { %v2898_v6 = vpop.f32.mrb[17].mxu1 }
 0x17c   : > { %v1490_v7 = vpop.f32.mrb[18].mxu1 }
 0x17d   : > { %v1437_v8 = vpop.f32.mrb[16].mxu0  ;;  %v2899_v9 = vpop.f32.mrb[19].mxu1 }
 0x17e   : > { %v1443_v10 = vadd.f32 %v1437_v8, %v1392_v3  ;;  %v2892_v11 = vpop.f32.mrb[17].mxu0 }
 0x17f   : > { %v1440_v12 = vpop.f32.mrb[18].mxu0 }
 0x180   : > { %v1493_v13 = vadd.f32 %v1487_v5, %v1443_v10  ;;  %v2893_v14 = vpop.f32.mrb[19].mxu0 }
 0x182   : > { %v1591_v15 = vpop.f32.mrb[20].mxu1 }
 0x183   : > { %v2910_v16 = vpop.f32.mrb[21].mxu1 }
 0x184   : > { %v1594_v17 = vpop.f32.mrb[22].mxu1 }
 0x185   : > { %v1537_v18 = vpop.f32.mrb[20].mxu0  ;;  %v2911_v19 = vpop.f32.mrb[23].mxu1 }
 0x186   : > { %v1543_v20 = vadd.f32 %v1537_v18, %v1493_v13  ;;  %v2904_v21 = vpop.f32.mrb[21].mxu0 }
 0x187   : > { %v1540_v22 = vpop.f32.mrb[22].mxu0 }
 0x188   : > { %v1597_v23 = vadd.f32 %v1591_v15, %v1543_v20  ;;  %v2905_v24 = vpop.f32.mrb[23].mxu0 }
 0x18a   : > { %v1691_v25 = vpop.f32.mrb[24].mxu1 }
 0x18b   : > { %v2922_v26 = vpop.f32.mrb[25].mxu1 }
 0x18c   : > { %v1694_v27 = vpop.f32.mrb[26].mxu1 }
 0x18d   : > { %v1641_v28 = vpop.f32.mrb[24].mxu0  ;;  %v2923_v29 = vpop.f32.mrb[27].mxu1 }
 0x18e   : > { %v1647_v30 = vadd.f32 %v1641_v28, %v1597_v23  ;;  %v2916_v31 = vpop.f32.mrb[25].mxu0 }
 0x18f   : > { %v1644_v32 = vpop.f32.mrb[26].mxu0 }
 0x190   : > { %v1697_v33 = vadd.f32 %v1691_v25, %v1647_v30  ;;  %v2917_v34 = vpop.f32.mrb[27].mxu0  ;;  %v2376_v32 = vpop.permute.xlu1 %2375 }
 0x192   : > { %v1796_v35 = vpop.f32.mrb[28].mxu1 }
 0x193   : > { %v2934_v36 = vpop.f32.mrb[29].mxu1 }
 0x194   : > { %v1799_v37 = vpop.f32.mrb[30].mxu1 }
 0x195   : > { %v1745_v38 = vpop.f32.mrb[28].mxu0  ;;  %v2935_v39 = vpop.f32.mrb[31].mxu1 }
 0x196   : > { %v1751_v40 = vadd.f32 %v1745_v38, %v1697_v33  ;;  %v2928_v41 = vpop.f32.mrb[29].mxu0 }
 0x197   : > { %v1748_v42 = vpop.f32.mrb[30].mxu0 }
 0x198   : > { %v1802_v0 = vadd.f32 %v1796_v35, %v1751_v40  ;;  %v2929_v43 = vpop.f32.mrb[31].mxu0 }
 0x19a   : > { %v1901_v44 = vpop.f32.mrb[32].mxu1 }
 0x19b   : > { %v2946_v45 = vpop.f32.mrb[33].mxu1 }
 0x19c   : > { %v1904_v46 = vpop.f32.mrb[34].mxu1 }
 0x19d   : > { %v1850_v47 = vpop.f32.mrb[32].mxu0  ;;  %v2947_v48 = vpop.f32.mrb[35].mxu1 }
 0x19e   : > { %v1856_v49 = vadd.f32 %v1850_v47, %v1802_v0  ;;  %v2940_v50 = vpop.f32.mrb[33].mxu0 }
 0x19f   : > { %v1853_v51 = vpop.f32.mrb[34].mxu0 }
 0x1a0   : > { %v1907_v52 = vadd.f32 %v1901_v44, %v1856_v49  ;;  %v2941_v53 = vpop.f32.mrb[35].mxu0 }
 0x1a2   : > { %v2001_v54 = vpop.f32.mrb[36].mxu1 }
 0x1a3   : > { %v2958_v55 = vpop.f32.mrb[37].mxu1 }
 0x1a4   : > { %v2004_v56 = vpop.f32.mrb[38].mxu1 }
 0x1a5   : > { %v1951_v57 = vpop.f32.mrb[36].mxu0  ;;  %v2959_v58 = vpop.f32.mrb[39].mxu1 }
 0x1a6   : > { %v1957_v59 = vadd.f32 %v1951_v57, %v1907_v52  ;;  %v2952_v60 = vpop.f32.mrb[37].mxu0 }
 0x1a7   : > { %v1954_v61 = vpop.f32.mrb[38].mxu0 }
 0x1a8   : > { %v2007_v62 = vadd.f32 %v2001_v54, %v1957_v59  ;;  %v2953_v63 = vpop.f32.mrb[39].mxu0 }
 0x1aa   : > { %v2105_v1 = vpop.f32.mrb[40].mxu1 }
 0x1ab   : > { %v2970_v2 = vpop.f32.mrb[41].mxu1 }
 0x1ac   : > { %v2108_v3 = vpop.f32.mrb[42].mxu1 }
 0x1ad   : > { %v2055_v4 = vpop.f32.mrb[40].mxu0  ;;  %v2971_v5 = vpop.f32.mrb[43].mxu1 }
 0x1ae   : > { %v2061_v6 = vadd.f32 %v2055_v4, %v2007_v62  ;;  %v2964_v7 = vpop.f32.mrb[41].mxu0 }
 0x1af   : > { %v2058_v8 = vpop.f32.mrb[42].mxu0 }
 0x1b0   : > { %v2111_v9 = vadd.f32 %v2105_v1, %v2061_v6  ;;  %v2965_v10 = vpop.f32.mrb[43].mxu0 }
 0x1b2   : > { %v2209_v11 = vpop.f32.mrb[44].mxu1 }
 0x1b3   : > { %v2982_v12 = vpop.f32.mrb[45].mxu1 }
 0x1b4   : > { %v2212_v13 = vpop.f32.mrb[46].mxu1 }
 0x1b5   : > { %v2155_v14 = vpop.f32.mrb[44].mxu0  ;;  %v2983_v15 = vpop.f32.mrb[47].mxu1 }
 0x1b6   : > { %v2161_v16 = vadd.f32 %v2155_v14, %v2111_v9  ;;  %v2976_v17 = vpop.f32.mrb[45].mxu0 }
 0x1b7   : > { %v2158_v18 = vpop.f32.mrb[46].mxu0 }
 0x1b8   : > { %v2215_v19 = vadd.f32 %v2209_v11, %v2161_v16  ;;  %v2977_v20 = vpop.f32.mrb[47].mxu0 }
 0x1ba   : > { %v2314_v21 = vpop.f32.mrb[48].mxu1 }
 0x1bb   : > { %v2994_v22 = vpop.f32.mrb[49].mxu1 }
 0x1bc   : > { %v2317_v23 = vpop.f32.mrb[50].mxu1 }
 0x1bd   : > { %v2260_v24 = vpop.f32.mrb[48].mxu0  ;;  %v2995_v25 = vpop.f32.mrb[51].mxu1 }
 0x1be   : > { %v2266_v26 = vadd.f32 %v2260_v24, %v2215_v19  ;;  %v2988_v27 = vpop.f32.mrb[49].mxu0 }
 0x1bf   : > { %v2263_v28 = vpop.f32.mrb[50].mxu0 }
 0x1c0   : > { %v2320_v29 = vadd.f32 %v2314_v21, %v2266_v26  ;;  %v2989_v30 = vpop.f32.mrb[51].mxu0 }
 0x1c5   : > { %v2365_v31 = vpop.f32.mrb[52].mxu0 }
 0x1c6   : > { %v2371_v33 = vadd.f32 %v2365_v31, %v2320_v29  ;;  %v3000_v34 = vpop.f32.mrb[53].mxu0 }
 0x1c7   : > { %v2368_v35 = vpop.f32.mrb[54].mxu0 }
 0x1c8   : > { %v2378_v36 = vadd.f32 %v2376_v32, %v2371_v33  ;;  %v3001_v37 = vpop.f32.mrb[55].mxu0 }
 0x1ca   : > { %v2379_v38 = vmax.f32 %v2378_v36, 0.0 }
 0x1cc   : > { %v2380_v39 = vpack.c.bf16 %v2379_v38, %v2379_v38 }
 0x1ce   : > { %2382 = vst.msk [vmem:[%s979_s26] sm:$0xf] %vm2381_vm3, %v2380_v39 }
 0x1cf PF: > { %s3587_s20 = sld [smem:[#allocation4_spill]]  ;;  %s3588_s29 = sld [smem:[#allocation2_spill]] }
 0x1d0   : > { %s3589_s30 = sld [smem:[#allocation3_spill]]  ;;  %s3590_s15 = sld [smem:[#allocation5_spill]] }
 0x1d1   : > { %s3591_s16 = sld [smem:[#allocation6_spill]] }
 0x1d5   : > { %s24_s17 = sadd.s32 1, %s3587_s20  }
 0x1d6   : > { %p21_p10 = scmp.ge.s32.totalorder %s24_s17, 6  }
 0x1d8   :  { %23 = sbr.rel (!%p21_p10) target bundleno = 3 (0x3), region = 165 }

// kernel: _lambda_.24
= control target key start
LH: loop header
LB: loop body
LE: loop exit
PB: predicated region body
PF: predicated region fallthrough
CT: control target
= control target key end

     0   :  { %s475_s12 = smov 0   ;;  %s477_s13 = smov 0   ;;  %s532_s0 = inlined_call_operand.vmem [shape: bf16[2,2,8,16], index: 0, kind: input, shape index: {}]   ;;  %s533_s1 = inlined_call_operand.vmem [shape: bf16[1,8,8], index: 1, kind: input, shape index: {}]   ;;  %s534_s2 = inlined_call_operand.vmem [shape: f32[8,1], index: 2, kind: input, shape index: {}]   ;;  %s535_s3 = inlined_call_operand.vmem [shape: bf16[2,2,8,16], index: 3, kind: output, shape index: {}]  }
   0x1   :  { %s479_s14 = smov 0   ;;  %s481_s15 = smov 0  }
   0x2   :  { %s483_s16 = smov 0  }
   0x3 LB: > { %s22_s17 = sadd.s32 1, %s442_s14  ;;  %s25_s18 = sadd.s32 1, %s446_s15  ;;  %s450_s16 = sphi %s483_s16, %s13_s16   ;;  %s446_s15 = sphi %s481_s15, %s539_s15   ;;  %s442_s14 = sphi %s479_s14, %s538_s14   ;;  %s438_s13 = sphi %s477_s13, %s537_s13   ;;  %s434_s12 = sphi %s475_s12, %s536_s12  }
   0x4   : > { %p23_p0 = scmp.ge.s32.totalorder %s22_s17, 2  ;;  %p352_p1 = scmp.ge.s32.totalorder %s450_s16, 1 }
   0x5   : > { %p156_p2 = scmp.lt.s32.totalorder %s450_s16, 5 }
   0x6   : > { %s541_s17 = smov (%p23_p0, %s22_s17), 0  ;;  %s543_s18 = smov (!%p23_p0, %s25_s18), %s446_s15 }
   0x7   : > { %p157_p3 = pnand %p352_p1, %p156_p2  ;;  %p27_p4 = scmp.ge.s32.totalorder %s543_s18, 2 }
   0x8   : > { %p186_p5 = scmp.lt.s32.totalorder (!%p157_p3), %s438_s13, 1  ;;  %p188_p6 = scmp.lt.s32.totalorder (!%p157_p3), %s434_s12, 1  ;;  %v452_v0 = vmov (!%p157_p3), 0.0   ;;  %vm453_vm0 = vmmov (!%p157_p3), 0   ;;  %v205_v1 = vld [vmem:[%s534_s2] sm:$0xff] (!%p157_p3)  ;;  %v454_v2 = vmov (!%p157_p3), 0  }
   0x9   : > { %s545_s18 = smov (%p27_p4, %s543_s18), 0  ;;  %160 = sbr.rel (%p157_p3) target bundleno = 243 (0xf3), region = 32 }
   0xa   : > { %362 = vmatprep.subr.bf16.mxu0 (!%p157_p3), %v452_v0  ;;  %364 = vmatprep.mubr.msk.bf16.mxu0 (!%p157_p3), %vm453_vm0, %v452_v0  ;;  %vm215_vm1 = vcmask (!%p157_p3), 1043456   ;;  %v204_v5 = vld [vmem:[%s533_s1] sm:$0xf] (!%p157_p3)  ;;  %vm211_vm2 = vcmask (!%p157_p3), 64512   ;;  %vm260_vm3 = vcmask (!%p157_p3), 125952  }
   0xb   : > { %411 = vset.pattern.permute.xlu0 (!%p157_p3), %v454_v2 }
   0xc   : > { %208 = vperm.xlu0 (!%p157_p3), %411, %v205_v1  }
  0x10   : > { %s547_s13 = smov (!%p186_p5, %s438_s13), 1  ;;  %s549_s12 = smov (!%p188_p6, %s434_s12), 1 }
  0x11   : > { %s353_s21 = sshll.u32 %s547_s13, 1 }
  0x12   : > { %s191_s22 = sadd.s32 %s353_s21, %s549_s12 }
  0x13   : > { %s354_s23 = sshll.u32 %s191_s22, 2 }
  0x14   : > { %s193_s26 = scalar_lea.vmem %s532_s0, %s354_s23  ;;  %s201_s4 = scalar_lea.vmem %s535_s3, %s354_s23 }
  0x15   : > { %v203_v3 = vld [vmem:[%s193_s26] sm:$0xf] }
  0x16   : > { %v217_v4 = vsel %vm215_vm1, %v203_v3, 0 }
  0x17   : > { %363 = vmatpush3.bf16.msra.mxu0 %v217_v4 }
  0x1a   : > { %365 = vmatmul.mubr.msk.bf16.vlgmr.msra.gmra.mrb[0].mxu0 %vm211_vm2, %v204_v5 }
  0x8b   : > { %v209_v6 = vpop.permute.xlu0 %208 }
  0xed   : > { %v253_v7 = vpop.f32.mrb[0].mxu0 }
  0xee   : > { %v254_v8 = vadd.f32 %v253_v7, %v209_v6  ;;  %v366_v9 = vpop.f32.mrb[1].mxu0 }
  0xef   : > { %v256_v10 = vpop.f32.mrb[2].mxu0 }
  0xf0   : > { %v259_v11 = vpack.c.bf16 %v254_v8, %v254_v8  ;;  %v367_v12 = vpop.f32.mrb[3].mxu0 }
  0xf2   : > { %261 = vst.msk [vmem:[%s201_s4] sm:$0xf] %vm260_vm3, %v259_v11 }
  0xf3 PF: > { %s13_s16 = sadd.s32 1, %s450_s16   ;;  %s536_s12 = smov %s442_s14 }
  0xf4   : > { %p10_p7 = scmp.ge.s32.totalorder %s13_s16, 6   ;;  %s537_s13 = smov %s446_s15 }
  0xf5   : > { %s538_s14 = smov %s541_s17  ;;  %s539_s15 = smov %s545_s18 }
  0xf6   :  { %12 = sbr.rel (!%p10_p7) target bundleno = 3 (0x3), region = 62 }

// kernel: _lambda_.23
= control target key start
LH: loop header
LB: loop body
LE: loop exit
PB: predicated region body
PF: predicated region fallthrough
CT: control target
= control target key end

     0   :  { %s2271_s18 = smov 0   ;;  %s2273_s19 = smov 0   ;;  %s2586_s0 = inlined_call_operand.vmem [shape: bf16[2,4,8,36], index: 0, kind: input, shape index: {}, may-alias: {0,1,2}]   ;;  %s2587_s1 = inlined_call_operand.vmem [shape: bf16[2,4,8,36], index: 1, kind: input, shape index: {}, may-alias: {0,1,2}]   ;;  %s2588_s2 = inlined_call_operand.vmem [shape: bf16[2,4,8,36], index: 2, kind: input, shape index: {}, may-alias: {0,1,2}]   ;;  %s2589_s3 = inlined_call_operand.vmem [shape: bf16[27,8,8], index: 3, kind: input, shape index: {}]   ;;  %s2590_s4 = inlined_call_operand.vmem [shape: f32[8,1], index: 4, kind: input, shape index: {}]   ;;  %s2591_s5 = inlined_call_operand.vmem [shape: bf16[2,2,8,22], index: 5, kind: output, shape index: {}]  }
   0x1   :  { %s2275_s20 = smov 0   ;;  %s2277_s21 = smov 0  }
   0x2   :  { %s2279_s22 = smov 0  }
   0x3 LB: > { %s24_s23 = sadd.s32 1, %s2220_s20  ;;  %s27_s24 = sadd.s32 1, %s2224_s21  ;;  %s2228_s22 = sphi %s2279_s22, %s15_s22   ;;  %s2224_s21 = sphi %s2277_s21, %s2595_s21   ;;  %s2220_s20 = sphi %s2275_s20, %s2594_s20   ;;  %s2216_s19 = sphi %s2273_s19, %s2593_s19   ;;  %s2212_s18 = sphi %s2271_s18, %s2592_s18  }
   0x4   : > { %p25_p0 = scmp.ge.s32.totalorder %s24_s23, 2  ;;  %p1852_p1 = scmp.ge.s32.totalorder %s2228_s22, 1 }
   0x5   : > { %p244_p2 = scmp.lt.s32.totalorder %s2228_s22, 5 }
   0x6   : > { %s2597_s23 = smov (%p25_p0, %s24_s23), 0  ;;  %s2599_s24 = smov (!%p25_p0, %s27_s24), %s2224_s21 }
   0x7   : > { %p245_p3 = pnand %p1852_p1, %p244_p2  ;;  %p29_p4 = scmp.ge.s32.totalorder %s2599_s24, 2 }
   0x8   : > { %p296_p5 = scmp.lt.s32.totalorder (!%p245_p3), %s2216_s19, 1  ;;  %p298_p6 = scmp.lt.s32.totalorder (!%p245_p3), %s2212_s18, 3  ;;  %v2230_v0 = vmov (!%p245_p3), 0.0   ;;  %vm2231_vm0 = vmmov (!%p245_p3), 0   ;;  %vm346_vm1 = vcmask (!%p245_p3), 1043456   ;;  %vm342_vm2 = vcmask (!%p245_p3), 64512  }
   0x9   : > { %s2601_s24 = smov (%p29_p4, %s2599_s24), 0  ;;  %248 = sbr.rel (%p245_p3) target bundleno = 469 (0x1d5), region = 40 }
   0xa   : > { %1973 = vmatprep.subr.bf16.mxu0 (!%p245_p3), %v2230_v0  ;;  %1979 = vmatprep.subr.bf16.mxu1 (!%p245_p3), %v2230_v0  ;;  %s304_s7 = sadd.s32 (!%p245_p3), 1, %s2212_s18  ;;  %v334_v4 = vld [vmem:[%s2589_s3] sm:$0xf] (!%p245_p3)  ;;  %s2232_s10 = smov (!%p245_p3), 127   ;;  %v2240_v10 = vmov (!%p245_p3), 0   ;;  %vm1724_vm3 = vcmask (!%p245_p3), 175104  }
   0xb   : > { %1975 = vmatprep.mubr.msk.bf16.mxu0 (!%p245_p3), %vm2231_vm0, %v2230_v0  ;;  %1981 = vmatprep.mubr.msk.bf16.mxu1 (!%p245_p3), %vm2231_vm0, %v2230_v0  ;;  %p307_p7 = scmp.lt.s32.totalorder (!%p245_p3), %s304_s7, 3  ;;  %s2233_s11 = smov (!%p245_p3), 122   ;;  %v1715_v9 = vld [vmem:[%s2590_s4] sm:$0xff] (!%p245_p3)  ;;  %v1867_v16 = vld [vmem:[%s2589_s3 + $0xc] sm:$0xf] (!%p245_p3) }
   0xc   : > { %s2234_s13 = smov (!%p245_p3), 126   ;;  %s2235_s14 = smov (!%p245_p3), 121   ;;  %2186 = vset.pattern.permute.xlu0 (!%p245_p3), %v2240_v10  ;;  %v1861_v15 = vld [vmem:[%s2589_s3 + $0x4] sm:$0xf] (!%p245_p3)  ;;  %v1865_v22 = vld [vmem:[%s2589_s3 + $0x8] sm:$0xf] (!%p245_p3) }
   0xd   : > { %s314_s16 = sadd.s32 (!%p245_p3), 2, %s2212_s18  ;;  %s2237_s29 = smov (!%p245_p3), 116   ;;  %v1871_v23 = vld [vmem:[%s2589_s3 + $0x14] sm:$0xf] (!%p245_p3)  ;;  %v1869_v28 = vld [vmem:[%s2589_s3 + $0x10] sm:$0xf] (!%p245_p3) }
   0xe   : > { %p317_p8 = scmp.lt.s32.totalorder (!%p245_p3), %s314_s16, 3  ;;  %s2238_s30 = smov (!%p245_p3), 115   ;;  %v1875_v29 = vld [vmem:[%s2589_s3 + $0x1c] sm:$0xf] (!%p245_p3)  ;;  %v1873_v34 = vld [vmem:[%s2589_s3 + $0x18] sm:$0xf] (!%p245_p3) }
   0xf   : > { %v1879_v35 = vld [vmem:[%s2589_s3 + $0x24] sm:$0xf] (!%p245_p3)  ;;  %v1877_v40 = vld [vmem:[%s2589_s3 + $0x20] sm:$0xf] (!%p245_p3)  ;;  %v1884_v41 = vld [vmem:[%s2589_s3 + $0x2c] sm:$0xf] (!%p245_p3) }
  0x10   : > { %s2603_s19 = smov (!%p296_p5, %s2216_s19), 1  ;;  %s2605_s7 = smov (!%p307_p7, %s304_s7), 3  ;;  %v1881_v46 = vld [vmem:[%s2589_s3 + $0x28] sm:$0xf]  ;;  %v1888_v47 = vld [vmem:[%s2589_s3 + $0x34] sm:$0xf] }
  0x11   : > { %s299_s25 = scalar_select %p298_p6, %s2212_s18, 3  ;;  %v1886_v52 = vld [vmem:[%s2589_s3 + $0x30] sm:$0xf]  ;;  %v1892_v53 = vld [vmem:[%s2589_s3 + $0x3c] sm:$0xf] }
  0x12   : > { %s2314_s26 = sshll.u32 %s2603_s19, 2  ;;  %s2607_s16 = smov (!%p317_p8, %s314_s16), 3  ;;  %v1890_v58 = vld [vmem:[%s2589_s3 + $0x38] sm:$0xf]  ;;  %v1896_v59 = vld [vmem:[%s2589_s3 + $0x44] sm:$0xf] }
  0x13   : > { %s301_s27 = sadd.s32 %s2314_s26, %s299_s25  ;;  %s310_s12 = sadd.s32 %s2314_s26, %s2605_s7  ;;  %v1894_v63 = vld [vmem:[%s2589_s3 + $0x40] sm:$0xf] }
  0x14   : > { %s1854_s28 = sshll.u32 %s301_s27, 2  ;;  %s1856_s15 = sshll.u32 %s310_s12, 2 }
  0x15   : > { %s303_s6 = scalar_lea.vmem %s2586_s0, %s1854_s28  ;;  %s312_s27 = scalar_lea.vmem %s2587_s1, %s1856_s15 }
  0x16   : > { %v333_v1 = vld [vmem:[%s303_s6] sm:$0xf]  ;;  %s2236_s28 = smov 120   ;;  %s2239_s6 = smov 114  }
  0x17   : > { %v1862_v2 = vcombine.low %v333_v1, %v333_v1  ;;  %v394_v3 = vsel %vm346_vm1, %v333_v1, 0  ;;  %v2338_v5 = vld [vmem:[%s312_s27] sm:$0xf]  ;;  %s320_s7 = sadd.s32 %s2314_s26, %s2607_s16  ;;  %v1900_v1 = vld [vmem:[%s2589_s3 + $0x4c] sm:$0xf]  ;;  %p326_p9 = scmp.lt.s32.totalorder %s2212_s18, 1 }
  0x18   : > { %1980 = vmatpush3.bf16.msra.mxu1 %v394_v3  ;;  %v1882_v6 = vcombine.low %v2338_v5, %v2338_v5  ;;  %s1858_s8 = sshll.u32 %s320_s7, 2  ;;  %v800_v31 = vsel %vm346_vm1, %v2338_v5, 0  ;;  %s1859_s26 = sshll.u32 %s2603_s19, 1 }
  0x19   : > { %340 = vrot.lane.b32.xlu0 %v1862_v2, %s2232_s10  ;;  %489 = vrot.lane.b32.xlu1 %v1862_v2, %s2233_s11  ;;  %s322_s15 = scalar_lea.vmem %s2588_s2, %s1858_s8  ;;  %s2609_s18 = smov (!%p326_p9, %s2212_s18), 1 }
  0x1a   : > { %1991 = vmatprep.subr.bf16.mxu1 %v2230_v0  ;;  %v2350_v7 = vld [vmem:[%s322_s15] sm:$0xf]  ;;  %s329_s16 = sadd.s32 %s1859_s26, %s2609_s18 }
  0x1b   : > { %1982 = vmatmul.mubr.msk.bf16.vlgmr.msra.gmra.mrb[0].mxu1 %vm342_vm2, %v334_v4  ;;  %v1901_v8 = vcombine.low %v2350_v7, %v2350_v7 }
  0x1c   : > { %1993 = vmatprep.mubr.msk.bf16.mxu1 %vm2231_vm0, %v2230_v0 }
  0x1d   : > { %438 = vrot.lane.b32.xlu0 %v1862_v2, %s2234_s13  ;;  %540 = vrot.lane.b32.xlu1 %v1862_v2, %s2235_s14 }
  0x21   : > { %591 = vrot.lane.b32.xlu0 %v1862_v2, %s2236_s28  ;;  %642 = vrot.lane.b32.xlu1 %v1862_v2, %s2237_s29 }
  0x25   : > { %693 = vrot.lane.b32.xlu0 %v1862_v2, %s2238_s30  ;;  %744 = vrot.lane.b32.xlu1 %v1862_v2, %s2239_s6  ;;  %v1261_v2 = vsel %vm346_vm1, %v2350_v7, 0  ;;  %v1905_v7 = vld [vmem:[%s2589_s3 + $0x54] sm:$0xf] }
  0x29   : > { %848 = vrot.lane.b32.xlu0 %v1882_v6, %s2232_s10  ;;  %899 = vrot.lane.b32.xlu1 %v1882_v6, %s2234_s13 }
  0x2d   : > { %950 = vrot.lane.b32.xlu0 %v1882_v6, %s2233_s11  ;;  %1001 = vrot.lane.b32.xlu1 %v1882_v6, %s2235_s14 }
  0x31   : > { %1052 = vrot.lane.b32.xlu0 %v1882_v6, %s2236_s28  ;;  %1103 = vrot.lane.b32.xlu1 %v1882_v6, %s2237_s29 }
  0x35   : > { %1154 = vrot.lane.b32.xlu0 %v1882_v6, %s2238_s30  ;;  %1205 = vrot.lane.b32.xlu1 %v1882_v6, %s2239_s6  ;;  %v1898_v6 = vld [vmem:[%s2589_s3 + $0x48] sm:$0xf] }
  0x39   : > { %1309 = vrot.lane.b32.xlu0 %v1901_v8, %s2232_s10  ;;  %1360 = vrot.lane.b32.xlu1 %v1901_v8, %s2234_s13  ;;  %s1860_s10 = sshll.u32 %s329_s16, 2 }
  0x3d   : > { %1411 = vrot.lane.b32.xlu0 %v1901_v8, %s2233_s11  ;;  %1462 = vrot.lane.b32.xlu1 %v1901_v8, %s2235_s14  ;;  %s331_s14 = scalar_lea.vmem %s2591_s5, %s1860_s10 }
  0x41   : > { %1513 = vrot.lane.b32.xlu0 %v1901_v8, %s2236_s28  ;;  %1564 = vrot.lane.b32.xlu1 %v1901_v8, %s2237_s29 }
  0x45   : > { %1615 = vrot.lane.b32.xlu0 %v1901_v8, %s2238_s30  ;;  %1666 = vrot.lane.b32.xlu1 %v1901_v8, %s2239_s6 }
  0x49   : > { %1718 = vperm.xlu0 %2186, %v1715_v9  }
  0x8b   : > { %v341_v11 = vpop.permute.xlu0 %340  ;;  %v490_v12 = vpop.permute.xlu1 %489 }
  0x8c   : > { %v348_v13 = vsel %vm346_vm1, %v341_v11, 0  ;;  %v495_v14 = vsel %vm346_vm1, %v490_v12, 0  ;;  %v1903_v12 = vld [vmem:[%s2589_s3 + $0x50] sm:$0xf] }
  0x8d   : > { %1974 = vmatpush3.bf16.msra.mxu0 %v348_v13  ;;  %1992 = vmatpush3.bf16.msra.mxu1 %v495_v14  ;;  %v1909_v13 = vld [vmem:[%s2589_s3 + $0x5c] sm:$0xf] }
  0x8e   : > { %1985 = vmatprep.subr.bf16.mxu0 %v2230_v0  ;;  %2003 = vmatprep.subr.bf16.mxu1 %v2230_v0 }
  0x8f   : > { %v439_v17 = vpop.permute.xlu0 %438  ;;  %v541_v19 = vpop.permute.xlu1 %540 }
  0x90   : > { %v444_v18 = vsel %vm346_vm1, %v439_v17, 0  ;;  %1976 = vmatmul.mubr.msk.bf16.vlgmr.msra.gmra.mrb[0].mxu0 %vm342_vm2, %v1861_v15  ;;  %1994 = vmatmul.mubr.msk.bf16.vlgmr.msra.gmra.mrb[4].mxu1 %vm342_vm2, %v1867_v16  ;;  %v546_v24 = vsel %vm346_vm1, %v541_v19, 0  ;;  %v1907_v17 = vld [vmem:[%s2589_s3 + $0x58] sm:$0xf] }
  0x91   : > { %1986 = vmatpush3.bf16.msra.mxu0 %v444_v18  ;;  %1987 = vmatprep.mubr.msk.bf16.mxu0 %vm2231_vm0, %v2230_v0  ;;  %v1913_v18 = vld [vmem:[%s2589_s3 + $0x64] sm:$0xf] }
  0x92   : > { %1997 = vmatprep.subr.bf16.mxu0 %v2230_v0  ;;  %2005 = vmatprep.mubr.msk.bf16.mxu1 %vm2231_vm0, %v2230_v0 }
  0x93   : > { %v592_v20 = vpop.permute.xlu0 %591  ;;  %v643_v27 = vpop.permute.xlu1 %642 }
  0x94   : > { %v597_v21 = vsel %vm346_vm1, %v592_v20, 0  ;;  %v648_v30 = vsel %vm346_vm1, %v643_v27, 0  ;;  %v1915_v27 = vld [vmem:[%s2589_s3 + $0x68] sm:$0xf] }
  0x95   : > { %2004 = vmatpush3.bf16.msra.mxu1 %v597_v21  ;;  %v1911_v21 = vld [vmem:[%s2589_s3 + $0x60] sm:$0xf] }
  0x96   : > { %2015 = vmatprep.subr.bf16.mxu1 %v2230_v0 }
  0x97   : > { %v694_v25 = vpop.permute.xlu0 %693  ;;  %v745_v32 = vpop.permute.xlu1 %744 }
  0x98   : > { %1988 = vmatmul.mubr.msk.bf16.vlgmr.msra.gmra.mrb[4].mxu0 %vm342_vm2, %v1865_v22  ;;  %2006 = vmatmul.mubr.msk.bf16.vlgmr.msra.gmra.mrb[8].mxu1 %vm342_vm2, %v1871_v23  ;;  %v699_v26 = vsel %vm346_vm1, %v694_v25, 0  ;;  %v750_v36 = vsel %vm346_vm1, %v745_v32, 0 }
  0x99   : > { %1998 = vmatpush3.bf16.msra.mxu0 %v546_v24  ;;  %1999 = vmatprep.mubr.msk.bf16.mxu0 %vm2231_vm0, %v2230_v0 }
  0x9a   : > { %2009 = vmatprep.subr.bf16.mxu0 %v2230_v0  ;;  %2016 = vmatpush3.bf16.msra.mxu1 %v699_v26 }
  0x9b   : > { %2017 = vmatprep.mubr.msk.bf16.mxu1 %vm2231_vm0, %v2230_v0  ;;  %2027 = vmatprep.subr.bf16.mxu1 %v2230_v0  ;;  %v900_v33 = vpop.permute.xlu1 %899  ;;  %v849_v38 = vpop.permute.xlu0 %848 }
  0x9c   : > { %v905_v37 = vsel %vm346_vm1, %v900_v33, 0  ;;  %v854_v42 = vsel %vm346_vm1, %v849_v38, 0 }
  0x9f   : > { %v1002_v39 = vpop.permute.xlu1 %1001  ;;  %v951_v44 = vpop.permute.xlu0 %950 }
  0xa0   : > { %2000 = vmatmul.mubr.msk.bf16.vlgmr.msra.gmra.mrb[8].mxu0 %vm342_vm2, %v1869_v28  ;;  %2018 = vmatmul.mubr.msk.bf16.vlgmr.msra.gmra.mrb[12].mxu1 %vm342_vm2, %v1875_v29  ;;  %v1007_v43 = vsel %vm346_vm1, %v1002_v39, 0  ;;  %v956_v48 = vsel %vm346_vm1, %v951_v44, 0 }
  0xa1   : > { %2010 = vmatpush3.bf16.msra.mxu0 %v648_v30  ;;  %2011 = vmatprep.mubr.msk.bf16.mxu0 %vm2231_vm0, %v2230_v0 }
  0xa2   : > { %2021 = vmatprep.subr.bf16.mxu0 %v2230_v0  ;;  %2028 = vmatpush3.bf16.msra.mxu1 %v800_v31 }
  0xa3   : > { %2029 = vmatprep.mubr.msk.bf16.mxu1 %vm2231_vm0, %v2230_v0  ;;  %2039 = vmatprep.subr.bf16.mxu1 %v2230_v0  ;;  %v1104_v45 = vpop.permute.xlu1 %1103  ;;  %v1053_v50 = vpop.permute.xlu0 %1052 }
  0xa4   : > { %v1109_v49 = vsel %vm346_vm1, %v1104_v45, 0  ;;  %v1058_v54 = vsel %vm346_vm1, %v1053_v50, 0 }
  0xa7   : > { %v1206_v51 = vpop.permute.xlu1 %1205  ;;  %v1155_v56 = vpop.permute.xlu0 %1154 }
  0xa8   : > { %2012 = vmatmul.mubr.msk.bf16.vlgmr.msra.gmra.mrb[12].mxu0 %vm342_vm2, %v1873_v34  ;;  %2030 = vmatmul.mubr.msk.bf16.vlgmr.msra.gmra.mrb[16].mxu1 %vm342_vm2, %v1879_v35  ;;  %v1211_v55 = vsel %vm346_vm1, %v1206_v51, 0  ;;  %v1160_v60 = vsel %vm346_vm1, %v1155_v56, 0 }
  0xa9   : > { %2022 = vmatpush3.bf16.msra.mxu0 %v750_v36  ;;  %2023 = vmatprep.mubr.msk.bf16.mxu0 %vm2231_vm0, %v2230_v0 }
  0xaa   : > { %2033 = vmatprep.subr.bf16.mxu0 %v2230_v0  ;;  %2040 = vmatpush3.bf16.msra.mxu1 %v905_v37 }
  0xab   : > { %2041 = vmatprep.mubr.msk.bf16.mxu1 %vm2231_vm0, %v2230_v0  ;;  %2051 = vmatprep.subr.bf16.mxu1 %v2230_v0  ;;  %v1310_v57 = vpop.permute.xlu0 %1309  ;;  %v1361_v4 = vpop.permute.xlu1 %1360 }
  0xac   : > { %v1315_v61 = vsel %vm346_vm1, %v1310_v57, 0  ;;  %v1366_v8 = vsel %vm346_vm1, %v1361_v4, 0 }
  0xaf   : > { %v1412_v62 = vpop.permute.xlu0 %1411  ;;  %v1463_v10 = vpop.permute.xlu1 %1462 }
  0xb0   : > { %2024 = vmatmul.mubr.msk.bf16.vlgmr.msra.gmra.mrb[16].mxu0 %vm342_vm2, %v1877_v40  ;;  %2042 = vmatmul.mubr.msk.bf16.vlgmr.msra.gmra.mrb[20].mxu1 %vm342_vm2, %v1884_v41  ;;  %v1417_v3 = vsel %vm346_vm1, %v1412_v62, 0  ;;  %v1468_v14 = vsel %vm346_vm1, %v1463_v10, 0 }
  0xb1   : > { %2034 = vmatpush3.bf16.msra.mxu0 %v854_v42  ;;  %2035 = vmatprep.mubr.msk.bf16.mxu0 %vm2231_vm0, %v2230_v0 }
  0xb2   : > { %2045 = vmatprep.subr.bf16.mxu0 %v2230_v0  ;;  %2052 = vmatpush3.bf16.msra.mxu1 %v1007_v43 }
  0xb3   : > { %2053 = vmatprep.mubr.msk.bf16.mxu1 %vm2231_vm0, %v2230_v0  ;;  %2063 = vmatprep.subr.bf16.mxu1 %v2230_v0  ;;  %v1514_v5 = vpop.permute.xlu0 %1513  ;;  %v1565_v16 = vpop.permute.xlu1 %1564 }
  0xb4   : > { %v1519_v9 = vsel %vm346_vm1, %v1514_v5, 0  ;;  %v1570_v19 = vsel %vm346_vm1, %v1565_v16, 0 }
  0xb7   : > { %v1616_v11 = vpop.permute.xlu0 %1615  ;;  %v1667_v20 = vpop.permute.xlu1 %1666 }
  0xb8   : > { %2036 = vmatmul.mubr.msk.bf16.vlgmr.msra.gmra.mrb[20].mxu0 %vm342_vm2, %v1881_v46  ;;  %2054 = vmatmul.mubr.msk.bf16.vlgmr.msra.gmra.mrb[24].mxu1 %vm342_vm2, %v1888_v47  ;;  %v1621_v15 = vsel %vm346_vm1, %v1616_v11, 0  ;;  %v1672_v22 = vsel %vm346_vm1, %v1667_v20, 0 }
  0xb9   : > { %2046 = vmatpush3.bf16.msra.mxu0 %v956_v48  ;;  %2047 = vmatprep.mubr.msk.bf16.mxu0 %vm2231_vm0, %v2230_v0 }
  0xba   : > { %2057 = vmatprep.subr.bf16.mxu0 %v2230_v0  ;;  %2064 = vmatpush3.bf16.msra.mxu1 %v1109_v49 }
  0xbb   : > { %2065 = vmatprep.mubr.msk.bf16.mxu1 %vm2231_vm0, %v2230_v0  ;;  %2075 = vmatprep.subr.bf16.mxu1 %v2230_v0 }
  0xc0   : > { %2048 = vmatmul.mubr.msk.bf16.vlgmr.msra.gmra.mrb[24].mxu0 %vm342_vm2, %v1886_v52  ;;  %2066 = vmatmul.mubr.msk.bf16.vlgmr.msra.gmra.mrb[28].mxu1 %vm342_vm2, %v1892_v53 }
  0xc1   : > { %2058 = vmatpush3.bf16.msra.mxu0 %v1058_v54  ;;  %2059 = vmatprep.mubr.msk.bf16.mxu0 %vm2231_vm0, %v2230_v0 }
  0xc2   : > { %2069 = vmatprep.subr.bf16.mxu0 %v2230_v0  ;;  %2076 = vmatpush3.bf16.msra.mxu1 %v1211_v55 }
  0xc3   : > { %2077 = vmatprep.mubr.msk.bf16.mxu1 %vm2231_vm0, %v2230_v0  ;;  %2087 = vmatprep.subr.bf16.mxu1 %v2230_v0 }
  0xc8   : > { %2060 = vmatmul.mubr.msk.bf16.vlgmr.msra.gmra.mrb[28].mxu0 %vm342_vm2, %v1890_v58  ;;  %2078 = vmatmul.mubr.msk.bf16.vlgmr.msra.gmra.mrb[32].mxu1 %vm342_vm2, %v1896_v59 }
  0xc9   : > { %2070 = vmatpush3.bf16.msra.mxu0 %v1160_v60  ;;  %2071 = vmatprep.mubr.msk.bf16.mxu0 %vm2231_vm0, %v2230_v0 }
  0xca   : > { %2081 = vmatprep.subr.bf16.mxu0 %v2230_v0  ;;  %2088 = vmatpush3.bf16.msra.mxu1 %v1315_v61 }
  0xcb   : > { %2089 = vmatprep.mubr.msk.bf16.mxu1 %vm2231_vm0, %v2230_v0  ;;  %2099 = vmatprep.subr.bf16.mxu1 %v2230_v0 }
  0xd0   : > { %2072 = vmatmul.mubr.msk.bf16.vlgmr.msra.gmra.mrb[32].mxu0 %vm342_vm2, %v1894_v63  ;;  %2090 = vmatmul.mubr.msk.bf16.vlgmr.msra.gmra.mrb[36].mxu1 %vm342_vm2, %v1900_v1 }
  0xd1   : > { %2082 = vmatpush3.bf16.msra.mxu0 %v1261_v2  ;;  %2083 = vmatprep.mubr.msk.bf16.mxu0 %vm2231_vm0, %v2230_v0 }
  0xd2   : > { %2093 = vmatprep.subr.bf16.mxu0 %v2230_v0  ;;  %2100 = vmatpush3.bf16.msra.mxu1 %v1417_v3 }
  0xd3   : > { %2101 = vmatprep.mubr.msk.bf16.mxu1 %vm2231_vm0, %v2230_v0  ;;  %2111 = vmatprep.subr.bf16.mxu1 %v2230_v0 }
  0xd8   : > { %2084 = vmatmul.mubr.msk.bf16.vlgmr.msra.gmra.mrb[36].mxu0 %vm342_vm2, %v1898_v6  ;;  %2102 = vmatmul.mubr.msk.bf16.vlgmr.msra.gmra.mrb[40].mxu1 %vm342_vm2, %v1905_v7 }
  0xd9   : > { %2094 = vmatpush3.bf16.msra.mxu0 %v1366_v8  ;;  %2095 = vmatprep.mubr.msk.bf16.mxu0 %vm2231_vm0, %v2230_v0 }
  0xda   : > { %2105 = vmatprep.subr.bf16.mxu0 %v2230_v0  ;;  %2112 = vmatpush3.bf16.msra.mxu1 %v1519_v9 }
  0xdb   : > { %2113 = vmatprep.mubr.msk.bf16.mxu1 %vm2231_vm0, %v2230_v0  ;;  %2123 = vmatprep.subr.bf16.mxu1 %v2230_v0 }
  0xe0   : > { %2096 = vmatmul.mubr.msk.bf16.vlgmr.msra.gmra.mrb[40].mxu0 %vm342_vm2, %v1903_v12  ;;  %2114 = vmatmul.mubr.msk.bf16.vlgmr.msra.gmra.mrb[44].mxu1 %vm342_vm2, %v1909_v13 }
  0xe1   : > { %2106 = vmatpush3.bf16.msra.mxu0 %v1468_v14  ;;  %2107 = vmatprep.mubr.msk.bf16.mxu0 %vm2231_vm0, %v2230_v0 }
  0xe2   : > { %2117 = vmatprep.subr.bf16.mxu0 %v2230_v0  ;;  %2124 = vmatpush3.bf16.msra.mxu1 %v1621_v15 }
  0xe3   : > { %2125 = vmatprep.mubr.msk.bf16.mxu1 %vm2231_vm0, %v2230_v0 }
  0xe8   : > { %2108 = vmatmul.mubr.msk.bf16.vlgmr.msra.gmra.mrb[44].mxu0 %vm342_vm2, %v1907_v17  ;;  %2126 = vmatmul.mubr.msk.bf16.vlgmr.msra.gmra.mrb[48].mxu1 %vm342_vm2, %v1913_v18 }
  0xe9   : > { %2118 = vmatpush3.bf16.msra.mxu0 %v1570_v19  ;;  %2119 = vmatprep.mubr.msk.bf16.mxu0 %vm2231_vm0, %v2230_v0 }
  0xea   : > { %2129 = vmatprep.subr.bf16.mxu0 %v2230_v0 }
  0xee   : > { %v430_v23 = vpop.f32.mrb[0].mxu1 }
  0xef   : > { %v1983_v24 = vpop.f32.mrb[1].mxu1 }
  0xf0   : > { %2120 = vmatmul.mubr.msk.bf16.vlgmr.msra.gmra.mrb[48].mxu0 %vm342_vm2, %v1911_v21  ;;  %v433_v25 = vpop.f32.mrb[2].mxu1 }
  0xf1   : > { %2130 = vmatpush3.bf16.msra.mxu0 %v1672_v22  ;;  %2131 = vmatprep.mubr.msk.bf16.mxu0 %vm2231_vm0, %v2230_v0  ;;  %v1984_v26 = vpop.f32.mrb[3].mxu1 }
  0xf8   : > { %2132 = vmatmul.mubr.msk.bf16.vlgmr.msra.gmra.mrb[52].mxu0 %vm342_vm2, %v1915_v27 }
 0x163   : > { %v384_v28 = vpop.f32.mrb[0].mxu0  ;;  %v531_v29 = vpop.f32.mrb[4].mxu1 }
 0x164   : > { %v1977_v30 = vpop.f32.mrb[1].mxu0  ;;  %v431_v31 = vadd.f32 %v430_v23, %v384_v28  ;;  %v1995_v32 = vpop.f32.mrb[5].mxu1 }
 0x165   : > { %v387_v33 = vpop.f32.mrb[2].mxu0  ;;  %v534_v34 = vpop.f32.mrb[6].mxu1 }
 0x166   : > { %v1978_v35 = vpop.f32.mrb[3].mxu0  ;;  %v1996_v36 = vpop.f32.mrb[7].mxu1 }
 0x16b   : > { %v480_v37 = vpop.f32.mrb[4].mxu0  ;;  %v633_v38 = vpop.f32.mrb[8].mxu1 }
 0x16c   : > { %v486_v39 = vadd.f32 %v480_v37, %v431_v31  ;;  %v1989_v0 = vpop.f32.mrb[5].mxu0  ;;  %v2007_v40 = vpop.f32.mrb[9].mxu1 }
 0x16d   : > { %v483_v41 = vpop.f32.mrb[6].mxu0  ;;  %v636_v42 = vpop.f32.mrb[10].mxu1 }
 0x16e   : > { %v537_v43 = vadd.f32 %v531_v29, %v486_v39  ;;  %v1990_v44 = vpop.f32.mrb[7].mxu0  ;;  %v2008_v45 = vpop.f32.mrb[11].mxu1 }
 0x173   : > { %v582_v46 = vpop.f32.mrb[8].mxu0  ;;  %v735_v47 = vpop.f32.mrb[12].mxu1 }
 0x174   : > { %v588_v48 = vadd.f32 %v582_v46, %v537_v43  ;;  %v2001_v49 = vpop.f32.mrb[9].mxu0  ;;  %v2019_v50 = vpop.f32.mrb[13].mxu1 }
 0x175   : > { %v585_v51 = vpop.f32.mrb[10].mxu0  ;;  %v738_v52 = vpop.f32.mrb[14].mxu1 }
 0x176   : > { %v639_v53 = vadd.f32 %v633_v38, %v588_v48  ;;  %v2002_v54 = vpop.f32.mrb[11].mxu0  ;;  %v2020_v55 = vpop.f32.mrb[15].mxu1 }
 0x17b   : > { %v684_v56 = vpop.f32.mrb[12].mxu0  ;;  %v836_v57 = vpop.f32.mrb[16].mxu1 }
 0x17c   : > { %v690_v58 = vadd.f32 %v684_v56, %v639_v53  ;;  %v2013_v59 = vpop.f32.mrb[13].mxu0  ;;  %v2031_v60 = vpop.f32.mrb[17].mxu1 }
 0x17d   : > { %v687_v61 = vpop.f32.mrb[14].mxu0  ;;  %v839_v62 = vpop.f32.mrb[18].mxu1 }
 0x17e   : > { %v741_v63 = vadd.f32 %v735_v47, %v690_v58  ;;  %v2014_v1 = vpop.f32.mrb[15].mxu0  ;;  %v2032_v2 = vpop.f32.mrb[19].mxu1 }
 0x183   : > { %v786_v3 = vpop.f32.mrb[16].mxu0  ;;  %v941_v4 = vpop.f32.mrb[20].mxu1 }
 0x184   : > { %v792_v5 = vadd.f32 %v786_v3, %v741_v63  ;;  %v2025_v6 = vpop.f32.mrb[17].mxu0  ;;  %v2043_v7 = vpop.f32.mrb[21].mxu1 }
 0x185   : > { %v789_v8 = vpop.f32.mrb[18].mxu0  ;;  %v944_v9 = vpop.f32.mrb[22].mxu1 }
 0x186   : > { %v842_v10 = vadd.f32 %v836_v57, %v792_v5  ;;  %v2026_v11 = vpop.f32.mrb[19].mxu0  ;;  %v2044_v12 = vpop.f32.mrb[23].mxu1 }
 0x18b   : > { %v890_v13 = vpop.f32.mrb[20].mxu0  ;;  %v1043_v14 = vpop.f32.mrb[24].mxu1 }
 0x18c   : > { %v896_v15 = vadd.f32 %v890_v13, %v842_v10  ;;  %v2037_v16 = vpop.f32.mrb[21].mxu0  ;;  %v2055_v17 = vpop.f32.mrb[25].mxu1 }
 0x18d   : > { %v893_v18 = vpop.f32.mrb[22].mxu0  ;;  %v1046_v19 = vpop.f32.mrb[26].mxu1 }
 0x18e   : > { %v947_v20 = vadd.f32 %v941_v4, %v896_v15  ;;  %v2038_v21 = vpop.f32.mrb[23].mxu0  ;;  %v2056_v22 = vpop.f32.mrb[27].mxu1 }
 0x193   : > { %v992_v23 = vpop.f32.mrb[24].mxu0  ;;  %v1145_v24 = vpop.f32.mrb[28].mxu1 }
 0x194   : > { %v998_v25 = vadd.f32 %v992_v23, %v947_v20  ;;  %v2049_v26 = vpop.f32.mrb[25].mxu0  ;;  %v2067_v27 = vpop.f32.mrb[29].mxu1 }
 0x195   : > { %v995_v28 = vpop.f32.mrb[26].mxu0  ;;  %v1148_v29 = vpop.f32.mrb[30].mxu1 }
 0x196   : > { %v1049_v30 = vadd.f32 %v1043_v14, %v998_v25  ;;  %v2050_v31 = vpop.f32.mrb[27].mxu0  ;;  %v2068_v32 = vpop.f32.mrb[31].mxu1 }
 0x197   : > { %v1719_v26 = vpop.permute.xlu0 %1718 }
 0x19b   : > { %v1094_v33 = vpop.f32.mrb[28].mxu0  ;;  %v1247_v34 = vpop.f32.mrb[32].mxu1 }
 0x19c   : > { %v1100_v35 = vadd.f32 %v1094_v33, %v1049_v30  ;;  %v2061_v36 = vpop.f32.mrb[29].mxu0  ;;  %v2079_v37 = vpop.f32.mrb[33].mxu1 }
 0x19d   : > { %v1097_v38 = vpop.f32.mrb[30].mxu0  ;;  %v1250_v39 = vpop.f32.mrb[34].mxu1 }
 0x19e   : > { %v1151_v0 = vadd.f32 %v1145_v24, %v1100_v35  ;;  %v2062_v40 = vpop.f32.mrb[31].mxu0  ;;  %v2080_v41 = vpop.f32.mrb[35].mxu1 }
 0x1a3   : > { %v1196_v42 = vpop.f32.mrb[32].mxu0  ;;  %v1351_v43 = vpop.f32.mrb[36].mxu1 }
 0x1a4   : > { %v1202_v44 = vadd.f32 %v1196_v42, %v1151_v0  ;;  %v2073_v45 = vpop.f32.mrb[33].mxu0  ;;  %v2091_v46 = vpop.f32.mrb[37].mxu1 }
 0x1a5   : > { %v1199_v47 = vpop.f32.mrb[34].mxu0  ;;  %v1354_v48 = vpop.f32.mrb[38].mxu1 }
 0x1a6   : > { %v1253_v49 = vadd.f32 %v1247_v34, %v1202_v44  ;;  %v2074_v50 = vpop.f32.mrb[35].mxu0  ;;  %v2092_v51 = vpop.f32.mrb[39].mxu1 }
 0x1ab   : > { %v1297_v52 = vpop.f32.mrb[36].mxu0  ;;  %v1453_v53 = vpop.f32.mrb[40].mxu1 }
 0x1ac   : > { %v1303_v54 = vadd.f32 %v1297_v52, %v1253_v49  ;;  %v2085_v55 = vpop.f32.mrb[37].mxu0  ;;  %v2103_v56 = vpop.f32.mrb[41].mxu1 }
 0x1ad   : > { %v1300_v57 = vpop.f32.mrb[38].mxu0  ;;  %v1456_v58 = vpop.f32.mrb[42].mxu1 }
 0x1ae   : > { %v1357_v59 = vadd.f32 %v1351_v43, %v1303_v54  ;;  %v2086_v60 = vpop.f32.mrb[39].mxu0  ;;  %v2104_v61 = vpop.f32.mrb[43].mxu1 }
 0x1b3   : > { %v1402_v62 = vpop.f32.mrb[40].mxu0  ;;  %v1555_v63 = vpop.f32.mrb[44].mxu1 }
 0x1b4   : > { %v1408_v1 = vadd.f32 %v1402_v62, %v1357_v59  ;;  %v2097_v2 = vpop.f32.mrb[41].mxu0  ;;  %v2115_v3 = vpop.f32.mrb[45].mxu1 }
 0x1b5   : > { %v1405_v4 = vpop.f32.mrb[42].mxu0  ;;  %v1558_v5 = vpop.f32.mrb[46].mxu1 }
 0x1b6   : > { %v1459_v6 = vadd.f32 %v1453_v53, %v1408_v1  ;;  %v2098_v7 = vpop.f32.mrb[43].mxu0  ;;  %v2116_v8 = vpop.f32.mrb[47].mxu1 }
 0x1bb   : > { %v1504_v9 = vpop.f32.mrb[44].mxu0  ;;  %v1657_v10 = vpop.f32.mrb[48].mxu1 }
 0x1bc   : > { %v1510_v11 = vadd.f32 %v1504_v9, %v1459_v6  ;;  %v2109_v12 = vpop.f32.mrb[45].mxu0  ;;  %v2127_v13 = vpop.f32.mrb[49].mxu1 }
 0x1bd   : > { %v1507_v14 = vpop.f32.mrb[46].mxu0  ;;  %v1660_v15 = vpop.f32.mrb[50].mxu1 }
 0x1be   : > { %v1561_v16 = vadd.f32 %v1555_v63, %v1510_v11  ;;  %v2110_v17 = vpop.f32.mrb[47].mxu0  ;;  %v2128_v18 = vpop.f32.mrb[51].mxu1 }
 0x1c3   : > { %v1606_v19 = vpop.f32.mrb[48].mxu0 }
 0x1c4   : > { %v1612_v20 = vadd.f32 %v1606_v19, %v1561_v16  ;;  %v2121_v21 = vpop.f32.mrb[49].mxu0 }
 0x1c5   : > { %v1609_v22 = vpop.f32.mrb[50].mxu0 }
 0x1c6   : > { %v1663_v23 = vadd.f32 %v1657_v10, %v1612_v20  ;;  %v2122_v24 = vpop.f32.mrb[51].mxu0 }
 0x1cb   : > { %v1708_v25 = vpop.f32.mrb[52].mxu0 }
 0x1cc   : > { %v1714_v27 = vadd.f32 %v1708_v25, %v1663_v23  ;;  %v2133_v28 = vpop.f32.mrb[53].mxu0 }
 0x1cd   : > { %v1711_v29 = vpop.f32.mrb[54].mxu0 }
 0x1ce   : > { %v1721_v30 = vadd.f32 %v1719_v26, %v1714_v27  ;;  %v2134_v31 = vpop.f32.mrb[55].mxu0 }
 0x1d0   : > { %v1722_v32 = vmax.f32 %v1721_v30, 0.0 }
 0x1d2   : > { %v1723_v33 = vpack.c.bf16 %v1722_v32, %v1722_v32 }
 0x1d4   : > { %1725 = vst.msk [vmem:[%s331_s14] sm:$0xf] %vm1724_vm3, %v1723_v33 }
 0x1d5 PF: > { %s15_s22 = sadd.s32 1, %s2228_s22   ;;  %s2592_s18 = smov %s2220_s20 }
 0x1d6   : > { %p12_p10 = scmp.ge.s32.totalorder %s15_s22, 6   ;;  %s2593_s19 = smov %s2224_s21 }
 0x1d7   : > { %s2594_s20 = smov %s2597_s23  ;;  %s2595_s21 = smov %s2601_s24 }
 0x1d8   :  { %14 = sbr.rel (!%p12_p10) target bundleno = 3 (0x3), region = 102 }

// kernel: _lambda_.26
= control target key start
LH: loop header
LB: loop body
LE: loop exit
PB: predicated region body
PF: predicated region fallthrough
CT: control target
= control target key end

     0   :  { %s543_s12 = smov 0   ;;  %s545_s13 = smov 0   ;;  %s610_s0 = inlined_call_operand.vmem [shape: bf16[2,2,8,20], index: 0, kind: input, shape index: {}]   ;;  %s611_s1 = inlined_call_operand.vmem [shape: bf16[2,8,8], index: 1, kind: input, shape index: {}]   ;;  %s612_s2 = inlined_call_operand.vmem [shape: f32[8,1], index: 2, kind: input, shape index: {}]   ;;  %s613_s3 = inlined_call_operand.vmem [shape: bf16[2,2,8,16], index: 3, kind: output, shape index: {}]  }
   0x1   :  { %s547_s14 = smov 0   ;;  %s549_s15 = smov 0  }
   0x2   :  { %s551_s16 = smov 0  }
   0x3 LB: > { %s22_s17 = sadd.s32 1, %s509_s14  ;;  %s25_s18 = sadd.s32 1, %s513_s15  ;;  %s517_s16 = sphi %s551_s16, %s13_s16   ;;  %s513_s15 = sphi %s549_s15, %s617_s15   ;;  %s509_s14 = sphi %s547_s14, %s616_s14   ;;  %s505_s13 = sphi %s545_s13, %s615_s13   ;;  %s501_s12 = sphi %s543_s12, %s614_s12  }
   0x4   : > { %p23_p0 = scmp.ge.s32.totalorder %s22_s17, 2  ;;  %p406_p1 = scmp.ge.s32.totalorder %s517_s16, 1 }
   0x5   : > { %p156_p2 = scmp.lt.s32.totalorder %s517_s16, 5 }
   0x6   : > { %s619_s17 = smov (%p23_p0, %s22_s17), 0  ;;  %s621_s18 = smov (!%p23_p0, %s25_s18), %s513_s15 }
   0x7   : > { %p157_p3 = pnand %p406_p1, %p156_p2  ;;  %p27_p4 = scmp.ge.s32.totalorder %s621_s18, 2 }
   0x8   : > { %p186_p5 = scmp.lt.s32.totalorder (!%p157_p3), %s505_s13, 1  ;;  %p188_p6 = scmp.lt.s32.totalorder (!%p157_p3), %s501_s12, 1  ;;  %v519_v0 = vmov (!%p157_p3), 0.0   ;;  %vm520_vm0 = vmmov (!%p157_p3), 0   ;;  %v521_v1 = vmov (!%p157_p3), 0   ;;  %vm216_vm1 = vcmask (!%p157_p3), 1043456  }
   0x9   : > { %s623_s18 = smov (%p27_p4, %s621_s18), 0  ;;  %160 = sbr.rel (%p157_p3) target bundleno = 362 (0x16a), region = 32 }
   0xa   : > { %427 = vmatprep.subr.bf16.mxu1 (!%p157_p3), %v519_v0  ;;  %421 = vmatprep.subr.bf16.mxu0 (!%p157_p3), %v519_v0  ;;  %v204_v5 = vld [vmem:[%s611_s1] sm:$0xf] (!%p157_p3)  ;;  %vm212_vm2 = vcmask (!%p157_p3), 64512   ;;  %s522_s27 = smov (!%p157_p3), 124   ;;  %v411_v9 = vld [vmem:[%s611_s1 + $0x4] sm:$0xf] (!%p157_p3) }
   0xb   : > { %429 = vmatprep.mubr.msk.bf16.mxu1 (!%p157_p3), %vm520_vm0, %v519_v0  ;;  %423 = vmatprep.mubr.msk.bf16.mxu0 (!%p157_p3), %vm520_vm0, %v519_v0  ;;  %v306_v6 = vld [vmem:[%s612_s2] sm:$0xff] (!%p157_p3)  ;;  %vm314_vm3 = vcmask (!%p157_p3), 125952  }
   0xc   : > { %477 = vset.pattern.permute.xlu0 (!%p157_p3), %v521_v1 }
  0x10   : > { %s625_s13 = smov (!%p186_p5, %s505_s13), 1  ;;  %s627_s12 = smov (!%p188_p6, %s501_s12), 1 }
  0x11   : > { %s407_s19 = sshll.u32 %s625_s13, 1 }
  0x12   : > { %s573_s20 = sadd.s32 %s407_s19, %s627_s12 }
  0x13   : > { %s408_s21 = sshll.u32 %s573_s20, 2 }
  0x14   : > { %s193_s24 = scalar_lea.vmem %s610_s0, %s408_s21  ;;  %s201_s7 = scalar_lea.vmem %s613_s3, %s408_s21 }
  0x15   : > { %v203_v2 = vld [vmem:[%s193_s24] sm:$0xf] }
  0x16   : > { %v412_v3 = vcombine.low %v203_v2, %v203_v2  ;;  %v264_v4 = vsel %vm216_vm1, %v203_v2, 0 }
  0x17   : > { %428 = vmatpush3.bf16.msra.mxu1 %v264_v4 }
  0x18   : > { %210 = vrot.lane.b32.xlu0 %v412_v3, %s522_s27 }
  0x1a   : > { %430 = vmatmul.mubr.msk.bf16.vlgmr.msra.gmra.mrb[0].mxu1 %vm212_vm2, %v204_v5 }
  0x1c   : > { %309 = vperm.xlu0 %477, %v306_v6  }
  0x8a   : > { %v211_v7 = vpop.permute.xlu0 %210 }
  0x8b   : > { %v218_v8 = vsel %vm216_vm1, %v211_v7, 0 }
  0x8c   : > { %422 = vmatpush3.bf16.msra.mxu0 %v218_v8 }
  0x8f   : > { %424 = vmatmul.mubr.msk.bf16.vlgmr.msra.gmra.mrb[0].mxu0 %vm212_vm2, %v411_v9 }
  0x9b   : > { %v310_v15 = vpop.permute.xlu0 %309 }
  0xed   : > { %v300_v10 = vpop.f32.mrb[0].mxu1 }
  0xee   : > { %v431_v11 = vpop.f32.mrb[1].mxu1 }
  0xef   : > { %v303_v12 = vpop.f32.mrb[2].mxu1 }
  0xf0   : > { %v432_v13 = vpop.f32.mrb[3].mxu1 }
 0x162   : > { %v254_v14 = vpop.f32.mrb[0].mxu0 }
 0x163   : > { %v301_v16 = vadd.f32 %v300_v10, %v254_v14  ;;  %v425_v17 = vpop.f32.mrb[1].mxu0 }
 0x164   : > { %v257_v18 = vpop.f32.mrb[2].mxu0 }
 0x165   : > { %v312_v19 = vadd.f32 %v310_v15, %v301_v16  ;;  %v426_v20 = vpop.f32.mrb[3].mxu0 }
 0x167   : > { %v313_v21 = vpack.c.bf16 %v312_v19, %v312_v19 }
 0x169   : > { %315 = vst.msk [vmem:[%s201_s7] sm:$0xf] %vm314_vm3, %v313_v21 }
 0x16a PF: > { %s13_s16 = sadd.s32 1, %s517_s16   ;;  %s614_s12 = smov %s509_s14 }
 0x16b   : > { %p10_p7 = scmp.ge.s32.totalorder %s13_s16, 6   ;;  %s615_s13 = smov %s513_s15 }
 0x16c   : > { %s616_s14 = smov %s619_s17  ;;  %s617_s15 = smov %s623_s18 }
 0x16d   :  { %12 = sbr.rel (!%p10_p7) target bundleno = 3 (0x3), region = 63 }

// kernel: _lambda_.28
= control target key start
LH: loop header
LB: loop body
LE: loop exit
PB: predicated region body
PF: predicated region fallthrough
CT: control target
= control target key end

     0   :  { %s624_s15 = smov 0   ;;  %s626_s16 = smov 0   ;;  %s698_s0 = inlined_call_operand.vmem [shape: bf16[2,3,8,16], index: 0, kind: input, shape index: {}, may-alias: {0,1}]   ;;  %s699_s1 = inlined_call_operand.vmem [shape: bf16[2,3,8,16], index: 1, kind: input, shape index: {}, may-alias: {0,1}]   ;;  %s700_s2 = inlined_call_operand.vmem [shape: bf16[2,8,8], index: 2, kind: input, shape index: {}]   ;;  %s701_s3 = inlined_call_operand.vmem [shape: f32[8,1], index: 3, kind: input, shape index: {}]   ;;  %s702_s4 = inlined_call_operand.vmem [shape: bf16[2,2,8,16], index: 4, kind: output, shape index: {}]  }
   0x1   :  { %s628_s17 = smov 0   ;;  %s630_s18 = smov 0  }
   0x2   :  { %s632_s19 = smov 0  }
   0x3 LB: > { %s23_s20 = sadd.s32 1, %s586_s17  ;;  %s26_s21 = sadd.s32 1, %s590_s18  ;;  %s594_s19 = sphi %s632_s19, %s14_s19   ;;  %s590_s18 = sphi %s630_s18, %s706_s18   ;;  %s586_s17 = sphi %s628_s17, %s705_s17   ;;  %s582_s16 = sphi %s626_s16, %s704_s16   ;;  %s578_s15 = sphi %s624_s15, %s703_s15  }
   0x4   : > { %p24_p0 = scmp.ge.s32.totalorder %s23_s20, 2  ;;  %p485_p1 = scmp.ge.s32.totalorder %s594_s19, 1 }
   0x5   : > { %p200_p2 = scmp.lt.s32.totalorder %s594_s19, 5 }
   0x6   : > { %s708_s20 = smov (%p24_p0, %s23_s20), 0  ;;  %s710_s21 = smov (!%p24_p0, %s26_s21), %s590_s18 }
   0x7   : > { %p201_p3 = pnand %p485_p1, %p200_p2  ;;  %p28_p4 = scmp.ge.s32.totalorder %s710_s21, 2 }
   0x8   : > { %p241_p5 = scmp.lt.s32.totalorder (!%p201_p3), %s582_s16, 1  ;;  %s249_s22 = sadd.s32 (!%p201_p3), 1, %s578_s15  ;;  %v596_v0 = vmov (!%p201_p3), 0.0   ;;  %vm597_vm0 = vmmov (!%p201_p3), 0   ;;  %v367_v1 = vld [vmem:[%s701_s3] sm:$0xff] (!%p201_p3)  ;;  %v598_v2 = vmov (!%p201_p3), 0  }
   0x9   : > { %s712_s21 = smov (%p28_p4, %s710_s21), 0  ;;  %204 = sbr.rel (%p201_p3) target bundleno = 247 (0xf7), region = 36 }
   0xa   : > { %499 = vmatprep.subr.bf16.mxu0 (!%p201_p3), %v596_v0  ;;  %505 = vmatprep.subr.bf16.mxu1 (!%p201_p3), %v596_v0  ;;  %p252_p6 = scmp.lt.s32.totalorder (!%p201_p3), %s249_s22, 2  ;;  %p243_p7 = scmp.lt.s32.totalorder (!%p201_p3), %s578_s15, 2  ;;  %vm277_vm1 = vcmask (!%p201_p3), 1043456   ;;  %v490_v7 = vld [vmem:[%s700_s2 + $0x4] sm:$0xf] (!%p201_p3)  ;;  %vm273_vm2 = vcmask (!%p201_p3), 64512  }
   0xb   : > { %501 = vmatprep.mubr.msk.bf16.mxu0 (!%p201_p3), %vm597_vm0, %v596_v0  ;;  %507 = vmatprep.mubr.msk.bf16.mxu1 (!%p201_p3), %vm597_vm0, %v596_v0  ;;  %v269_v8 = vld [vmem:[%s700_s2] sm:$0xf] (!%p201_p3)  ;;  %p261_p8 = scmp.lt.s32.totalorder (!%p201_p3), %s578_s15, 1  ;;  %vm375_vm3 = vcmask (!%p201_p3), 125952  }
   0xc   : > { %555 = vset.pattern.permute.xlu0 (!%p201_p3), %v598_v2 }
   0xd   : > { %370 = vperm.xlu0 (!%p201_p3), %555, %v367_v1  }
  0x10   : > { %s714_s16 = smov (!%p241_p5, %s582_s16), 1  ;;  %s716_s22 = smov (!%p252_p6, %s249_s22), 2 }
  0x11   : > { %s511_s25 = smul.u32 3, %s714_s16 }
  0x12   : > { %s244_s26 = scalar_select %p243_p7, %s578_s15, 2 }
  0x13   : > { %s255_s27 = sadd.s32 %s511_s25, %s716_s22  ;;  %s718_s15 = smov (!%p261_p8, %s578_s15), 1 }
  0x14   : > { %s487_s28 = sshll.u32 %s255_s27, 2  ;;  %s246_s29 = sadd.s32 %s511_s25, %s244_s26 }
  0x15   : > { %s257_s6 = scalar_lea.vmem %s699_s1, %s487_s28  ;;  %s486_s7 = sshll.u32 %s246_s29, 2 }
  0x16   : > { %v270_v3 = vld [vmem:[%s257_s6] sm:$0xf]  ;;  %s248_s10 = scalar_lea.vmem %s698_s0, %s486_s7  ;;  %s488_s22 = sshll.u32 %s714_s16, 1 }
  0x17   : > { %v279_v4 = vsel %vm277_vm1, %v270_v3, 0  ;;  %v268_v5 = vld [vmem:[%s248_s10] sm:$0xf]  ;;  %s264_s23 = sadd.s32 %s488_s22, %s718_s15 }
  0x18   : > { %500 = vmatpush3.bf16.msra.mxu0 %v279_v4  ;;  %v325_v6 = vsel %vm277_vm1, %v268_v5, 0  ;;  %s489_s24 = sshll.u32 %s264_s23, 2 }
  0x19   : > { %506 = vmatpush3.bf16.msra.mxu1 %v325_v6  ;;  %s266_s27 = scalar_lea.vmem %s702_s4, %s489_s24 }
  0x1b   : > { %502 = vmatmul.mubr.msk.bf16.vlgmr.msra.gmra.mrb[0].mxu0 %vm273_vm2, %v490_v7 }
  0x1c   : > { %508 = vmatmul.mubr.msk.bf16.vlgmr.msra.gmra.mrb[0].mxu1 %vm273_vm2, %v269_v8 }
  0x8c   : > { %v371_v10 = vpop.permute.xlu0 %370 }
  0xee   : > { %v315_v9 = vpop.f32.mrb[0].mxu0 }
  0xef   : > { %v361_v11 = vpop.f32.mrb[0].mxu1  ;;  %v503_v12 = vpop.f32.mrb[1].mxu0 }
  0xf0   : > { %v362_v13 = vadd.f32 %v361_v11, %v315_v9  ;;  %v509_v14 = vpop.f32.mrb[1].mxu1  ;;  %v318_v15 = vpop.f32.mrb[2].mxu0 }
  0xf1   : > { %v364_v16 = vpop.f32.mrb[2].mxu1  ;;  %v504_v17 = vpop.f32.mrb[3].mxu0 }
  0xf2   : > { %v373_v18 = vadd.f32 %v371_v10, %v362_v13  ;;  %v510_v19 = vpop.f32.mrb[3].mxu1 }
  0xf4   : > { %v374_v20 = vpack.c.bf16 %v373_v18, %v373_v18 }
  0xf6   : > { %376 = vst.msk [vmem:[%s266_s27] sm:$0xf] %vm375_vm3, %v374_v20 }
  0xf7 PF: > { %s14_s19 = sadd.s32 1, %s594_s19   ;;  %s703_s15 = smov %s586_s17 }
  0xf8   : > { %p11_p9 = scmp.ge.s32.totalorder %s14_s19, 6   ;;  %s704_s16 = smov %s590_s18 }
  0xf9   : > { %s705_s17 = smov %s708_s20  ;;  %s706_s18 = smov %s712_s21 }
  0xfa   :  { %13 = sbr.rel (!%p11_p9) target bundleno = 3 (0x3), region = 70 }

// kernel: _lambda_.30
= control target key start
LH: loop header
LB: loop body
LE: loop exit
PB: predicated region body
PF: predicated region fallthrough
CT: control target
= control target key end

     0   :  { %s759_s15 = smov 0   ;;  %s761_s16 = smov 0   ;;  %s851_s0 = inlined_call_operand.vmem [shape: bf16[2,3,8,20], index: 0, kind: input, shape index: {}, may-alias: {0,1}]   ;;  %s852_s1 = inlined_call_operand.vmem [shape: bf16[2,3,8,20], index: 1, kind: input, shape index: {}, may-alias: {0,1}]   ;;  %s853_s2 = inlined_call_operand.vmem [shape: bf16[4,8,8], index: 2, kind: input, shape index: {}]   ;;  %s854_s3 = inlined_call_operand.vmem [shape: f32[8,1], index: 3, kind: input, shape index: {}]   ;;  %s855_s4 = inlined_call_operand.vmem [shape: bf16[2,2,8,16], index: 4, kind: output, shape index: {}]  }
   0x1   :  { %s763_s17 = smov 0   ;;  %s765_s18 = smov 0  }
   0x2   :  { %s767_s19 = smov 0  }
   0x3 LB: > { %s23_s20 = sadd.s32 1, %s720_s17  ;;  %s26_s21 = sadd.s32 1, %s724_s18  ;;  %s728_s19 = sphi %s767_s19, %s14_s19   ;;  %s724_s18 = sphi %s765_s18, %s859_s18   ;;  %s720_s17 = sphi %s763_s17, %s858_s17   ;;  %s716_s16 = sphi %s761_s16, %s857_s16   ;;  %s712_s15 = sphi %s759_s15, %s856_s15  }
   0x4   : > { %p24_p0 = scmp.ge.s32.totalorder %s23_s20, 2  ;;  %p593_p1 = scmp.ge.s32.totalorder %s728_s19, 1 }
   0x5   : > { %p200_p2 = scmp.lt.s32.totalorder %s728_s19, 5 }
   0x6   : > { %s861_s20 = smov (%p24_p0, %s23_s20), 0  ;;  %s863_s21 = smov (!%p24_p0, %s26_s21), %s724_s18 }
   0x7   : > { %p201_p3 = pnand %p593_p1, %p200_p2  ;;  %p28_p4 = scmp.ge.s32.totalorder %s863_s21, 2 }
   0x8   : > { %p241_p5 = scmp.lt.s32.totalorder (!%p201_p3), %s716_s16, 1  ;;  %p243_p6 = scmp.lt.s32.totalorder (!%p201_p3), %s712_s15, 2  ;;  %v730_v0 = vmov (!%p201_p3), 0.0   ;;  %vm731_vm0 = vmmov (!%p201_p3), 0   ;;  %vm281_vm1 = vcmask (!%p201_p3), 1043456   ;;  %vm277_vm2 = vcmask (!%p201_p3), 64512  }
   0x9   : > { %s865_s21 = smov (%p28_p4, %s863_s21), 0  ;;  %204 = sbr.rel (%p201_p3) target bundleno = 374 (0x176), region = 36 }
   0xa   : > { %s249_s22 = sadd.s32 (!%p201_p3), 1, %s712_s15  ;;  %617 = vmatprep.subr.bf16.mxu0 (!%p201_p3), %v730_v0  ;;  %623 = vmatprep.subr.bf16.mxu1 (!%p201_p3), %v730_v0  ;;  %v269_v4 = vld [vmem:[%s853_s2] sm:$0xf] (!%p201_p3)  ;;  %s732_s9 = smov (!%p201_p3), 124   ;;  %v733_v6 = vmov (!%p201_p3), 0   ;;  %vm483_vm3 = vcmask (!%p201_p3), 125952  }
   0xb   : > { %619 = vmatprep.mubr.msk.bf16.mxu0 (!%p201_p3), %vm731_vm0, %v730_v0  ;;  %625 = vmatprep.mubr.msk.bf16.mxu1 (!%p201_p3), %vm731_vm0, %v730_v0  ;;  %p252_p7 = scmp.lt.s32.totalorder (!%p201_p3), %s249_s22, 2  ;;  %v475_v5 = vld [vmem:[%s854_s3] sm:$0xff] (!%p201_p3)  ;;  %v604_v15 = vld [vmem:[%s853_s2 + $0xc] sm:$0xf] (!%p201_p3)  ;;  %v602_v16 = vld [vmem:[%s853_s2 + $0x8] sm:$0xf] (!%p201_p3) }
   0xc   : > { %686 = vset.pattern.permute.xlu1 (!%p201_p3), %v733_v6  ;;  %687 = vset.pattern.permute.xlu0 (!%p201_p3), %v733_v6  ;;  %v598_v11 = vld [vmem:[%s853_s2 + $0x4] sm:$0xf] (!%p201_p3)  ;;  %p261_p8 = scmp.lt.s32.totalorder (!%p201_p3), %s712_s15, 1 }
   0xd   : > { %478 = vperm.xlu1 (!%p201_p3), %686, %v475_v5  }
  0x10   : > { %s867_s16 = smov (!%p241_p5, %s716_s16), 1  ;;  %s869_s22 = smov (!%p252_p7, %s249_s22), 2 }
  0x11   : > { %s244_s23 = scalar_select %p243_p6, %s712_s15, 2 }
  0x12   : > { %s641_s24 = smul.u32 3, %s867_s16  ;;  %s871_s15 = smov (!%p261_p8, %s712_s15), 1 }
  0x13   : > { %s596_s27 = sshll.u32 %s867_s16, 1 }
  0x14   : > { %s246_s25 = sadd.s32 %s641_s24, %s244_s23  ;;  %s255_s30 = sadd.s32 %s641_s24, %s869_s22 }
  0x15   : > { %s594_s26 = sshll.u32 %s246_s25, 2  ;;  %s595_s10 = sshll.u32 %s255_s30, 2 }
  0x16   : > { %s248_s29 = scalar_lea.vmem %s851_s0, %s594_s26  ;;  %s257_s13 = scalar_lea.vmem %s852_s1, %s595_s10 }
  0x17   : > { %v268_v1 = vld [vmem:[%s248_s29] sm:$0xf]  ;;  %s264_s28 = sadd.s32 %s596_s27, %s871_s15 }
  0x18   : > { %v599_v2 = vcombine.low %v268_v1, %v268_v1  ;;  %v329_v3 = vsel %vm281_vm1, %v268_v1, 0  ;;  %v371_v7 = vld [vmem:[%s257_s13] sm:$0xf]  ;;  %s597_s29 = sshll.u32 %s264_s28, 2 }
  0x19   : > { %624 = vmatpush3.bf16.msra.mxu1 %v329_v3  ;;  %v605_v8 = vcombine.low %v371_v7, %v371_v7  ;;  %v378_v12 = vsel %vm281_vm1, %v371_v7, 0  ;;  %s266_s6 = scalar_lea.vmem %s855_s4, %s597_s29 }
  0x1a   : > { %275 = vrot.lane.b32.xlu0 %v599_v2, %s732_s9  ;;  %635 = vmatprep.subr.bf16.mxu1 %v730_v0 }
  0x1c   : > { %626 = vmatmul.mubr.msk.bf16.vlgmr.msra.gmra.mrb[0].mxu1 %vm277_vm2, %v269_v4 }
  0x1d   : > { %637 = vmatprep.mubr.msk.bf16.mxu1 %vm731_vm0, %v730_v0 }
  0x1e   : > { %426 = vrot.lane.b32.xlu0 %v605_v8, %s732_s9 }
  0x8c   : > { %v276_v9 = vpop.permute.xlu0 %275  ;;  %v479_v34 = vpop.permute.xlu1 %478 }
  0x8d   : > { %v283_v10 = vsel %vm281_vm1, %v276_v9, 0 }
  0x8e   : > { %618 = vmatpush3.bf16.msra.mxu0 %v283_v10 }
  0x8f   : > { %629 = vmatprep.subr.bf16.mxu0 %v730_v0 }
  0x90   : > { %v427_v13 = vpop.permute.xlu0 %426 }
  0x91   : > { %620 = vmatmul.mubr.msk.bf16.vlgmr.msra.gmra.mrb[0].mxu0 %vm277_vm2, %v598_v11  ;;  %v432_v14 = vsel %vm281_vm1, %v427_v13, 0 }
  0x92   : > { %630 = vmatpush3.bf16.msra.mxu0 %v378_v12  ;;  %631 = vmatprep.mubr.msk.bf16.mxu0 %vm731_vm0, %v730_v0 }
  0x93   : > { %636 = vmatpush3.bf16.msra.mxu1 %v432_v14 }
  0x96   : > { %638 = vmatmul.mubr.msk.bf16.vlgmr.msra.gmra.mrb[4].mxu1 %vm277_vm2, %v604_v15 }
  0x99   : > { %632 = vmatmul.mubr.msk.bf16.vlgmr.msra.gmra.mrb[4].mxu0 %vm277_vm2, %v602_v16 }
  0xef   : > { %v365_v17 = vpop.f32.mrb[0].mxu1 }
  0xf0   : > { %v627_v18 = vpop.f32.mrb[1].mxu1 }
  0xf1   : > { %v368_v19 = vpop.f32.mrb[2].mxu1 }
  0xf2   : > { %v628_v20 = vpop.f32.mrb[3].mxu1 }
 0x164   : > { %v319_v21 = vpop.f32.mrb[0].mxu0 }
 0x165   : > { %v366_v22 = vadd.f32 %v365_v17, %v319_v21  ;;  %v621_v23 = vpop.f32.mrb[1].mxu0 }
 0x166   : > { %v322_v24 = vpop.f32.mrb[2].mxu0 }
 0x167   : > { %v622_v25 = vpop.f32.mrb[3].mxu0 }
 0x169   : > { %v468_v26 = vpop.f32.mrb[4].mxu1 }
 0x16a   : > { %v639_v27 = vpop.f32.mrb[5].mxu1 }
 0x16b   : > { %v471_v28 = vpop.f32.mrb[6].mxu1 }
 0x16c   : > { %v414_v29 = vpop.f32.mrb[4].mxu0  ;;  %v640_v30 = vpop.f32.mrb[7].mxu1 }
 0x16d   : > { %v420_v31 = vadd.f32 %v414_v29, %v366_v22  ;;  %v633_v32 = vpop.f32.mrb[5].mxu0 }
 0x16e   : > { %v417_v33 = vpop.f32.mrb[6].mxu0 }
 0x16f   : > { %v474_v35 = vadd.f32 %v468_v26, %v420_v31  ;;  %v634_v36 = vpop.f32.mrb[7].mxu0 }
 0x171   : > { %v481_v37 = vadd.f32 %v479_v34, %v474_v35 }
 0x173   : > { %v482_v38 = vpack.c.bf16 %v481_v37, %v481_v37 }
 0x175   : > { %484 = vst.msk [vmem:[%s266_s6] sm:$0xf] %vm483_vm3, %v482_v38 }
 0x176 PF: > { %s14_s19 = sadd.s32 1, %s728_s19   ;;  %s856_s15 = smov %s720_s17 }
 0x177   : > { %p11_p9 = scmp.ge.s32.totalorder %s14_s19, 6   ;;  %s857_s16 = smov %s724_s18 }
 0x178   : > { %s858_s17 = smov %s861_s20  ;;  %s859_s18 = smov %s865_s21 }
 0x179   :  { %13 = sbr.rel (!%p11_p9) target bundleno = 3 (0x3), region = 72 }

// kernel: _lambda_.27
= control target key start
LH: loop header
LB: loop body
LE: loop exit
PB: predicated region body
PF: predicated region fallthrough
CT: control target
= control target key end

     0   :  { %s670_s12 = smov 0   ;;  %s672_s13 = smov 0   ;;  %s755_s0 = inlined_call_operand.vmem [shape: bf16[2,2,8,25], index: 0, kind: input, shape index: {}]   ;;  %s756_s1 = inlined_call_operand.vmem [shape: bf16[4,8,8], index: 1, kind: input, shape index: {}]   ;;  %s757_s2 = inlined_call_operand.vmem [shape: f32[8,1], index: 2, kind: input, shape index: {}]   ;;  %s758_s3 = inlined_call_operand.vmem [shape: bf16[2,2,8,19], index: 3, kind: output, shape index: {}]  }
   0x1   :  { %s674_s14 = smov 0   ;;  %s676_s15 = smov 0  }
   0x2   :  { %s678_s16 = smov 0  }
   0x3 LB: > { %s22_s17 = sadd.s32 1, %s634_s14  ;;  %s25_s18 = sadd.s32 1, %s638_s15  ;;  %s642_s16 = sphi %s678_s16, %s13_s16   ;;  %s638_s15 = sphi %s676_s15, %s762_s15   ;;  %s634_s14 = sphi %s674_s14, %s761_s14   ;;  %s630_s13 = sphi %s672_s13, %s760_s13   ;;  %s626_s12 = sphi %s670_s12, %s759_s12  }
   0x4   : > { %p23_p0 = scmp.ge.s32.totalorder %s22_s17, 2  ;;  %p508_p1 = scmp.ge.s32.totalorder %s642_s16, 1 }
   0x5   : > { %p156_p2 = scmp.lt.s32.totalorder %s642_s16, 5 }
   0x6   : > { %s764_s17 = smov (%p23_p0, %s22_s17), 0  ;;  %s766_s18 = smov (!%p23_p0, %s25_s18), %s638_s15 }
   0x7   : > { %p157_p3 = pnand %p508_p1, %p156_p2  ;;  %p27_p4 = scmp.ge.s32.totalorder %s766_s18, 2 }
   0x8   : > { %p186_p5 = scmp.lt.s32.totalorder (!%p157_p3), %s630_s13, 1  ;;  %p188_p6 = scmp.lt.s32.totalorder (!%p157_p3), %s626_s12, 1  ;;  %v644_v0 = vmov (!%p157_p3), 0.0   ;;  %vm645_vm0 = vmmov (!%p157_p3), 0   ;;  %vm216_vm1 = vcmask (!%p157_p3), 1043456   ;;  %vm212_vm2 = vcmask (!%p157_p3), 64512  }
   0x9   : > { %s768_s18 = smov (%p27_p4, %s766_s18), 0  ;;  %160 = sbr.rel (%p157_p3) target bundleno = 372 (0x174), region = 32 }
   0xa   : > { %531 = vmatprep.subr.bf16.mxu0 (!%p157_p3), %v644_v0  ;;  %537 = vmatprep.subr.bf16.mxu1 (!%p157_p3), %v644_v0  ;;  %v204_v4 = vld [vmem:[%s756_s1] sm:$0xf] (!%p157_p3)  ;;  %s646_s27 = smov (!%p157_p3), 127   ;;  %s647_s28 = smov (!%p157_p3), 122   ;;  %v648_v5 = vmov (!%p157_p3), 0   ;;  %vm416_vm3 = vcmask (!%p157_p3), 150528  }
   0xb   : > { %533 = vmatprep.mubr.msk.bf16.mxu0 (!%p157_p3), %vm645_vm0, %v644_v0  ;;  %539 = vmatprep.mubr.msk.bf16.mxu1 (!%p157_p3), %vm645_vm0, %v644_v0  ;;  %v408_v6 = vld [vmem:[%s757_s2] sm:$0xff] (!%p157_p3)  ;;  %s649_s4 = smov (!%p157_p3), 123   ;;  %v519_v12 = vld [vmem:[%s756_s1 + $0xc] sm:$0xf] (!%p157_p3)  ;;  %v517_v15 = vld [vmem:[%s756_s1 + $0x8] sm:$0xf] (!%p157_p3) }
   0xc   : > { %601 = vset.pattern.permute.xlu1 (!%p157_p3), %v648_v5  ;;  %602 = vset.pattern.permute.xlu0 (!%p157_p3), %v648_v5  ;;  %v513_v11 = vld [vmem:[%s756_s1 + $0x4] sm:$0xf] (!%p157_p3) }
  0x10   : > { %s770_s13 = smov (!%p186_p5, %s630_s13), 1  ;;  %s772_s12 = smov (!%p188_p6, %s626_s12), 1 }
  0x11   : > { %s509_s19 = sshll.u32 %s770_s13, 1 }
  0x12   : > { %s702_s20 = sadd.s32 %s509_s19, %s772_s12 }
  0x13   : > { %s510_s21 = sshll.u32 %s702_s20, 2 }
  0x14   : > { %s193_s24 = scalar_lea.vmem %s755_s0, %s510_s21  ;;  %s201_s13 = scalar_lea.vmem %s758_s3, %s510_s21 }
  0x15   : > { %v203_v1 = vld [vmem:[%s193_s24] sm:$0xf] }
  0x16   : > { %v514_v2 = vcombine.low %v203_v1, %v203_v1  ;;  %v264_v3 = vsel %vm216_vm1, %v203_v1, 0 }
  0x17   : > { %538 = vmatpush3.bf16.msra.mxu1 %v264_v3 }
  0x18   : > { %210 = vrot.lane.b32.xlu0 %v514_v2, %s646_s27  ;;  %359 = vrot.lane.b32.xlu1 %v514_v2, %s647_s28 }
  0x19   : > { %549 = vmatprep.subr.bf16.mxu1 %v644_v0 }
  0x1a   : > { %540 = vmatmul.mubr.msk.bf16.vlgmr.msra.gmra.mrb[0].mxu1 %vm212_vm2, %v204_v4 }
  0x1b   : > { %551 = vmatprep.mubr.msk.bf16.mxu1 %vm645_vm0, %v644_v0 }
  0x1c   : > { %308 = vrot.lane.b32.xlu0 %v514_v2, %s649_s4  ;;  %411 = vperm.xlu1 %601, %v408_v6  }
  0x8a   : > { %v211_v7 = vpop.permute.xlu0 %210  ;;  %v360_v8 = vpop.permute.xlu1 %359 }
  0x8b   : > { %v218_v9 = vsel %vm216_vm1, %v211_v7, 0  ;;  %v365_v10 = vsel %vm216_vm1, %v360_v8, 0 }
  0x8c   : > { %532 = vmatpush3.bf16.msra.mxu0 %v218_v9  ;;  %550 = vmatpush3.bf16.msra.mxu1 %v365_v10 }
  0x8d   : > { %543 = vmatprep.subr.bf16.mxu0 %v644_v0 }
  0x8e   : > { %v309_v13 = vpop.permute.xlu0 %308 }
  0x8f   : > { %v314_v14 = vsel %vm216_vm1, %v309_v13, 0  ;;  %534 = vmatmul.mubr.msk.bf16.vlgmr.msra.gmra.mrb[0].mxu0 %vm212_vm2, %v513_v11  ;;  %552 = vmatmul.mubr.msk.bf16.vlgmr.msra.gmra.mrb[4].mxu1 %vm212_vm2, %v519_v12 }
  0x90   : > { %544 = vmatpush3.bf16.msra.mxu0 %v314_v14  ;;  %545 = vmatprep.mubr.msk.bf16.mxu0 %vm645_vm0, %v644_v0 }
  0x97   : > { %546 = vmatmul.mubr.msk.bf16.vlgmr.msra.gmra.mrb[4].mxu0 %vm212_vm2, %v517_v15 }
  0x9b   : > { %v412_v33 = vpop.permute.xlu1 %411 }
  0xed   : > { %v300_v16 = vpop.f32.mrb[0].mxu1 }
  0xee   : > { %v541_v17 = vpop.f32.mrb[1].mxu1 }
  0xef   : > { %v303_v18 = vpop.f32.mrb[2].mxu1 }
  0xf0   : > { %v542_v19 = vpop.f32.mrb[3].mxu1 }
 0x162   : > { %v254_v20 = vpop.f32.mrb[0].mxu0  ;;  %v401_v21 = vpop.f32.mrb[4].mxu1 }
 0x163   : > { %v301_v22 = vadd.f32 %v300_v16, %v254_v20  ;;  %v535_v23 = vpop.f32.mrb[1].mxu0  ;;  %v553_v24 = vpop.f32.mrb[5].mxu1 }
 0x164   : > { %v257_v25 = vpop.f32.mrb[2].mxu0  ;;  %v404_v26 = vpop.f32.mrb[6].mxu1 }
 0x165   : > { %v536_v27 = vpop.f32.mrb[3].mxu0  ;;  %v554_v28 = vpop.f32.mrb[7].mxu1 }
 0x16a   : > { %v350_v29 = vpop.f32.mrb[4].mxu0 }
 0x16b   : > { %v356_v30 = vadd.f32 %v350_v29, %v301_v22  ;;  %v547_v31 = vpop.f32.mrb[5].mxu0 }
 0x16c   : > { %v353_v32 = vpop.f32.mrb[6].mxu0 }
 0x16d   : > { %v407_v34 = vadd.f32 %v401_v21, %v356_v30  ;;  %v548_v35 = vpop.f32.mrb[7].mxu0 }
 0x16f   : > { %v414_v36 = vadd.f32 %v412_v33, %v407_v34 }
 0x171   : > { %v415_v37 = vpack.c.bf16 %v414_v36, %v414_v36 }
 0x173   : > { %417 = vst.msk [vmem:[%s201_s13] sm:$0xf] %vm416_vm3, %v415_v37 }
 0x174 PF: > { %s13_s16 = sadd.s32 1, %s642_s16   ;;  %s759_s12 = smov %s634_s14 }
 0x175   : > { %p10_p7 = scmp.ge.s32.totalorder %s13_s16, 6   ;;  %s760_s13 = smov %s638_s15 }
 0x176   : > { %s761_s14 = smov %s764_s17  ;;  %s762_s15 = smov %s768_s18 }
 0x177   :  { %12 = sbr.rel (!%p10_p7) target bundleno = 3 (0x3), region = 65 }

// kernel: _lambda_.29
= control target key start
LH: loop header
LB: loop body
LE: loop exit
PB: predicated region body
PF: predicated region fallthrough
CT: control target
= control target key end

     0   :  { %s759_s15 = smov 0   ;;  %s761_s16 = smov 0   ;;  %s851_s0 = inlined_call_operand.vmem [shape: bf16[2,3,8,20], index: 0, kind: input, shape index: {}, may-alias: {0,1}]   ;;  %s852_s1 = inlined_call_operand.vmem [shape: bf16[2,3,8,20], index: 1, kind: input, shape index: {}, may-alias: {0,1}]   ;;  %s853_s2 = inlined_call_operand.vmem [shape: bf16[4,8,8], index: 2, kind: input, shape index: {}]   ;;  %s854_s3 = inlined_call_operand.vmem [shape: f32[8,1], index: 3, kind: input, shape index: {}]   ;;  %s855_s4 = inlined_call_operand.vmem [shape: bf16[2,2,8,19], index: 4, kind: output, shape index: {}]  }
   0x1   :  { %s763_s17 = smov 0   ;;  %s765_s18 = smov 0  }
   0x2   :  { %s767_s19 = smov 0  }
   0x3 LB: > { %s23_s20 = sadd.s32 1, %s720_s17  ;;  %s26_s21 = sadd.s32 1, %s724_s18  ;;  %s728_s19 = sphi %s767_s19, %s14_s19   ;;  %s724_s18 = sphi %s765_s18, %s859_s18   ;;  %s720_s17 = sphi %s763_s17, %s858_s17   ;;  %s716_s16 = sphi %s761_s16, %s857_s16   ;;  %s712_s15 = sphi %s759_s15, %s856_s15  }
   0x4   : > { %p24_p0 = scmp.ge.s32.totalorder %s23_s20, 2  ;;  %p593_p1 = scmp.ge.s32.totalorder %s728_s19, 1 }
   0x5   : > { %p200_p2 = scmp.lt.s32.totalorder %s728_s19, 5 }
   0x6   : > { %s861_s20 = smov (%p24_p0, %s23_s20), 0  ;;  %s863_s21 = smov (!%p24_p0, %s26_s21), %s724_s18 }
   0x7   : > { %p201_p3 = pnand %p593_p1, %p200_p2  ;;  %p28_p4 = scmp.ge.s32.totalorder %s863_s21, 2 }
   0x8   : > { %p241_p5 = scmp.lt.s32.totalorder (!%p201_p3), %s716_s16, 1  ;;  %p243_p6 = scmp.lt.s32.totalorder (!%p201_p3), %s712_s15, 2  ;;  %v730_v0 = vmov (!%p201_p3), 0.0   ;;  %vm731_vm0 = vmmov (!%p201_p3), 0   ;;  %vm281_vm1 = vcmask (!%p201_p3), 1043456   ;;  %vm277_vm2 = vcmask (!%p201_p3), 64512  }
   0x9   : > { %s865_s21 = smov (%p28_p4, %s863_s21), 0  ;;  %204 = sbr.rel (%p201_p3) target bundleno = 374 (0x176), region = 36 }
   0xa   : > { %s249_s22 = sadd.s32 (!%p201_p3), 1, %s712_s15  ;;  %617 = vmatprep.subr.bf16.mxu0 (!%p201_p3), %v730_v0  ;;  %623 = vmatprep.subr.bf16.mxu1 (!%p201_p3), %v730_v0  ;;  %v269_v4 = vld [vmem:[%s853_s2] sm:$0xf] (!%p201_p3)  ;;  %s732_s9 = smov (!%p201_p3), 127   ;;  %v733_v6 = vmov (!%p201_p3), 0   ;;  %vm483_vm3 = vcmask (!%p201_p3), 150528  }
   0xb   : > { %619 = vmatprep.mubr.msk.bf16.mxu0 (!%p201_p3), %vm731_vm0, %v730_v0  ;;  %625 = vmatprep.mubr.msk.bf16.mxu1 (!%p201_p3), %vm731_vm0, %v730_v0  ;;  %p252_p7 = scmp.lt.s32.totalorder (!%p201_p3), %s249_s22, 2  ;;  %v475_v5 = vld [vmem:[%s854_s3] sm:$0xff] (!%p201_p3)  ;;  %v604_v15 = vld [vmem:[%s853_s2 + $0xc] sm:$0xf] (!%p201_p3)  ;;  %v602_v16 = vld [vmem:[%s853_s2 + $0x8] sm:$0xf] (!%p201_p3) }
   0xc   : > { %686 = vset.pattern.permute.xlu1 (!%p201_p3), %v733_v6  ;;  %687 = vset.pattern.permute.xlu0 (!%p201_p3), %v733_v6  ;;  %v598_v11 = vld [vmem:[%s853_s2 + $0x4] sm:$0xf] (!%p201_p3)  ;;  %p261_p8 = scmp.lt.s32.totalorder (!%p201_p3), %s712_s15, 1 }
   0xd   : > { %478 = vperm.xlu1 (!%p201_p3), %686, %v475_v5  }
  0x10   : > { %s867_s16 = smov (!%p241_p5, %s716_s16), 1  ;;  %s869_s22 = smov (!%p252_p7, %s249_s22), 2 }
  0x11   : > { %s244_s23 = scalar_select %p243_p6, %s712_s15, 2 }
  0x12   : > { %s641_s24 = smul.u32 3, %s867_s16  ;;  %s871_s15 = smov (!%p261_p8, %s712_s15), 1 }
  0x13   : > { %s596_s27 = sshll.u32 %s867_s16, 1 }
  0x14   : > { %s246_s25 = sadd.s32 %s641_s24, %s244_s23  ;;  %s255_s30 = sadd.s32 %s641_s24, %s869_s22 }
  0x15   : > { %s594_s26 = sshll.u32 %s246_s25, 2  ;;  %s595_s10 = sshll.u32 %s255_s30, 2 }
  0x16   : > { %s248_s29 = scalar_lea.vmem %s851_s0, %s594_s26  ;;  %s257_s13 = scalar_lea.vmem %s852_s1, %s595_s10 }
  0x17   : > { %v268_v1 = vld [vmem:[%s248_s29] sm:$0xf]  ;;  %s264_s28 = sadd.s32 %s596_s27, %s871_s15 }
  0x18   : > { %v599_v2 = vcombine.low %v268_v1, %v268_v1  ;;  %v329_v3 = vsel %vm281_vm1, %v268_v1, 0  ;;  %v371_v7 = vld [vmem:[%s257_s13] sm:$0xf]  ;;  %s597_s29 = sshll.u32 %s264_s28, 2 }
  0x19   : > { %624 = vmatpush3.bf16.msra.mxu1 %v329_v3  ;;  %v605_v8 = vcombine.low %v371_v7, %v371_v7  ;;  %v378_v12 = vsel %vm281_vm1, %v371_v7, 0  ;;  %s266_s6 = scalar_lea.vmem %s855_s4, %s597_s29 }
  0x1a   : > { %275 = vrot.lane.b32.xlu0 %v599_v2, %s732_s9  ;;  %635 = vmatprep.subr.bf16.mxu1 %v730_v0 }
  0x1c   : > { %626 = vmatmul.mubr.msk.bf16.vlgmr.msra.gmra.mrb[0].mxu1 %vm277_vm2, %v269_v4 }
  0x1d   : > { %637 = vmatprep.mubr.msk.bf16.mxu1 %vm731_vm0, %v730_v0 }
  0x1e   : > { %426 = vrot.lane.b32.xlu0 %v605_v8, %s732_s9 }
  0x8c   : > { %v276_v9 = vpop.permute.xlu0 %275  ;;  %v479_v34 = vpop.permute.xlu1 %478 }
  0x8d   : > { %v283_v10 = vsel %vm281_vm1, %v276_v9, 0 }
  0x8e   : > { %618 = vmatpush3.bf16.msra.mxu0 %v283_v10 }
  0x8f   : > { %629 = vmatprep.subr.bf16.mxu0 %v730_v0 }
  0x90   : > { %v427_v13 = vpop.permute.xlu0 %426 }
  0x91   : > { %620 = vmatmul.mubr.msk.bf16.vlgmr.msra.gmra.mrb[0].mxu0 %vm277_vm2, %v598_v11  ;;  %v432_v14 = vsel %vm281_vm1, %v427_v13, 0 }
  0x92   : > { %630 = vmatpush3.bf16.msra.mxu0 %v378_v12  ;;  %631 = vmatprep.mubr.msk.bf16.mxu0 %vm731_vm0, %v730_v0 }
  0x93   : > { %636 = vmatpush3.bf16.msra.mxu1 %v432_v14 }
  0x96   : > { %638 = vmatmul.mubr.msk.bf16.vlgmr.msra.gmra.mrb[4].mxu1 %vm277_vm2, %v604_v15 }
  0x99   : > { %632 = vmatmul.mubr.msk.bf16.vlgmr.msra.gmra.mrb[4].mxu0 %vm277_vm2, %v602_v16 }
  0xef   : > { %v365_v17 = vpop.f32.mrb[0].mxu1 }
  0xf0   : > { %v627_v18 = vpop.f32.mrb[1].mxu1 }
  0xf1   : > { %v368_v19 = vpop.f32.mrb[2].mxu1 }
  0xf2   : > { %v628_v20 = vpop.f32.mrb[3].mxu1 }
 0x164   : > { %v319_v21 = vpop.f32.mrb[0].mxu0 }
 0x165   : > { %v366_v22 = vadd.f32 %v365_v17, %v319_v21  ;;  %v621_v23 = vpop.f32.mrb[1].mxu0 }
 0x166   : > { %v322_v24 = vpop.f32.mrb[2].mxu0 }
 0x167   : > { %v622_v25 = vpop.f32.mrb[3].mxu0 }
 0x169   : > { %v468_v26 = vpop.f32.mrb[4].mxu1 }
 0x16a   : > { %v639_v27 = vpop.f32.mrb[5].mxu1 }
 0x16b   : > { %v471_v28 = vpop.f32.mrb[6].mxu1 }
 0x16c   : > { %v414_v29 = vpop.f32.mrb[4].mxu0  ;;  %v640_v30 = vpop.f32.mrb[7].mxu1 }
 0x16d   : > { %v420_v31 = vadd.f32 %v414_v29, %v366_v22  ;;  %v633_v32 = vpop.f32.mrb[5].mxu0 }
 0x16e   : > { %v417_v33 = vpop.f32.mrb[6].mxu0 }
 0x16f   : > { %v474_v35 = vadd.f32 %v468_v26, %v420_v31  ;;  %v634_v36 = vpop.f32.mrb[7].mxu0 }
 0x171   : > { %v481_v37 = vadd.f32 %v479_v34, %v474_v35 }
 0x173   : > { %v482_v38 = vpack.c.bf16 %v481_v37, %v481_v37 }
 0x175   : > { %484 = vst.msk [vmem:[%s266_s6] sm:$0xf] %vm483_vm3, %v482_v38 }
 0x176 PF: > { %s14_s19 = sadd.s32 1, %s728_s19   ;;  %s856_s15 = smov %s720_s17 }
 0x177   : > { %p11_p9 = scmp.ge.s32.totalorder %s14_s19, 6   ;;  %s857_s16 = smov %s724_s18 }
 0x178   : > { %s858_s17 = smov %s861_s20  ;;  %s859_s18 = smov %s865_s21 }
 0x179   :  { %13 = sbr.rel (!%p11_p9) target bundleno = 3 (0x3), region = 72 }

// kernel: _lambda_.31
= control target key start
LH: loop header
LB: loop body
LE: loop exit
PB: predicated region body
PF: predicated region fallthrough
CT: control target
= control target key end

     0   :  { %s1006_s15 = smov 0   ;;  %s1008_s16 = smov 0   ;;  %s1138_s0 = inlined_call_operand.vmem [shape: bf16[2,3,8,25], index: 0, kind: input, shape index: {}, may-alias: {0,1}]   ;;  %s1139_s1 = inlined_call_operand.vmem [shape: bf16[2,3,8,25], index: 1, kind: input, shape index: {}, may-alias: {0,1}]   ;;  %s1140_s2 = inlined_call_operand.vmem [shape: bf16[8,8,8], index: 2, kind: input, shape index: {}]   ;;  %s1141_s3 = inlined_call_operand.vmem [shape: f32[8,1], index: 3, kind: input, shape index: {}]   ;;  %s1142_s4 = inlined_call_operand.vmem [shape: bf16[2,2,8,19], index: 4, kind: output, shape index: {}]  }
   0x1   :  { %s1010_s17 = smov 0   ;;  %s1012_s18 = smov 0  }
   0x2   :  { %s1014_s19 = smov 0  }
   0x3 LB: > { %s23_s20 = sadd.s32 1, %s965_s17  ;;  %s26_s21 = sadd.s32 1, %s969_s18  ;;  %s973_s19 = sphi %s1014_s19, %s14_s19   ;;  %s969_s18 = sphi %s1012_s18, %s1146_s18   ;;  %s965_s17 = sphi %s1010_s17, %s1145_s17   ;;  %s961_s16 = sphi %s1008_s16, %s1144_s16   ;;  %s957_s15 = sphi %s1006_s15, %s1143_s15  }
   0x4   : > { %p24_p0 = scmp.ge.s32.totalorder %s23_s20, 2  ;;  %p797_p1 = scmp.ge.s32.totalorder %s973_s19, 1 }
   0x5   : > { %p200_p2 = scmp.lt.s32.totalorder %s973_s19, 5 }
   0x6   : > { %s1148_s20 = smov (%p24_p0, %s23_s20), 0  ;;  %s1150_s21 = smov (!%p24_p0, %s26_s21), %s969_s18 }
   0x7   : > { %p201_p3 = pnand %p797_p1, %p200_p2  ;;  %p28_p4 = scmp.ge.s32.totalorder %s1150_s21, 2 }
   0x8   : > { %p241_p5 = scmp.lt.s32.totalorder (!%p201_p3), %s961_s16, 1  ;;  %p243_p6 = scmp.lt.s32.totalorder (!%p201_p3), %s957_s15, 2  ;;  %v975_v0 = vmov (!%p201_p3), 0.0   ;;  %vm976_vm0 = vmmov (!%p201_p3), 0   ;;  %vm281_vm1 = vcmask (!%p201_p3), 1043456   ;;  %vm277_vm2 = vcmask (!%p201_p3), 64512  }
   0x9   : > { %s1152_s21 = smov (%p28_p4, %s1150_s21), 0  ;;  %204 = sbr.rel (%p201_p3) target bundleno = 390 (0x186), region = 36 }
   0xa   : > { %837 = vmatprep.subr.bf16.mxu0 (!%p201_p3), %v975_v0  ;;  %843 = vmatprep.subr.bf16.mxu1 (!%p201_p3), %v975_v0  ;;  %s249_s24 = sadd.s32 (!%p201_p3), 1, %s957_s15  ;;  %v269_v4 = vld [vmem:[%s1140_s2] sm:$0xf] (!%p201_p3)  ;;  %s977_s7 = smov (!%p201_p3), 127   ;;  %v980_v8 = vmov (!%p201_p3), 0   ;;  %vm687_vm3 = vcmask (!%p201_p3), 150528  }
   0xb   : > { %839 = vmatprep.mubr.msk.bf16.mxu0 (!%p201_p3), %vm976_vm0, %v975_v0  ;;  %845 = vmatprep.mubr.msk.bf16.mxu1 (!%p201_p3), %vm976_vm0, %v975_v0  ;;  %p252_p7 = scmp.lt.s32.totalorder (!%p201_p3), %s249_s24, 2  ;;  %s978_s8 = smov (!%p201_p3), 122   ;;  %v679_v7 = vld [vmem:[%s1141_s3] sm:$0xff] (!%p201_p3)  ;;  %v808_v14 = vld [vmem:[%s1140_s2 + $0xc] sm:$0xf] (!%p201_p3) }
   0xc   : > { %s979_s13 = smov (!%p201_p3), 123   ;;  %932 = vset.pattern.permute.xlu0 (!%p201_p3), %v980_v8  ;;  %v802_v13 = vld [vmem:[%s1140_s2 + $0x4] sm:$0xf] (!%p201_p3)  ;;  %v806_v20 = vld [vmem:[%s1140_s2 + $0x8] sm:$0xf] (!%p201_p3)  ;;  %p261_p8 = scmp.lt.s32.totalorder (!%p201_p3), %s957_s15, 1 }
   0xd   : > { %v812_v21 = vld [vmem:[%s1140_s2 + $0x14] sm:$0xf] (!%p201_p3)  ;;  %v810_v25 = vld [vmem:[%s1140_s2 + $0x10] sm:$0xf] (!%p201_p3)  ;;  %v817_v26 = vld [vmem:[%s1140_s2 + $0x1c] sm:$0xf] (!%p201_p3) }
   0xe   : > { %v815_v28 = vld [vmem:[%s1140_s2 + $0x18] sm:$0xf] (!%p201_p3) }
  0x10   : > { %s1154_s16 = smov (!%p241_p5, %s961_s16), 1  ;;  %s1156_s24 = smov (!%p252_p7, %s249_s24), 2 }
  0x11   : > { %s244_s22 = scalar_select %p243_p6, %s957_s15, 2 }
  0x12   : > { %s885_s23 = smul.u32 3, %s1154_s16  ;;  %s1158_s15 = smov (!%p261_p8, %s957_s15), 1 }
  0x13   : > { %s800_s11 = sshll.u32 %s1154_s16, 1 }
  0x14   : > { %s246_s25 = sadd.s32 %s885_s23, %s244_s22  ;;  %s255_s30 = sadd.s32 %s885_s23, %s1156_s24 }
  0x15   : > { %s798_s26 = sshll.u32 %s246_s25, 2  ;;  %s799_s9 = sshll.u32 %s255_s30, 2 }
  0x16   : > { %s248_s29 = scalar_lea.vmem %s1138_s0, %s798_s26  ;;  %s257_s12 = scalar_lea.vmem %s1139_s1, %s799_s9 }
  0x17   : > { %v268_v1 = vld [vmem:[%s248_s29] sm:$0xf] }
  0x18   : > { %v803_v2 = vcombine.low %v268_v1, %v268_v1  ;;  %v329_v3 = vsel %vm281_vm1, %v268_v1, 0  ;;  %v473_v5 = vld [vmem:[%s257_s12] sm:$0xf]  ;;  %s264_s12 = sadd.s32 %s800_s11, %s1158_s15 }
  0x19   : > { %844 = vmatpush3.bf16.msra.mxu1 %v329_v3  ;;  %v813_v6 = vcombine.low %v473_v5, %v473_v5  ;;  %v480_v22 = vsel %vm281_vm1, %v473_v5, 0 }
  0x1a   : > { %275 = vrot.lane.b32.xlu0 %v803_v2, %s977_s7  ;;  %424 = vrot.lane.b32.xlu1 %v803_v2, %s978_s8 }
  0x1b   : > { %855 = vmatprep.subr.bf16.mxu1 %v975_v0 }
  0x1c   : > { %846 = vmatmul.mubr.msk.bf16.vlgmr.msra.gmra.mrb[0].mxu1 %vm277_vm2, %v269_v4 }
  0x1d   : > { %857 = vmatprep.mubr.msk.bf16.mxu1 %vm976_vm0, %v975_v0 }
  0x1e   : > { %373 = vrot.lane.b32.xlu0 %v803_v2, %s979_s13  ;;  %528 = vrot.lane.b32.xlu1 %v813_v6, %s977_s7 }
  0x22   : > { %579 = vrot.lane.b32.xlu0 %v813_v6, %s979_s13  ;;  %630 = vrot.lane.b32.xlu1 %v813_v6, %s978_s8  ;;  %s801_s13 = sshll.u32 %s264_s12, 2 }
  0x23   : > { %s266_s23 = scalar_lea.vmem %s1142_s4, %s801_s13 }
  0x26   : > { %682 = vperm.xlu0 %932, %v679_v7  }
  0x8c   : > { %v276_v9 = vpop.permute.xlu0 %275  ;;  %v425_v10 = vpop.permute.xlu1 %424 }
  0x8d   : > { %v283_v11 = vsel %vm281_vm1, %v276_v9, 0  ;;  %v430_v12 = vsel %vm281_vm1, %v425_v10, 0 }
  0x8e   : > { %838 = vmatpush3.bf16.msra.mxu0 %v283_v11  ;;  %856 = vmatpush3.bf16.msra.mxu1 %v430_v12 }
  0x8f   : > { %849 = vmatprep.subr.bf16.mxu0 %v975_v0  ;;  %867 = vmatprep.subr.bf16.mxu1 %v975_v0 }
  0x90   : > { %v374_v15 = vpop.permute.xlu0 %373  ;;  %v529_v17 = vpop.permute.xlu1 %528 }
  0x91   : > { %v379_v16 = vsel %vm281_vm1, %v374_v15, 0  ;;  %840 = vmatmul.mubr.msk.bf16.vlgmr.msra.gmra.mrb[0].mxu0 %vm277_vm2, %v802_v13  ;;  %858 = vmatmul.mubr.msk.bf16.vlgmr.msra.gmra.mrb[4].mxu1 %vm277_vm2, %v808_v14  ;;  %v534_v18 = vsel %vm281_vm1, %v529_v17, 0 }
  0x92   : > { %850 = vmatpush3.bf16.msra.mxu0 %v379_v16  ;;  %851 = vmatprep.mubr.msk.bf16.mxu0 %vm976_vm0, %v975_v0 }
  0x93   : > { %861 = vmatprep.subr.bf16.mxu0 %v975_v0  ;;  %868 = vmatpush3.bf16.msra.mxu1 %v534_v18 }
  0x94   : > { %869 = vmatprep.mubr.msk.bf16.mxu1 %vm976_vm0, %v975_v0  ;;  %879 = vmatprep.subr.bf16.mxu1 %v975_v0  ;;  %v631_v19 = vpop.permute.xlu1 %630  ;;  %v580_v24 = vpop.permute.xlu0 %579 }
  0x95   : > { %v636_v23 = vsel %vm281_vm1, %v631_v19, 0  ;;  %v585_v27 = vsel %vm281_vm1, %v580_v24, 0 }
  0x99   : > { %852 = vmatmul.mubr.msk.bf16.vlgmr.msra.gmra.mrb[4].mxu0 %vm277_vm2, %v806_v20  ;;  %870 = vmatmul.mubr.msk.bf16.vlgmr.msra.gmra.mrb[8].mxu1 %vm277_vm2, %v812_v21 }
  0x9a   : > { %862 = vmatpush3.bf16.msra.mxu0 %v480_v22  ;;  %863 = vmatprep.mubr.msk.bf16.mxu0 %vm976_vm0, %v975_v0 }
  0x9b   : > { %873 = vmatprep.subr.bf16.mxu0 %v975_v0  ;;  %880 = vmatpush3.bf16.msra.mxu1 %v636_v23 }
  0x9c   : > { %881 = vmatprep.mubr.msk.bf16.mxu1 %vm976_vm0, %v975_v0 }
  0xa1   : > { %864 = vmatmul.mubr.msk.bf16.vlgmr.msra.gmra.mrb[8].mxu0 %vm277_vm2, %v810_v25  ;;  %882 = vmatmul.mubr.msk.bf16.vlgmr.msra.gmra.mrb[12].mxu1 %vm277_vm2, %v817_v26 }
  0xa2   : > { %874 = vmatpush3.bf16.msra.mxu0 %v585_v27  ;;  %875 = vmatprep.mubr.msk.bf16.mxu0 %vm976_vm0, %v975_v0 }
  0xa5   : > { %v683_v2 = vpop.permute.xlu0 %682 }
  0xa9   : > { %876 = vmatmul.mubr.msk.bf16.vlgmr.msra.gmra.mrb[12].mxu0 %vm277_vm2, %v815_v28 }
  0xef   : > { %v365_v29 = vpop.f32.mrb[0].mxu1 }
  0xf0   : > { %v847_v30 = vpop.f32.mrb[1].mxu1 }
  0xf1   : > { %v368_v31 = vpop.f32.mrb[2].mxu1 }
  0xf2   : > { %v848_v32 = vpop.f32.mrb[3].mxu1 }
 0x164   : > { %v319_v33 = vpop.f32.mrb[0].mxu0  ;;  %v466_v34 = vpop.f32.mrb[4].mxu1 }
 0x165   : > { %v366_v35 = vadd.f32 %v365_v29, %v319_v33  ;;  %v841_v36 = vpop.f32.mrb[1].mxu0  ;;  %v859_v37 = vpop.f32.mrb[5].mxu1 }
 0x166   : > { %v322_v38 = vpop.f32.mrb[2].mxu0  ;;  %v469_v39 = vpop.f32.mrb[6].mxu1 }
 0x167   : > { %v842_v40 = vpop.f32.mrb[3].mxu0  ;;  %v860_v41 = vpop.f32.mrb[7].mxu1 }
 0x16c   : > { %v415_v42 = vpop.f32.mrb[4].mxu0  ;;  %v570_v43 = vpop.f32.mrb[8].mxu1 }
 0x16d   : > { %v421_v44 = vadd.f32 %v415_v42, %v366_v35  ;;  %v853_v45 = vpop.f32.mrb[5].mxu0  ;;  %v871_v46 = vpop.f32.mrb[9].mxu1 }
 0x16e   : > { %v418_v47 = vpop.f32.mrb[6].mxu0  ;;  %v573_v48 = vpop.f32.mrb[10].mxu1 }
 0x16f   : > { %v472_v49 = vadd.f32 %v466_v34, %v421_v44  ;;  %v854_v50 = vpop.f32.mrb[7].mxu0  ;;  %v872_v51 = vpop.f32.mrb[11].mxu1 }
 0x174   : > { %v516_v52 = vpop.f32.mrb[8].mxu0  ;;  %v672_v53 = vpop.f32.mrb[12].mxu1 }
 0x175   : > { %v522_v54 = vadd.f32 %v516_v52, %v472_v49  ;;  %v865_v55 = vpop.f32.mrb[9].mxu0  ;;  %v883_v56 = vpop.f32.mrb[13].mxu1 }
 0x176   : > { %v519_v57 = vpop.f32.mrb[10].mxu0  ;;  %v675_v58 = vpop.f32.mrb[14].mxu1 }
 0x177   : > { %v576_v59 = vadd.f32 %v570_v43, %v522_v54  ;;  %v866_v60 = vpop.f32.mrb[11].mxu0  ;;  %v884_v61 = vpop.f32.mrb[15].mxu1 }
 0x17c   : > { %v621_v62 = vpop.f32.mrb[12].mxu0 }
 0x17d   : > { %v627_v63 = vadd.f32 %v621_v62, %v576_v59  ;;  %v877_v0 = vpop.f32.mrb[13].mxu0 }
 0x17e   : > { %v624_v1 = vpop.f32.mrb[14].mxu0 }
 0x17f   : > { %v678_v3 = vadd.f32 %v672_v53, %v627_v63  ;;  %v878_v4 = vpop.f32.mrb[15].mxu0 }
 0x181   : > { %v685_v5 = vadd.f32 %v683_v2, %v678_v3 }
 0x183   : > { %v686_v6 = vpack.c.bf16 %v685_v5, %v685_v5 }
 0x185   : > { %688 = vst.msk [vmem:[%s266_s23] sm:$0xf] %vm687_vm3, %v686_v6 }
 0x186 PF: > { %s14_s19 = sadd.s32 1, %s973_s19   ;;  %s1143_s15 = smov %s965_s17 }
 0x187   : > { %p11_p9 = scmp.ge.s32.totalorder %s14_s19, 6   ;;  %s1144_s16 = smov %s969_s18 }
 0x188   : > { %s1145_s17 = smov %s1148_s20  ;;  %s1146_s18 = smov %s1152_s21 }
 0x189   :  { %13 = sbr.rel (!%p11_p9) target bundleno = 3 (0x3), region = 76 }

// kernel: _lambda_.25
= control target key start
LH: loop header
LB: loop body
LE: loop exit
PB: predicated region body
PF: predicated region fallthrough
CT: control target
= control target key end

     0   :  { %s543_s12 = smov 0   ;;  %s545_s13 = smov 0   ;;  %s610_s0 = inlined_call_operand.vmem [shape: bf16[2,2,8,20], index: 0, kind: input, shape index: {}]   ;;  %s611_s1 = inlined_call_operand.vmem [shape: bf16[2,8,8], index: 1, kind: input, shape index: {}]   ;;  %s612_s2 = inlined_call_operand.vmem [shape: f32[8,1], index: 2, kind: input, shape index: {}]   ;;  %s613_s3 = inlined_call_operand.vmem [shape: bf16[2,2,8,19], index: 3, kind: output, shape index: {}]  }
   0x1   :  { %s547_s14 = smov 0   ;;  %s549_s15 = smov 0  }
   0x2   :  { %s551_s16 = smov 0  }
   0x3 LB: > { %s22_s17 = sadd.s32 1, %s509_s14  ;;  %s25_s18 = sadd.s32 1, %s513_s15  ;;  %s517_s16 = sphi %s551_s16, %s13_s16   ;;  %s513_s15 = sphi %s549_s15, %s617_s15   ;;  %s509_s14 = sphi %s547_s14, %s616_s14   ;;  %s505_s13 = sphi %s545_s13, %s615_s13   ;;  %s501_s12 = sphi %s543_s12, %s614_s12  }
   0x4   : > { %p23_p0 = scmp.ge.s32.totalorder %s22_s17, 2  ;;  %p406_p1 = scmp.ge.s32.totalorder %s517_s16, 1 }
   0x5   : > { %p156_p2 = scmp.lt.s32.totalorder %s517_s16, 5 }
   0x6   : > { %s619_s17 = smov (%p23_p0, %s22_s17), 0  ;;  %s621_s18 = smov (!%p23_p0, %s25_s18), %s513_s15 }
   0x7   : > { %p157_p3 = pnand %p406_p1, %p156_p2  ;;  %p27_p4 = scmp.ge.s32.totalorder %s621_s18, 2 }
   0x8   : > { %p186_p5 = scmp.lt.s32.totalorder (!%p157_p3), %s505_s13, 1  ;;  %p188_p6 = scmp.lt.s32.totalorder (!%p157_p3), %s501_s12, 1  ;;  %v519_v0 = vmov (!%p157_p3), 0.0   ;;  %vm520_vm0 = vmmov (!%p157_p3), 0   ;;  %v521_v1 = vmov (!%p157_p3), 0   ;;  %vm216_vm1 = vcmask (!%p157_p3), 1043456  }
   0x9   : > { %s623_s18 = smov (%p27_p4, %s621_s18), 0  ;;  %160 = sbr.rel (%p157_p3) target bundleno = 362 (0x16a), region = 32 }
   0xa   : > { %427 = vmatprep.subr.bf16.mxu1 (!%p157_p3), %v519_v0  ;;  %421 = vmatprep.subr.bf16.mxu0 (!%p157_p3), %v519_v0  ;;  %v204_v5 = vld [vmem:[%s611_s1] sm:$0xf] (!%p157_p3)  ;;  %vm212_vm2 = vcmask (!%p157_p3), 64512   ;;  %s522_s27 = smov (!%p157_p3), 127   ;;  %v411_v9 = vld [vmem:[%s611_s1 + $0x4] sm:$0xf] (!%p157_p3) }
   0xb   : > { %429 = vmatprep.mubr.msk.bf16.mxu1 (!%p157_p3), %vm520_vm0, %v519_v0  ;;  %423 = vmatprep.mubr.msk.bf16.mxu0 (!%p157_p3), %vm520_vm0, %v519_v0  ;;  %v306_v6 = vld [vmem:[%s612_s2] sm:$0xff] (!%p157_p3)  ;;  %vm314_vm3 = vcmask (!%p157_p3), 150528  }
   0xc   : > { %477 = vset.pattern.permute.xlu0 (!%p157_p3), %v521_v1 }
  0x10   : > { %s625_s13 = smov (!%p186_p5, %s505_s13), 1  ;;  %s627_s12 = smov (!%p188_p6, %s501_s12), 1 }
  0x11   : > { %s407_s19 = sshll.u32 %s625_s13, 1 }
  0x12   : > { %s573_s20 = sadd.s32 %s407_s19, %s627_s12 }
  0x13   : > { %s408_s21 = sshll.u32 %s573_s20, 2 }
  0x14   : > { %s193_s24 = scalar_lea.vmem %s610_s0, %s408_s21  ;;  %s201_s7 = scalar_lea.vmem %s613_s3, %s408_s21 }
  0x15   : > { %v203_v2 = vld [vmem:[%s193_s24] sm:$0xf] }
  0x16   : > { %v412_v3 = vcombine.low %v203_v2, %v203_v2  ;;  %v264_v4 = vsel %vm216_vm1, %v203_v2, 0 }
  0x17   : > { %428 = vmatpush3.bf16.msra.mxu1 %v264_v4 }
  0x18   : > { %210 = vrot.lane.b32.xlu0 %v412_v3, %s522_s27 }
  0x1a   : > { %430 = vmatmul.mubr.msk.bf16.vlgmr.msra.gmra.mrb[0].mxu1 %vm212_vm2, %v204_v5 }
  0x1c   : > { %309 = vperm.xlu0 %477, %v306_v6  }
  0x8a   : > { %v211_v7 = vpop.permute.xlu0 %210 }
  0x8b   : > { %v218_v8 = vsel %vm216_vm1, %v211_v7, 0 }
  0x8c   : > { %422 = vmatpush3.bf16.msra.mxu0 %v218_v8 }
  0x8f   : > { %424 = vmatmul.mubr.msk.bf16.vlgmr.msra.gmra.mrb[0].mxu0 %vm212_vm2, %v411_v9 }
  0x9b   : > { %v310_v15 = vpop.permute.xlu0 %309 }
  0xed   : > { %v300_v10 = vpop.f32.mrb[0].mxu1 }
  0xee   : > { %v431_v11 = vpop.f32.mrb[1].mxu1 }
  0xef   : > { %v303_v12 = vpop.f32.mrb[2].mxu1 }
  0xf0   : > { %v432_v13 = vpop.f32.mrb[3].mxu1 }
 0x162   : > { %v254_v14 = vpop.f32.mrb[0].mxu0 }
 0x163   : > { %v301_v16 = vadd.f32 %v300_v10, %v254_v14  ;;  %v425_v17 = vpop.f32.mrb[1].mxu0 }
 0x164   : > { %v257_v18 = vpop.f32.mrb[2].mxu0 }
 0x165   : > { %v312_v19 = vadd.f32 %v310_v15, %v301_v16  ;;  %v426_v20 = vpop.f32.mrb[3].mxu0 }
 0x167   : > { %v313_v21 = vpack.c.bf16 %v312_v19, %v312_v19 }
 0x169   : > { %315 = vst.msk [vmem:[%s201_s7] sm:$0xf] %vm314_vm3, %v313_v21 }
 0x16a PF: > { %s13_s16 = sadd.s32 1, %s517_s16   ;;  %s614_s12 = smov %s509_s14 }
 0x16b   : > { %p10_p7 = scmp.ge.s32.totalorder %s13_s16, 6   ;;  %s615_s13 = smov %s513_s15 }
 0x16c   : > { %s616_s14 = smov %s619_s17  ;;  %s617_s15 = smov %s623_s18 }
 0x16d   :  { %12 = sbr.rel (!%p10_p7) target bundleno = 3 (0x3), region = 63 }

// kernel: _lambda_.32
= control target key start
LH: loop header
LB: loop body
LE: loop exit
PB: predicated region body
PF: predicated region fallthrough
CT: control target
= control target key end

     0   :  { %s475_s12 = smov 0   ;;  %s477_s13 = smov 0   ;;  %s532_s0 = inlined_call_operand.vmem [shape: bf16[2,4,8,64], index: 0, kind: input, shape index: {}]   ;;  %s533_s1 = inlined_call_operand.vmem [shape: bf16[1,4,8], index: 1, kind: input, shape index: {}]   ;;  %s534_s2 = inlined_call_operand.vmem [shape: f32[4,1], index: 2, kind: input, shape index: {}]   ;;  %s535_s3 = inlined_call_operand.vmem [shape: bf16[2,4,4,64], index: 3, kind: output, shape index: {}]  }
   0x1   :  { %s479_s14 = smov 0   ;;  %s481_s15 = smov 0  }
   0x2   :  { %s483_s16 = smov 0  }
   0x3 LB: > { %s22_s17 = sadd.s32 1, %s442_s14  ;;  %s25_s18 = sadd.s32 1, %s446_s15  ;;  %s450_s16 = sphi %s483_s16, %s13_s16   ;;  %s446_s15 = sphi %s481_s15, %s539_s15   ;;  %s442_s14 = sphi %s479_s14, %s538_s14   ;;  %s438_s13 = sphi %s477_s13, %s537_s13   ;;  %s434_s12 = sphi %s475_s12, %s536_s12  }
   0x4   : > { %p23_p0 = scmp.ge.s32.totalorder %s22_s17, 4  ;;  %p352_p1 = scmp.ge.s32.totalorder %s450_s16, 1 }
   0x5   : > { %p156_p2 = scmp.lt.s32.totalorder %s450_s16, 9 }
   0x6   : > { %s541_s17 = smov (%p23_p0, %s22_s17), 0  ;;  %s543_s18 = smov (!%p23_p0, %s25_s18), %s446_s15 }
   0x7   : > { %p157_p3 = pnand %p352_p1, %p156_p2  ;;  %p27_p4 = scmp.ge.s32.totalorder %s543_s18, 2 }
   0x8   : > { %p186_p5 = scmp.lt.s32.totalorder (!%p157_p3), %s438_s13, 1  ;;  %p188_p6 = scmp.lt.s32.totalorder (!%p157_p3), %s434_s12, 3  ;;  %v452_v0 = vmov (!%p157_p3), 0.0   ;;  %vm453_vm0 = vmmov (!%p157_p3), 0   ;;  %v205_v1 = vld [vmem:[%s534_s2] sm:$0xf] (!%p157_p3) }
   0x9   : > { %s545_s18 = smov (%p27_p4, %s543_s18), 0  ;;  %160 = sbr.rel (%p157_p3) target bundleno = 243 (0xf3), region = 32 }
   0xa   : > { %362 = vmatprep.subr.bf16.mxu0 (!%p157_p3), %v452_v0  ;;  %364 = vmatprep.mubr.msk.bf16.mxu0 (!%p157_p3), %vm453_vm0, %v452_v0  ;;  %v454_v2 = vmov (!%p157_p3), 0   ;;  %vm215_vm1 = vcmask (!%p157_p3), 1043456   ;;  %v204_v5 = vld [vmem:[%s533_s1] sm:$0x3] (!%p157_p3)  ;;  %vm211_vm2 = vcmask (!%p157_p3), 64512   ;;  %vm260_vm3 = vcmask (!%p157_p3), 517120  }
   0xb   : > { %411 = vset.pattern.permute.xlu0 (!%p157_p3), %v454_v2 }
   0xc   : > { %208 = vperm.xlu0 (!%p157_p3), %411, %v205_v1  }
  0x10   : > { %s547_s13 = smov (!%p186_p5, %s438_s13), 1  ;;  %s549_s12 = smov (!%p188_p6, %s434_s12), 3 }
  0x11   : > { %s353_s21 = sshll.u32 %s547_s13, 2 }
  0x12   : > { %s191_s22 = sadd.s32 %s353_s21, %s549_s12 }
  0x13   : > { %s354_s23 = sshll.u32 %s191_s22, 2  ;;  %s356_s29 = sshll.u32 %s191_s22, 1 }
  0x14   : > { %s193_s26 = scalar_lea.vmem %s532_s0, %s354_s23  ;;  %s201_s5 = scalar_lea.vmem %s535_s3, %s356_s29 }
  0x15   : > { %v203_v3 = vld [vmem:[%s193_s26] sm:$0xf] }
  0x16   : > { %v217_v4 = vsel %vm215_vm1, %v203_v3, 0 }
  0x17   : > { %363 = vmatpush3.bf16.msra.mxu0 %v217_v4 }
  0x1a   : > { %365 = vmatmul.mubr.msk.bf16.vlgmr.msra.gmra.mrb[0].mxu0 %vm211_vm2, %v204_v5 }
  0x8b   : > { %v209_v6 = vpop.permute.xlu0 %208 }
  0xed   : > { %v253_v7 = vpop.f32.mrb[0].mxu0 }
  0xee   : > { %v254_v8 = vadd.f32 %v253_v7, %v209_v6  ;;  %v366_v9 = vpop.f32.mrb[1].mxu0 }
  0xef   : > { %v256_v10 = vpop.f32.mrb[2].mxu0 }
  0xf0   : > { %v259_v11 = vpack.c.bf16 %v254_v8, %v254_v8  ;;  %v367_v12 = vpop.f32.mrb[3].mxu0 }
  0xf2   : > { %261 = vst.msk [vmem:[%s201_s5] sm:$0x3] %vm260_vm3, %v259_v11 }
  0xf3 PF: > { %s13_s16 = sadd.s32 1, %s450_s16   ;;  %s536_s12 = smov %s442_s14 }
  0xf4   : > { %p10_p7 = scmp.ge.s32.totalorder %s13_s16, 10   ;;  %s537_s13 = smov %s446_s15 }
  0xf5   : > { %s538_s14 = smov %s541_s17  ;;  %s539_s15 = smov %s545_s18 }
  0xf6   :  { %12 = sbr.rel (!%p10_p7) target bundleno = 3 (0x3), region = 62 }

// kernel: _lambda_.34
= control target key start
LH: loop header
LB: loop body
LE: loop exit
PB: predicated region body
PF: predicated region fallthrough
CT: control target
= control target key end

     0   :  { %s543_s12 = smov 0   ;;  %s545_s13 = smov 0   ;;  %s607_s0 = inlined_call_operand.vmem [shape: bf16[2,4,8,72], index: 0, kind: input, shape index: {}]   ;;  %s608_s1 = inlined_call_operand.vmem [shape: bf16[2,4,8], index: 1, kind: input, shape index: {}]   ;;  %s609_s2 = inlined_call_operand.vmem [shape: f32[4,1], index: 2, kind: input, shape index: {}]   ;;  %s610_s3 = inlined_call_operand.vmem [shape: bf16[2,4,4,64], index: 3, kind: output, shape index: {}]  }
   0x1   :  { %s547_s14 = smov 0   ;;  %s549_s15 = smov 0  }
   0x2   :  { %s551_s16 = smov 0  }
   0x3 LB: > { %s22_s17 = sadd.s32 1, %s509_s14  ;;  %s25_s18 = sadd.s32 1, %s513_s15  ;;  %s517_s16 = sphi %s551_s16, %s13_s16   ;;  %s513_s15 = sphi %s549_s15, %s614_s15   ;;  %s509_s14 = sphi %s547_s14, %s613_s14   ;;  %s505_s13 = sphi %s545_s13, %s612_s13   ;;  %s501_s12 = sphi %s543_s12, %s611_s12  }
   0x4   : > { %p23_p0 = scmp.ge.s32.totalorder %s22_s17, 4  ;;  %p406_p1 = scmp.ge.s32.totalorder %s517_s16, 1 }
   0x5   : > { %p156_p2 = scmp.lt.s32.totalorder %s517_s16, 9 }
   0x6   : > { %s616_s17 = smov (%p23_p0, %s22_s17), 0  ;;  %s618_s18 = smov (!%p23_p0, %s25_s18), %s513_s15 }
   0x7   : > { %p157_p3 = pnand %p406_p1, %p156_p2  ;;  %p27_p4 = scmp.ge.s32.totalorder %s618_s18, 2 }
   0x8   : > { %p186_p5 = scmp.lt.s32.totalorder (!%p157_p3), %s505_s13, 1  ;;  %p188_p6 = scmp.lt.s32.totalorder (!%p157_p3), %s501_s12, 3  ;;  %v519_v0 = vmov (!%p157_p3), 0.0   ;;  %vm520_vm0 = vmmov (!%p157_p3), 0   ;;  %v521_v1 = vmov (!%p157_p3), 0   ;;  %vm216_vm1 = vcmask (!%p157_p3), 1043456  }
   0x9   : > { %s620_s18 = smov (%p27_p4, %s618_s18), 0  ;;  %160 = sbr.rel (%p157_p3) target bundleno = 362 (0x16a), region = 32 }
   0xa   : > { %427 = vmatprep.subr.bf16.mxu1 (!%p157_p3), %v519_v0  ;;  %421 = vmatprep.subr.bf16.mxu0 (!%p157_p3), %v519_v0  ;;  %v204_v5 = vld [vmem:[%s608_s1] sm:$0x3] (!%p157_p3)  ;;  %vm212_vm2 = vcmask (!%p157_p3), 64512   ;;  %s522_s27 = smov (!%p157_p3), 120   ;;  %v411_v9 = vld [vmem:[%s608_s1 + $0x2] sm:$0x3] (!%p157_p3) }
   0xb   : > { %429 = vmatprep.mubr.msk.bf16.mxu1 (!%p157_p3), %vm520_vm0, %v519_v0  ;;  %423 = vmatprep.mubr.msk.bf16.mxu0 (!%p157_p3), %vm520_vm0, %v519_v0  ;;  %v306_v6 = vld [vmem:[%s609_s2] sm:$0xf] (!%p157_p3)  ;;  %vm314_vm3 = vcmask (!%p157_p3), 517120  }
   0xc   : > { %477 = vset.pattern.permute.xlu0 (!%p157_p3), %v521_v1 }
  0x10   : > { %s622_s13 = smov (!%p186_p5, %s505_s13), 1  ;;  %s624_s12 = smov (!%p188_p6, %s501_s12), 3 }
  0x11   : > { %s407_s19 = sshll.u32 %s622_s13, 2 }
  0x12   : > { %s573_s20 = sadd.s32 %s407_s19, %s624_s12 }
  0x13   : > { %s408_s21 = sshll.u32 %s573_s20, 2  ;;  %s410_s5 = sshll.u32 %s573_s20, 1 }
  0x14   : > { %s193_s24 = scalar_lea.vmem %s607_s0, %s408_s21  ;;  %s201_s8 = scalar_lea.vmem %s610_s3, %s410_s5 }
  0x15   : > { %v203_v2 = vld [vmem:[%s193_s24] sm:$0xf] }
  0x16   : > { %v412_v3 = vcombine.low %v203_v2, %v203_v2  ;;  %v264_v4 = vsel %vm216_vm1, %v203_v2, 0 }
  0x17   : > { %428 = vmatpush3.bf16.msra.mxu1 %v264_v4 }
  0x18   : > { %210 = vrot.lane.b32.xlu0 %v412_v3, %s522_s27 }
  0x1a   : > { %430 = vmatmul.mubr.msk.bf16.vlgmr.msra.gmra.mrb[0].mxu1 %vm212_vm2, %v204_v5 }
  0x1c   : > { %309 = vperm.xlu0 %477, %v306_v6  }
  0x8a   : > { %v211_v7 = vpop.permute.xlu0 %210 }
  0x8b   : > { %v218_v8 = vsel %vm216_vm1, %v211_v7, 0 }
  0x8c   : > { %422 = vmatpush3.bf16.msra.mxu0 %v218_v8 }
  0x8f   : > { %424 = vmatmul.mubr.msk.bf16.vlgmr.msra.gmra.mrb[0].mxu0 %vm212_vm2, %v411_v9 }
  0x9b   : > { %v310_v15 = vpop.permute.xlu0 %309 }
  0xed   : > { %v300_v10 = vpop.f32.mrb[0].mxu1 }
  0xee   : > { %v431_v11 = vpop.f32.mrb[1].mxu1 }
  0xef   : > { %v303_v12 = vpop.f32.mrb[2].mxu1 }
  0xf0   : > { %v432_v13 = vpop.f32.mrb[3].mxu1 }
 0x162   : > { %v254_v14 = vpop.f32.mrb[0].mxu0 }
 0x163   : > { %v301_v16 = vadd.f32 %v300_v10, %v254_v14  ;;  %v425_v17 = vpop.f32.mrb[1].mxu0 }
 0x164   : > { %v257_v18 = vpop.f32.mrb[2].mxu0 }
 0x165   : > { %v312_v19 = vadd.f32 %v310_v15, %v301_v16  ;;  %v426_v20 = vpop.f32.mrb[3].mxu0 }
 0x167   : > { %v313_v21 = vpack.c.bf16 %v312_v19, %v312_v19 }
 0x169   : > { %315 = vst.msk [vmem:[%s201_s8] sm:$0x3] %vm314_vm3, %v313_v21 }
 0x16a PF: > { %s13_s16 = sadd.s32 1, %s517_s16   ;;  %s611_s12 = smov %s509_s14 }
 0x16b   : > { %p10_p7 = scmp.ge.s32.totalorder %s13_s16, 10   ;;  %s612_s13 = smov %s513_s15 }
 0x16c   : > { %s613_s14 = smov %s616_s17  ;;  %s614_s15 = smov %s620_s18 }
 0x16d   :  { %12 = sbr.rel (!%p10_p7) target bundleno = 3 (0x3), region = 63 }

// kernel: _lambda_.36
= control target key start
LH: loop header
LB: loop body
LE: loop exit
PB: predicated region body
PF: predicated region fallthrough
CT: control target
= control target key end

     0   :  { %s624_s15 = smov 0   ;;  %s626_s16 = smov 0   ;;  %s698_s0 = inlined_call_operand.vmem [shape: bf16[2,5,8,64], index: 0, kind: input, shape index: {}, may-alias: {0,1}]   ;;  %s699_s1 = inlined_call_operand.vmem [shape: bf16[2,5,8,64], index: 1, kind: input, shape index: {}, may-alias: {0,1}]   ;;  %s700_s2 = inlined_call_operand.vmem [shape: bf16[2,4,8], index: 2, kind: input, shape index: {}]   ;;  %s701_s3 = inlined_call_operand.vmem [shape: f32[4,1], index: 3, kind: input, shape index: {}]   ;;  %s702_s4 = inlined_call_operand.vmem [shape: bf16[2,4,4,64], index: 4, kind: output, shape index: {}]  }
   0x1   :  { %s628_s17 = smov 0   ;;  %s630_s18 = smov 0  }
   0x2   :  { %s632_s19 = smov 0  }
   0x3 LB: > { %s23_s20 = sadd.s32 1, %s586_s17  ;;  %s26_s21 = sadd.s32 1, %s590_s18  ;;  %s594_s19 = sphi %s632_s19, %s14_s19   ;;  %s590_s18 = sphi %s630_s18, %s706_s18   ;;  %s586_s17 = sphi %s628_s17, %s705_s17   ;;  %s582_s16 = sphi %s626_s16, %s704_s16   ;;  %s578_s15 = sphi %s624_s15, %s703_s15  }
   0x4   : > { %p24_p0 = scmp.ge.s32.totalorder %s23_s20, 4  ;;  %p485_p1 = scmp.ge.s32.totalorder %s594_s19, 1 }
   0x5   : > { %p200_p2 = scmp.lt.s32.totalorder %s594_s19, 9 }
   0x6   : > { %s708_s20 = smov (%p24_p0, %s23_s20), 0  ;;  %s710_s21 = smov (!%p24_p0, %s26_s21), %s590_s18 }
   0x7   : > { %p201_p3 = pnand %p485_p1, %p200_p2  ;;  %p28_p4 = scmp.ge.s32.totalorder %s710_s21, 2 }
   0x8   : > { %p241_p5 = scmp.lt.s32.totalorder (!%p201_p3), %s582_s16, 1  ;;  %s249_s22 = sadd.s32 (!%p201_p3), 1, %s578_s15  ;;  %v596_v0 = vmov (!%p201_p3), 0.0   ;;  %vm597_vm0 = vmmov (!%p201_p3), 0   ;;  %v367_v1 = vld [vmem:[%s701_s3] sm:$0xf] (!%p201_p3) }
   0x9   : > { %s712_s21 = smov (%p28_p4, %s710_s21), 0  ;;  %204 = sbr.rel (%p201_p3) target bundleno = 247 (0xf7), region = 36 }
   0xa   : > { %499 = vmatprep.subr.bf16.mxu0 (!%p201_p3), %v596_v0  ;;  %505 = vmatprep.subr.bf16.mxu1 (!%p201_p3), %v596_v0  ;;  %p252_p6 = scmp.lt.s32.totalorder (!%p201_p3), %s249_s22, 4  ;;  %p243_p7 = scmp.lt.s32.totalorder (!%p201_p3), %s578_s15, 4  ;;  %v598_v2 = vmov (!%p201_p3), 0   ;;  %vm277_vm1 = vcmask (!%p201_p3), 1043456   ;;  %v490_v7 = vld [vmem:[%s700_s2 + $0x2] sm:$0x3] (!%p201_p3) }
   0xb   : > { %501 = vmatprep.mubr.msk.bf16.mxu0 (!%p201_p3), %vm597_vm0, %v596_v0  ;;  %507 = vmatprep.mubr.msk.bf16.mxu1 (!%p201_p3), %vm597_vm0, %v596_v0  ;;  %vm273_vm2 = vcmask (!%p201_p3), 64512   ;;  %v269_v8 = vld [vmem:[%s700_s2] sm:$0x3] (!%p201_p3)  ;;  %p261_p8 = scmp.lt.s32.totalorder (!%p201_p3), %s578_s15, 3  ;;  %vm375_vm3 = vcmask (!%p201_p3), 517120  }
   0xc   : > { %555 = vset.pattern.permute.xlu0 (!%p201_p3), %v598_v2 }
   0xd   : > { %370 = vperm.xlu0 (!%p201_p3), %555, %v367_v1  }
  0x10   : > { %s714_s16 = smov (!%p241_p5, %s582_s16), 1  ;;  %s716_s22 = smov (!%p252_p6, %s249_s22), 4 }
  0x11   : > { %s511_s25 = smul.u32 5, %s714_s16 }
  0x12   : > { %s244_s26 = scalar_select %p243_p7, %s578_s15, 4 }
  0x13   : > { %s255_s27 = sadd.s32 %s511_s25, %s716_s22  ;;  %s718_s15 = smov (!%p261_p8, %s578_s15), 3 }
  0x14   : > { %s487_s28 = sshll.u32 %s255_s27, 2  ;;  %s246_s29 = sadd.s32 %s511_s25, %s244_s26 }
  0x15   : > { %s257_s6 = scalar_lea.vmem %s699_s1, %s487_s28  ;;  %s486_s7 = sshll.u32 %s246_s29, 2 }
  0x16   : > { %v270_v3 = vld [vmem:[%s257_s6] sm:$0xf]  ;;  %s248_s10 = scalar_lea.vmem %s698_s0, %s486_s7  ;;  %s488_s22 = sshll.u32 %s714_s16, 2 }
  0x17   : > { %v279_v4 = vsel %vm277_vm1, %v270_v3, 0  ;;  %v268_v5 = vld [vmem:[%s248_s10] sm:$0xf]  ;;  %s264_s23 = sadd.s32 %s488_s22, %s718_s15 }
  0x18   : > { %500 = vmatpush3.bf16.msra.mxu0 %v279_v4  ;;  %v325_v6 = vsel %vm277_vm1, %v268_v5, 0  ;;  %s489_s24 = sshll.u32 %s264_s23, 1 }
  0x19   : > { %506 = vmatpush3.bf16.msra.mxu1 %v325_v6  ;;  %s266_s27 = scalar_lea.vmem %s702_s4, %s489_s24 }
  0x1b   : > { %502 = vmatmul.mubr.msk.bf16.vlgmr.msra.gmra.mrb[0].mxu0 %vm273_vm2, %v490_v7 }
  0x1c   : > { %508 = vmatmul.mubr.msk.bf16.vlgmr.msra.gmra.mrb[0].mxu1 %vm273_vm2, %v269_v8 }
  0x8c   : > { %v371_v10 = vpop.permute.xlu0 %370 }
  0xee   : > { %v315_v9 = vpop.f32.mrb[0].mxu0 }
  0xef   : > { %v361_v11 = vpop.f32.mrb[0].mxu1  ;;  %v503_v12 = vpop.f32.mrb[1].mxu0 }
  0xf0   : > { %v362_v13 = vadd.f32 %v361_v11, %v315_v9  ;;  %v509_v14 = vpop.f32.mrb[1].mxu1  ;;  %v318_v15 = vpop.f32.mrb[2].mxu0 }
  0xf1   : > { %v364_v16 = vpop.f32.mrb[2].mxu1  ;;  %v504_v17 = vpop.f32.mrb[3].mxu0 }
  0xf2   : > { %v373_v18 = vadd.f32 %v371_v10, %v362_v13  ;;  %v510_v19 = vpop.f32.mrb[3].mxu1 }
  0xf4   : > { %v374_v20 = vpack.c.bf16 %v373_v18, %v373_v18 }
  0xf6   : > { %376 = vst.msk [vmem:[%s266_s27] sm:$0x3] %vm375_vm3, %v374_v20 }
  0xf7 PF: > { %s14_s19 = sadd.s32 1, %s594_s19   ;;  %s703_s15 = smov %s586_s17 }
  0xf8   : > { %p11_p9 = scmp.ge.s32.totalorder %s14_s19, 10   ;;  %s704_s16 = smov %s590_s18 }
  0xf9   : > { %s705_s17 = smov %s708_s20  ;;  %s706_s18 = smov %s712_s21 }
  0xfa   :  { %13 = sbr.rel (!%p11_p9) target bundleno = 3 (0x3), region = 70 }

// kernel: _lambda_.38
= control target key start
LH: loop header
LB: loop body
LE: loop exit
PB: predicated region body
PF: predicated region fallthrough
CT: control target
= control target key end

     0   :  { %s759_s15 = smov 0   ;;  %s761_s16 = smov 0   ;;  %s851_s0 = inlined_call_operand.vmem [shape: bf16[2,5,8,72], index: 0, kind: input, shape index: {}, may-alias: {0,1}]   ;;  %s852_s1 = inlined_call_operand.vmem [shape: bf16[2,5,8,72], index: 1, kind: input, shape index: {}, may-alias: {0,1}]   ;;  %s853_s2 = inlined_call_operand.vmem [shape: bf16[4,4,8], index: 2, kind: input, shape index: {}]   ;;  %s854_s3 = inlined_call_operand.vmem [shape: f32[4,1], index: 3, kind: input, shape index: {}]   ;;  %s855_s4 = inlined_call_operand.vmem [shape: bf16[2,4,4,64], index: 4, kind: output, shape index: {}]  }
   0x1   :  { %s763_s17 = smov 0   ;;  %s765_s18 = smov 0  }
   0x2   :  { %s767_s19 = smov 0  }
   0x3 LB: > { %s23_s20 = sadd.s32 1, %s720_s17  ;;  %s26_s21 = sadd.s32 1, %s724_s18  ;;  %s728_s19 = sphi %s767_s19, %s14_s19   ;;  %s724_s18 = sphi %s765_s18, %s859_s18   ;;  %s720_s17 = sphi %s763_s17, %s858_s17   ;;  %s716_s16 = sphi %s761_s16, %s857_s16   ;;  %s712_s15 = sphi %s759_s15, %s856_s15  }
   0x4   : > { %p24_p0 = scmp.ge.s32.totalorder %s23_s20, 4  ;;  %p593_p1 = scmp.ge.s32.totalorder %s728_s19, 1 }
   0x5   : > { %p200_p2 = scmp.lt.s32.totalorder %s728_s19, 9 }
   0x6   : > { %s861_s20 = smov (%p24_p0, %s23_s20), 0  ;;  %s863_s21 = smov (!%p24_p0, %s26_s21), %s724_s18 }
   0x7   : > { %p201_p3 = pnand %p593_p1, %p200_p2  ;;  %p28_p4 = scmp.ge.s32.totalorder %s863_s21, 2 }
   0x8   : > { %p241_p5 = scmp.lt.s32.totalorder (!%p201_p3), %s716_s16, 1  ;;  %p243_p6 = scmp.lt.s32.totalorder (!%p201_p3), %s712_s15, 4  ;;  %v730_v0 = vmov (!%p201_p3), 0.0   ;;  %vm731_vm0 = vmmov (!%p201_p3), 0   ;;  %vm281_vm1 = vcmask (!%p201_p3), 1043456   ;;  %vm277_vm2 = vcmask (!%p201_p3), 64512  }
   0x9   : > { %s865_s21 = smov (%p28_p4, %s863_s21), 0  ;;  %204 = sbr.rel (%p201_p3) target bundleno = 374 (0x176), region = 36 }
   0xa   : > { %s249_s22 = sadd.s32 (!%p201_p3), 1, %s712_s15  ;;  %617 = vmatprep.subr.bf16.mxu0 (!%p201_p3), %v730_v0  ;;  %623 = vmatprep.subr.bf16.mxu1 (!%p201_p3), %v730_v0  ;;  %v269_v4 = vld [vmem:[%s853_s2] sm:$0x3] (!%p201_p3)  ;;  %s732_s9 = smov (!%p201_p3), 120   ;;  %v733_v6 = vmov (!%p201_p3), 0   ;;  %vm483_vm3 = vcmask (!%p201_p3), 517120  }
   0xb   : > { %619 = vmatprep.mubr.msk.bf16.mxu0 (!%p201_p3), %vm731_vm0, %v730_v0  ;;  %625 = vmatprep.mubr.msk.bf16.mxu1 (!%p201_p3), %vm731_vm0, %v730_v0  ;;  %p252_p7 = scmp.lt.s32.totalorder (!%p201_p3), %s249_s22, 4  ;;  %v475_v5 = vld [vmem:[%s854_s3] sm:$0xf] (!%p201_p3)  ;;  %v604_v15 = vld [vmem:[%s853_s2 + $0x6] sm:$0x3] (!%p201_p3)  ;;  %p261_p8 = scmp.lt.s32.totalorder (!%p201_p3), %s712_s15, 3 }
   0xc   : > { %686 = vset.pattern.permute.xlu1 (!%p201_p3), %v733_v6  ;;  %687 = vset.pattern.permute.xlu0 (!%p201_p3), %v733_v6  ;;  %v598_v11 = vld [vmem:[%s853_s2 + $0x2] sm:$0x3] (!%p201_p3)  ;;  %v602_v16 = vld [vmem:[%s853_s2 + $0x4] sm:$0x3] (!%p201_p3) }
   0xd   : > { %478 = vperm.xlu1 (!%p201_p3), %686, %v475_v5  }
  0x10   : > { %s867_s16 = smov (!%p241_p5, %s716_s16), 1  ;;  %s869_s22 = smov (!%p252_p7, %s249_s22), 4 }
  0x11   : > { %s244_s23 = scalar_select %p243_p6, %s712_s15, 4 }
  0x12   : > { %s641_s24 = smul.u32 5, %s867_s16  ;;  %s871_s15 = smov (!%p261_p8, %s712_s15), 3 }
  0x13   : > { %s596_s27 = sshll.u32 %s867_s16, 2 }
  0x14   : > { %s246_s25 = sadd.s32 %s641_s24, %s244_s23  ;;  %s255_s30 = sadd.s32 %s641_s24, %s869_s22 }
  0x15   : > { %s594_s26 = sshll.u32 %s246_s25, 2  ;;  %s595_s10 = sshll.u32 %s255_s30, 2 }
  0x16   : > { %s248_s29 = scalar_lea.vmem %s851_s0, %s594_s26  ;;  %s257_s13 = scalar_lea.vmem %s852_s1, %s595_s10 }
  0x17   : > { %v268_v1 = vld [vmem:[%s248_s29] sm:$0xf]  ;;  %s264_s28 = sadd.s32 %s596_s27, %s871_s15 }
  0x18   : > { %v599_v2 = vcombine.low %v268_v1, %v268_v1  ;;  %v329_v3 = vsel %vm281_vm1, %v268_v1, 0  ;;  %v371_v7 = vld [vmem:[%s257_s13] sm:$0xf]  ;;  %s597_s29 = sshll.u32 %s264_s28, 1 }
  0x19   : > { %624 = vmatpush3.bf16.msra.mxu1 %v329_v3  ;;  %v605_v8 = vcombine.low %v371_v7, %v371_v7  ;;  %v378_v12 = vsel %vm281_vm1, %v371_v7, 0  ;;  %s266_s6 = scalar_lea.vmem %s855_s4, %s597_s29 }
  0x1a   : > { %275 = vrot.lane.b32.xlu0 %v599_v2, %s732_s9  ;;  %635 = vmatprep.subr.bf16.mxu1 %v730_v0 }
  0x1c   : > { %626 = vmatmul.mubr.msk.bf16.vlgmr.msra.gmra.mrb[0].mxu1 %vm277_vm2, %v269_v4 }
  0x1d   : > { %637 = vmatprep.mubr.msk.bf16.mxu1 %vm731_vm0, %v730_v0 }
  0x1e   : > { %426 = vrot.lane.b32.xlu0 %v605_v8, %s732_s9 }
  0x8c   : > { %v276_v9 = vpop.permute.xlu0 %275  ;;  %v479_v34 = vpop.permute.xlu1 %478 }
  0x8d   : > { %v283_v10 = vsel %vm281_vm1, %v276_v9, 0 }
  0x8e   : > { %618 = vmatpush3.bf16.msra.mxu0 %v283_v10 }
  0x8f   : > { %629 = vmatprep.subr.bf16.mxu0 %v730_v0 }
  0x90   : > { %v427_v13 = vpop.permute.xlu0 %426 }
  0x91   : > { %620 = vmatmul.mubr.msk.bf16.vlgmr.msra.gmra.mrb[0].mxu0 %vm277_vm2, %v598_v11  ;;  %v432_v14 = vsel %vm281_vm1, %v427_v13, 0 }
  0x92   : > { %630 = vmatpush3.bf16.msra.mxu0 %v378_v12  ;;  %631 = vmatprep.mubr.msk.bf16.mxu0 %vm731_vm0, %v730_v0 }
  0x93   : > { %636 = vmatpush3.bf16.msra.mxu1 %v432_v14 }
  0x96   : > { %638 = vmatmul.mubr.msk.bf16.vlgmr.msra.gmra.mrb[4].mxu1 %vm277_vm2, %v604_v15 }
  0x99   : > { %632 = vmatmul.mubr.msk.bf16.vlgmr.msra.gmra.mrb[4].mxu0 %vm277_vm2, %v602_v16 }
  0xef   : > { %v365_v17 = vpop.f32.mrb[0].mxu1 }
  0xf0   : > { %v627_v18 = vpop.f32.mrb[1].mxu1 }
  0xf1   : > { %v368_v19 = vpop.f32.mrb[2].mxu1 }
  0xf2   : > { %v628_v20 = vpop.f32.mrb[3].mxu1 }
 0x164   : > { %v319_v21 = vpop.f32.mrb[0].mxu0 }
 0x165   : > { %v366_v22 = vadd.f32 %v365_v17, %v319_v21  ;;  %v621_v23 = vpop.f32.mrb[1].mxu0 }
 0x166   : > { %v322_v24 = vpop.f32.mrb[2].mxu0 }
 0x167   : > { %v622_v25 = vpop.f32.mrb[3].mxu0 }
 0x169   : > { %v468_v26 = vpop.f32.mrb[4].mxu1 }
 0x16a   : > { %v639_v27 = vpop.f32.mrb[5].mxu1 }
 0x16b   : > { %v471_v28 = vpop.f32.mrb[6].mxu1 }
 0x16c   : > { %v414_v29 = vpop.f32.mrb[4].mxu0  ;;  %v640_v30 = vpop.f32.mrb[7].mxu1 }
 0x16d   : > { %v420_v31 = vadd.f32 %v414_v29, %v366_v22  ;;  %v633_v32 = vpop.f32.mrb[5].mxu0 }
 0x16e   : > { %v417_v33 = vpop.f32.mrb[6].mxu0 }
 0x16f   : > { %v474_v35 = vadd.f32 %v468_v26, %v420_v31  ;;  %v634_v36 = vpop.f32.mrb[7].mxu0 }
 0x171   : > { %v481_v37 = vadd.f32 %v479_v34, %v474_v35 }
 0x173   : > { %v482_v38 = vpack.c.bf16 %v481_v37, %v481_v37 }
 0x175   : > { %484 = vst.msk [vmem:[%s266_s6] sm:$0x3] %vm483_vm3, %v482_v38 }
 0x176 PF: > { %s14_s19 = sadd.s32 1, %s728_s19   ;;  %s856_s15 = smov %s720_s17 }
 0x177   : > { %p11_p9 = scmp.ge.s32.totalorder %s14_s19, 10   ;;  %s857_s16 = smov %s724_s18 }
 0x178   : > { %s858_s17 = smov %s861_s20  ;;  %s859_s18 = smov %s865_s21 }
 0x179   :  { %13 = sbr.rel (!%p11_p9) target bundleno = 3 (0x3), region = 72 }

// kernel: _lambda_.33
= control target key start
LH: loop header
LB: loop body
LE: loop exit
PB: predicated region body
PF: predicated region fallthrough
CT: control target
= control target key end

     0   :  { %s543_s12 = smov 0   ;;  %s545_s13 = smov 0   ;;  %s607_s0 = inlined_call_operand.vmem [shape: bf16[2,4,8,72], index: 0, kind: input, shape index: {}]   ;;  %s608_s1 = inlined_call_operand.vmem [shape: bf16[2,4,8], index: 1, kind: input, shape index: {}]   ;;  %s609_s2 = inlined_call_operand.vmem [shape: f32[4,1], index: 2, kind: input, shape index: {}]   ;;  %s610_s3 = inlined_call_operand.vmem [shape: bf16[2,4,4,71], index: 3, kind: output, shape index: {}]  }
   0x1   :  { %s547_s14 = smov 0   ;;  %s549_s15 = smov 0  }
   0x2   :  { %s551_s16 = smov 0  }
   0x3 LB: > { %s22_s17 = sadd.s32 1, %s509_s14  ;;  %s25_s18 = sadd.s32 1, %s513_s15  ;;  %s517_s16 = sphi %s551_s16, %s13_s16   ;;  %s513_s15 = sphi %s549_s15, %s614_s15   ;;  %s509_s14 = sphi %s547_s14, %s613_s14   ;;  %s505_s13 = sphi %s545_s13, %s612_s13   ;;  %s501_s12 = sphi %s543_s12, %s611_s12  }
   0x4   : > { %p23_p0 = scmp.ge.s32.totalorder %s22_s17, 4  ;;  %p406_p1 = scmp.ge.s32.totalorder %s517_s16, 1 }
   0x5   : > { %p156_p2 = scmp.lt.s32.totalorder %s517_s16, 9 }
   0x6   : > { %s616_s17 = smov (%p23_p0, %s22_s17), 0  ;;  %s618_s18 = smov (!%p23_p0, %s25_s18), %s513_s15 }
   0x7   : > { %p157_p3 = pnand %p406_p1, %p156_p2  ;;  %p27_p4 = scmp.ge.s32.totalorder %s618_s18, 2 }
   0x8   : > { %p186_p5 = scmp.lt.s32.totalorder (!%p157_p3), %s505_s13, 1  ;;  %p188_p6 = scmp.lt.s32.totalorder (!%p157_p3), %s501_s12, 3  ;;  %v519_v0 = vmov (!%p157_p3), 0.0   ;;  %vm520_vm0 = vmmov (!%p157_p3), 0   ;;  %v521_v1 = vmov (!%p157_p3), 0   ;;  %vm216_vm1 = vcmask (!%p157_p3), 1043456  }
   0x9   : > { %s620_s18 = smov (%p27_p4, %s618_s18), 0  ;;  %160 = sbr.rel (%p157_p3) target bundleno = 362 (0x16a), region = 32 }
   0xa   : > { %427 = vmatprep.subr.bf16.mxu1 (!%p157_p3), %v519_v0  ;;  %421 = vmatprep.subr.bf16.mxu0 (!%p157_p3), %v519_v0  ;;  %v204_v5 = vld [vmem:[%s608_s1] sm:$0x3] (!%p157_p3)  ;;  %vm212_vm2 = vcmask (!%p157_p3), 64512   ;;  %s522_s27 = smov (!%p157_p3), 127   ;;  %v411_v9 = vld [vmem:[%s608_s1 + $0x2] sm:$0x3] (!%p157_p3) }
   0xb   : > { %429 = vmatprep.mubr.msk.bf16.mxu1 (!%p157_p3), %vm520_vm0, %v519_v0  ;;  %423 = vmatprep.mubr.msk.bf16.mxu0 (!%p157_p3), %vm520_vm0, %v519_v0  ;;  %v306_v6 = vld [vmem:[%s609_s2] sm:$0xf] (!%p157_p3)  ;;  %vm314_vm3 = vcmask (!%p157_p3), 574464  }
   0xc   : > { %477 = vset.pattern.permute.xlu0 (!%p157_p3), %v521_v1 }
  0x10   : > { %s622_s13 = smov (!%p186_p5, %s505_s13), 1  ;;  %s624_s12 = smov (!%p188_p6, %s501_s12), 3 }
  0x11   : > { %s407_s19 = sshll.u32 %s622_s13, 2 }
  0x12   : > { %s573_s20 = sadd.s32 %s407_s19, %s624_s12 }
  0x13   : > { %s408_s21 = sshll.u32 %s573_s20, 2  ;;  %s410_s5 = sshll.u32 %s573_s20, 1 }
  0x14   : > { %s193_s24 = scalar_lea.vmem %s607_s0, %s408_s21  ;;  %s201_s8 = scalar_lea.vmem %s610_s3, %s410_s5 }
  0x15   : > { %v203_v2 = vld [vmem:[%s193_s24] sm:$0xf] }
  0x16   : > { %v412_v3 = vcombine.low %v203_v2, %v203_v2  ;;  %v264_v4 = vsel %vm216_vm1, %v203_v2, 0 }
  0x17   : > { %428 = vmatpush3.bf16.msra.mxu1 %v264_v4 }
  0x18   : > { %210 = vrot.lane.b32.xlu0 %v412_v3, %s522_s27 }
  0x1a   : > { %430 = vmatmul.mubr.msk.bf16.vlgmr.msra.gmra.mrb[0].mxu1 %vm212_vm2, %v204_v5 }
  0x1c   : > { %309 = vperm.xlu0 %477, %v306_v6  }
  0x8a   : > { %v211_v7 = vpop.permute.xlu0 %210 }
  0x8b   : > { %v218_v8 = vsel %vm216_vm1, %v211_v7, 0 }
  0x8c   : > { %422 = vmatpush3.bf16.msra.mxu0 %v218_v8 }
  0x8f   : > { %424 = vmatmul.mubr.msk.bf16.vlgmr.msra.gmra.mrb[0].mxu0 %vm212_vm2, %v411_v9 }
  0x9b   : > { %v310_v15 = vpop.permute.xlu0 %309 }
  0xed   : > { %v300_v10 = vpop.f32.mrb[0].mxu1 }
  0xee   : > { %v431_v11 = vpop.f32.mrb[1].mxu1 }
  0xef   : > { %v303_v12 = vpop.f32.mrb[2].mxu1 }
  0xf0   : > { %v432_v13 = vpop.f32.mrb[3].mxu1 }
 0x162   : > { %v254_v14 = vpop.f32.mrb[0].mxu0 }
 0x163   : > { %v301_v16 = vadd.f32 %v300_v10, %v254_v14  ;;  %v425_v17 = vpop.f32.mrb[1].mxu0 }
 0x164   : > { %v257_v18 = vpop.f32.mrb[2].mxu0 }
 0x165   : > { %v312_v19 = vadd.f32 %v310_v15, %v301_v16  ;;  %v426_v20 = vpop.f32.mrb[3].mxu0 }
 0x167   : > { %v313_v21 = vpack.c.bf16 %v312_v19, %v312_v19 }
 0x169   : > { %315 = vst.msk [vmem:[%s201_s8] sm:$0x3] %vm314_vm3, %v313_v21 }
 0x16a PF: > { %s13_s16 = sadd.s32 1, %s517_s16   ;;  %s611_s12 = smov %s509_s14 }
 0x16b   : > { %p10_p7 = scmp.ge.s32.totalorder %s13_s16, 10   ;;  %s612_s13 = smov %s513_s15 }
 0x16c   : > { %s613_s14 = smov %s616_s17  ;;  %s614_s15 = smov %s620_s18 }
 0x16d   :  { %12 = sbr.rel (!%p10_p7) target bundleno = 3 (0x3), region = 63 }

// kernel: _lambda_.35
= control target key start
LH: loop header
LB: loop body
LE: loop exit
PB: predicated region body
PF: predicated region fallthrough
CT: control target
= control target key end

     0   :  { %s670_s12 = smov 0   ;;  %s672_s13 = smov 0   ;;  %s752_s0 = inlined_call_operand.vmem [shape: bf16[2,4,8,81], index: 0, kind: input, shape index: {}]   ;;  %s753_s1 = inlined_call_operand.vmem [shape: bf16[4,4,8], index: 1, kind: input, shape index: {}]   ;;  %s754_s2 = inlined_call_operand.vmem [shape: f32[4,1], index: 2, kind: input, shape index: {}]   ;;  %s755_s3 = inlined_call_operand.vmem [shape: bf16[2,4,4,71], index: 3, kind: output, shape index: {}]  }
   0x1   :  { %s674_s14 = smov 0   ;;  %s676_s15 = smov 0  }
   0x2   :  { %s678_s16 = smov 0  }
   0x3 LB: > { %s22_s17 = sadd.s32 1, %s634_s14  ;;  %s25_s18 = sadd.s32 1, %s638_s15  ;;  %s642_s16 = sphi %s678_s16, %s13_s16   ;;  %s638_s15 = sphi %s676_s15, %s759_s15   ;;  %s634_s14 = sphi %s674_s14, %s758_s14   ;;  %s630_s13 = sphi %s672_s13, %s757_s13   ;;  %s626_s12 = sphi %s670_s12, %s756_s12  }
   0x4   : > { %p23_p0 = scmp.ge.s32.totalorder %s22_s17, 4  ;;  %p508_p1 = scmp.ge.s32.totalorder %s642_s16, 1 }
   0x5   : > { %p156_p2 = scmp.lt.s32.totalorder %s642_s16, 9 }
   0x6   : > { %s761_s17 = smov (%p23_p0, %s22_s17), 0  ;;  %s763_s18 = smov (!%p23_p0, %s25_s18), %s638_s15 }
   0x7   : > { %p157_p3 = pnand %p508_p1, %p156_p2  ;;  %p27_p4 = scmp.ge.s32.totalorder %s763_s18, 2 }
   0x8   : > { %p186_p5 = scmp.lt.s32.totalorder (!%p157_p3), %s630_s13, 1  ;;  %p188_p6 = scmp.lt.s32.totalorder (!%p157_p3), %s626_s12, 3  ;;  %v644_v0 = vmov (!%p157_p3), 0.0   ;;  %vm645_vm0 = vmmov (!%p157_p3), 0   ;;  %vm216_vm1 = vcmask (!%p157_p3), 1043456   ;;  %vm212_vm2 = vcmask (!%p157_p3), 64512  }
   0x9   : > { %s765_s18 = smov (%p27_p4, %s763_s18), 0  ;;  %160 = sbr.rel (%p157_p3) target bundleno = 372 (0x174), region = 32 }
   0xa   : > { %531 = vmatprep.subr.bf16.mxu0 (!%p157_p3), %v644_v0  ;;  %537 = vmatprep.subr.bf16.mxu1 (!%p157_p3), %v644_v0  ;;  %v204_v4 = vld [vmem:[%s753_s1] sm:$0x3] (!%p157_p3)  ;;  %s646_s27 = smov (!%p157_p3), 127   ;;  %s647_s28 = smov (!%p157_p3), 118   ;;  %v648_v5 = vmov (!%p157_p3), 0   ;;  %vm416_vm3 = vcmask (!%p157_p3), 574464  }
   0xb   : > { %533 = vmatprep.mubr.msk.bf16.mxu0 (!%p157_p3), %vm645_vm0, %v644_v0  ;;  %539 = vmatprep.mubr.msk.bf16.mxu1 (!%p157_p3), %vm645_vm0, %v644_v0  ;;  %v408_v6 = vld [vmem:[%s754_s2] sm:$0xf] (!%p157_p3)  ;;  %s649_s4 = smov (!%p157_p3), 119   ;;  %v519_v12 = vld [vmem:[%s753_s1 + $0x6] sm:$0x3] (!%p157_p3) }
   0xc   : > { %601 = vset.pattern.permute.xlu1 (!%p157_p3), %v648_v5  ;;  %602 = vset.pattern.permute.xlu0 (!%p157_p3), %v648_v5  ;;  %v513_v11 = vld [vmem:[%s753_s1 + $0x2] sm:$0x3] (!%p157_p3)  ;;  %v517_v15 = vld [vmem:[%s753_s1 + $0x4] sm:$0x3] (!%p157_p3) }
  0x10   : > { %s767_s13 = smov (!%p186_p5, %s630_s13), 1  ;;  %s769_s12 = smov (!%p188_p6, %s626_s12), 3 }
  0x11   : > { %s509_s19 = sshll.u32 %s767_s13, 2 }
  0x12   : > { %s702_s20 = sadd.s32 %s509_s19, %s769_s12 }
  0x13   : > { %s510_s21 = sshll.u32 %s702_s20, 2  ;;  %s512_s11 = sshll.u32 %s702_s20, 1 }
  0x14   : > { %s193_s24 = scalar_lea.vmem %s752_s0, %s510_s21  ;;  %s201_s19 = scalar_lea.vmem %s755_s3, %s512_s11 }
  0x15   : > { %v203_v1 = vld [vmem:[%s193_s24] sm:$0xf] }
  0x16   : > { %v514_v2 = vcombine.low %v203_v1, %v203_v1  ;;  %v264_v3 = vsel %vm216_vm1, %v203_v1, 0 }
  0x17   : > { %538 = vmatpush3.bf16.msra.mxu1 %v264_v3 }
  0x18   : > { %210 = vrot.lane.b32.xlu0 %v514_v2, %s646_s27  ;;  %359 = vrot.lane.b32.xlu1 %v514_v2, %s647_s28 }
  0x19   : > { %549 = vmatprep.subr.bf16.mxu1 %v644_v0 }
  0x1a   : > { %540 = vmatmul.mubr.msk.bf16.vlgmr.msra.gmra.mrb[0].mxu1 %vm212_vm2, %v204_v4 }
  0x1b   : > { %551 = vmatprep.mubr.msk.bf16.mxu1 %vm645_vm0, %v644_v0 }
  0x1c   : > { %308 = vrot.lane.b32.xlu0 %v514_v2, %s649_s4  ;;  %411 = vperm.xlu1 %601, %v408_v6  }
  0x8a   : > { %v211_v7 = vpop.permute.xlu0 %210  ;;  %v360_v8 = vpop.permute.xlu1 %359 }
  0x8b   : > { %v218_v9 = vsel %vm216_vm1, %v211_v7, 0  ;;  %v365_v10 = vsel %vm216_vm1, %v360_v8, 0 }
  0x8c   : > { %532 = vmatpush3.bf16.msra.mxu0 %v218_v9  ;;  %550 = vmatpush3.bf16.msra.mxu1 %v365_v10 }
  0x8d   : > { %543 = vmatprep.subr.bf16.mxu0 %v644_v0 }
  0x8e   : > { %v309_v13 = vpop.permute.xlu0 %308 }
  0x8f   : > { %v314_v14 = vsel %vm216_vm1, %v309_v13, 0  ;;  %534 = vmatmul.mubr.msk.bf16.vlgmr.msra.gmra.mrb[0].mxu0 %vm212_vm2, %v513_v11  ;;  %552 = vmatmul.mubr.msk.bf16.vlgmr.msra.gmra.mrb[4].mxu1 %vm212_vm2, %v519_v12 }
  0x90   : > { %544 = vmatpush3.bf16.msra.mxu0 %v314_v14  ;;  %545 = vmatprep.mubr.msk.bf16.mxu0 %vm645_vm0, %v644_v0 }
  0x97   : > { %546 = vmatmul.mubr.msk.bf16.vlgmr.msra.gmra.mrb[4].mxu0 %vm212_vm2, %v517_v15 }
  0x9b   : > { %v412_v33 = vpop.permute.xlu1 %411 }
  0xed   : > { %v300_v16 = vpop.f32.mrb[0].mxu1 }
  0xee   : > { %v541_v17 = vpop.f32.mrb[1].mxu1 }
  0xef   : > { %v303_v18 = vpop.f32.mrb[2].mxu1 }
  0xf0   : > { %v542_v19 = vpop.f32.mrb[3].mxu1 }
 0x162   : > { %v254_v20 = vpop.f32.mrb[0].mxu0  ;;  %v401_v21 = vpop.f32.mrb[4].mxu1 }
 0x163   : > { %v301_v22 = vadd.f32 %v300_v16, %v254_v20  ;;  %v535_v23 = vpop.f32.mrb[1].mxu0  ;;  %v553_v24 = vpop.f32.mrb[5].mxu1 }
 0x164   : > { %v257_v25 = vpop.f32.mrb[2].mxu0  ;;  %v404_v26 = vpop.f32.mrb[6].mxu1 }
 0x165   : > { %v536_v27 = vpop.f32.mrb[3].mxu0  ;;  %v554_v28 = vpop.f32.mrb[7].mxu1 }
 0x16a   : > { %v350_v29 = vpop.f32.mrb[4].mxu0 }
 0x16b   : > { %v356_v30 = vadd.f32 %v350_v29, %v301_v22  ;;  %v547_v31 = vpop.f32.mrb[5].mxu0 }
 0x16c   : > { %v353_v32 = vpop.f32.mrb[6].mxu0 }
 0x16d   : > { %v407_v34 = vadd.f32 %v401_v21, %v356_v30  ;;  %v548_v35 = vpop.f32.mrb[7].mxu0 }
 0x16f   : > { %v414_v36 = vadd.f32 %v412_v33, %v407_v34 }
 0x171   : > { %v415_v37 = vpack.c.bf16 %v414_v36, %v414_v36 }
 0x173   : > { %417 = vst.msk [vmem:[%s201_s19] sm:$0x3] %vm416_vm3, %v415_v37 }
 0x174 PF: > { %s13_s16 = sadd.s32 1, %s642_s16   ;;  %s756_s12 = smov %s634_s14 }
 0x175   : > { %p10_p7 = scmp.ge.s32.totalorder %s13_s16, 10   ;;  %s757_s13 = smov %s638_s15 }
 0x176   : > { %s758_s14 = smov %s761_s17  ;;  %s759_s15 = smov %s765_s18 }
 0x177   :  { %12 = sbr.rel (!%p10_p7) target bundleno = 3 (0x3), region = 65 }

// kernel: _lambda_.37
= control target key start
LH: loop header
LB: loop body
LE: loop exit
PB: predicated region body
PF: predicated region fallthrough
CT: control target
= control target key end

     0   :  { %s759_s15 = smov 0   ;;  %s761_s16 = smov 0   ;;  %s851_s0 = inlined_call_operand.vmem [shape: bf16[2,5,8,72], index: 0, kind: input, shape index: {}, may-alias: {0,1}]   ;;  %s852_s1 = inlined_call_operand.vmem [shape: bf16[2,5,8,72], index: 1, kind: input, shape index: {}, may-alias: {0,1}]   ;;  %s853_s2 = inlined_call_operand.vmem [shape: bf16[4,4,8], index: 2, kind: input, shape index: {}]   ;;  %s854_s3 = inlined_call_operand.vmem [shape: f32[4,1], index: 3, kind: input, shape index: {}]   ;;  %s855_s4 = inlined_call_operand.vmem [shape: bf16[2,4,4,71], index: 4, kind: output, shape index: {}]  }
   0x1   :  { %s763_s17 = smov 0   ;;  %s765_s18 = smov 0  }
   0x2   :  { %s767_s19 = smov 0  }
   0x3 LB: > { %s23_s20 = sadd.s32 1, %s720_s17  ;;  %s26_s21 = sadd.s32 1, %s724_s18  ;;  %s728_s19 = sphi %s767_s19, %s14_s19   ;;  %s724_s18 = sphi %s765_s18, %s859_s18   ;;  %s720_s17 = sphi %s763_s17, %s858_s17   ;;  %s716_s16 = sphi %s761_s16, %s857_s16   ;;  %s712_s15 = sphi %s759_s15, %s856_s15  }
   0x4   : > { %p24_p0 = scmp.ge.s32.totalorder %s23_s20, 4  ;;  %p593_p1 = scmp.ge.s32.totalorder %s728_s19, 1 }
   0x5   : > { %p200_p2 = scmp.lt.s32.totalorder %s728_s19, 9 }
   0x6   : > { %s861_s20 = smov (%p24_p0, %s23_s20), 0  ;;  %s863_s21 = smov (!%p24_p0, %s26_s21), %s724_s18 }
   0x7   : > { %p201_p3 = pnand %p593_p1, %p200_p2  ;;  %p28_p4 = scmp.ge.s32.totalorder %s863_s21, 2 }
   0x8   : > { %p241_p5 = scmp.lt.s32.totalorder (!%p201_p3), %s716_s16, 1  ;;  %p243_p6 = scmp.lt.s32.totalorder (!%p201_p3), %s712_s15, 4  ;;  %v730_v0 = vmov (!%p201_p3), 0.0   ;;  %vm731_vm0 = vmmov (!%p201_p3), 0   ;;  %vm281_vm1 = vcmask (!%p201_p3), 1043456   ;;  %vm277_vm2 = vcmask (!%p201_p3), 64512  }
   0x9   : > { %s865_s21 = smov (%p28_p4, %s863_s21), 0  ;;  %204 = sbr.rel (%p201_p3) target bundleno = 374 (0x176), region = 36 }
   0xa   : > { %s249_s22 = sadd.s32 (!%p201_p3), 1, %s712_s15  ;;  %617 = vmatprep.subr.bf16.mxu0 (!%p201_p3), %v730_v0  ;;  %623 = vmatprep.subr.bf16.mxu1 (!%p201_p3), %v730_v0  ;;  %v269_v4 = vld [vmem:[%s853_s2] sm:$0x3] (!%p201_p3)  ;;  %s732_s9 = smov (!%p201_p3), 127   ;;  %v733_v6 = vmov (!%p201_p3), 0   ;;  %vm483_vm3 = vcmask (!%p201_p3), 574464  }
   0xb   : > { %619 = vmatprep.mubr.msk.bf16.mxu0 (!%p201_p3), %vm731_vm0, %v730_v0  ;;  %625 = vmatprep.mubr.msk.bf16.mxu1 (!%p201_p3), %vm731_vm0, %v730_v0  ;;  %p252_p7 = scmp.lt.s32.totalorder (!%p201_p3), %s249_s22, 4  ;;  %v475_v5 = vld [vmem:[%s854_s3] sm:$0xf] (!%p201_p3)  ;;  %v604_v15 = vld [vmem:[%s853_s2 + $0x6] sm:$0x3] (!%p201_p3)  ;;  %p261_p8 = scmp.lt.s32.totalorder (!%p201_p3), %s712_s15, 3 }
   0xc   : > { %686 = vset.pattern.permute.xlu1 (!%p201_p3), %v733_v6  ;;  %687 = vset.pattern.permute.xlu0 (!%p201_p3), %v733_v6  ;;  %v598_v11 = vld [vmem:[%s853_s2 + $0x2] sm:$0x3] (!%p201_p3)  ;;  %v602_v16 = vld [vmem:[%s853_s2 + $0x4] sm:$0x3] (!%p201_p3) }
   0xd   : > { %478 = vperm.xlu1 (!%p201_p3), %686, %v475_v5  }
  0x10   : > { %s867_s16 = smov (!%p241_p5, %s716_s16), 1  ;;  %s869_s22 = smov (!%p252_p7, %s249_s22), 4 }
  0x11   : > { %s244_s23 = scalar_select %p243_p6, %s712_s15, 4 }
  0x12   : > { %s641_s24 = smul.u32 5, %s867_s16  ;;  %s871_s15 = smov (!%p261_p8, %s712_s15), 3 }
  0x13   : > { %s596_s27 = sshll.u32 %s867_s16, 2 }
  0x14   : > { %s246_s25 = sadd.s32 %s641_s24, %s244_s23  ;;  %s255_s30 = sadd.s32 %s641_s24, %s869_s22 }
  0x15   : > { %s594_s26 = sshll.u32 %s246_s25, 2  ;;  %s595_s10 = sshll.u32 %s255_s30, 2 }
  0x16   : > { %s248_s29 = scalar_lea.vmem %s851_s0, %s594_s26  ;;  %s257_s13 = scalar_lea.vmem %s852_s1, %s595_s10 }
  0x17   : > { %v268_v1 = vld [vmem:[%s248_s29] sm:$0xf]  ;;  %s264_s28 = sadd.s32 %s596_s27, %s871_s15 }
  0x18   : > { %v599_v2 = vcombine.low %v268_v1, %v268_v1  ;;  %v329_v3 = vsel %vm281_vm1, %v268_v1, 0  ;;  %v371_v7 = vld [vmem:[%s257_s13] sm:$0xf]  ;;  %s597_s29 = sshll.u32 %s264_s28, 1 }
  0x19   : > { %624 = vmatpush3.bf16.msra.mxu1 %v329_v3  ;;  %v605_v8 = vcombine.low %v371_v7, %v371_v7  ;;  %v378_v12 = vsel %vm281_vm1, %v371_v7, 0  ;;  %s266_s6 = scalar_lea.vmem %s855_s4, %s597_s29 }
  0x1a   : > { %275 = vrot.lane.b32.xlu0 %v599_v2, %s732_s9  ;;  %635 = vmatprep.subr.bf16.mxu1 %v730_v0 }
  0x1c   : > { %626 = vmatmul.mubr.msk.bf16.vlgmr.msra.gmra.mrb[0].mxu1 %vm277_vm2, %v269_v4 }
  0x1d   : > { %637 = vmatprep.mubr.msk.bf16.mxu1 %vm731_vm0, %v730_v0 }
  0x1e   : > { %426 = vrot.lane.b32.xlu0 %v605_v8, %s732_s9 }
  0x8c   : > { %v276_v9 = vpop.permute.xlu0 %275  ;;  %v479_v34 = vpop.permute.xlu1 %478 }
  0x8d   : > { %v283_v10 = vsel %vm281_vm1, %v276_v9, 0 }
  0x8e   : > { %618 = vmatpush3.bf16.msra.mxu0 %v283_v10 }
  0x8f   : > { %629 = vmatprep.subr.bf16.mxu0 %v730_v0 }
  0x90   : > { %v427_v13 = vpop.permute.xlu0 %426 }
  0x91   : > { %620 = vmatmul.mubr.msk.bf16.vlgmr.msra.gmra.mrb[0].mxu0 %vm277_vm2, %v598_v11  ;;  %v432_v14 = vsel %vm281_vm1, %v427_v13, 0 }
  0x92   : > { %630 = vmatpush3.bf16.msra.mxu0 %v378_v12  ;;  %631 = vmatprep.mubr.msk.bf16.mxu0 %vm731_vm0, %v730_v0 }
  0x93   : > { %636 = vmatpush3.bf16.msra.mxu1 %v432_v14 }
  0x96   : > { %638 = vmatmul.mubr.msk.bf16.vlgmr.msra.gmra.mrb[4].mxu1 %vm277_vm2, %v604_v15 }
  0x99   : > { %632 = vmatmul.mubr.msk.bf16.vlgmr.msra.gmra.mrb[4].mxu0 %vm277_vm2, %v602_v16 }
  0xef   : > { %v365_v17 = vpop.f32.mrb[0].mxu1 }
  0xf0   : > { %v627_v18 = vpop.f32.mrb[1].mxu1 }
  0xf1   : > { %v368_v19 = vpop.f32.mrb[2].mxu1 }
  0xf2   : > { %v628_v20 = vpop.f32.mrb[3].mxu1 }
 0x164   : > { %v319_v21 = vpop.f32.mrb[0].mxu0 }
 0x165   : > { %v366_v22 = vadd.f32 %v365_v17, %v319_v21  ;;  %v621_v23 = vpop.f32.mrb[1].mxu0 }
 0x166   : > { %v322_v24 = vpop.f32.mrb[2].mxu0 }
 0x167   : > { %v622_v25 = vpop.f32.mrb[3].mxu0 }
 0x169   : > { %v468_v26 = vpop.f32.mrb[4].mxu1 }
 0x16a   : > { %v639_v27 = vpop.f32.mrb[5].mxu1 }
 0x16b   : > { %v471_v28 = vpop.f32.mrb[6].mxu1 }
 0x16c   : > { %v414_v29 = vpop.f32.mrb[4].mxu0  ;;  %v640_v30 = vpop.f32.mrb[7].mxu1 }
 0x16d   : > { %v420_v31 = vadd.f32 %v414_v29, %v366_v22  ;;  %v633_v32 = vpop.f32.mrb[5].mxu0 }
 0x16e   : > { %v417_v33 = vpop.f32.mrb[6].mxu0 }
 0x16f   : > { %v474_v35 = vadd.f32 %v468_v26, %v420_v31  ;;  %v634_v36 = vpop.f32.mrb[7].mxu0 }
 0x171   : > { %v481_v37 = vadd.f32 %v479_v34, %v474_v35 }
 0x173   : > { %v482_v38 = vpack.c.bf16 %v481_v37, %v481_v37 }
 0x175   : > { %484 = vst.msk [vmem:[%s266_s6] sm:$0x3] %vm483_vm3, %v482_v38 }
 0x176 PF: > { %s14_s19 = sadd.s32 1, %s728_s19   ;;  %s856_s15 = smov %s720_s17 }
 0x177   : > { %p11_p9 = scmp.ge.s32.totalorder %s14_s19, 10   ;;  %s857_s16 = smov %s724_s18 }
 0x178   : > { %s858_s17 = smov %s861_s20  ;;  %s859_s18 = smov %s865_s21 }
 0x179   :  { %13 = sbr.rel (!%p11_p9) target bundleno = 3 (0x3), region = 72 }

// kernel: _lambda_.39
= control target key start
LH: loop header
LB: loop body
LE: loop exit
PB: predicated region body
PF: predicated region fallthrough
CT: control target
= control target key end

     0   :  { %s1006_s15 = smov 0   ;;  %s1008_s16 = smov 0   ;;  %s1138_s0 = inlined_call_operand.vmem [shape: bf16[2,5,8,81], index: 0, kind: input, shape index: {}, may-alias: {0,1}]   ;;  %s1139_s1 = inlined_call_operand.vmem [shape: bf16[2,5,8,81], index: 1, kind: input, shape index: {}, may-alias: {0,1}]   ;;  %s1140_s2 = inlined_call_operand.vmem [shape: bf16[8,4,8], index: 2, kind: input, shape index: {}]   ;;  %s1141_s3 = inlined_call_operand.vmem [shape: f32[4,1], index: 3, kind: input, shape index: {}]   ;;  %s1142_s4 = inlined_call_operand.vmem [shape: bf16[2,4,4,71], index: 4, kind: output, shape index: {}]  }
   0x1   :  { %s1010_s17 = smov 0   ;;  %s1012_s18 = smov 0  }
   0x2   :  { %s1014_s19 = smov 0  }
   0x3 LB: > { %s23_s20 = sadd.s32 1, %s965_s17  ;;  %s26_s21 = sadd.s32 1, %s969_s18  ;;  %s973_s19 = sphi %s1014_s19, %s14_s19   ;;  %s969_s18 = sphi %s1012_s18, %s1146_s18   ;;  %s965_s17 = sphi %s1010_s17, %s1145_s17   ;;  %s961_s16 = sphi %s1008_s16, %s1144_s16   ;;  %s957_s15 = sphi %s1006_s15, %s1143_s15  }
   0x4   : > { %p24_p0 = scmp.ge.s32.totalorder %s23_s20, 4  ;;  %p797_p1 = scmp.ge.s32.totalorder %s973_s19, 1 }
   0x5   : > { %p200_p2 = scmp.lt.s32.totalorder %s973_s19, 9 }
   0x6   : > { %s1148_s20 = smov (%p24_p0, %s23_s20), 0  ;;  %s1150_s21 = smov (!%p24_p0, %s26_s21), %s969_s18 }
   0x7   : > { %p201_p3 = pnand %p797_p1, %p200_p2  ;;  %p28_p4 = scmp.ge.s32.totalorder %s1150_s21, 2 }
   0x8   : > { %p241_p5 = scmp.lt.s32.totalorder (!%p201_p3), %s961_s16, 1  ;;  %p243_p6 = scmp.lt.s32.totalorder (!%p201_p3), %s957_s15, 4  ;;  %v975_v0 = vmov (!%p201_p3), 0.0   ;;  %vm976_vm0 = vmmov (!%p201_p3), 0   ;;  %vm281_vm1 = vcmask (!%p201_p3), 1043456   ;;  %vm277_vm2 = vcmask (!%p201_p3), 64512  }
   0x9   : > { %s1152_s21 = smov (%p28_p4, %s1150_s21), 0  ;;  %204 = sbr.rel (%p201_p3) target bundleno = 390 (0x186), region = 36 }
   0xa   : > { %837 = vmatprep.subr.bf16.mxu0 (!%p201_p3), %v975_v0  ;;  %843 = vmatprep.subr.bf16.mxu1 (!%p201_p3), %v975_v0  ;;  %s249_s24 = sadd.s32 (!%p201_p3), 1, %s957_s15  ;;  %v269_v4 = vld [vmem:[%s1140_s2] sm:$0x3] (!%p201_p3)  ;;  %s977_s7 = smov (!%p201_p3), 127   ;;  %v980_v8 = vmov (!%p201_p3), 0   ;;  %vm687_vm3 = vcmask (!%p201_p3), 574464  }
   0xb   : > { %839 = vmatprep.mubr.msk.bf16.mxu0 (!%p201_p3), %vm976_vm0, %v975_v0  ;;  %845 = vmatprep.mubr.msk.bf16.mxu1 (!%p201_p3), %vm976_vm0, %v975_v0  ;;  %p252_p7 = scmp.lt.s32.totalorder (!%p201_p3), %s249_s24, 4  ;;  %s978_s8 = smov (!%p201_p3), 118   ;;  %v679_v7 = vld [vmem:[%s1141_s3] sm:$0xf] (!%p201_p3)  ;;  %v808_v14 = vld [vmem:[%s1140_s2 + $0x6] sm:$0x3] (!%p201_p3) }
   0xc   : > { %s979_s13 = smov (!%p201_p3), 119   ;;  %932 = vset.pattern.permute.xlu0 (!%p201_p3), %v980_v8  ;;  %v802_v13 = vld [vmem:[%s1140_s2 + $0x2] sm:$0x3] (!%p201_p3)  ;;  %v806_v20 = vld [vmem:[%s1140_s2 + $0x4] sm:$0x3] (!%p201_p3)  ;;  %p261_p8 = scmp.lt.s32.totalorder (!%p201_p3), %s957_s15, 3 }
   0xd   : > { %v812_v21 = vld [vmem:[%s1140_s2 + $0xa] sm:$0x3] (!%p201_p3)  ;;  %v810_v25 = vld [vmem:[%s1140_s2 + $0x8] sm:$0x3] (!%p201_p3)  ;;  %v817_v26 = vld [vmem:[%s1140_s2 + $0xe] sm:$0x3] (!%p201_p3) }
   0xe   : > { %v815_v28 = vld [vmem:[%s1140_s2 + $0xc] sm:$0x3] (!%p201_p3) }
  0x10   : > { %s1154_s16 = smov (!%p241_p5, %s961_s16), 1  ;;  %s1156_s24 = smov (!%p252_p7, %s249_s24), 4 }
  0x11   : > { %s244_s22 = scalar_select %p243_p6, %s957_s15, 4 }
  0x12   : > { %s885_s23 = smul.u32 5, %s1154_s16  ;;  %s1158_s15 = smov (!%p261_p8, %s957_s15), 3 }
  0x13   : > { %s800_s11 = sshll.u32 %s1154_s16, 2 }
  0x14   : > { %s246_s25 = sadd.s32 %s885_s23, %s244_s22  ;;  %s255_s30 = sadd.s32 %s885_s23, %s1156_s24 }
  0x15   : > { %s798_s26 = sshll.u32 %s246_s25, 2  ;;  %s799_s9 = sshll.u32 %s255_s30, 2 }
  0x16   : > { %s248_s29 = scalar_lea.vmem %s1138_s0, %s798_s26  ;;  %s257_s12 = scalar_lea.vmem %s1139_s1, %s799_s9 }
  0x17   : > { %v268_v1 = vld [vmem:[%s248_s29] sm:$0xf] }
  0x18   : > { %v803_v2 = vcombine.low %v268_v1, %v268_v1  ;;  %v329_v3 = vsel %vm281_vm1, %v268_v1, 0  ;;  %v473_v5 = vld [vmem:[%s257_s12] sm:$0xf]  ;;  %s264_s12 = sadd.s32 %s800_s11, %s1158_s15 }
  0x19   : > { %844 = vmatpush3.bf16.msra.mxu1 %v329_v3  ;;  %v813_v6 = vcombine.low %v473_v5, %v473_v5  ;;  %v480_v22 = vsel %vm281_vm1, %v473_v5, 0 }
  0x1a   : > { %275 = vrot.lane.b32.xlu0 %v803_v2, %s977_s7  ;;  %424 = vrot.lane.b32.xlu1 %v803_v2, %s978_s8 }
  0x1b   : > { %855 = vmatprep.subr.bf16.mxu1 %v975_v0 }
  0x1c   : > { %846 = vmatmul.mubr.msk.bf16.vlgmr.msra.gmra.mrb[0].mxu1 %vm277_vm2, %v269_v4 }
  0x1d   : > { %857 = vmatprep.mubr.msk.bf16.mxu1 %vm976_vm0, %v975_v0 }
  0x1e   : > { %373 = vrot.lane.b32.xlu0 %v803_v2, %s979_s13  ;;  %528 = vrot.lane.b32.xlu1 %v813_v6, %s977_s7 }
  0x22   : > { %579 = vrot.lane.b32.xlu0 %v813_v6, %s979_s13  ;;  %630 = vrot.lane.b32.xlu1 %v813_v6, %s978_s8  ;;  %s801_s13 = sshll.u32 %s264_s12, 1 }
  0x23   : > { %s266_s23 = scalar_lea.vmem %s1142_s4, %s801_s13 }
  0x26   : > { %682 = vperm.xlu0 %932, %v679_v7  }
  0x8c   : > { %v276_v9 = vpop.permute.xlu0 %275  ;;  %v425_v10 = vpop.permute.xlu1 %424 }
  0x8d   : > { %v283_v11 = vsel %vm281_vm1, %v276_v9, 0  ;;  %v430_v12 = vsel %vm281_vm1, %v425_v10, 0 }
  0x8e   : > { %838 = vmatpush3.bf16.msra.mxu0 %v283_v11  ;;  %856 = vmatpush3.bf16.msra.mxu1 %v430_v12 }
  0x8f   : > { %849 = vmatprep.subr.bf16.mxu0 %v975_v0  ;;  %867 = vmatprep.subr.bf16.mxu1 %v975_v0 }
  0x90   : > { %v374_v15 = vpop.permute.xlu0 %373  ;;  %v529_v17 = vpop.permute.xlu1 %528 }
  0x91   : > { %v379_v16 = vsel %vm281_vm1, %v374_v15, 0  ;;  %840 = vmatmul.mubr.msk.bf16.vlgmr.msra.gmra.mrb[0].mxu0 %vm277_vm2, %v802_v13  ;;  %858 = vmatmul.mubr.msk.bf16.vlgmr.msra.gmra.mrb[4].mxu1 %vm277_vm2, %v808_v14  ;;  %v534_v18 = vsel %vm281_vm1, %v529_v17, 0 }
  0x92   : > { %850 = vmatpush3.bf16.msra.mxu0 %v379_v16  ;;  %851 = vmatprep.mubr.msk.bf16.mxu0 %vm976_vm0, %v975_v0 }
  0x93   : > { %861 = vmatprep.subr.bf16.mxu0 %v975_v0  ;;  %868 = vmatpush3.bf16.msra.mxu1 %v534_v18 }
  0x94   : > { %869 = vmatprep.mubr.msk.bf16.mxu1 %vm976_vm0, %v975_v0  ;;  %879 = vmatprep.subr.bf16.mxu1 %v975_v0  ;;  %v631_v19 = vpop.permute.xlu1 %630  ;;  %v580_v24 = vpop.permute.xlu0 %579 }
  0x95   : > { %v636_v23 = vsel %vm281_vm1, %v631_v19, 0  ;;  %v585_v27 = vsel %vm281_vm1, %v580_v24, 0 }
  0x99   : > { %852 = vmatmul.mubr.msk.bf16.vlgmr.msra.gmra.mrb[4].mxu0 %vm277_vm2, %v806_v20  ;;  %870 = vmatmul.mubr.msk.bf16.vlgmr.msra.gmra.mrb[8].mxu1 %vm277_vm2, %v812_v21 }
  0x9a   : > { %862 = vmatpush3.bf16.msra.mxu0 %v480_v22  ;;  %863 = vmatprep.mubr.msk.bf16.mxu0 %vm976_vm0, %v975_v0 }
  0x9b   : > { %873 = vmatprep.subr.bf16.mxu0 %v975_v0  ;;  %880 = vmatpush3.bf16.msra.mxu1 %v636_v23 }
  0x9c   : > { %881 = vmatprep.mubr.msk.bf16.mxu1 %vm976_vm0, %v975_v0 }
  0xa1   : > { %864 = vmatmul.mubr.msk.bf16.vlgmr.msra.gmra.mrb[8].mxu0 %vm277_vm2, %v810_v25  ;;  %882 = vmatmul.mubr.msk.bf16.vlgmr.msra.gmra.mrb[12].mxu1 %vm277_vm2, %v817_v26 }
  0xa2   : > { %874 = vmatpush3.bf16.msra.mxu0 %v585_v27  ;;  %875 = vmatprep.mubr.msk.bf16.mxu0 %vm976_vm0, %v975_v0 }
  0xa5   : > { %v683_v2 = vpop.permute.xlu0 %682 }
  0xa9   : > { %876 = vmatmul.mubr.msk.bf16.vlgmr.msra.gmra.mrb[12].mxu0 %vm277_vm2, %v815_v28 }
  0xef   : > { %v365_v29 = vpop.f32.mrb[0].mxu1 }
  0xf0   : > { %v847_v30 = vpop.f32.mrb[1].mxu1 }
  0xf1   : > { %v368_v31 = vpop.f32.mrb[2].mxu1 }
  0xf2   : > { %v848_v32 = vpop.f32.mrb[3].mxu1 }
 0x164   : > { %v319_v33 = vpop.f32.mrb[0].mxu0  ;;  %v466_v34 = vpop.f32.mrb[4].mxu1 }
 0x165   : > { %v366_v35 = vadd.f32 %v365_v29, %v319_v33  ;;  %v841_v36 = vpop.f32.mrb[1].mxu0  ;;  %v859_v37 = vpop.f32.mrb[5].mxu1 }
 0x166   : > { %v322_v38 = vpop.f32.mrb[2].mxu0  ;;  %v469_v39 = vpop.f32.mrb[6].mxu1 }
 0x167   : > { %v842_v40 = vpop.f32.mrb[3].mxu0  ;;  %v860_v41 = vpop.f32.mrb[7].mxu1 }
 0x16c   : > { %v415_v42 = vpop.f32.mrb[4].mxu0  ;;  %v570_v43 = vpop.f32.mrb[8].mxu1 }
 0x16d   : > { %v421_v44 = vadd.f32 %v415_v42, %v366_v35  ;;  %v853_v45 = vpop.f32.mrb[5].mxu0  ;;  %v871_v46 = vpop.f32.mrb[9].mxu1 }
 0x16e   : > { %v418_v47 = vpop.f32.mrb[6].mxu0  ;;  %v573_v48 = vpop.f32.mrb[10].mxu1 }
 0x16f   : > { %v472_v49 = vadd.f32 %v466_v34, %v421_v44  ;;  %v854_v50 = vpop.f32.mrb[7].mxu0  ;;  %v872_v51 = vpop.f32.mrb[11].mxu1 }
 0x174   : > { %v516_v52 = vpop.f32.mrb[8].mxu0  ;;  %v672_v53 = vpop.f32.mrb[12].mxu1 }
 0x175   : > { %v522_v54 = vadd.f32 %v516_v52, %v472_v49  ;;  %v865_v55 = vpop.f32.mrb[9].mxu0  ;;  %v883_v56 = vpop.f32.mrb[13].mxu1 }
 0x176   : > { %v519_v57 = vpop.f32.mrb[10].mxu0  ;;  %v675_v58 = vpop.f32.mrb[14].mxu1 }
 0x177   : > { %v576_v59 = vadd.f32 %v570_v43, %v522_v54  ;;  %v866_v60 = vpop.f32.mrb[11].mxu0  ;;  %v884_v61 = vpop.f32.mrb[15].mxu1 }
 0x17c   : > { %v621_v62 = vpop.f32.mrb[12].mxu0 }
 0x17d   : > { %v627_v63 = vadd.f32 %v621_v62, %v576_v59  ;;  %v877_v0 = vpop.f32.mrb[13].mxu0 }
 0x17e   : > { %v624_v1 = vpop.f32.mrb[14].mxu0 }
 0x17f   : > { %v678_v3 = vadd.f32 %v672_v53, %v627_v63  ;;  %v878_v4 = vpop.f32.mrb[15].mxu0 }
 0x181   : > { %v685_v5 = vadd.f32 %v683_v2, %v678_v3 }
 0x183   : > { %v686_v6 = vpack.c.bf16 %v685_v5, %v685_v5 }
 0x185   : > { %688 = vst.msk [vmem:[%s266_s23] sm:$0x3] %vm687_vm3, %v686_v6 }
 0x186 PF: > { %s14_s19 = sadd.s32 1, %s973_s19   ;;  %s1143_s15 = smov %s965_s17 }
 0x187   : > { %p11_p9 = scmp.ge.s32.totalorder %s14_s19, 10   ;;  %s1144_s16 = smov %s969_s18 }
 0x188   : > { %s1145_s17 = smov %s1148_s20  ;;  %s1146_s18 = smov %s1152_s21 }
 0x189   :  { %13 = sbr.rel (!%p11_p9) target bundleno = 3 (0x3), region = 76 }

</bundles_post_ra>
